<compile_context>
chip_gen: v7x
topology: tpu7x:2x2x1
jax: 0.10.0
libtpu: 0.0.40
codegen_flags: <defaults>
</compile_context>

<pallas_src>
import math
import functools

import jax
import jax.numpy as jnp
from jax import lax
from jax.experimental import pallas as pl
from jax.experimental.pallas import tpu as pltpu


# ----------------------------------------------------------------------------
# Fused multi-head attention kernel (one grid step = one (batch, q-tile) pair)
# ----------------------------------------------------------------------------
def _mha_kernel(q_ref, k_ref, v_ref, m_ref,
                wq_ref, bq_ref, wk_ref, bk_ref, wv_ref, bv_ref,
                wo_ref, bo_ref, o_ref, *, num_heads):
    tq, d = q_ref.shape[1], q_ref.shape[2]
    dk = d // num_heads

    x_q = q_ref[0]           # (tq, D)  query tile
    x_k = k_ref[0]           # (Tk, D)  full keys for this batch element
    x_v = v_ref[0]           # (Tk, D)  full values
    m_add = m_ref[0]         # (tq, Tk) additive mask: 0 keep / -1e9 masked

    # Fused input projections (1/sqrt(dk) already folded into wq/bq).
    q = jnp.dot(x_q, wq_ref[...], preferred_element_type=jnp.float32) + bq_ref[...]
    k = jnp.dot(x_k, wk_ref[...], preferred_element_type=jnp.float32) + bk_ref[...]
    v = jnp.dot(x_v, wv_ref[...], preferred_element_type=jnp.float32) + bv_ref[...]

    # Per-head attention. Heads are static lane slices, so no HBM relayout and
    # the concatenated result is already the lane-dense (tq, D) layout the
    # output projection needs.
    head_outs = []
    for h in range(num_heads):
        sl = slice(h * dk, (h + 1) * dk)
        qh, kh, vh = q[:, sl], k[:, sl], v[:, sl]
        s = lax.dot_general(qh, kh, (((1,), (1,)), ((), ())),
                            preferred_element_type=jnp.float32)      # (tq, Tk)
        s = s + m_add
        s = s - jnp.max(s, axis=-1, keepdims=True)
        p = jnp.exp(s)
        p = p * pl.reciprocal(jnp.sum(p, axis=-1, keepdims=True), approx=True)
        head_outs.append(jnp.dot(p, vh, preferred_element_type=jnp.float32))
    o = jnp.concatenate(head_outs, axis=-1)                           # (tq, D)

    y = jnp.dot(o, wo_ref[...], preferred_element_type=jnp.float32) + bo_ref[...]
    o_ref[0] = y.astype(o_ref.dtype)


# ----------------------------------------------------------------------------
# Wrapper
# ----------------------------------------------------------------------------
def _pick_q_tile(tq_total):
    for cand in (128, 64, 32, 16, 8):
        if tq_total % cand == 0:
            return cand
    return tq_total  # fall back to a single full-extent block


@functools.partial(jax.jit, static_argnames=("num_heads",))
def multi_head_attention(params, query, key, value, mask=None, *, num_heads):
    B, Tq, D = query.shape
    Tk = key.shape[1]
    dk = D // num_heads
    scale = 1.0 / math.sqrt(dk)

    # Fold the attention scale into the Q projection (one tiny XLA op).
    wq = params["wq"] * scale
    bq = params["bq"] * scale

    # Precompute the additive mask once; reused across heads and q-tiles.
    if mask is None:
        add_mask = jnp.zeros((B, Tq, Tk), jnp.float32)
    else:
        add_mask = jnp.where(mask == 0, jnp.float32(-1e9), jnp.float32(0.0))
        add_mask = jnp.broadcast_to(add_mask, (B, Tq, Tk))

    tq = _pick_q_tile(Tq)
    grid = (B, Tq // tq)

    flops = (2 * B * D * D * (Tq + 2 * Tk)      # q/k/v projections
             + 4 * B * Tq * Tk * D              # scores + p @ v
             + 2 * B * Tq * D * D)              # output projection
    transcendentals = B * num_heads * Tq * Tk
    bytes_accessed = 4 * (2 * B * Tq * D + 2 * B * Tk * D + B * Tq * Tk
                          + 4 * D * D + 4 * D)

    kern = functools.partial(_mha_kernel, num_heads=num_heads)
    full = lambda b, i: (0, 0)

    return pl.pallas_call(
        kern,
        out_shape=jax.ShapeDtypeStruct((B, Tq, D), query.dtype),
        grid=grid,
        in_specs=[
            pl.BlockSpec((1, tq, D), lambda b, i: (b, i, 0)),    # query tile
            pl.BlockSpec((1, Tk, D), lambda b, i: (b, 0, 0)),    # key (full per batch)
            pl.BlockSpec((1, Tk, D), lambda b, i: (b, 0, 0)),    # value (full per batch)
            pl.BlockSpec((1, tq, Tk), lambda b, i: (b, i, 0)),   # additive mask tile
            pl.BlockSpec((D, D), full), pl.BlockSpec((1, D), full),   # Wq, bq (scaled)
            pl.BlockSpec((D, D), full), pl.BlockSpec((1, D), full),   # Wk, bk
            pl.BlockSpec((D, D), full), pl.BlockSpec((1, D), full),   # Wv, bv
            pl.BlockSpec((D, D), full), pl.BlockSpec((1, D), full),   # Wo, bo
        ],
        out_specs=pl.BlockSpec((1, tq, D), lambda b, i: (b, i, 0)),
        compiler_params=pltpu.CompilerParams(
            dimension_semantics=("parallel", "parallel")),
        cost_estimate=pl.CostEstimate(flops=flops,
                                      transcendentals=transcendentals,
                                      bytes_accessed=bytes_accessed),
    )(query, key, value, add_mask,
      wq, bq, params["wk"], params["bk"],
      params["wv"], params["bv"], params["wo"], params["bo"])


# ----------------------------------------------------------------------------
# Pure-JAX reference (matches the PyTorch forward) for correctness checking
# ----------------------------------------------------------------------------
def mha_reference(params, query, key, value, mask, num_heads):
    B, Tq, D = query.shape
    dk = D // num_heads

    def proj(x, w, b):
        y = x @ w + b
        return y.reshape(B, -1, num_heads, dk).transpose(0, 2, 1, 3)

    q = proj(query, params["wq"], params["bq"])
    k = proj(key, params["wk"], params["bk"])
    v = proj(value, params["wv"], params["bv"])
    s = jnp.einsum("bhqd,bhkd->bhqk", q, k) / math.sqrt(dk)
    if mask is not None:
        s = jnp.where(mask[:, None] == 0, -1e9, s)
    p = jax.nn.softmax(s, axis=-1)
    o = jnp.einsum("bhqk,bhkd->bhqd", p, v)
    o = o.transpose(0, 2, 1, 3).reshape(B, Tq, D)
    return o @ params["wo"] + params["bo"]


# ----------------------------------------------------------------------------
# Deterministic parameter initialization (dense projections, compress=False)
# ----------------------------------------------------------------------------
def init_mha_params(key, d_model):
    ks = jax.random.split(key, 8)

    def lin(kw, kb):
        w = jax.random.normal(kw, (d_model, d_model), jnp.float32) * 0.05
        b = jax.random.normal(kb, (1, d_model), jnp.float32) * 0.05
        return w, b

    wq, bq = lin(ks[0], ks[1])
    wk, bk = lin(ks[2], ks[3])
    wv, bv = lin(ks[4], ks[5])
    wo, bo = lin(ks[6], ks[7])
    return dict(wq=wq, bq=bq, wk=wk, bk=bk, wv=wv, bv=bv, wo=wo, bo=bo)


# ----------------------------------------------------------------------------
# Main
# ----------------------------------------------------------------------------
if __name__ == "__main__":
    B, T, D_MODEL, H = 2, 256, 128, 4

    root = jax.random.PRNGKey(0)
    kp, kq, kk, kv = jax.random.split(root, 4)
    params = init_mha_params(kp, D_MODEL)

    query = jax.random.normal(kq, (B, T, D_MODEL), jnp.float32)
    key_in = jax.random.normal(kk, (B, T, D_MODEL), jnp.float32)
    value_in = jax.random.normal(kv, (B, T, D_MODEL), jnp.float32)

    # Causal (subsequent-position) mask, shape (B, Tq, Tk); 0 == masked.
    mask = jnp.tril(jnp.ones((T, T), jnp.float32))[None].repeat(B, axis=0)

    out = multi_head_attention(params, query, key_in, value_in, mask, num_heads=H)
    out = jax.block_until_ready(out)
    assert out.shape == (B, T, D_MODEL)

    ref = mha_reference(params, query, key_in, value_in, mask, H)
    assert bool(jnp.allclose(out, ref, atol=2e-2, rtol=2e-2)), \
        float(jnp.max(jnp.abs(out - ref)))

    print("KERNEL_OK")
</pallas_src>

<mosaic_0001>
module attributes {stable_mosaic.version = 11 : i64} {
  func.func @_mha_kernel(%arg0: i32, %arg1: i32, %arg2: memref<1x128x128xf32, #tpu.memory_space<vmem>>, %arg3: memref<1x256x128xf32, #tpu.memory_space<vmem>>, %arg4: memref<1x256x128xf32, #tpu.memory_space<vmem>>, %arg5: memref<1x128x256xf32, #tpu.memory_space<vmem>>, %arg6: memref<128x128xf32, #tpu.memory_space<vmem>>, %arg7: memref<1x128xf32, #tpu.memory_space<vmem>>, %arg8: memref<128x128xf32, #tpu.memory_space<vmem>>, %arg9: memref<1x128xf32, #tpu.memory_space<vmem>>, %arg10: memref<128x128xf32, #tpu.memory_space<vmem>>, %arg11: memref<1x128xf32, #tpu.memory_space<vmem>>, %arg12: memref<128x128xf32, #tpu.memory_space<vmem>>, %arg13: memref<1x128xf32, #tpu.memory_space<vmem>>, %arg14: memref<1x128x128xf32, #tpu.memory_space<vmem>>) attributes {dimension_semantics = [#tpu.dimension_semantics<parallel>, #tpu.dimension_semantics<parallel>], iteration_bounds = array<i64: 2, 2>, scalar_prefetch = 0 : i64, scratch_operands = 0 : i64, tpu.core_type = #tpu.core_type<tc>, window_params = [{transform_indices = @transform_0, window_bounds = array<i64: 1, 128, 128>}, {transform_indices = @transform_1, window_bounds = array<i64: 1, 256, 128>}, {transform_indices = @transform_2, window_bounds = array<i64: 1, 256, 128>}, {transform_indices = @transform_3, window_bounds = array<i64: 1, 128, 256>}, {pipeline_mode = #tpu.pipeline_mode<synchronous>, transform_indices = @transform_4, window_bounds = array<i64: 128, 128>}, {pipeline_mode = #tpu.pipeline_mode<synchronous>, transform_indices = @transform_5, window_bounds = array<i64: 1, 128>}, {pipeline_mode = #tpu.pipeline_mode<synchronous>, transform_indices = @transform_6, window_bounds = array<i64: 128, 128>}, {pipeline_mode = #tpu.pipeline_mode<synchronous>, transform_indices = @transform_7, window_bounds = array<i64: 1, 128>}, {pipeline_mode = #tpu.pipeline_mode<synchronous>, transform_indices = @transform_8, window_bounds = array<i64: 128, 128>}, {pipeline_mode = #tpu.pipeline_mode<synchronous>, transform_indices = @transform_9, window_bounds = array<i64: 1, 128>}, {pipeline_mode = #tpu.pipeline_mode<synchronous>, transform_indices = @transform_10, window_bounds = array<i64: 128, 128>}, {pipeline_mode = #tpu.pipeline_mode<synchronous>, transform_indices = @transform_11, window_bounds = array<i64: 1, 128>}, {transform_indices = @transform_12, window_bounds = array<i64: 1, 128, 128>}]} {
    %c0 = arith.constant 0 : index
    %c0_0 = arith.constant 0 : index
    %c0_1 = arith.constant 0 : index
    %0 = vector.load %arg2[%c0, %c0_0, %c0_1] : memref<1x128x128xf32, #tpu.memory_space<vmem>>, vector<1x128x128xf32>
    %1 = vector.shape_cast %0 : vector<1x128x128xf32> to vector<128x128xf32>
    %c0_2 = arith.constant 0 : index
    %c0_3 = arith.constant 0 : index
    %c0_4 = arith.constant 0 : index
    %2 = vector.load %arg3[%c0_2, %c0_3, %c0_4] : memref<1x256x128xf32, #tpu.memory_space<vmem>>, vector<1x256x128xf32>
    %3 = vector.shape_cast %2 : vector<1x256x128xf32> to vector<256x128xf32>
    %c0_5 = arith.constant 0 : index
    %c0_6 = arith.constant 0 : index
    %c0_7 = arith.constant 0 : index
    %4 = vector.load %arg4[%c0_5, %c0_6, %c0_7] : memref<1x256x128xf32, #tpu.memory_space<vmem>>, vector<1x256x128xf32>
    %5 = vector.shape_cast %4 : vector<1x256x128xf32> to vector<256x128xf32>
    %c0_8 = arith.constant 0 : index
    %c0_9 = arith.constant 0 : index
    %c0_10 = arith.constant 0 : index
    %6 = vector.load %arg5[%c0_8, %c0_9, %c0_10] : memref<1x128x256xf32, #tpu.memory_space<vmem>>, vector<1x128x256xf32>
    %7 = vector.shape_cast %6 : vector<1x128x256xf32> to vector<128x256xf32>
    %c0_11 = arith.constant 0 : index
    %c0_12 = arith.constant 0 : index
    %8 = vector.load %arg6[%c0_11, %c0_12] : memref<128x128xf32, #tpu.memory_space<vmem>>, vector<128x128xf32>
    %cst = arith.constant dense<0.000000e+00> : vector<128x128xf32>
    %9 = tpu.matmul %1, %8, %cst {dimension_numbers = #tpu.dot_dimension_numbers<[1], [0], [0], [1], [0, 0, 1, 1], [], []>} : vector<128x128xf32>, vector<128x128xf32>, vector<128x128xf32> -> vector<128x128xf32>
    %c0_13 = arith.constant 0 : index
    %c0_14 = arith.constant 0 : index
    %10 = vector.load %arg7[%c0_13, %c0_14] : memref<1x128xf32, #tpu.memory_space<vmem>>, vector<1x128xf32>
    %11 = vector.broadcast %10 : vector<1x128xf32> to vector<128x128xf32>
    %12 = arith.addf %9, %11 : vector<128x128xf32>
    %c0_15 = arith.constant 0 : index
    %c0_16 = arith.constant 0 : index
    %13 = vector.load %arg8[%c0_15, %c0_16] : memref<128x128xf32, #tpu.memory_space<vmem>>, vector<128x128xf32>
    %cst_17 = arith.constant dense<0.000000e+00> : vector<256x128xf32>
    %14 = tpu.matmul %3, %13, %cst_17 {dimension_numbers = #tpu.dot_dimension_numbers<[1], [0], [0], [1], [0, 0, 1, 1], [], []>} : vector<256x128xf32>, vector<128x128xf32>, vector<256x128xf32> -> vector<256x128xf32>
    %c0_18 = arith.constant 0 : index
    %c0_19 = arith.constant 0 : index
    %15 = vector.load %arg9[%c0_18, %c0_19] : memref<1x128xf32, #tpu.memory_space<vmem>>, vector<1x128xf32>
    %16 = vector.broadcast %15 : vector<1x128xf32> to vector<256x128xf32>
    %17 = arith.addf %14, %16 : vector<256x128xf32>
    %c0_20 = arith.constant 0 : index
    %c0_21 = arith.constant 0 : index
    %18 = vector.load %arg10[%c0_20, %c0_21] : memref<128x128xf32, #tpu.memory_space<vmem>>, vector<128x128xf32>
    %cst_22 = arith.constant dense<0.000000e+00> : vector<256x128xf32>
    %19 = tpu.matmul %5, %18, %cst_22 {dimension_numbers = #tpu.dot_dimension_numbers<[1], [0], [0], [1], [0, 0, 1, 1], [], []>} : vector<256x128xf32>, vector<128x128xf32>, vector<256x128xf32> -> vector<256x128xf32>
    %c0_23 = arith.constant 0 : index
    %c0_24 = arith.constant 0 : index
    %20 = vector.load %arg11[%c0_23, %c0_24] : memref<1x128xf32, #tpu.memory_space<vmem>>, vector<1x128xf32>
    %21 = vector.broadcast %20 : vector<1x128xf32> to vector<256x128xf32>
    %22 = arith.addf %19, %21 : vector<256x128xf32>
    %23 = vector.extract_strided_slice %12 {offsets = [0, 0], sizes = [128, 32], strides = [1, 1]} : vector<128x128xf32> to vector<128x32xf32>
    %24 = vector.extract_strided_slice %17 {offsets = [0, 0], sizes = [256, 32], strides = [1, 1]} : vector<256x128xf32> to vector<256x32xf32>
    %25 = vector.extract_strided_slice %22 {offsets = [0, 0], sizes = [256, 32], strides = [1, 1]} : vector<256x128xf32> to vector<256x32xf32>
    %cst_25 = arith.constant dense<0.000000e+00> : vector<128x256xf32>
    %26 = tpu.matmul %23, %24, %cst_25 {dimension_numbers = #tpu.dot_dimension_numbers<[1], [1], [0], [0], [0, 0, 1, 0], [], []>} : vector<128x32xf32>, vector<256x32xf32>, vector<128x256xf32> -> vector<128x256xf32>
    %27 = arith.addf %26, %7 : vector<128x256xf32>
    %cst_26 = arith.constant dense<0xFF800000> : vector<128xf32>
    %28 = vector.multi_reduction <maximumf>, %27, %cst_26 [1] : vector<128x256xf32> to vector<128xf32>
    %29 = vector.shape_cast %28 : vector<128xf32> to vector<128x1xf32>
    %30 = vector.broadcast %29 : vector<128x1xf32> to vector<128x256xf32>
    %31 = arith.subf %27, %30 : vector<128x256xf32>
    %32 = math.exp %31 : vector<128x256xf32>
    %cst_27 = arith.constant dense<0.000000e+00> : vector<128xf32>
    %33 = vector.multi_reduction <add>, %32, %cst_27 [1] : vector<128x256xf32> to vector<128xf32>
    %34 = vector.shape_cast %33 : vector<128xf32> to vector<128x1xf32>
    %35 = tpu.reciprocal %34 {approx = true} : vector<128x1xf32> -> vector<128x1xf32>
    %36 = vector.broadcast %35 : vector<128x1xf32> to vector<128x256xf32>
    %37 = arith.mulf %32, %36 : vector<128x256xf32>
    %cst_28 = arith.constant dense<0.000000e+00> : vector<128x32xf32>
    %38 = tpu.matmul %37, %25, %cst_28 {dimension_numbers = #tpu.dot_dimension_numbers<[1], [0], [0], [1], [0, 0, 1, 1], [], []>} : vector<128x256xf32>, vector<256x32xf32>, vector<128x32xf32> -> vector<128x32xf32>
    %39 = vector.extract_strided_slice %12 {offsets = [0, 32], sizes = [128, 32], strides = [1, 1]} : vector<128x128xf32> to vector<128x32xf32>
    %40 = vector.extract_strided_slice %17 {offsets = [0, 32], sizes = [256, 32], strides = [1, 1]} : vector<256x128xf32> to vector<256x32xf32>
    %41 = vector.extract_strided_slice %22 {offsets = [0, 32], sizes = [256, 32], strides = [1, 1]} : vector<256x128xf32> to vector<256x32xf32>
    %cst_29 = arith.constant dense<0.000000e+00> : vector<128x256xf32>
    %42 = tpu.matmul %39, %40, %cst_29 {dimension_numbers = #tpu.dot_dimension_numbers<[1], [1], [0], [0], [0, 0, 1, 0], [], []>} : vector<128x32xf32>, vector<256x32xf32>, vector<128x256xf32> -> vector<128x256xf32>
    %43 = arith.addf %42, %7 : vector<128x256xf32>
    %cst_30 = arith.constant dense<0xFF800000> : vector<128xf32>
    %44 = vector.multi_reduction <maximumf>, %43, %cst_30 [1] : vector<128x256xf32> to vector<128xf32>
    %45 = vector.shape_cast %44 : vector<128xf32> to vector<128x1xf32>
    %46 = vector.broadcast %45 : vector<128x1xf32> to vector<128x256xf32>
    %47 = arith.subf %43, %46 : vector<128x256xf32>
    %48 = math.exp %47 : vector<128x256xf32>
    %cst_31 = arith.constant dense<0.000000e+00> : vector<128xf32>
    %49 = vector.multi_reduction <add>, %48, %cst_31 [1] : vector<128x256xf32> to vector<128xf32>
    %50 = vector.shape_cast %49 : vector<128xf32> to vector<128x1xf32>
    %51 = tpu.reciprocal %50 {approx = true} : vector<128x1xf32> -> vector<128x1xf32>
    %52 = vector.broadcast %51 : vector<128x1xf32> to vector<128x256xf32>
    %53 = arith.mulf %48, %52 : vector<128x256xf32>
    %cst_32 = arith.constant dense<0.000000e+00> : vector<128x32xf32>
    %54 = tpu.matmul %53, %41, %cst_32 {dimension_numbers = #tpu.dot_dimension_numbers<[1], [0], [0], [1], [0, 0, 1, 1], [], []>} : vector<128x256xf32>, vector<256x32xf32>, vector<128x32xf32> -> vector<128x32xf32>
    %55 = vector.extract_strided_slice %12 {offsets = [0, 64], sizes = [128, 32], strides = [1, 1]} : vector<128x128xf32> to vector<128x32xf32>
    %56 = vector.extract_strided_slice %17 {offsets = [0, 64], sizes = [256, 32], strides = [1, 1]} : vector<256x128xf32> to vector<256x32xf32>
    %57 = vector.extract_strided_slice %22 {offsets = [0, 64], sizes = [256, 32], strides = [1, 1]} : vector<256x128xf32> to vector<256x32xf32>
    %cst_33 = arith.constant dense<0.000000e+00> : vector<128x256xf32>
    %58 = tpu.matmul %55, %56, %cst_33 {dimension_numbers = #tpu.dot_dimension_numbers<[1], [1], [0], [0], [0, 0, 1, 0], [], []>} : vector<128x32xf32>, vector<256x32xf32>, vector<128x256xf32> -> vector<128x256xf32>
    %59 = arith.addf %58, %7 : vector<128x256xf32>
    %cst_34 = arith.constant dense<0xFF800000> : vector<128xf32>
    %60 = vector.multi_reduction <maximumf>, %59, %cst_34 [1] : vector<128x256xf32> to vector<128xf32>
    %61 = vector.shape_cast %60 : vector<128xf32> to vector<128x1xf32>
    %62 = vector.broadcast %61 : vector<128x1xf32> to vector<128x256xf32>
    %63 = arith.subf %59, %62 : vector<128x256xf32>
    %64 = math.exp %63 : vector<128x256xf32>
    %cst_35 = arith.constant dense<0.000000e+00> : vector<128xf32>
    %65 = vector.multi_reduction <add>, %64, %cst_35 [1] : vector<128x256xf32> to vector<128xf32>
    %66 = vector.shape_cast %65 : vector<128xf32> to vector<128x1xf32>
    %67 = tpu.reciprocal %66 {approx = true} : vector<128x1xf32> -> vector<128x1xf32>
    %68 = vector.broadcast %67 : vector<128x1xf32> to vector<128x256xf32>
    %69 = arith.mulf %64, %68 : vector<128x256xf32>
    %cst_36 = arith.constant dense<0.000000e+00> : vector<128x32xf32>
    %70 = tpu.matmul %69, %57, %cst_36 {dimension_numbers = #tpu.dot_dimension_numbers<[1], [0], [0], [1], [0, 0, 1, 1], [], []>} : vector<128x256xf32>, vector<256x32xf32>, vector<128x32xf32> -> vector<128x32xf32>
    %71 = vector.extract_strided_slice %12 {offsets = [0, 96], sizes = [128, 32], strides = [1, 1]} : vector<128x128xf32> to vector<128x32xf32>
    %72 = vector.extract_strided_slice %17 {offsets = [0, 96], sizes = [256, 32], strides = [1, 1]} : vector<256x128xf32> to vector<256x32xf32>
    %73 = vector.extract_strided_slice %22 {offsets = [0, 96], sizes = [256, 32], strides = [1, 1]} : vector<256x128xf32> to vector<256x32xf32>
    %cst_37 = arith.constant dense<0.000000e+00> : vector<128x256xf32>
    %74 = tpu.matmul %71, %72, %cst_37 {dimension_numbers = #tpu.dot_dimension_numbers<[1], [1], [0], [0], [0, 0, 1, 0], [], []>} : vector<128x32xf32>, vector<256x32xf32>, vector<128x256xf32> -> vector<128x256xf32>
    %75 = arith.addf %74, %7 : vector<128x256xf32>
    %cst_38 = arith.constant dense<0xFF800000> : vector<128xf32>
    %76 = vector.multi_reduction <maximumf>, %75, %cst_38 [1] : vector<128x256xf32> to vector<128xf32>
    %77 = vector.shape_cast %76 : vector<128xf32> to vector<128x1xf32>
    %78 = vector.broadcast %77 : vector<128x1xf32> to vector<128x256xf32>
    %79 = arith.subf %75, %78 : vector<128x256xf32>
    %80 = math.exp %79 : vector<128x256xf32>
    %cst_39 = arith.constant dense<0.000000e+00> : vector<128xf32>
    %81 = vector.multi_reduction <add>, %80, %cst_39 [1] : vector<128x256xf32> to vector<128xf32>
    %82 = vector.shape_cast %81 : vector<128xf32> to vector<128x1xf32>
    %83 = tpu.reciprocal %82 {approx = true} : vector<128x1xf32> -> vector<128x1xf32>
    %84 = vector.broadcast %83 : vector<128x1xf32> to vector<128x256xf32>
    %85 = arith.mulf %80, %84 : vector<128x256xf32>
    %cst_40 = arith.constant dense<0.000000e+00> : vector<128x32xf32>
    %86 = tpu.matmul %85, %73, %cst_40 {dimension_numbers = #tpu.dot_dimension_numbers<[1], [0], [0], [1], [0, 0, 1, 1], [], []>} : vector<128x256xf32>, vector<256x32xf32>, vector<128x32xf32> -> vector<128x32xf32>
    %87 = tpu.concatenate %38, %54, %70, %86 in 1 : vector<128x32xf32>, vector<128x32xf32>, vector<128x32xf32>, vector<128x32xf32> -> vector<128x128xf32>
    %c0_41 = arith.constant 0 : index
    %c0_42 = arith.constant 0 : index
    %88 = vector.load %arg12[%c0_41, %c0_42] : memref<128x128xf32, #tpu.memory_space<vmem>>, vector<128x128xf32>
    %cst_43 = arith.constant dense<0.000000e+00> : vector<128x128xf32>
    %89 = tpu.matmul %87, %88, %cst_43 {dimension_numbers = #tpu.dot_dimension_numbers<[1], [0], [0], [1], [0, 0, 1, 1], [], []>} : vector<128x128xf32>, vector<128x128xf32>, vector<128x128xf32> -> vector<128x128xf32>
    %c0_44 = arith.constant 0 : index
    %c0_45 = arith.constant 0 : index
    %90 = vector.load %arg13[%c0_44, %c0_45] : memref<1x128xf32, #tpu.memory_space<vmem>>, vector<1x128xf32>
    %91 = vector.broadcast %90 : vector<1x128xf32> to vector<128x128xf32>
    %92 = arith.addf %89, %91 : vector<128x128xf32>
    %c0_46 = arith.constant 0 : index
    %c0_47 = arith.constant 0 : index
    %c0_48 = arith.constant 0 : index
    %93 = vector.load %arg14[%c0_46, %c0_47, %c0_48] : memref<1x128x128xf32, #tpu.memory_space<vmem>>, vector<1x128x128xf32>
    %94 = vector.shape_cast %93 : vector<1x128x128xf32> to vector<128x128xf32>
    %95 = vector.shape_cast %92 : vector<128x128xf32> to vector<1x128x128xf32>
    tpu.vector_store %arg14[%c0_46, %c0_47, %c0_48], %95 {strides = array<i32>} : memref<1x128x128xf32, #tpu.memory_space<vmem>>, vector<1x128x128xf32>,
    return
  }
  func.func @transform_0(%arg0: i32, %arg1: i32) -> (i32, i32, i32) {
    %c0_i32 = arith.constant 0 : i32
    %c0_i32_0 = arith.constant 0 : i32
    return %arg0, %arg1, %c0_i32 : i32, i32, i32
  }
  func.func @transform_1(%arg0: i32, %arg1: i32) -> (i32, i32, i32) {
    %c0_i32 = arith.constant 0 : i32
    %c0_i32_0 = arith.constant 0 : i32
    %c0_i32_1 = arith.constant 0 : i32
    return %arg0, %c0_i32, %c0_i32_0 : i32, i32, i32
  }
  func.func @transform_2(%arg0: i32, %arg1: i32) -> (i32, i32, i32) {
    %c0_i32 = arith.constant 0 : i32
    %c0_i32_0 = arith.constant 0 : i32
    %c0_i32_1 = arith.constant 0 : i32
    return %arg0, %c0_i32, %c0_i32_0 : i32, i32, i32
  }
  func.func @transform_3(%arg0: i32, %arg1: i32) -> (i32, i32, i32) {
    %c0_i32 = arith.constant 0 : i32
    %c0_i32_0 = arith.constant 0 : i32
    return %arg0, %arg1, %c0_i32 : i32, i32, i32
  }
  func.func @transform_4(%arg0: i32, %arg1: i32) -> (i32, i32) {
    %c0_i32 = arith.constant 0 : i32
    %c0_i32_0 = arith.constant 0 : i32
    %c0_i32_1 = arith.constant 0 : i32
    return %c0_i32, %c0_i32_0 : i32, i32
  }
  func.func @transform_5(%arg0: i32, %arg1: i32) -> (i32, i32) {
    %c0_i32 = arith.constant 0 : i32
    %c0_i32_0 = arith.constant 0 : i32
    %c0_i32_1 = arith.constant 0 : i32
    return %c0_i32, %c0_i32_0 : i32, i32
  }
  func.func @transform_6(%arg0: i32, %arg1: i32) -> (i32, i32) {
    %c0_i32 = arith.constant 0 : i32
    %c0_i32_0 = arith.constant 0 : i32
    %c0_i32_1 = arith.constant 0 : i32
    return %c0_i32, %c0_i32_0 : i32, i32
  }
  func.func @transform_7(%arg0: i32, %arg1: i32) -> (i32, i32) {
    %c0_i32 = arith.constant 0 : i32
    %c0_i32_0 = arith.constant 0 : i32
    %c0_i32_1 = arith.constant 0 : i32
    return %c0_i32, %c0_i32_0 : i32, i32
  }
  func.func @transform_8(%arg0: i32, %arg1: i32) -> (i32, i32) {
    %c0_i32 = arith.constant 0 : i32
    %c0_i32_0 = arith.constant 0 : i32
    %c0_i32_1 = arith.constant 0 : i32
    return %c0_i32, %c0_i32_0 : i32, i32
  }
  func.func @transform_9(%arg0: i32, %arg1: i32) -> (i32, i32) {
    %c0_i32 = arith.constant 0 : i32
    %c0_i32_0 = arith.constant 0 : i32
    %c0_i32_1 = arith.constant 0 : i32
    return %c0_i32, %c0_i32_0 : i32, i32
  }
  func.func @transform_10(%arg0: i32, %arg1: i32) -> (i32, i32) {
    %c0_i32 = arith.constant 0 : i32
    %c0_i32_0 = arith.constant 0 : i32
    %c0_i32_1 = arith.constant 0 : i32
    return %c0_i32, %c0_i32_0 : i32, i32
  }
  func.func @transform_11(%arg0: i32, %arg1: i32) -> (i32, i32) {
    %c0_i32 = arith.constant 0 : i32
    %c0_i32_0 = arith.constant 0 : i32
    %c0_i32_1 = arith.constant 0 : i32
    return %c0_i32, %c0_i32_0 : i32, i32
  }
  func.func @transform_12(%arg0: i32, %arg1: i32) -> (i32, i32, i32) {
    %c0_i32 = arith.constant 0 : i32
    %c0_i32_0 = arith.constant 0 : i32
    return %arg0, %arg1, %c0_i32 : i32, i32, i32
  }
}

</mosaic_0001>

<bundles_post_ra>
// kernel: multi_head_attention.1
= control target key start
LH: loop header
LB: loop body
LE: loop exit
PB: predicated region body
PF: predicated region fallthrough
CT: control target
= control target key end

     0   :  { %s11704_s0 = inlined_call_operand.vmem [shape: f32[2,256,128], index: 0, kind: input, shape index: {}]   ;;  %s11705_s1 = inlined_call_operand.vmem [shape: f32[2,256,128], index: 1, kind: input, shape index: {}]   ;;  %s11706_s2 = inlined_call_operand.vmem [shape: f32[2,256,128], index: 2, kind: input, shape index: {}]   ;;  %s11707_s3 = inlined_call_operand.vmem [shape: f32[2,256,256], index: 3, kind: input, shape index: {}]   ;;  %s11708_s4 = inlined_call_operand.vmem [shape: f32[128,128], index: 4, kind: input, shape index: {}]   ;;  %s11709_s5 = inlined_call_operand.vmem [shape: f32[1,128], index: 5, kind: input, shape index: {}]   ;;  %s11710_s6 = inlined_call_operand.vmem [shape: f32[128,128], index: 6, kind: input, shape index: {}]   ;;  %s11711_s7 = inlined_call_operand.vmem [shape: f32[1,128], index: 7, kind: input, shape index: {}]   ;;  %s11712_s8 = inlined_call_operand.vmem [shape: f32[128,128], index: 8, kind: input, shape index: {}]   ;;  %s11713_s9 = inlined_call_operand.vmem [shape: f32[1,128], index: 9, kind: input, shape index: {}]   ;;  %s11714_s10 = inlined_call_operand.vmem [shape: f32[128,128], index: 10, kind: input, shape index: {}]   ;;  %s11715_s11 = inlined_call_operand.vmem [shape: f32[1,128], index: 11, kind: input, shape index: {}]   ;;  %s11716_s12 = inlined_call_operand.hbm [shape: f32[2,256,128], index: 12, kind: output, shape index: {}]  }
   0x1   :  { %11981 = sst [smem:[#allocation127_spill]] %s11716_s12 }
   0x2   :  { %17 = vsyncpa [#allocation3], 0 }
   0x3   :  { %19 = vsyncpa [#allocation3 + $0x1], 0  ;;  %s8044_s21 = smov 0   ;;  %s8046_s22 = smov 0  }
   0x4   :  { %s8048_s23 = smov 0   ;;  %s8050_s24 = smov 0  }
   0x5   :  { %s8052_s25 = smov 0   ;;  %s8054_s26 = smov 0  }
   0x6   :  { %s8056_s27 = smov 0   ;;  %s8058_s28 = smov 0  }
   0x7 LB: > { %11982 = sst [smem:[#allocation5_spill]] %s7943_s21  ;;  %s5092_s29 = sadd.s32 4294967295, %s7971_s28   ;;  %s7971_s28 = sphi %s8058_s28, %s25_s28   ;;  %s7967_s27 = sphi %s8056_s27, %s12575_s27   ;;  %s7963_s26 = sphi %s8054_s26, %s12574_s26   ;;  %s7959_s25 = sphi %s8052_s25, %s12573_s25   ;;  %s7955_s24 = sphi %s8050_s24, %s12572_s24   ;;  %s7951_s23 = sphi %s8048_s23, %s12571_s23   ;;  %s7947_s22 = sphi %s8046_s22, %s12577_s22   ;;  %s7943_s21 = sphi %s8044_s21, %s12576_s21  }
   0x8   : > { %11983 = sst [smem:[#allocation6_spill]] %s7951_s23  ;;  %s5093_s30 = sadd.s32 4294967294, %s7971_s28  }
   0x9   : > { %11984 = sst [smem:[#allocation7_spill]] %s7963_s26  ;;  %s34_s13 = sadd.s32 1, %s7963_s26 }
   0xa   : > { %11985 = sst [smem:[#allocation8_spill]] %s7967_s27  ;;  %p35_p0 = scmp.ge.s32.totalorder %s34_s13, 2 }
   0xb   : > { %11986 = sst [smem:[#allocation9_spill]] %s7971_s28  ;;  %s37_s14 = sadd.s32 1, %s7967_s27 }
   0xc   : > { %p332_p1 = scmp.ne.s32.totalorder %s7951_s23, %s7947_s22  ;;  %p333_p2 = scmp.eq.s32.totalorder %s5092_s29, 3 }
   0xd   : > { %s12579_s13 = smov (%p35_p0, %s34_s13), 0  ;;  %s12581_s14 = smov (!%p35_p0, %s37_s14), %s7967_s27 }
   0xe   : > { %11987 = sst [smem:[#allocation10_spill]] %s12579_s13  ;;  %s318_s15 = ssub.s32 %s7963_s26, %s12579_s13 }
   0xf   : > { %p8095_p3 = por %p333_p2, %p332_p1  ;;  %p39_p4 = scmp.ge.s32.totalorder %s12581_s14, 2 }
  0x10   : > { %p338_p5 = scmp.ne.s32.totalorder %s7947_s22, %s7943_s21  ;;  %p339_p6 = scmp.eq.s32.totalorder %s5093_s30, 3 }
  0x11   : > { %p5096_p7 = scmp.ge.s32.totalorder %s7971_s28, 1  ;;  %s12583_s14 = smov (%p39_p4, %s12581_s14), 0 }
  0x12   : > { %11989 = sst [smem:[#allocation11_spill]] %s12583_s14  ;;  %p8104_p8 = por %p339_p6, %p338_p5 }
  0x13   : > { %p424_p9 = scmp.lt.s32.totalorder %s7971_s28, 5  ;;  %s317_s18 = ssub.s32 %s7967_s27, %s12583_s14 }
  0x14   : > { %s11990_s17 = scalar_select %p8104_p8, 1, 0 }
  0x15   : > { %s322_s19 = sadd.s32 1, %s7951_s23  ;;  %s319_s20 = sor.u32 %s318_s15, %s317_s18 }
  0x16   : > { %11991 = sst [smem:[#allocation12_spill]] %s11990_s17  ;;  %p425_p10 = pnand %p5096_p7, %p424_p9 }
  0x17   : > { %p320_p11 = scmp.eq.s32.totalorder %s319_s20, 0 }
  0x18   : > { %428 = sbr.rel (%p425_p10) target bundleno = 2421 (0x975), region = 68 }
  0x19   : > { %s8113_s29 = scalar_select %p320_p11, %s7951_s23, %s322_s19  }
  0x1b   : > { %11992 = sst [smem:[#allocation13_spill]] %s8113_s29 }
  0x1f   : > { %v634_v0 = vld [vmem:[%s11708_s4] sm:$0xff]  ;;  %v635_v1 = vld [vmem:[%s11708_s4 + $0x8] sm:$0xff]  ;;  %s8125_s15 = sshll.u32 %s7955_s24, 4  ;;  %p491_p12 = scmp.lt.s32.totalorder %s7959_s25, 1  ;;  %v636_v5 = vld [vmem:[%s11708_s4 + $0x10] sm:$0xff]  ;;  %vm1298_vm0 = vcmask 261120  }
  0x20   : > { %v802_v2 = vld [vmem:[%s11710_s6] sm:$0xff]  ;;  %v6321_v3 = vpack.c.bf16 %v635_v1, %v634_v0  ;;  %v803_v4 = vld [vmem:[%s11710_s6 + $0x8] sm:$0xff]  ;;  %v637_v6 = vld [vmem:[%s11708_s4 + $0x18] sm:$0xff]  ;;  %p493_p13 = scmp.lt.s32.totalorder %s8125_s15, 31  ;;  %s7973_s13 = smov 96   ;;  %vm4731_vm2 = vcmask 523264  }
  0x21   : > { %v6353_v7 = vpack.c.bf16 %v803_v4, %v802_v2  ;;  %v6325_v8 = vpack.c.bf16 %v637_v6, %v636_v5  ;;  %v804_v9 = vld [vmem:[%s11710_s6 + $0x10] sm:$0xff]  ;;  %v805_v10 = vld [vmem:[%s11710_s6 + $0x18] sm:$0xff]  ;;  %v638_v11 = vld [vmem:[%s11708_s4 + $0x20] sm:$0xff]  ;;  %s8148_s26 = scalar_select %p491_p12, %s7959_s25, 1  ;;  %vm4748_vm3 = vcmask 785408  }
  0x22   : > { %6322 = vmatprep.subr.bf16.mxu0 %v6321_v3  ;;  %v6357_v12 = vpack.c.bf16 %v805_v10, %v804_v9  ;;  %v639_v13 = vld [vmem:[%s11708_s4 + $0x28] sm:$0xff]  ;;  %v806_v14 = vld [vmem:[%s11710_s6 + $0x20] sm:$0xff]  ;;  %s494_s30 = scalar_select %p493_p13, %s8125_s15, 31  ;;  %v640_v18 = vld [vmem:[%s11708_s4 + $0x30] sm:$0xff] }
  0x23   : > { %v807_v15 = vld [vmem:[%s11710_s6 + $0x28] sm:$0xff]  ;;  %6354 = vmatprep.subr.bf16.mxu1 %v6353_v7  ;;  %6324 = vmatpush3.bf16.msra.mxu0 %v6321_v3  ;;  %s5099_s18 = sshll.u32 %s8148_s26, 5  ;;  %v6329_v16 = vpack.c.bf16 %v639_v13, %v638_v11  ;;  %v641_v19 = vld [vmem:[%s11708_s4 + $0x38] sm:$0xff]  ;;  %v808_v20 = vld [vmem:[%s11710_s6 + $0x30] sm:$0xff]  ;;  %s11993_s20 = sshll.u32 %s8148_s26, 8 }
  0x24   : > { %6356 = vmatpush3.bf16.msra.mxu1 %v6353_v7  ;;  %6326 = vmatprep.subr.bf16.mxu0 %v6325_v8  ;;  %s496_s19 = sadd.s32 %s5099_s18, %s494_s30  ;;  %v6361_v17 = vpack.c.bf16 %v807_v15, %v806_v14  ;;  %v809_v21 = vld [vmem:[%s11710_s6 + $0x38] sm:$0xff]  ;;  %s5106_s21 = sshll.u32 %s494_s30, 1  ;;  %v6333_v22 = vpack.c.bf16 %v641_v19, %v640_v18  ;;  %v642_v24 = vld [vmem:[%s11708_s4 + $0x40] sm:$0xff]  ;;  %v643_v25 = vld [vmem:[%s11708_s4 + $0x48] sm:$0xff] }
  0x25   : > { %6358 = vmatprep.subr.bf16.mxu1 %v6357_v12  ;;  %s5100_s17 = sshll.u32 %s496_s19, 3  ;;  %s8184_s19 = scalar_lea.vmem %s11705_s1, %s11993_s20  ;;  %v6365_v23 = vpack.c.bf16 %v809_v21, %v808_v20  ;;  %v810_v27 = vld [vmem:[%s11710_s6 + $0x40] sm:$0xff]  ;;  %v811_v28 = vld [vmem:[%s11710_s6 + $0x48] sm:$0xff]  ;;  %v6337_v30 = vpack.c.bf16 %v643_v25, %v642_v24  ;;  %v644_v32 = vld [vmem:[%s11708_s4 + $0x50] sm:$0xff] }
  0x26   : > { %s8177_s12 = scalar_lea.vmem %s11704_s0, %s5100_s17  ;;  %s5107_s27 = sshll.u32 %s8148_s26, 6  ;;  %v538_v29 = vld [vmem:[%s8184_s19] sm:$0xff]  ;;  %v6369_v31 = vpack.c.bf16 %v811_v28, %v810_v27  ;;  %v645_v33 = vld [vmem:[%s11708_s4 + $0x58] sm:$0xff]  ;;  %v812_v34 = vld [vmem:[%s11710_s6 + $0x50] sm:$0xff] }
  0x27   : > { %6328 = vmatpush3.bf16.msra.mxu0 %v6325_v8  ;;  %s8187_s23 = sadd.s32 %s5107_s27, %s5106_s21  ;;  %v522_v26 = vld [vmem:[%s8177_s12] sm:$0xff]  ;;  %6137 = vmatprep.mubr.f32.mxu1 %v538_v29  ;;  %v813_v35 = vld [vmem:[%s11710_s6 + $0x58] sm:$0xff]  ;;  %v6341_v36 = vpack.c.bf16 %v645_v33, %v644_v32  ;;  %v647_v39 = vld [vmem:[%s11708_s4 + $0x68] sm:$0xff]  ;;  %s11994_s14 = sshll.u32 %s8148_s26, 8 }
  0x28   : > { %6360 = vmatpush3.bf16.msra.mxu1 %v6357_v12  ;;  %6330 = vmatprep.subr.bf16.mxu0 %v6329_v16  ;;  %v6373_v37 = vpack.c.bf16 %v813_v35, %v812_v34  ;;  %v646_v38 = vld [vmem:[%s11708_s4 + $0x60] sm:$0xff]  ;;  %v815_v41 = vld [vmem:[%s11710_s6 + $0x68] sm:$0xff]  ;;  %v648_v44 = vld [vmem:[%s11708_s4 + $0x70] sm:$0xff]  ;;  %s8319_s29 = scalar_lea.vmem %s11706_s2, %s11994_s14  ;;  %s7974_s17 = smov 64  }
  0x29   : > { %6362 = vmatprep.subr.bf16.mxu1 %v6361_v17  ;;  %6081 = vmatprep.mubr.f32.mxu0 %v522_v26  ;;  %v814_v40 = vld [vmem:[%s11710_s6 + $0x60] sm:$0xff]  ;;  %v6345_v42 = vpack.c.bf16 %v647_v39, %v646_v38  ;;  %v649_v45 = vld [vmem:[%s11708_s4 + $0x78] sm:$0xff]  ;;  %v816_v46 = vld [vmem:[%s11710_s6 + $0x70] sm:$0xff]  ;;  %s7975_s18 = smov 32   ;;  %s5108_s21 = sshll.u32 %s8187_s23, 3 }
  0x2a   : > { %v6377_v43 = vpack.c.bf16 %v815_v41, %v814_v40  ;;  %v817_v47 = vld [vmem:[%s11710_s6 + $0x78] sm:$0xff]  ;;  %v6349_v48 = vpack.c.bf16 %v649_v45, %v648_v44  ;;  %v1050_v50 = vld [vmem:[%s11712_s8] sm:$0xff]  ;;  %v1051_v51 = vld [vmem:[%s11712_s8 + $0x8] sm:$0xff]  ;;  %s9333_s28 = scalar_lea.vmem %s11707_s3, %s5108_s21  ;;  %s5307_s27 = sshll.u32 %s7959_s25, 5 }
  0x2b   : > { %6332 = vmatpush3.bf16.msra.mxu0 %v6329_v16  ;;  %v6381_v49 = vpack.c.bf16 %v817_v47, %v816_v46  ;;  %v6385_v52 = vpack.c.bf16 %v1051_v51, %v1050_v50  ;;  %v1052_v53 = vld [vmem:[%s11712_s8 + $0x10] sm:$0xff]  ;;  %v1053_v54 = vld [vmem:[%s11712_s8 + $0x18] sm:$0xff]  ;;  %v523_v55 = vld [vmem:[%s8177_s12 + $0x8] sm:$0xff]  ;;  %s7976_s20 = smov [#allocation2]  }
  0x2c   : > { %6364 = vmatpush3.bf16.msra.mxu1 %v6361_v17  ;;  %6334 = vmatprep.subr.bf16.mxu0 %v6333_v22  ;;  %v539_v56 = vld [vmem:[%s8184_s19 + $0x8] sm:$0xff]  ;;  %v524_v57 = vld [vmem:[%s8177_s12 + $0x10] sm:$0xff]  ;;  %v6389_v59 = vpack.c.bf16 %v1053_v54, %v1052_v53  ;;  %v1054_v60 = vld [vmem:[%s11712_s8 + $0x20] sm:$0xff]  ;;  %s7881_s24 = sshll.u32 %s7976_s20, 4  ;;  %s7882_s24 = int_to_ptr.vmem [resolvable:$false] %s7881_s24 }
  0x2d   : > { %6366 = vmatprep.subr.bf16.mxu1 %v6365_v23  ;;  %v540_v58 = vld [vmem:[%s8184_s19 + $0x10] sm:$0xff]  ;;  %v1055_v61 = vld [vmem:[%s11712_s8 + $0x28] sm:$0xff]  ;;  %v525_v62 = vld [vmem:[%s8177_s12 + $0x18] sm:$0xff] }
  0x2e   : > { %v541_v63 = vld [vmem:[%s8184_s19 + $0x18] sm:$0xff]  ;;  %v526_v0 = vld [vmem:[%s8177_s12 + $0x20] sm:$0xff]  ;;  %v6393_v2 = vpack.c.bf16 %v1055_v61, %v1054_v60  ;;  %v1056_v3 = vld [vmem:[%s11712_s8 + $0x30] sm:$0xff] }
  0x2f   : > { %6336 = vmatpush3.bf16.msra.mxu0 %v6333_v22  ;;  %v542_v1 = vld [vmem:[%s8184_s19 + $0x20] sm:$0xff]  ;;  %v1057_v4 = vld [vmem:[%s11712_s8 + $0x38] sm:$0xff]  ;;  %v527_v5 = vld [vmem:[%s8177_s12 + $0x28] sm:$0xff] }
  0x30   : > { %6368 = vmatpush3.bf16.msra.mxu1 %v6365_v23  ;;  %6338 = vmatprep.subr.bf16.mxu0 %v6337_v30  ;;  %v543_v6 = vld [vmem:[%s8184_s19 + $0x28] sm:$0xff]  ;;  %v528_v7 = vld [vmem:[%s8177_s12 + $0x30] sm:$0xff]  ;;  %v6397_v9 = vpack.c.bf16 %v1057_v4, %v1056_v3  ;;  %v1058_v10 = vld [vmem:[%s11712_s8 + $0x40] sm:$0xff] }
  0x31   : > { %6370 = vmatprep.subr.bf16.mxu1 %v6369_v31  ;;  %v544_v8 = vld [vmem:[%s8184_s19 + $0x30] sm:$0xff]  ;;  %v1059_v11 = vld [vmem:[%s11712_s8 + $0x48] sm:$0xff]  ;;  %v529_v12 = vld [vmem:[%s8177_s12 + $0x38] sm:$0xff] }
  0x32   : > { %v545_v13 = vld [vmem:[%s8184_s19 + $0x38] sm:$0xff]  ;;  %v530_v14 = vld [vmem:[%s8177_s12 + $0x40] sm:$0xff]  ;;  %v6401_v16 = vpack.c.bf16 %v1059_v11, %v1058_v10  ;;  %v1060_v17 = vld [vmem:[%s11712_s8 + $0x50] sm:$0xff] }
  0x33   : > { %6340 = vmatpush3.bf16.msra.mxu0 %v6337_v30  ;;  %v546_v15 = vld [vmem:[%s8184_s19 + $0x40] sm:$0xff]  ;;  %v1061_v18 = vld [vmem:[%s11712_s8 + $0x58] sm:$0xff]  ;;  %v531_v19 = vld [vmem:[%s8177_s12 + $0x48] sm:$0xff] }
  0x34   : > { %6372 = vmatpush3.bf16.msra.mxu1 %v6369_v31  ;;  %6342 = vmatprep.subr.bf16.mxu0 %v6341_v36  ;;  %v547_v20 = vld [vmem:[%s8184_s19 + $0x48] sm:$0xff]  ;;  %v532_v21 = vld [vmem:[%s8177_s12 + $0x50] sm:$0xff]  ;;  %v6405_v23 = vpack.c.bf16 %v1061_v18, %v1060_v17  ;;  %v1062_v24 = vld [vmem:[%s11712_s8 + $0x60] sm:$0xff] }
  0x35   : > { %6374 = vmatprep.subr.bf16.mxu1 %v6373_v37  ;;  %v548_v22 = vld [vmem:[%s8184_s19 + $0x50] sm:$0xff]  ;;  %v1063_v25 = vld [vmem:[%s11712_s8 + $0x68] sm:$0xff]  ;;  %v533_v26 = vld [vmem:[%s8177_s12 + $0x58] sm:$0xff] }
  0x36   : > { %v549_v27 = vld [vmem:[%s8184_s19 + $0x58] sm:$0xff]  ;;  %v534_v28 = vld [vmem:[%s8177_s12 + $0x60] sm:$0xff]  ;;  %v6409_v30 = vpack.c.bf16 %v1063_v25, %v1062_v24  ;;  %v1064_v31 = vld [vmem:[%s11712_s8 + $0x70] sm:$0xff] }
  0x37   : > { %6344 = vmatpush3.bf16.msra.mxu0 %v6341_v36  ;;  %v550_v29 = vld [vmem:[%s8184_s19 + $0x60] sm:$0xff]  ;;  %v1065_v32 = vld [vmem:[%s11712_s8 + $0x78] sm:$0xff]  ;;  %v535_v33 = vld [vmem:[%s8177_s12 + $0x68] sm:$0xff] }
  0x38   : > { %6376 = vmatpush3.bf16.msra.mxu1 %v6373_v37  ;;  %6346 = vmatprep.subr.bf16.mxu0 %v6345_v42  ;;  %v551_v34 = vld [vmem:[%s8184_s19 + $0x68] sm:$0xff]  ;;  %v536_v35 = vld [vmem:[%s8177_s12 + $0x70] sm:$0xff]  ;;  %v6413_v37 = vpack.c.bf16 %v1065_v32, %v1064_v31  ;;  %v537_v38 = vld [vmem:[%s8177_s12 + $0x78] sm:$0xff] }
  0x39   : > { %6378 = vmatprep.subr.bf16.mxu1 %v6377_v43  ;;  %v552_v36 = vld [vmem:[%s8184_s19 + $0x70] sm:$0xff]  ;;  %v553_v39 = vld [vmem:[%s8184_s19 + $0x78] sm:$0xff]  ;;  %v570_v40 = vld [vmem:[%s8319_s29] sm:$0xff] }
  0x3a   : > { %v554_v41 = vld [vmem:[%s8184_s19 + $0x80] sm:$0xff]  ;;  %v556_v44 = vld [vmem:[%s8184_s19 + $0x90] sm:$0xff]  ;;  %v557_v46 = vld [vmem:[%s8184_s19 + $0x98] sm:$0xff] }
  0x3b   : > { %6348 = vmatpush3.bf16.msra.mxu0 %v6345_v42  ;;  %v555_v42 = vld [vmem:[%s8184_s19 + $0x88] sm:$0xff]  ;;  %v572_v45 = vld [vmem:[%s8319_s29 + $0x10] sm:$0xff]  ;;  %v573_v47 = vld [vmem:[%s8319_s29 + $0x18] sm:$0xff] }
  0x3c   : > { %6380 = vmatpush3.bf16.msra.mxu1 %v6377_v43  ;;  %6350 = vmatprep.subr.bf16.mxu0 %v6349_v48  ;;  %v571_v43 = vld [vmem:[%s8319_s29 + $0x8] sm:$0xff]  ;;  %v576_v53 = vld [vmem:[%s8319_s29 + $0x30] sm:$0xff]  ;;  %v561_v54 = vld [vmem:[%s8184_s19 + $0xb8] sm:$0xff] }
  0x3d   : > { %6382 = vmatprep.subr.bf16.mxu1 %v6381_v49  ;;  %v559_v50 = vld [vmem:[%s8184_s19 + $0xa8] sm:$0xff]  ;;  %v564_v60 = vld [vmem:[%s8184_s19 + $0xd0] sm:$0xff]  ;;  %v589_v11 = vld [vmem:[%s8319_s29 + $0x98] sm:$0xff] }
  0x3e   : > { %v575_v51 = vld [vmem:[%s8319_s29 + $0x28] sm:$0xff]  ;;  %v580_v61 = vld [vmem:[%s8319_s29 + $0x50] sm:$0xff]  ;;  %v8375_v24 = vld [vmem:[%s11709_s5] ss:$0 sm:$0xff] }
  0x3f   : > { %6352 = vmatpush3.bf16.msra.mxu0 %v6349_v48  ;;  %v558_v48 = vld [vmem:[%s8184_s19 + $0xa0] sm:$0xff]  ;;  %v583_v3 = vld [vmem:[%s8319_s29 + $0x68] sm:$0xff]  ;;  %v568_v4 = vld [vmem:[%s8184_s19 + $0xf0] sm:$0xff] }
  0x40   : > { %6384 = vmatpush3.bf16.msra.mxu1 %v6381_v49  ;;  %6386 = vmatprep.subr.bf16.mxu0 %v6385_v52  ;;  %v574_v49 = vld [vmem:[%s8319_s29 + $0x20] sm:$0xff]  ;;  %v588_v10 = vld [vmem:[%s8319_s29 + $0x90] sm:$0xff]  ;;  %v595_v17 = vld [vmem:[%s8319_s29 + $0xc8] sm:$0xff] }
  0x41   : > { %v596_v18 = vld [vmem:[%s8319_s29 + $0xd0] sm:$0xff]  ;;  %v8380_v25 = vld [vmem:[%s11711_s7] ss:$0 sm:$0xff]  ;;  %vm8572_vm1 = vmpackc.low %vm1298_vm0, %vm1298_vm0 }
  0x42   : > { %6082 = vmatmul.mubr.f32.vlgmr.msra.gmra.mrb[0].mxu0 %v523_v55  ;;  %v577_v55 = vld [vmem:[%s8319_s29 + $0x38] sm:$0xff] }
  0x43   : > { %6138 = vmatmul.mubr.f32.vlgmr.msra.gmra.mrb[0].mxu1 %v539_v56  ;;  %6084 = vmatprep.mubr.f32.mxu0 %v524_v57  ;;  %v562_v56 = vld [vmem:[%s8184_s19 + $0xc0] sm:$0xff] }
  0x44   : > { %6140 = vmatprep.mubr.f32.mxu1 %v540_v58  ;;  %6388 = vmatpush3.bf16.msra.mxu0 %v6385_v52  ;;  %v560_v52 = vld [vmem:[%s8184_s19 + $0xb0] sm:$0xff]  ;;  %v578_v57 = vld [vmem:[%s8319_s29 + $0x40] sm:$0xff]  ;;  %v563_v58 = vld [vmem:[%s8184_s19 + $0xc8] sm:$0xff] }
  0x45   : > { %6390 = vmatprep.subr.bf16.mxu0 %v6389_v59 }
  0x46   : > { %6085 = vmatmul.mubr.f32.gmra.mrb[2].mxu0 %v525_v62  ;;  %v565_v62 = vld [vmem:[%s8184_s19 + $0xd8] sm:$0xff] }
  0x47   : > { %6141 = vmatmul.mubr.f32.gmra.mrb[2].mxu1 %v541_v63  ;;  %6087 = vmatprep.mubr.f32.mxu0 %v526_v0  ;;  %v581_v63 = vld [vmem:[%s8319_s29 + $0x58] sm:$0xff]  ;;  %v566_v0 = vld [vmem:[%s8184_s19 + $0xe0] sm:$0xff] }
  0x48   : > { %6143 = vmatprep.mubr.f32.mxu1 %v542_v1  ;;  %6392 = vmatpush3.bf16.msra.mxu0 %v6389_v59  ;;  %v579_v59 = vld [vmem:[%s8319_s29 + $0x48] sm:$0xff]  ;;  %v582_v1 = vld [vmem:[%s8319_s29 + $0x60] sm:$0xff] }
  0x49   : > { %6394 = vmatprep.subr.bf16.mxu0 %v6393_v2 }
  0x4a   : > { %6088 = vmatmul.mubr.f32.gmra.mrb[4].mxu0 %v527_v5  ;;  %v584_v5 = vld [vmem:[%s8319_s29 + $0x70] sm:$0xff] }
  0x4b   : > { %6144 = vmatmul.mubr.f32.gmra.mrb[4].mxu1 %v543_v6  ;;  %6090 = vmatprep.mubr.f32.mxu0 %v528_v7  ;;  %v569_v6 = vld [vmem:[%s8184_s19 + $0xf8] sm:$0xff] }
  0x4c   : > { %6146 = vmatprep.mubr.f32.mxu1 %v544_v8  ;;  %6396 = vmatpush3.bf16.msra.mxu0 %v6393_v2  ;;  %v567_v2 = vld [vmem:[%s8184_s19 + $0xe8] sm:$0xff]  ;;  %v585_v7 = vld [vmem:[%s8319_s29 + $0x78] sm:$0xff]  ;;  %v586_v8 = vld [vmem:[%s8319_s29 + $0x80] sm:$0xff]  ;;  %s12566_s19 = sld [smem:[#allocation127_spill]] }
  0x4d   : > { %6398 = vmatprep.subr.bf16.mxu0 %v6397_v9 }
  0x4e   : > { %6091 = vmatmul.mubr.f32.gmra.mrb[6].mxu0 %v529_v12  ;;  %v590_v12 = vld [vmem:[%s8319_s29 + $0xa0] sm:$0xff] }
  0x4f   : > { %6147 = vmatmul.mubr.f32.gmra.mrb[6].mxu1 %v545_v13  ;;  %6093 = vmatprep.mubr.f32.mxu0 %v530_v14  ;;  %v591_v13 = vld [vmem:[%s8319_s29 + $0xa8] sm:$0xff]  ;;  %v592_v14 = vld [vmem:[%s8319_s29 + $0xb0] sm:$0xff] }
  0x50   : > { %6149 = vmatprep.mubr.f32.mxu1 %v546_v15  ;;  %6400 = vmatpush3.bf16.msra.mxu0 %v6397_v9  ;;  %v587_v9 = vld [vmem:[%s8319_s29 + $0x88] sm:$0xff]  ;;  %v593_v15 = vld [vmem:[%s8319_s29 + $0xb8] sm:$0xff] }
  0x51   : > { %6402 = vmatprep.subr.bf16.mxu0 %v6401_v16 }
  0x52   : > { %6094 = vmatmul.mubr.f32.gmra.mrb[8].mxu0 %v531_v19  ;;  %v597_v19 = vld [vmem:[%s8319_s29 + $0xd8] sm:$0xff] }
  0x53   : > { %6150 = vmatmul.mubr.f32.gmra.mrb[8].mxu1 %v547_v20  ;;  %6096 = vmatprep.mubr.f32.mxu0 %v532_v21  ;;  %v598_v20 = vld [vmem:[%s8319_s29 + $0xe0] sm:$0xff]  ;;  %v599_v21 = vld [vmem:[%s8319_s29 + $0xe8] sm:$0xff] }
  0x54   : > { %6152 = vmatprep.mubr.f32.mxu1 %v548_v22  ;;  %6404 = vmatpush3.bf16.msra.mxu0 %v6401_v16  ;;  %v594_v16 = vld [vmem:[%s8319_s29 + $0xc0] sm:$0xff]  ;;  %v600_v22 = vld [vmem:[%s8319_s29 + $0xf0] sm:$0xff] }
  0x55   : > { %6406 = vmatprep.subr.bf16.mxu0 %v6405_v23 }
  0x56   : > { %6097 = vmatmul.mubr.f32.gmra.mrb[10].mxu0 %v533_v26 }
  0x57   : > { %6153 = vmatmul.mubr.f32.gmra.mrb[10].mxu1 %v549_v27  ;;  %6099 = vmatprep.mubr.f32.mxu0 %v534_v28 }
  0x58   : > { %6155 = vmatprep.mubr.f32.mxu1 %v550_v29  ;;  %6408 = vmatpush3.bf16.msra.mxu0 %v6405_v23  ;;  %v601_v23 = vld [vmem:[%s8319_s29 + $0xf8] sm:$0xff] }
  0x59   : > { %6410 = vmatprep.subr.bf16.mxu0 %v6409_v30 }
  0x5a   : > { %6100 = vmatmul.mubr.f32.gmra.mrb[12].mxu0 %v535_v33 }
  0x5b   : > { %6156 = vmatmul.mubr.f32.gmra.mrb[12].mxu1 %v551_v34  ;;  %6102 = vmatprep.mubr.f32.mxu0 %v536_v35 }
  0x5c   : > { %6158 = vmatprep.mubr.f32.mxu1 %v552_v36  ;;  %6412 = vmatpush3.bf16.msra.mxu0 %v6409_v30 }
  0x5d   : > { %6414 = vmatprep.subr.bf16.mxu0 %v6413_v37 }
  0x5e   : > { %6103 = vmatmul.mubr.f32.gmra.mrb[14].mxu0 %v537_v38 }
  0x5f   : > { %6159 = vmatmul.mubr.f32.gmra.mrb[14].mxu1 %v553_v39  ;;  %6217 = vmatprep.mubr.f32.mxu0 %v570_v40 }
  0x60   : > { %6161 = vmatprep.mubr.f32.mxu1 %v554_v41  ;;  %6416 = vmatpush3.bf16.msra.mxu0 %v6413_v37 }
  0x63   : > { %6162 = vmatmul.mubr.f32.gmra.mrb[16].mxu1 %v555_v42  ;;  %6218 = vmatmul.mubr.f32.vlgmr.msra.gmra.mrb[16].mxu0 %v571_v43 }
  0x64   : > { %6164 = vmatprep.mubr.f32.mxu1 %v556_v44  ;;  %6220 = vmatprep.mubr.f32.mxu0 %v572_v45 }
  0x67   : > { %6165 = vmatmul.mubr.f32.gmra.mrb[18].mxu1 %v557_v46  ;;  %6221 = vmatmul.mubr.f32.gmra.mrb[18].mxu0 %v573_v47 }
  0x68   : > { %6167 = vmatprep.mubr.f32.mxu1 %v558_v48  ;;  %6223 = vmatprep.mubr.f32.mxu0 %v574_v49 }
  0x6b   : > { %6168 = vmatmul.mubr.f32.gmra.mrb[20].mxu1 %v559_v50  ;;  %6224 = vmatmul.mubr.f32.gmra.mrb[20].mxu0 %v575_v51 }
  0x6c   : > { %6170 = vmatprep.mubr.f32.mxu1 %v560_v52  ;;  %6226 = vmatprep.mubr.f32.mxu0 %v576_v53 }
  0x6f   : > { %6171 = vmatmul.mubr.f32.gmra.mrb[22].mxu1 %v561_v54  ;;  %6227 = vmatmul.mubr.f32.gmra.mrb[22].mxu0 %v577_v55 }
  0x70   : > { %6173 = vmatprep.mubr.f32.mxu1 %v562_v56  ;;  %6229 = vmatprep.mubr.f32.mxu0 %v578_v57 }
  0x73   : > { %6174 = vmatmul.mubr.f32.gmra.mrb[24].mxu1 %v563_v58  ;;  %6230 = vmatmul.mubr.f32.gmra.mrb[24].mxu0 %v579_v59 }
  0x74   : > { %6176 = vmatprep.mubr.f32.mxu1 %v564_v60  ;;  %6232 = vmatprep.mubr.f32.mxu0 %v580_v61 }
  0x77   : > { %6177 = vmatmul.mubr.f32.gmra.mrb[26].mxu1 %v565_v62  ;;  %6233 = vmatmul.mubr.f32.gmra.mrb[26].mxu0 %v581_v63 }
  0x78   : > { %6179 = vmatprep.mubr.f32.mxu1 %v566_v0  ;;  %6235 = vmatprep.mubr.f32.mxu0 %v582_v1 }
  0x7b   : > { %6180 = vmatmul.mubr.f32.gmra.mrb[28].mxu1 %v567_v2  ;;  %6236 = vmatmul.mubr.f32.gmra.mrb[28].mxu0 %v583_v3 }
  0x7c   : > { %6182 = vmatprep.mubr.f32.mxu1 %v568_v4  ;;  %6238 = vmatprep.mubr.f32.mxu0 %v584_v5 }
  0x7f   : > { %6183 = vmatmul.mubr.f32.gmra.mrb[30].mxu1 %v569_v6  ;;  %6239 = vmatmul.mubr.f32.gmra.mrb[30].mxu0 %v585_v7 }
  0x80   : > { %6241 = vmatprep.mubr.f32.mxu0 %v586_v8 }
  0x83   : > { %6242 = vmatmul.mubr.f32.gmra.mrb[32].mxu0 %v587_v9 }
  0x84   : > { %6244 = vmatprep.mubr.f32.mxu0 %v588_v10 }
  0x87   : > { %6245 = vmatmul.mubr.f32.gmra.mrb[34].mxu0 %v589_v11 }
  0x88   : > { %6247 = vmatprep.mubr.f32.mxu0 %v590_v12 }
  0x8b   : > { %6248 = vmatmul.mubr.f32.gmra.mrb[36].mxu0 %v591_v13 }
  0x8c   : > { %6250 = vmatprep.mubr.f32.mxu0 %v592_v14 }
  0x8f   : > { %6251 = vmatmul.mubr.f32.gmra.mrb[38].mxu0 %v593_v15 }
  0x90   : > { %6253 = vmatprep.mubr.f32.mxu0 %v594_v16 }
  0x93   : > { %6254 = vmatmul.mubr.f32.gmra.mrb[40].mxu0 %v595_v17 }
  0x94   : > { %6256 = vmatprep.mubr.f32.mxu0 %v596_v18 }
  0x97   : > { %6257 = vmatmul.mubr.f32.gmra.mrb[42].mxu0 %v597_v19 }
  0x98   : > { %6259 = vmatprep.mubr.f32.mxu0 %v598_v20 }
  0x9b   : > { %6260 = vmatmul.mubr.f32.gmra.mrb[44].mxu0 %v599_v21 }
  0x9c   : > { %6262 = vmatprep.mubr.f32.mxu0 %v600_v22 }
  0x9f   : > { %6263 = vmatmul.mubr.f32.gmra.mrb[46].mxu0 %v601_v23 }
 0x115   : > { %v6083_v26 = vpop.f32.mrb[0].mxu0 }
 0x116   : > { %v8383_v27 = vadd.f32 %v6083_v26, %v8375_v24  ;;  %v6139_v28 = vpop.f32.mrb[0].mxu1  ;;  %v723_v29 = vpop.f32.mrb[1].mxu0 }
 0x117   : > { %v8386_v30 = vadd.f32 %v6139_v28, %v8380_v25  ;;  %v8389_v31 = vadd.f32 %v8375_v24, %v723_v29  ;;  %v891_v32 = vpop.f32.mrb[1].mxu1 }
 0x118   : > { %v8392_v33 = vadd.f32 %v8380_v25, %v891_v32  ;;  %1991 = vrot.lane.b32.xlu1 %v8383_v27, %s7973_s13 }
 0x119   : > { %5473 = vmatprep.mubr.msk.f32.mxu1 %vm1298_vm0, %v8389_v31  ;;  %v6086_v34 = vpop.f32.mrb[2].mxu0 }
 0x11a   : > { %v6420_v35 = vpack.c.bf16 %v8386_v30, %v8392_v33  ;;  %v6845_v36 = vpack.i.bf16 %v8386_v30, %v8392_v33  ;;  %v6142_v37 = vpop.f32.mrb[2].mxu1  ;;  %v8402_v38 = vpop.f32.mrb[3].mxu0  ;;  %v8470_v4 = vadd.f32 %v6086_v34, %v8375_v24 }
 0x11b   : > { %v8405_v39 = vadd.f32 %v6142_v37, %v8380_v25  ;;  %v901_v40 = vpop.f32.mrb[3].mxu1  ;;  %v8523_v29 = vadd.f32 %v8375_v24, %v8402_v38 }
 0x11c   : > { %6846 = vrot.lane.b32.xlu0 %v6845_v36, %s7973_s13  ;;  %2857 = vrot.lane.b32.xlu1 %v8383_v27, %s7974_s17  ;;  %v8411_v41 = vadd.f32 %v8380_v25, %v901_v40 }
 0x11d   : > { %v8413_v42 = vpop.f32.mrb[4].mxu0 }
 0x11e   : > { %v6426_v43 = vpack.c.bf16 %v8405_v39, %v8411_v41  ;;  %v6145_v44 = vpop.f32.mrb[4].mxu1  ;;  %v8419_v45 = vpack.i.bf16 %v8405_v39, %v8411_v41  ;;  %v8421_v46 = vpop.f32.mrb[5].mxu0 }
 0x11f   : > { %v8424_v47 = vadd.f32 %v6145_v44, %v8380_v25  ;;  %v911_v48 = vpop.f32.mrb[5].mxu1 }
 0x120   : > { %6851 = vrot.lane.b32.xlu0 %v6845_v36, %s7974_s17  ;;  %3691 = vrot.lane.b32.xlu1 %v8383_v27, %s7975_s18  ;;  %v8430_v49 = vadd.f32 %v8380_v25, %v911_v48 }
 0x121   : > { %v6092_v50 = vpop.f32.mrb[6].mxu0 }
 0x122   : > { %v6148_v52 = vpop.f32.mrb[6].mxu1  ;;  %v8436_v53 = vpack.i.bf16 %v8424_v47, %v8430_v49  ;;  %v8439_v54 = vadd.f32 %v6092_v50, %v8375_v24  ;;  %v8441_v55 = vpop.f32.mrb[7].mxu0 }
 0x123   : > { %v8444_v56 = vadd.f32 %v6148_v52, %v8380_v25  ;;  %v921_v57 = vpop.f32.mrb[7].mxu1 }
 0x124   : > { %6856 = vrot.lane.b32.xlu0 %v6845_v36, %s7975_s18  ;;  %1989 = vrot.lane.b32.xlu1 %v8389_v31, %s7973_s13  ;;  %v8450_v58 = vadd.f32 %v8380_v25, %v921_v57  ;;  %v8550_v57 = vld [vmem:[%s11713_s9] ss:$0 sm:$0xff] }
 0x125   : > { %v6095_v59 = vpop.f32.mrb[8].mxu0 }
 0x126   : > { %v6151_v61 = vpop.f32.mrb[8].mxu1  ;;  %v8456_v62 = vpack.i.bf16 %v8444_v56, %v8450_v58  ;;  %v8459_v63 = vadd.f32 %v6095_v59, %v8375_v24  ;;  %v763_v0 = vpop.f32.mrb[9].mxu0 }
 0x127   : > { %v8462_v1 = vadd.f32 %v6151_v61, %v8380_v25  ;;  %v931_v2 = vpop.f32.mrb[9].mxu1  ;;  %v8465_v3 = vadd.f32 %v8375_v24, %v763_v0 }
 0x128   : > { %3689 = vrot.lane.b32.xlu0 %v8389_v31, %s7975_s18  ;;  %2855 = vrot.lane.b32.xlu1 %v8389_v31, %s7974_s17  ;;  %v8475_v5 = vadd.f32 %v8380_v25, %v931_v2 }
 0x129   : > { %v6098_v6 = vpop.f32.mrb[10].mxu0 }
 0x12a   : > { %v6154_v8 = vpop.f32.mrb[10].mxu1  ;;  %v8481_v9 = vpack.i.bf16 %v8462_v1, %v8475_v5  ;;  %v8484_v10 = vadd.f32 %v6098_v6, %v8375_v24  ;;  %v773_v11 = vpop.f32.mrb[11].mxu0 }
 0x12b   : > { %v8487_v12 = vadd.f32 %v6154_v8, %v8380_v25  ;;  %v941_v13 = vpop.f32.mrb[11].mxu1  ;;  %v8490_v14 = vadd.f32 %v8375_v24, %v773_v11 }
 0x12c   : > { %6866 = vrot.lane.b32.xlu0 %v8419_v45, %s7974_s17  ;;  %1995 = vrot.lane.b32.xlu1 %v8470_v4, %s7973_s13  ;;  %v8497_v15 = vadd.f32 %v8380_v25, %v941_v13 }
 0x12d   : > { %v6101_v16 = vpop.f32.mrb[12].mxu0 }
 0x12e   : > { %v6157_v18 = vpop.f32.mrb[12].mxu1  ;;  %v8503_v19 = vpack.i.bf16 %v8487_v12, %v8497_v15  ;;  %v8506_v20 = vadd.f32 %v6101_v16, %v8375_v24  ;;  %v783_v21 = vpop.f32.mrb[13].mxu0 }
 0x12f   : > { %v8509_v22 = vadd.f32 %v6157_v18, %v8380_v25  ;;  %v951_v23 = vpop.f32.mrb[13].mxu1  ;;  %v8512_v26 = vadd.f32 %v8375_v24, %v783_v21 }
 0x130   : > { %11995 = vst [vmem:[#allocation14_spill] sm:$0xff] %v8506_v20  ;;  %6871 = vrot.lane.b32.xlu0 %v8419_v45, %s7975_s18  ;;  %2861 = vrot.lane.b32.xlu1 %v8470_v4, %s7974_s17  ;;  %v8519_v28 = vadd.f32 %v8380_v25, %v951_v23  ;;  %v8578_v23 = vadd.f32 %v8375_v24, %v8421_v46 }
 0x131   : > { %v6104_v32 = vpop.f32.mrb[14].mxu0 }
 0x132   : > { %v6160_v36 = vpop.f32.mrb[14].mxu1  ;;  %v8529_v37 = vpack.i.bf16 %v8509_v22, %v8519_v28  ;;  %v8532_v40 = vadd.f32 %v6104_v32, %v8375_v24  ;;  %v793_v44 = vpop.f32.mrb[15].mxu0 }
 0x133   : > { %v8535_v48 = vadd.f32 %v6160_v36, %v8380_v25  ;;  %v961_v50 = vpop.f32.mrb[15].mxu1  ;;  %v8538_v38 = vadd.f32 %v8375_v24, %v793_v44 }
 0x134   : > { %11996 = vst [vmem:[#allocation15_spill] sm:$0xff] %v8532_v40  ;;  %3693 = vrot.lane.b32.xlu0 %v8523_v29, %s7975_s18  ;;  %v8543_v52 = vadd.f32 %v8380_v25, %v961_v50  ;;  %3695 = vrot.lane.b32.xlu1 %v8470_v4, %s7975_s18 }
 0x136   : > { %v6163_v61 = vpop.f32.mrb[16].mxu1  ;;  %v8556_v0 = vpack.i.bf16 %v8535_v48, %v8543_v52  ;;  %v6219_v2 = vpop.f32.mrb[16].mxu0 }
 0x137   : > { %v977_v6 = vadd.f32 %v6163_v61, %v8380_v25  ;;  %v971_v8 = vpop.f32.mrb[17].mxu1  ;;  %v8560_v11 = vadd.f32 %v6219_v2, %v8550_v57  ;;  %v1139_v13 = vpop.f32.mrb[17].mxu0 }
 0x138   : > { %v972_v16 = vadd.f32 %v8380_v25, %v971_v8  ;;  %6881 = vrot.lane.b32.xlu0 %v8436_v53, %s7974_s17  ;;  %6861 = vrot.lane.b32.xlu1 %v8419_v45, %s7973_s13  ;;  %v8568_v18 = vadd.f32 %v8550_v57, %v1139_v13 }
 0x13a   : > { %v6417_v32 = vpack.c.bf16 %v977_v6, %v972_v16  ;;  %v6166_v36 = vpop.f32.mrb[18].mxu1  ;;  %v8580_v44 = vpack.i.bf16 %v977_v6, %v972_v16  ;;  %v6222_v50 = vpop.f32.mrb[18].mxu0  ;;  %v8585_v2 = vpack.i.bf16 %v8560_v11, %v8568_v18 }
 0x13b   : > { %v987_v45 = vadd.f32 %v6166_v36, %v8380_v25  ;;  %v981_v61 = vpop.f32.mrb[19].mxu1  ;;  %v8588_v8 = vadd.f32 %v6222_v50, %v8550_v57  ;;  %v1149_v13 = vpop.f32.mrb[19].mxu0 }
 0x13c   : > { %11999 = vst [vmem:[#allocation16_spill] sm:$0xff] %v8585_v2  ;;  %6419 = vmatprep.subr.msk.bf16.mxu1 %vm8572_vm1, %v6417_v32  ;;  %6886 = vrot.lane.b32.xlu0 %v8436_v53, %s7975_s18  ;;  %v982_v6 = vadd.f32 %v8380_v25, %v981_v61  ;;  %v8598_v16 = vadd.f32 %v8550_v57, %v1149_v13 }
 0x13d   : > { %6422 = vmatpush3.bf16.xpose.msk.msra.mxu1 %vm8572_vm1, %v6420_v35  ;;  %1993 = vrot.lane.b32.xlu1 %v8523_v29, %s7973_s13 }
 0x13e   : > { %v6423_v36 = vpack.c.bf16 %v987_v45, %v982_v6  ;;  %v6169_v50 = vpop.f32.mrb[20].mxu1  ;;  %v8607_v32 = vpack.i.bf16 %v987_v45, %v982_v6  ;;  %v8611_v59 = vpack.i.bf16 %v8588_v8, %v8598_v16  ;;  %v6225_v61 = vpop.f32.mrb[20].mxu0 }
 0x13f   : > { %v997_v13 = vadd.f32 %v6169_v50, %v8380_v25  ;;  %v991_v34 = vpop.f32.mrb[21].mxu1  ;;  %v8615_v30 = vadd.f32 %v6225_v61, %v8550_v57  ;;  %v1159_v33 = vpop.f32.mrb[21].mxu0  ;;  %v8629_v50 = vadd.f32 %v8413_v42, %v8375_v24 }
 0x140   : > { %12000 = vst [vmem:[#allocation17_spill] sm:$0xff] %v8611_v59  ;;  %3697 = vrot.lane.b32.xlu0 %v8578_v23, %s7975_s18  ;;  %6425 = vmatprep.subr.msk.bf16.mxu1 %vm8572_vm1, %v6423_v36  ;;  %v992_v45 = vadd.f32 %v8380_v25, %v991_v34  ;;  %v8625_v6 = vadd.f32 %v8550_v57, %v1159_v33 }
 0x141   : > { %2859 = vrot.lane.b32.xlu1 %v8523_v29, %s7974_s17 }
 0x142   : > { %v6429_v61 = vpack.c.bf16 %v997_v13, %v992_v45  ;;  %v6172_v17 = vpop.f32.mrb[22].mxu1  ;;  %v6228_v35 = vpop.f32.mrb[22].mxu0  ;;  %v8633_v46 = vpack.i.bf16 %v997_v13, %v992_v45  ;;  %v8641_v60 = vpack.i.bf16 %v8615_v30, %v8625_v6 }
 0x143   : > { %v1007_v7 = vadd.f32 %v6172_v17, %v8380_v25  ;;  %v1001_v36 = vpop.f32.mrb[23].mxu1  ;;  %v8637_v34 = vadd.f32 %v6228_v35, %v8550_v57  ;;  %v1169_v33 = vpop.f32.mrb[23].mxu0 }
 0x144   : > { %12001 = vst [vmem:[#allocation18_spill] sm:$0xff] %v8641_v60  ;;  %6896 = vrot.lane.b32.xlu0 %v8456_v62, %s7974_s17  ;;  %v1002_v42 = vadd.f32 %v8380_v25, %v1001_v36  ;;  %v8647_v51 = vadd.f32 %v8550_v57, %v1169_v33 }
 0x145   : > { %6428 = vmatpush3.bf16.xpose.msk.msra.mxu1 %vm8572_vm1, %v6426_v43  ;;  %1999 = vrot.lane.b32.xlu1 %v8629_v50, %s7973_s13 }
 0x146   : > { %6431 = vmatprep.subr.msk.bf16.mxu1 %vm8572_vm1, %v6429_v61  ;;  %v6435_v17 = vpack.c.bf16 %v1007_v7, %v1002_v42  ;;  %v6175_v13 = vpop.f32.mrb[24].mxu1  ;;  %v6231_v35 = vpop.f32.mrb[24].mxu0  ;;  %v8658_v45 = vpack.i.bf16 %v1007_v7, %v1002_v42  ;;  %v8666_v41 = vpack.i.bf16 %v8637_v34, %v8647_v51  ;;  %v8674_v7 = vadd.f32 %v8375_v24, %v8441_v55 }
 0x147   : > { %v1017_v36 = vadd.f32 %v6175_v13, %v8380_v25  ;;  %v1011_v33 = vpop.f32.mrb[25].mxu1  ;;  %v8662_v40 = vadd.f32 %v6231_v35, %v8550_v57  ;;  %v1179_v39 = vpop.f32.mrb[25].mxu0 }
 0x148   : > { %12002 = vst [vmem:[#allocation19_spill] sm:$0xff] %v8658_v45  ;;  %12003 = vst [vmem:[#allocation20_spill] sm:$0xff] %v8666_v41  ;;  %6901 = vrot.lane.b32.xlu0 %v8456_v62, %s7975_s18  ;;  %v1012_v61 = vadd.f32 %v8380_v25, %v1011_v33  ;;  %v8678_v42 = vadd.f32 %v8550_v57, %v1179_v39  ;;  %v12007_v33 = vpack.c.bf16 %v8424_v47, %v8430_v49 }
 0x149   : > { %2865 = vrot.lane.b32.xlu1 %v8629_v50, %s7974_s17 }
 0x14a   : > { %v6441_v13 = vpack.c.bf16 %v1017_v36, %v1012_v61  ;;  %v6178_v35 = vpop.f32.mrb[26].mxu1  ;;  %v8682_v41 = vpop.f32.mrb[26].mxu0  ;;  %v8684_v43 = vpack.i.bf16 %v1017_v36, %v1012_v61  ;;  %v8691_v24 = vpack.i.bf16 %v8662_v40, %v8678_v42 }
 0x14b   : > { %12004 = vst [vmem:[#allocation21_spill] sm:$0xff] %v8682_v41  ;;  %v1027_v45 = vadd.f32 %v6178_v35, %v8380_v25  ;;  %v1021_v60 = vpop.f32.mrb[27].mxu1  ;;  %v8687_v20 = vpop.f32.mrb[27].mxu0 }
 0x14c   : > { %12005 = vst [vmem:[#allocation22_spill] sm:$0xff] %v8687_v20  ;;  %12006 = vst [vmem:[#allocation23_spill] sm:$0xff] %v8691_v24  ;;  %3701 = vrot.lane.b32.xlu0 %v8674_v7, %s7975_s18  ;;  %v1022_v55 = vadd.f32 %v8380_v25, %v1021_v60 }
 0x14d   : > { %6434 = vmatpush3.bf16.xpose.msk.msra.mxu1 %vm8572_vm1, %v12007_v33  ;;  %3699 = vrot.lane.b32.xlu1 %v8629_v50, %s7975_s18 }
 0x14e   : > { %6437 = vmatprep.subr.msk.bf16.mxu1 %vm8572_vm1, %v6435_v17  ;;  %v6447_v36 = vpack.c.bf16 %v1027_v45, %v1022_v55  ;;  %v6181_v39 = vpop.f32.mrb[28].mxu1  ;;  %v8705_v61 = vpop.f32.mrb[28].mxu0  ;;  %v8707_v35 = vpack.i.bf16 %v1027_v45, %v1022_v55 }
 0x14f   : > { %v1037_v60 = vadd.f32 %v6181_v39, %v8380_v25  ;;  %v1031_v20 = vpop.f32.mrb[29].mxu1  ;;  %v8710_v41 = vpop.f32.mrb[29].mxu0 }
 0x150   : > { %12008 = vst [vmem:[#allocation24_spill] sm:$0xff] %v8710_v41  ;;  %6911 = vrot.lane.b32.xlu0 %v8481_v9, %s7974_s17  ;;  %v1032_v47 = vadd.f32 %v8380_v25, %v1031_v20  ;;  %v12011_v20 = vpack.c.bf16 %v8444_v56, %v8450_v58 }
 0x151   : > { %6876 = vrot.lane.b32.xlu1 %v8436_v53, %s7973_s13 }
 0x152   : > { %v6453_v49 = vpack.c.bf16 %v1037_v60, %v1032_v47  ;;  %v6184_v17 = vpop.f32.mrb[30].mxu1  ;;  %v8717_v33 = vpop.f32.mrb[30].mxu0 }
 0x153   : > { %12009 = vst [vmem:[#allocation25_spill] sm:$0xff] %v8717_v33  ;;  %v8720_v45 = vadd.f32 %v6184_v17, %v8380_v25  ;;  %v1041_v55 = vpop.f32.mrb[31].mxu1  ;;  %v8722_v39 = vpop.f32.mrb[31].mxu0  ;;  %v8739_v33 = vpack.i.bf16 %v1037_v60, %v1032_v47  ;;  %v12012_v47 = vpack.c.bf16 %v8462_v1, %v8475_v5 }
 0x154   : > { %12010 = vst [vmem:[#allocation26_spill] sm:$0xff] %v8722_v39  ;;  %6916 = vrot.lane.b32.xlu0 %v8481_v9, %s7975_s18  ;;  %v1042_v41 = vadd.f32 %v8380_v25, %v1041_v55  ;;  %v6479_v39 = vpack.c.bf16 %v8637_v34, %v8647_v51 }
 0x155   : > { %6440 = vmatpush3.bf16.xpose.msk.msra.mxu1 %vm8572_vm1, %v12011_v20  ;;  %1997 = vrot.lane.b32.xlu1 %v8578_v23, %s7973_s13  ;;  %v12013_v20 = vpack.c.bf16 %v8560_v11, %v8568_v18  ;;  %v12014_v11 = vpack.c.bf16 %v8588_v8, %v8598_v16  ;;  %v12015_v8 = vpack.c.bf16 %v8487_v12, %v8497_v15 }
 0x156   : > { %6443 = vmatprep.subr.msk.bf16.mxu1 %vm8572_vm1, %v6441_v13  ;;  %v6459_v53 = vpack.c.bf16 %v8720_v45, %v1042_v41  ;;  %v6243_v17 = vpop.f32.mrb[32].mxu0  ;;  %v12016_v16 = vpack.c.bf16 %v8615_v30, %v8625_v6  ;;  %v6483_v12 = vpack.c.bf16 %v8662_v40, %v8678_v42  ;;  %v12017_v40 = vpack.c.bf16 %v8509_v22, %v8519_v28 }
 0x157   : > { %v8742_v25 = vadd.f32 %v6243_v17, %v8550_v57  ;;  %v1219_v56 = vpop.f32.mrb[33].mxu0 }
 0x158   : > { %3705 = vrot.lane.b32.xlu0 %v8465_v3, %s7975_s18  ;;  %v8747_v58 = vadd.f32 %v8550_v57, %v1219_v56 }
 0x159   : > { %2863 = vrot.lane.b32.xlu1 %v8578_v23, %s7974_s17 }
 0x15a   : > { %v6465_v13 = vpack.c.bf16 %v8742_v25, %v8747_v58  ;;  %v6246_v55 = vpop.f32.mrb[34].mxu0 }
 0x15b   : > { %v8754_v51 = vadd.f32 %v6246_v55, %v8550_v57  ;;  %v1229_v34 = vpop.f32.mrb[35].mxu0  ;;  %v8791_v55 = vpack.i.bf16 %v8720_v45, %v1042_v41 }
 0x15c   : > { %6926 = vrot.lane.b32.xlu0 %v8503_v19, %s7974_s17  ;;  %6466 = vmatprep.subr.bf16.mxu0 %v6465_v13  ;;  %v8759_v60 = vadd.f32 %v8550_v57, %v1229_v34 }
 0x15d   : > { %6446 = vmatpush3.bf16.xpose.msk.msra.mxu1 %vm8572_vm1, %v12012_v47  ;;  %2003 = vrot.lane.b32.xlu1 %v8439_v54, %s7973_s13 }
 0x15e   : > { %6449 = vmatprep.subr.msk.bf16.mxu1 %vm8572_vm1, %v6447_v36  ;;  %6468 = vmatpush3.bf16.msra.mxu0 %v12013_v20  ;;  %v6469_v17 = vpack.c.bf16 %v8754_v51, %v8759_v60  ;;  %v6249_v56 = vpop.f32.mrb[36].mxu0 }
 0x15f   : > { %v8776_v13 = vadd.f32 %v6249_v56, %v8550_v57  ;;  %v1239_v1 = vpop.f32.mrb[37].mxu0 }
 0x160   : > { %6931 = vrot.lane.b32.xlu0 %v8503_v19, %s7975_s18  ;;  %6470 = vmatprep.subr.bf16.mxu0 %v6469_v17  ;;  %v8781_v5 = vadd.f32 %v8550_v57, %v1239_v1 }
 0x161   : > { %2869 = vrot.lane.b32.xlu1 %v8439_v54, %s7974_s17 }
 0x162   : > { %6472 = vmatpush3.bf16.msra.mxu0 %v12014_v11  ;;  %v6473_v18 = vpack.c.bf16 %v8776_v13, %v8781_v5  ;;  %v6252_v36 = vpop.f32.mrb[38].mxu0 }
 0x163   : > { %v8794_v34 = vadd.f32 %v6252_v36, %v8550_v57  ;;  %v1249_v47 = vpop.f32.mrb[39].mxu0 }
 0x164   : > { %3709 = vrot.lane.b32.xlu0 %v8490_v14, %s7975_s18  ;;  %6474 = vmatprep.subr.bf16.mxu0 %v6473_v18  ;;  %v8799_v20 = vadd.f32 %v8550_v57, %v1249_v47 }
 0x165   : > { %6452 = vmatpush3.bf16.xpose.msk.msra.mxu1 %vm8572_vm1, %v12015_v8  ;;  %3703 = vrot.lane.b32.xlu1 %v8439_v54, %s7975_s18  ;;  %v12029_v8 = vld [vmem:[#allocation15_spill] sm:$0xff] }
 0x166   : > { %6455 = vmatprep.subr.msk.bf16.mxu1 %vm8572_vm1, %v6453_v49  ;;  %6476 = vmatpush3.bf16.msra.mxu0 %v12016_v16  ;;  %v6477_v41 = vpack.c.bf16 %v8794_v34, %v8799_v20  ;;  %v6255_v45 = vpop.f32.mrb[40].mxu0 }
 0x167   : > { %v8818_v15 = vadd.f32 %v6255_v45, %v8550_v57  ;;  %v1259_v17 = vpop.f32.mrb[41].mxu0 }
 0x168   : > { %6941 = vrot.lane.b32.xlu0 %v8529_v37, %s7974_s17  ;;  %6478 = vmatprep.subr.bf16.mxu0 %v6477_v41  ;;  %v8823_v49 = vadd.f32 %v8550_v57, %v1259_v17  ;;  %v12030_v41 = vld [vmem:[#allocation20_spill] sm:$0xff] }
 0x169   : > { %6891 = vrot.lane.b32.xlu1 %v8456_v62, %s7973_s13  ;;  %v12018_v62 = vpack.c.bf16 %v8535_v48, %v8543_v52 }
 0x16a   : > { %6480 = vmatpush3.bf16.msra.mxu0 %v6479_v39  ;;  %v6481_v30 = vpack.c.bf16 %v8818_v15, %v8823_v49 }
 0x16c   : > { %6946 = vrot.lane.b32.xlu0 %v8529_v37, %s7975_s18  ;;  %6482 = vmatprep.subr.bf16.mxu0 %v6481_v30 }
 0x16d   : > { %6458 = vmatpush3.bf16.xpose.msk.msra.mxu1 %vm8572_vm1, %v12017_v40  ;;  %2001 = vrot.lane.b32.xlu1 %v8674_v7, %s7973_s13 }
 0x16e   : > { %6461 = vmatprep.subr.msk.bf16.mxu1 %vm8572_vm1, %v6459_v53  ;;  %6484 = vmatpush3.bf16.msra.mxu0 %v6483_v12  ;;  %v12026_v53 = vld [vmem:[#allocation19_spill] sm:$0xff] }
 0x170   : > { %3713 = vrot.lane.b32.xlu0 %v8512_v26, %s7975_s18 }
 0x171   : > { %2867 = vrot.lane.b32.xlu1 %v8674_v7, %s7974_s17 }
 0x174   : > { %6956 = vrot.lane.b32.xlu0 %v8556_v0, %s7974_s17 }
 0x175   : > { %6464 = vmatpush3.bf16.xpose.msk.msra.mxu1 %vm8572_vm1, %v12018_v62  ;;  %2007 = vrot.lane.b32.xlu1 %v8459_v63, %s7973_s13 }
 0x178   : > { %6961 = vrot.lane.b32.xlu0 %v8556_v0, %s7975_s18 }
 0x179   : > { %2873 = vrot.lane.b32.xlu1 %v8459_v63, %s7974_s17 }
 0x17c   : > { %3717 = vrot.lane.b32.xlu0 %v8538_v38, %s7975_s18  ;;  %5474 = vmatmul.mubr.msk.f32.vlgmr.msra.gmra.mrb[32].mxu1 %vm1298_vm0, %v8389_v31 }
 0x17d   : > { %3707 = vrot.lane.b32.xlu1 %v8459_v63, %s7975_s18  ;;  %5475 = vmatprep.mubr.msk.f32.mxu1 %vm1298_vm0, %v8383_v27 }
 0x180   : > { %6966 = vrot.lane.b32.xlu0 %v8580_v44, %s7973_s13  ;;  %5476 = vmatmul.mubr.msk.f32.gmra.mrb[34].mxu1 %vm1298_vm0, %v8383_v27 }
 0x181   : > { %6906 = vrot.lane.b32.xlu1 %v8481_v9, %s7973_s13  ;;  %5477 = vmatprep.mubr.msk.f32.mxu1 %vm1298_vm0, %v8523_v29 }
 0x184   : > { %6971 = vrot.lane.b32.xlu0 %v8580_v44, %s7974_s17  ;;  %5478 = vmatmul.mubr.msk.f32.gmra.mrb[36].mxu1 %vm1298_vm0, %v8523_v29 }
 0x185   : > { %2005 = vrot.lane.b32.xlu1 %v8465_v3, %s7973_s13  ;;  %5479 = vmatprep.mubr.msk.f32.mxu1 %vm1298_vm0, %v8470_v4 }
 0x188   : > { %6976 = vrot.lane.b32.xlu0 %v8580_v44, %s7975_s18  ;;  %5480 = vmatmul.mubr.msk.f32.gmra.mrb[38].mxu1 %vm1298_vm0, %v8470_v4  ;;  %v12022_v44 = vld [vmem:[#allocation14_spill] sm:$0xff] }
 0x189   : > { %2871 = vrot.lane.b32.xlu1 %v8465_v3, %s7974_s17  ;;  %5481 = vmatprep.mubr.msk.f32.mxu1 %vm1298_vm0, %v8578_v23 }
 0x18a   : > { %v8889_v27 = vpop.permute.xlu1 %1991 }
 0x18c   : > { %6981 = vrot.lane.b32.xlu0 %v8585_v2, %s7973_s13  ;;  %5482 = vmatmul.mubr.msk.f32.gmra.mrb[40].mxu1 %vm1298_vm0, %v8578_v23 }
 0x18d   : > { %2011 = vrot.lane.b32.xlu1 %v8484_v10, %s7973_s13  ;;  %5483 = vmatprep.mubr.msk.f32.mxu1 %vm1298_vm0, %v8629_v50 }
 0x18e   : > { %v8899_v31 = vpop.permute.xlu0 %6846  ;;  %v8901_v4 = vpop.permute.xlu1 %2857 }
 0x190   : > { %6991 = vrot.lane.b32.xlu0 %v8607_v32, %s7974_s17  ;;  %5484 = vmatmul.mubr.msk.f32.gmra.mrb[42].mxu1 %vm1298_vm0, %v8629_v50  ;;  %v8975_v50 = vpop.f32.mrb[42].mxu0 }
 0x191   : > { %2877 = vrot.lane.b32.xlu1 %v8484_v10, %s7974_s17  ;;  %5485 = vmatprep.mubr.msk.f32.mxu1 %vm1298_vm0, %v8674_v7 }
 0x192   : > { %v8911_v9 = vpop.permute.xlu0 %6851  ;;  %v8913_v22 = vpop.permute.xlu1 %3691 }
 0x193   : > { %12019 = vst [vmem:[#allocation27_spill] sm:$0xff] %v8913_v22 }
 0x194   : > { %6996 = vrot.lane.b32.xlu0 %v8607_v32, %s7975_s18  ;;  %5486 = vmatmul.mubr.msk.f32.gmra.mrb[44].mxu1 %vm1298_vm0, %v8674_v7  ;;  %v12025_v7 = vld [vmem:[#allocation18_spill] sm:$0xff] }
 0x195   : > { %3711 = vrot.lane.b32.xlu1 %v8484_v10, %s7975_s18  ;;  %5487 = vmatprep.mubr.msk.f32.mxu1 %vm1298_vm0, %v8439_v54 }
 0x196   : > { %v8923_v28 = vpop.permute.xlu0 %6856  ;;  %v8925_v29 = vpop.permute.xlu1 %1989 }
 0x198   : > { %7001 = vrot.lane.b32.xlu0 %v8611_v59, %s7973_s13  ;;  %5488 = vmatmul.mubr.msk.f32.gmra.mrb[46].mxu1 %vm1298_vm0, %v8439_v54 }
 0x199   : > { %6921 = vrot.lane.b32.xlu1 %v8503_v19, %s7973_s13  ;;  %5489 = vmatprep.mubr.msk.f32.mxu1 %vm1298_vm0, %v8465_v3 }
 0x19a   : > { %v8935_v48 = vpop.permute.xlu0 %3689  ;;  %v8937_v52 = vpop.permute.xlu1 %2855 }
 0x19b   : > { %12020 = vst [vmem:[#allocation28_spill] sm:$0xff] %v8935_v48 }
 0x19c   : > { %7006 = vrot.lane.b32.xlu0 %v8633_v46, %s7973_s13  ;;  %5490 = vmatmul.mubr.msk.f32.gmra.mrb[48].mxu1 %vm1298_vm0, %v8465_v3 }
 0x19d   : > { %2009 = vrot.lane.b32.xlu1 %v8490_v14, %s7973_s13  ;;  %5491 = vmatprep.mubr.msk.f32.mxu1 %vm1298_vm0, %v8459_v63 }
 0x19e   : > { %v8947_v54 = vpop.permute.xlu0 %6866  ;;  %v8949_v19 = vpop.permute.xlu1 %1995 }
 0x1a0   : > { %7011 = vrot.lane.b32.xlu0 %v8633_v46, %s7974_s17  ;;  %5492 = vmatmul.mubr.msk.f32.gmra.mrb[50].mxu1 %vm1298_vm0, %v8459_v63 }
 0x1a1   : > { %2875 = vrot.lane.b32.xlu1 %v8490_v14, %s7974_s17  ;;  %5493 = vmatprep.mubr.msk.f32.mxu1 %vm1298_vm0, %v8490_v14 }
 0x1a2   : > { %v8959_v3 = vpop.permute.xlu0 %6871  ;;  %v8961_v23 = vpop.permute.xlu1 %2861 }
 0x1a3   : > { %12021 = vst [vmem:[#allocation29_spill] sm:$0xff] %v8961_v23 }
 0x1a4   : > { %7016 = vrot.lane.b32.xlu0 %v8633_v46, %s7975_s18  ;;  %5494 = vmatmul.mubr.msk.f32.gmra.mrb[52].mxu1 %vm1298_vm0, %v8490_v14  ;;  %v8981_v46 = vpop.f32.mrb[43].mxu0 }
 0x1a5   : > { %2015 = vrot.lane.b32.xlu1 %v12022_v44, %s7973_s13  ;;  %5495 = vmatprep.mubr.msk.f32.mxu1 %vm1298_vm0, %v8484_v10  ;;  %v8991_v39 = vpop.f32.mrb[44].mxu0 }
 0x1a6   : > { %v8971_v63 = vpop.permute.xlu0 %3693  ;;  %v8973_v6 = vpop.permute.xlu1 %3695 }
 0x1a7   : > { %12023 = vst [vmem:[#allocation14_spill] sm:$0xff] %v8971_v63  ;;  %12024 = vst [vmem:[#allocation30_spill] sm:$0xff] %v8973_v6  ;;  %v12060_v6 = vld [vmem:[#allocation26_spill] sm:$0xff] }
 0x1a8   : > { %7021 = vrot.lane.b32.xlu0 %v12025_v7, %s7973_s13  ;;  %5496 = vmatmul.mubr.msk.f32.gmra.mrb[54].mxu1 %vm1298_vm0, %v8484_v10  ;;  %v8997_v10 = vpop.f32.mrb[45].mxu0  ;;  %v9101_v7 = vpack.i.bf16 %v8742_v25, %v8747_v58 }
 0x1a9   : > { %2881 = vrot.lane.b32.xlu1 %v12022_v44, %s7974_s17  ;;  %5497 = vmatprep.mubr.msk.f32.mxu1 %vm1298_vm0, %v8512_v26  ;;  %v9007_v11 = vpop.f32.mrb[46].mxu0 }
 0x1aa   : > { %v8987_v14 = vpop.permute.xlu0 %6881  ;;  %v8989_v42 = vpop.permute.xlu1 %6861  ;;  %12040 = vst [vmem:[#allocation40_spill] sm:$0xff] %v9101_v7 }
 0x1ab   : > { %v9013_v18 = vpop.f32.mrb[47].mxu0 }
 0x1ac   : > { %7026 = vrot.lane.b32.xlu0 %v12026_v53, %s7973_s13  ;;  %5498 = vmatmul.mubr.msk.f32.gmra.mrb[56].mxu1 %vm1298_vm0, %v8512_v26 }
 0x1ad   : > { %3715 = vrot.lane.b32.xlu1 %v12022_v44, %s7975_s18  ;;  %5499 = vmatprep.mubr.msk.f32.mxu1 %vm1298_vm0, %v12022_v44 }
 0x1ae   : > { %v9003_v56 = vpop.permute.xlu0 %6886  ;;  %v12151_v21 = vld [vmem:[#allocation30_spill] sm:$0xff] }
 0x1af   : > { %12027 = vst [vmem:[#allocation19_spill] sm:$0xff] %v9003_v56  ;;  %v9005_v1 = vpop.permute.xlu1 %1993 }
 0x1b0   : > { %7031 = vrot.lane.b32.xlu0 %v12026_v53, %s7974_s17  ;;  %5500 = vmatmul.mubr.msk.f32.gmra.mrb[58].mxu1 %vm1298_vm0, %v12022_v44 }
 0x1b1   : > { %6936 = vrot.lane.b32.xlu1 %v8529_v37, %s7973_s13  ;;  %5501 = vmatprep.mubr.msk.f32.mxu1 %vm1298_vm0, %v8538_v38 }
 0x1b2   : > { %v9019_v36 = vpop.permute.xlu0 %3697 }
 0x1b3   : > { %12028 = vst [vmem:[#allocation31_spill] sm:$0xff] %v9019_v36  ;;  %v9021_v47 = vpop.permute.xlu1 %2859 }
 0x1b4   : > { %7036 = vrot.lane.b32.xlu0 %v12026_v53, %s7975_s18  ;;  %5502 = vmatmul.mubr.msk.f32.gmra.mrb[60].mxu1 %vm1298_vm0, %v8538_v38 }
 0x1b5   : > { %2013 = vrot.lane.b32.xlu1 %v8512_v26, %s7973_s13  ;;  %5503 = vmatprep.mubr.msk.f32.mxu1 %vm1298_vm0, %v12029_v8 }
 0x1b6   : > { %v9031_v37 = vpop.permute.xlu0 %6896 }
 0x1b7   : > { %v9033_v16 = vpop.permute.xlu1 %1999 }
 0x1b8   : > { %7041 = vrot.lane.b32.xlu0 %v12030_v41, %s7973_s13  ;;  %5504 = vmatmul.mubr.msk.f32.gmra.mrb[62].mxu1 %vm1298_vm0, %v12029_v8 }
 0x1b9   : > { %2879 = vrot.lane.b32.xlu1 %v8512_v26, %s7974_s17  ;;  %5617 = vmatprep.mubr.msk.f32.mxu1 %vm1298_vm0, %v8925_v29 }
 0x1ba   : > { %v9043_v45 = vpop.permute.xlu0 %6901 }
 0x1bb   : > { %12031 = vst [vmem:[#allocation15_spill] sm:$0xff] %v9043_v45  ;;  %v9045_v12 = vpop.permute.xlu1 %2865 }
 0x1bc   : > { %12032 = vst [vmem:[#allocation32_spill] sm:$0xff] %v9045_v12  ;;  %7046 = vrot.lane.b32.xlu0 %v8684_v43, %s7973_s13  ;;  %v9361_v12 = vld [vmem:[%s9333_s28 + $0x18] sm:$0xff] }
 0x1bd   : > { %2019 = vrot.lane.b32.xlu1 %v12029_v8, %s7973_s13  ;;  %12086 = vst [vmem:[#allocation76_spill] sm:$0xff] %v9361_v12 }
 0x1be   : > { %v9051_v17 = vpop.permute.xlu0 %3701 }
 0x1bf   : > { %12033 = vst [vmem:[#allocation33_spill] sm:$0xff] %v9051_v17  ;;  %v9053_v30 = vpop.permute.xlu1 %3699  ;;  %v9181_v17 = vadd.f32 %v8705_v61, %v8550_v57  ;;  %v1280_v61 = vadd.f32 %v8550_v57, %v8997_v10  ;;  %v1295_v10 = vadd.f32 %v9007_v11, %v8550_v57 }
 0x1c0   : > { %12034 = vst [vmem:[#allocation34_spill] sm:$0xff] %v9053_v30  ;;  %7051 = vrot.lane.b32.xlu0 %v8684_v43, %s7974_s17  ;;  %v12059_v30 = vld [vmem:[#allocation25_spill] sm:$0xff] }
 0x1c1   : > { %2885 = vrot.lane.b32.xlu1 %v12029_v8, %s7974_s17  ;;  %v1215_v36 = vadd.f32 %v12059_v30, %v8550_v57 }
 0x1c2   : > { %v9059_v26 = vpop.permute.xlu0 %6911 }
 0x1c3   : > { %v9061_v40 = vpop.permute.xlu1 %6876 }
 0x1c4   : > { %7056 = vrot.lane.b32.xlu0 %v8684_v43, %s7975_s18 }
 0x1c5   : > { %3719 = vrot.lane.b32.xlu1 %v12029_v8, %s7975_s18 }
 0x1c6   : > { %v9067_v62 = vpop.permute.xlu0 %6916 }
 0x1c7   : > { %12035 = vst [vmem:[#allocation35_spill] sm:$0xff] %v9067_v62  ;;  %v9069_v44 = vpop.permute.xlu1 %1997 }
 0x1c8   : > { %7061 = vrot.lane.b32.xlu0 %v8691_v24, %s7973_s13 }
 0x1c9   : > { %6951 = vrot.lane.b32.xlu1 %v8556_v0, %s7973_s13 }
 0x1ca   : > { %v9075_v53 = vpop.permute.xlu0 %3705 }
 0x1cb   : > { %12036 = vst [vmem:[#allocation36_spill] sm:$0xff] %v9075_v53  ;;  %v9077_v41 = vpop.permute.xlu1 %2863 }
 0x1cc   : > { %12037 = vst [vmem:[#allocation37_spill] sm:$0xff] %v9077_v41  ;;  %7066 = vrot.lane.b32.xlu0 %v8707_v35, %s7973_s13 }
 0x1cd   : > { %2017 = vrot.lane.b32.xlu1 %v8538_v38, %s7973_s13 }
 0x1ce   : > { %v9083_v43 = vpop.permute.xlu0 %6926 }
 0x1cf   : > { %v9085_v8 = vpop.permute.xlu1 %2003 }
 0x1d0   : > { %7071 = vrot.lane.b32.xlu0 %v8707_v35, %s7974_s17 }
 0x1d1   : > { %2883 = vrot.lane.b32.xlu1 %v8538_v38, %s7974_s17 }
 0x1d2   : > { %v9091_v0 = vpop.permute.xlu0 %6931 }
 0x1d3   : > { %12038 = vst [vmem:[#allocation38_spill] sm:$0xff] %v9091_v0  ;;  %v9093_v24 = vpop.permute.xlu1 %2869 }
 0x1d4   : > { %12039 = vst [vmem:[#allocation39_spill] sm:$0xff] %v9093_v24  ;;  %7076 = vrot.lane.b32.xlu0 %v8707_v35, %s7975_s18 }
 0x1d5   : > { %6986 = vrot.lane.b32.xlu1 %v8607_v32, %s7973_s13  ;;  %v9121_v32 = vpack.i.bf16 %v8754_v51, %v8759_v60 }
 0x1d6   : > { %v9103_v59 = vpop.permute.xlu0 %3709 }
 0x1d7   : > { %12041 = vst [vmem:[#allocation41_spill] sm:$0xff] %v9103_v59  ;;  %v9105_v53 = vpop.permute.xlu1 %3703  ;;  %12043 = vst [vmem:[#allocation43_spill] sm:$0xff] %v9121_v32  ;;  %v9133_v59 = vpack.i.bf16 %v8776_v13, %v8781_v5  ;;  %v12049_v13 = vld [vmem:[#allocation21_spill] sm:$0xff] }
 0x1d8   : > { %12042 = vst [vmem:[#allocation42_spill] sm:$0xff] %v9105_v53  ;;  %7081 = vrot.lane.b32.xlu0 %v8739_v33, %s7973_s13  ;;  %v9153_v5 = vadd.f32 %v12049_v13, %v8550_v57  ;;  %v9173_v13 = vpack.i.bf16 %v8818_v15, %v8823_v49  ;;  %v1285_v15 = vadd.f32 %v8991_v39, %v8550_v57 }
 0x1d9   : > { %7131 = vrot.lane.b32.xlu1 %v9101_v7, %s7973_s13  ;;  %12045 = vst [vmem:[#allocation45_spill] sm:$0xff] %v9133_v59 }
 0x1da   : > { %v9111_v38 = vpop.permute.xlu0 %6941  ;;  %12051 = vst [vmem:[#allocation21_spill] sm:$0xff] %v9173_v13  ;;  %v9223_v30 = vpack.i.bf16 %v1285_v15, %v1280_v61 }
 0x1db   : > { %v9113_v35 = vpop.permute.xlu1 %6891 }
 0x1dc   : > { %7086 = vrot.lane.b32.xlu0 %v8739_v33, %s7974_s17  ;;  %12062 = vst [vmem:[#allocation26_spill] sm:$0xff] %v9223_v30 }
 0x1dd   : > { %7136 = vrot.lane.b32.xlu1 %v9101_v7, %s7974_s17 }
 0x1de   : > { %v9123_v25 = vpop.permute.xlu0 %6946 }
 0x1df   : > { %12044 = vst [vmem:[#allocation44_spill] sm:$0xff] %v9123_v25  ;;  %v9125_v58 = vpop.permute.xlu1 %2001 }
 0x1e0   : > { %7091 = vrot.lane.b32.xlu0 %v8739_v33, %s7975_s18  ;;  %v9145_v33 = vpack.i.bf16 %v8794_v34, %v8799_v20  ;;  %v9165_v34 = vadd.f32 %v8975_v50, %v8550_v57  ;;  %v9169_v20 = vadd.f32 %v8550_v57, %v8981_v46 }
 0x1e1   : > { %7141 = vrot.lane.b32.xlu1 %v9121_v32, %s7973_s13  ;;  %v12050_v32 = vld [vmem:[#allocation22_spill] sm:$0xff] }
 0x1e2   : > { %v9135_v53 = vpop.permute.xlu0 %3713  ;;  %12048 = vst [vmem:[#allocation48_spill] sm:$0xff] %v9145_v33  ;;  %v9201_v49 = vpack.i.bf16 %v9165_v34, %v9169_v20 }
 0x1e3   : > { %12046 = vst [vmem:[#allocation46_spill] sm:$0xff] %v9135_v53  ;;  %v9137_v7 = vpop.permute.xlu1 %2867  ;;  %v9157_v53 = vadd.f32 %v8550_v57, %v12050_v32 }
 0x1e4   : > { %12047 = vst [vmem:[#allocation47_spill] sm:$0xff] %v9137_v7  ;;  %7096 = vrot.lane.b32.xlu0 %v8791_v55, %s7973_s13  ;;  %12056 = vst [vmem:[#allocation50_spill] sm:$0xff] %v9201_v49 }
 0x1e5   : > { %7146 = vrot.lane.b32.xlu1 %v9133_v59, %s7973_s13  ;;  %v9191_v46 = vpack.i.bf16 %v9153_v5, %v9157_v53  ;;  %v6487_v62 = vpack.c.bf16 %v9153_v5, %v9157_v53 }
 0x1e6   : > { %v9147_v51 = vpop.permute.xlu0 %6956 }
 0x1e7   : > { %v9149_v60 = vpop.permute.xlu1 %2007 }
 0x1e8   : > { %7101 = vrot.lane.b32.xlu0 %v8791_v55, %s7974_s17 }
 0x1e9   : > { %7151 = vrot.lane.b32.xlu1 %v9145_v33, %s7973_s13  ;;  %v12054_v33 = vld [vmem:[#allocation24_spill] sm:$0xff] }
 0x1ea   : > { %v9175_v32 = vpop.permute.xlu0 %6961  ;;  %v9185_v50 = vadd.f32 %v8550_v57, %v12054_v33  ;;  %12055 = vst [vmem:[#allocation24_spill] sm:$0xff] %v9191_v46 }
 0x1eb   : > { %12052 = vst [vmem:[#allocation22_spill] sm:$0xff] %v9175_v32  ;;  %v9177_v59 = vpop.permute.xlu1 %2873 }
 0x1ec   : > { %12053 = vst [vmem:[#allocation49_spill] sm:$0xff] %v9177_v59  ;;  %7106 = vrot.lane.b32.xlu0 %v8791_v55, %s7975_s18  ;;  %v9215_v39 = vpack.i.bf16 %v9181_v17, %v9185_v50  ;;  %v6491_v7 = vpack.c.bf16 %v9181_v17, %v9185_v50 }
 0x1ed   : > { %7156 = vrot.lane.b32.xlu1 %v9173_v13, %s7973_s13  ;;  %v1210_v13 = vadd.f32 %v8550_v57, %v12060_v6  ;;  %v6849_v6 = vunpack.i.h.bf16 %v8899_v31 }
 0x1ee   : > { %v9203_v33 = vpop.permute.xlu0 %3717  ;;  %12061 = vst [vmem:[#allocation25_spill] sm:$0xff] %v9215_v39 }
 0x1ef   : > { %12057 = vst [vmem:[#allocation51_spill] sm:$0xff] %v9203_v33  ;;  %v9205_v55 = vpop.permute.xlu1 %3707  ;;  %v1290_v33 = vadd.f32 %v8550_v57, %v9013_v18 }
 0x1f0   : > { %12058 = vst [vmem:[#allocation52_spill] sm:$0xff] %v9205_v55  ;;  %7111 = vrot.lane.b32.xlu0 %v9191_v46, %s7973_s13  ;;  %v6848_v55 = vunpack.i.l.bf16 %v8899_v31 }
 0x1f1   : > { %7161 = vrot.lane.b32.xlu1 %v9201_v49, %s7973_s13  ;;  %v9231_v49 = vpack.i.bf16 %v1215_v36, %v1210_v13  ;;  %v9235_v57 = vpack.i.bf16 %v1295_v10, %v1290_v33 }
 0x1f2   : > { %v6967_v46 = vpop.permute.xlu0 %6966  ;;  %v6500_v18 = vpack.c.bf16 %v6849_v6, %v6848_v55 }
 0x1f3   : > { %v6969_v63 = vunpack.i.h.bf16 %v6967_v46  ;;  %v6968_v22 = vunpack.i.l.bf16 %v6967_v46  ;;  %v9227_v48 = vpop.permute.xlu1 %6906  ;;  %12063 = vst [vmem:[#allocation53_spill] sm:$0xff] %v9231_v49  ;;  %12064 = vst [vmem:[#allocation54_spill] sm:$0xff] %v9235_v57 }
 0x1f4   : > { %7116 = vrot.lane.b32.xlu0 %v9215_v39, %s7973_s13 }
 0x1f5   : > { %v6497_v11 = vpack.c.bf16 %v6969_v63, %v6968_v22  ;;  %7166 = vrot.lane.b32.xlu1 %v9223_v30, %s7973_s13 }
 0x1f6   : > { %v9237_v32 = vpop.permute.xlu0 %6971 }
 0x1f7   : > { %6499 = vmatprep.subr.msk.bf16.mxu1 %vm8572_vm1, %v6497_v11  ;;  %v9241_v31 = vpop.permute.xlu1 %2005 }
 0x1f8   : > { %7121 = vrot.lane.b32.xlu0 %v9231_v49, %s7973_s13  ;;  %6502 = vmatpush3.bf16.xpose.msk.msra.mxu1 %vm8572_vm1, %v6500_v18 }
 0x1f9   : > { %7171 = vrot.lane.b32.xlu1 %v9235_v57, %s7973_s13 }
 0x1fa   : > { %v9249_v22 = vpop.permute.xlu0 %6976 }
 0x1fb   : > { %v9251_v63 = vpop.permute.xlu1 %2871 }
 0x1fc   : > { %12065 = vst [vmem:[#allocation55_spill] sm:$0xff] %v9251_v63  ;;  %7126 = vrot.lane.b32.xlu0 %v8585_v2, %s7974_s17 }
 0x1fe   : > { %v9255_v46 = vpop.permute.xlu0 %6981 }
 0x1ff   : > { %12066 = vst [vmem:[#allocation56_spill] sm:$0xff] %v9255_v46  ;;  %v9257_v55 = vpop.permute.xlu1 %2011 }
 0x202   : > { %v9259_v6 = vpop.permute.xlu0 %6991 }
 0x203   : > { %v9261_v11 = vpop.permute.xlu1 %2877 }
 0x204   : > { %12067 = vst [vmem:[#allocation57_spill] sm:$0xff] %v9261_v11 }
 0x206   : > { %v9263_v49 = vpop.permute.xlu0 %6996 }
 0x207   : > { %v9265_v18 = vpop.permute.xlu1 %3711 }
 0x208   : > { %12068 = vst [vmem:[#allocation58_spill] sm:$0xff] %v9265_v18 }
 0x20a   : > { %v9267_v57 = vpop.permute.xlu0 %7001 }
 0x20b   : > { %12069 = vst [vmem:[#allocation59_spill] sm:$0xff] %v9267_v57  ;;  %v9269_v39 = vpop.permute.xlu1 %6921  ;;  %v6485_v57 = vpack.c.bf16 %v9165_v34, %v9169_v20  ;;  %v6495_v20 = vpack.c.bf16 %v1215_v36, %v1210_v13 }
 0x20d   : > { %6486 = vmatprep.subr.bf16.mxu0 %v6485_v57 }
 0x20e   : > { %v7007_v30 = vpop.permute.xlu0 %7006  ;;  %6488 = vmatpush3.bf16.msra.mxu0 %v6487_v62 }
 0x20f   : > { %v9271_v25 = vpop.permute.xlu1 %2009 }
 0x212   : > { %v9273_v2 = vpop.permute.xlu0 %7011 }
 0x213   : > { %v9275_v46 = vpop.permute.xlu1 %2875 }
 0x214   : > { %12070 = vst [vmem:[#allocation60_spill] sm:$0xff] %v9275_v46  ;;  %v6489_v46 = vpack.c.bf16 %v1285_v15, %v1280_v61 }
 0x216   : > { %v9277_v0 = vpop.permute.xlu0 %7016  ;;  %6490 = vmatprep.subr.bf16.mxu0 %v6489_v46  ;;  %v6863_v46 = vunpack.i.l.bf16 %v8989_v42 }
 0x217   : > { %v9279_v59 = vpop.permute.xlu1 %2015  ;;  %6492 = vmatpush3.bf16.msra.mxu0 %v6491_v7 }
 0x21a   : > { %v9281_v11 = vpop.permute.xlu0 %7021 }
 0x21b   : > { %12071 = vst [vmem:[#allocation61_spill] sm:$0xff] %v9281_v11  ;;  %v9283_v63 = vpop.permute.xlu1 %2881 }
 0x21c   : > { %12072 = vst [vmem:[#allocation62_spill] sm:$0xff] %v9283_v63  ;;  %v6493_v63 = vpack.c.bf16 %v1295_v10, %v1290_v33 }
 0x21e   : > { %v7027_v18 = vpop.permute.xlu0 %7026  ;;  %6494 = vmatprep.subr.bf16.mxu0 %v6493_v63  ;;  %v6864_v63 = vunpack.i.h.bf16 %v8989_v42  ;;  %v9340_v42 = vld [vmem:[%s9333_s28] sm:$0xff] }
 0x21f   : > { %v9289_v24 = vpop.permute.xlu1 %3715  ;;  %6496 = vmatpush3.bf16.msra.mxu0 %v6495_v20  ;;  %12082 = vst [vmem:[#allocation72_spill] sm:$0xff] %v9340_v42 }
 0x220   : > { %12073 = vst [vmem:[#allocation63_spill] sm:$0xff] %v9289_v24  ;;  %v7008_v24 = vunpack.i.l.bf16 %v7007_v30 }
 0x222   : > { %v9293_v45 = vpop.permute.xlu0 %7031 }
 0x223   : > { %v9295_v11 = vpop.permute.xlu1 %6936 }
 0x226   : > { %v9297_v34 = vpop.permute.xlu0 %7036 }
 0x227   : > { %12074 = vst [vmem:[#allocation64_spill] sm:$0xff] %v9297_v34  ;;  %v9299_v53 = vpop.permute.xlu1 %2013 }
 0x22a   : > { %v9301_v62 = vpop.permute.xlu0 %7041 }
 0x22b   : > { %12075 = vst [vmem:[#allocation65_spill] sm:$0xff] %v9301_v62  ;;  %v9303_v5 = vpop.permute.xlu1 %2879  ;;  %v7009_v62 = vunpack.i.h.bf16 %v7007_v30  ;;  %v9345_v30 = vld [vmem:[%s9333_s28 + $0x8] sm:$0xff] }
 0x22c   : > { %12076 = vst [vmem:[#allocation66_spill] sm:$0xff] %v9303_v5 }
 0x22e   : > { %v9307_v50 = vpop.permute.xlu0 %7046 }
 0x22f   : > { %v9305_v17 = vpop.permute.xlu1 %2019 }
 0x232   : > { %v9311_v7 = vpop.permute.xlu0 %7051 }
 0x233   : > { %v9309_v15 = vpop.permute.xlu1 %2885 }
 0x234   : > { %12077 = vst [vmem:[#allocation67_spill] sm:$0xff] %v9309_v15 }
 0x236   : > { %v9317_v13 = vpop.permute.xlu0 %7056 }
 0x237   : > { %v9313_v61 = vpop.permute.xlu1 %3719  ;;  %12079 = vst [vmem:[#allocation69_spill] sm:$0xff] %v9317_v13  ;;  %v6509_v13 = vpack.c.bf16 %v7009_v62, %v7008_v24  ;;  %v7029_v62 = vunpack.i.h.bf16 %v7027_v18 }
 0x238   : > { %12078 = vst [vmem:[#allocation68_spill] sm:$0xff] %v9313_v61 }
 0x23a   : > { %v9321_v10 = vpop.permute.xlu0 %7061 }
 0x23b   : > { %v9315_v36 = vpop.permute.xlu1 %6951  ;;  %12080 = vst [vmem:[#allocation70_spill] sm:$0xff] %v9321_v10 }
 0x23e   : > { %v9328_v5 = vpop.permute.xlu0 %7066 }
 0x23f   : > { %v9319_v33 = vpop.permute.xlu1 %2017 }
 0x243   : > { %v9323_v57 = vpop.permute.xlu1 %2883 }
 0x244   : > { %12081 = vst [vmem:[#allocation71_spill] sm:$0xff] %v9323_v57  ;;  %v6506_v57 = vpack.c.bf16 %v6864_v63, %v6863_v46  ;;  %v7028_v63 = vunpack.i.l.bf16 %v7027_v18 }
 0x246   : > { %v6515_v56 = vpack.c.bf16 %v7029_v62, %v7028_v63  ;;  %v6893_v62 = vunpack.i.l.bf16 %v9113_v35 }
 0x247   : > { %v6987_v20 = vpop.permute.xlu1 %6986 }
 0x248   : > { %v6989_v15 = vunpack.i.h.bf16 %v6987_v20  ;;  %v6988_v61 = vunpack.i.l.bf16 %v6987_v20  ;;  %v6879_v20 = vunpack.i.h.bf16 %v9061_v40 }
 0x24a   : > { %v6503_v10 = vpack.c.bf16 %v6989_v15, %v6988_v61  ;;  %v6878_v15 = vunpack.i.l.bf16 %v9061_v40  ;;  %v9349_v61 = vpop.permute.xlu0 %7071 }
 0x24c   : > { %6505 = vmatprep.subr.msk.bf16.mxu1 %vm8572_vm1, %v6503_v10  ;;  %v6512_v41 = vpack.c.bf16 %v6879_v20, %v6878_v15  ;;  %v9376_v20 = vld [vmem:[%s9333_s28 + $0x20] sm:$0xff]  ;;  %v9381_v15 = vld [vmem:[%s9333_s28 + $0x28] sm:$0xff] }
 0x24d   : > { %6508 = vmatpush3.bf16.xpose.msk.msra.mxu1 %vm8572_vm1, %v6506_v57  ;;  %12089 = vst [vmem:[#allocation79_spill] sm:$0xff] %v9376_v20  ;;  %12090 = vst [vmem:[#allocation80_spill] sm:$0xff] %v9381_v15 }
 0x24e   : > { %6511 = vmatprep.subr.msk.bf16.mxu1 %vm8572_vm1, %v6509_v13  ;;  %v9358_v13 = vld [vmem:[%s9333_s28 + $0x10] sm:$0xff] }
 0x24f   : > { %v1509_v24 = vpop.f32.mrb[32].mxu1  ;;  %12085 = vst [vmem:[#allocation75_spill] sm:$0xff] %v9358_v13 }
 0x250   : > { %v9352_v10 = vadd.f32 %v1509_v24, %v9340_v42  ;;  %v1511_v57 = vpop.f32.mrb[33].mxu1  ;;  %v9368_v42 = vpop.permute.xlu0 %7076 }
 0x251   : > { %v9355_v46 = vadd.f32 %v1511_v57, %v9345_v30 }
 0x252   : > { %12083 = vst [vmem:[#allocation73_spill] sm:$0xff] %v9352_v10 }
 0x253   : > { %12084 = vst [vmem:[#allocation74_spill] sm:$0xff] %v9355_v46  ;;  %v1604_v40 = vmax.f32 %v9352_v10, %v9355_v46  ;;  %v1515_v34 = vpop.f32.mrb[34].mxu1 }
 0x254   : > { %v9366_v18 = vadd.f32 %v1515_v34, %v9358_v13  ;;  %v1517_v24 = vpop.f32.mrb[35].mxu1  ;;  %v6894_v34 = vunpack.i.h.bf16 %v9113_v35  ;;  %v9399_v35 = vld [vmem:[%s9333_s28 + $0x38] sm:$0xff] }
 0x255   : > { %v9371_v23 = vadd.f32 %v1517_v24, %v9361_v12  ;;  %6514 = vmatpush3.bf16.xpose.msk.msra.mxu1 %vm8572_vm1, %v6512_v41  ;;  %1605 = vmax.xlane.f32.xlu0 %v1604_v40  ;;  %v7049_v24 = vunpack.i.h.bf16 %v9307_v50  ;;  %v7048_v41 = vunpack.i.l.bf16 %v9307_v50  ;;  %v9396_v12 = vld [vmem:[%s9333_s28 + $0x30] sm:$0xff]  ;;  %12094 = vst [vmem:[#allocation84_spill] sm:$0xff] %v9399_v35 }
 0x256   : > { %12087 = vst [vmem:[#allocation77_spill] sm:$0xff] %v9366_v18  ;;  %6517 = vmatprep.subr.msk.bf16.mxu1 %vm8572_vm1, %v6515_v56  ;;  %12093 = vst [vmem:[#allocation83_spill] sm:$0xff] %v9396_v12 }
 0x257   : > { %12088 = vst [vmem:[#allocation78_spill] sm:$0xff] %v9371_v23  ;;  %v1607_v63 = vmax.f32 %v9366_v18, %v9371_v23  ;;  %v1521_v57 = vpop.f32.mrb[36].mxu1  ;;  %v6518_v23 = vpack.c.bf16 %v6894_v34, %v6893_v62  ;;  %v7082_v18 = vpop.permute.xlu0 %7081  ;;  %v6521_v13 = vpack.c.bf16 %v7049_v24, %v7048_v41  ;;  %v9412_v34 = vld [vmem:[%s9333_s28 + $0x40] sm:$0xff]  ;;  %v9417_v62 = vld [vmem:[%s9333_s28 + $0x48] sm:$0xff]  ;;  %v6908_v24 = vunpack.i.l.bf16 %v9227_v48 }
 0x258   : > { %v9390_v40 = vadd.f32 %v1521_v57, %v9376_v20  ;;  %v1523_v46 = vpop.f32.mrb[37].mxu1  ;;  %12097 = vst [vmem:[#allocation87_spill] sm:$0xff] %v9412_v34 }
 0x259   : > { %v9393_v56 = vadd.f32 %v1523_v46, %v9381_v15  ;;  %1608 = vmax.xlane.f32.xlu1 %v1607_v63  ;;  %v6909_v63 = vunpack.i.h.bf16 %v9227_v48  ;;  %v9434_v48 = vld [vmem:[%s9333_s28 + $0x50] sm:$0xff] }
 0x25a   : > { %12091 = vst [vmem:[#allocation81_spill] sm:$0xff] %v9390_v40  ;;  %12100 = vst [vmem:[#allocation90_spill] sm:$0xff] %v9434_v48 }
 0x25b   : > { %12092 = vst [vmem:[#allocation82_spill] sm:$0xff] %v9393_v56  ;;  %v1610_v10 = vmax.f32 %v9390_v40, %v9393_v56  ;;  %v1527_v50 = vpop.f32.mrb[38].mxu1 }
 0x25c   : > { %v9404_v57 = vadd.f32 %v1527_v50, %v9396_v12  ;;  %v1529_v20 = vpop.f32.mrb[39].mxu1 }
 0x25d   : > { %v9407_v46 = vadd.f32 %v1529_v20, %v9399_v35  ;;  %6520 = vmatpush3.bf16.xpose.msk.msra.mxu1 %vm8572_vm1, %v6518_v23  ;;  %1611 = vmax.xlane.f32.xlu0 %v1610_v10  ;;  %v7069_v23 = vunpack.i.h.bf16 %v9328_v5  ;;  %v7068_v10 = vunpack.i.l.bf16 %v9328_v5 }
 0x25e   : > { %12095 = vst [vmem:[#allocation85_spill] sm:$0xff] %v9404_v57  ;;  %6523 = vmatprep.subr.msk.bf16.mxu1 %vm8572_vm1, %v6521_v13  ;;  %v9428_v13 = vpop.permute.xlu0 %7086 }
 0x25f   : > { %12096 = vst [vmem:[#allocation86_spill] sm:$0xff] %v9407_v46  ;;  %v1613_v20 = vmax.f32 %v9404_v57, %v9407_v46  ;;  %v1533_v41 = vpop.f32.mrb[40].mxu1  ;;  %v9437_v46 = vld [vmem:[%s9333_s28 + $0x58] sm:$0xff]  ;;  %v6524_v57 = vpack.c.bf16 %v6909_v63, %v6908_v24  ;;  %v7084_v63 = vunpack.i.h.bf16 %v7082_v18  ;;  %v7083_v24 = vunpack.i.l.bf16 %v7082_v18 }
 0x260   : > { %v9426_v50 = vadd.f32 %v1533_v41, %v9412_v34  ;;  %v1535_v56 = vpop.f32.mrb[41].mxu1  ;;  %12101 = vst [vmem:[#allocation91_spill] sm:$0xff] %v9437_v46  ;;  %v6527_v41 = vpack.c.bf16 %v7069_v23, %v7068_v10 }
 0x261   : > { %v9431_v35 = vadd.f32 %v1535_v56, %v9417_v62  ;;  %1614 = vmax.xlane.f32.xlu0 %v1613_v20  ;;  %v9450_v56 = vld [vmem:[%s9333_s28 + $0x60] sm:$0xff]  ;;  %v9455_v20 = vld [vmem:[%s9333_s28 + $0x68] sm:$0xff] }
 0x262   : > { %12098 = vst [vmem:[#allocation88_spill] sm:$0xff] %v9426_v50  ;;  %12104 = vst [vmem:[#allocation94_spill] sm:$0xff] %v9450_v56  ;;  %v9459_v23 = vpop.permute.xlu0 %7091 }
 0x263   : > { %12099 = vst [vmem:[#allocation89_spill] sm:$0xff] %v9431_v35  ;;  %v1616_v5 = vmax.f32 %v9426_v50, %v9431_v35  ;;  %v1539_v40 = vpop.f32.mrb[42].mxu1 }
 0x264   : > { %v9442_v34 = vadd.f32 %v1539_v40, %v9434_v48  ;;  %v1541_v12 = vpop.f32.mrb[43].mxu1  ;;  %v6924_v40 = vunpack.i.h.bf16 %v9269_v39 }
 0x265   : > { %v9445_v15 = vadd.f32 %v1541_v12, %v9437_v46  ;;  %6526 = vmatpush3.bf16.xpose.msk.msra.mxu1 %vm8572_vm1, %v6524_v57  ;;  %1617 = vmax.xlane.f32.xlu1 %v1616_v5  ;;  %v6923_v12 = vunpack.i.l.bf16 %v9269_v39  ;;  %v6533_v46 = vpack.c.bf16 %v7084_v63, %v7083_v24  ;;  %v9473_v39 = vld [vmem:[%s9333_s28 + $0x78] sm:$0xff]  ;;  %v9486_v63 = vld [vmem:[%s9333_s28 + $0x80] sm:$0xff] }
 0x266   : > { %12102 = vst [vmem:[#allocation92_spill] sm:$0xff] %v9442_v34  ;;  %6529 = vmatprep.subr.msk.bf16.mxu1 %vm8572_vm1, %v6527_v41  ;;  %v9470_v41 = vld [vmem:[%s9333_s28 + $0x70] sm:$0xff]  ;;  %12108 = vst [vmem:[#allocation98_spill] sm:$0xff] %v9473_v39  ;;  %v7097_v48 = vpop.permute.xlu0 %7096 }
 0x267   : > { %12103 = vst [vmem:[#allocation93_spill] sm:$0xff] %v9445_v15  ;;  %v1619_v57 = vmax.f32 %v9442_v34, %v9445_v15  ;;  %v1545_v10 = vpop.f32.mrb[44].mxu1  ;;  %12107 = vst [vmem:[#allocation97_spill] sm:$0xff] %v9470_v41  ;;  %v6530_v50 = vpack.c.bf16 %v6924_v40, %v6923_v12  ;;  %v7099_v24 = vunpack.i.h.bf16 %v7097_v48  ;;  %v7098_v40 = vunpack.i.l.bf16 %v7097_v48 }
 0x268   : > { %v9464_v5 = vadd.f32 %v1545_v10, %v9450_v56  ;;  %v1547_v18 = vpop.f32.mrb[45].mxu1  ;;  %12111 = vst [vmem:[#allocation101_spill] sm:$0xff] %v9486_v63  ;;  %v6939_v12 = vunpack.i.h.bf16 %v9295_v11 }
 0x269   : > { %v9467_v35 = vadd.f32 %v1547_v18, %v9455_v20  ;;  %1620 = vmax.xlane.f32.xlu0 %v1619_v57 }
 0x26a   : > { %12105 = vst [vmem:[#allocation95_spill] sm:$0xff] %v9464_v5 }
 0x26b   : > { %12106 = vst [vmem:[#allocation96_spill] sm:$0xff] %v9467_v35  ;;  %v1622_v15 = vmax.f32 %v9464_v5, %v9467_v35  ;;  %v1551_v34 = vpop.f32.mrb[46].mxu1  ;;  %v9507_v5 = vld [vmem:[%s9333_s28 + $0x98] sm:$0xff] }
 0x26c   : > { %v9478_v10 = vadd.f32 %v1551_v34, %v9470_v41  ;;  %v1553_v56 = vpop.f32.mrb[47].mxu1  ;;  %v9491_v34 = vld [vmem:[%s9333_s28 + $0x88] sm:$0xff]  ;;  %12114 = vst [vmem:[#allocation104_spill] sm:$0xff] %v9507_v5 }
 0x26d   : > { %v9481_v18 = vadd.f32 %v1553_v56, %v9473_v39  ;;  %6532 = vmatpush3.bf16.xpose.msk.msra.mxu1 %vm8572_vm1, %v6530_v50  ;;  %1623 = vmax.xlane.f32.xlu1 %v1622_v15  ;;  %v6938_v56 = vunpack.i.l.bf16 %v9295_v11  ;;  %v6539_v39 = vpack.c.bf16 %v7099_v24, %v7098_v40  ;;  %v9520_v24 = vld [vmem:[%s9333_s28 + $0xa0] sm:$0xff]  ;;  %v9523_v40 = vld [vmem:[%s9333_s28 + $0xa8] sm:$0xff] }
 0x26e   : > { %12109 = vst [vmem:[#allocation99_spill] sm:$0xff] %v9478_v10  ;;  %6535 = vmatprep.subr.msk.bf16.mxu1 %vm8572_vm1, %v6533_v46  ;;  %v9504_v46 = vld [vmem:[%s9333_s28 + $0x90] sm:$0xff]  ;;  %12117 = vst [vmem:[#allocation107_spill] sm:$0xff] %v9520_v24 }
 0x26f   : > { %12110 = vst [vmem:[#allocation100_spill] sm:$0xff] %v9481_v18  ;;  %v1625_v57 = vmax.f32 %v9478_v10, %v9481_v18  ;;  %v1557_v35 = vpop.f32.mrb[48].mxu1  ;;  %v6536_v11 = vpack.c.bf16 %v6939_v12, %v6938_v56  ;;  %v6953_v12 = vunpack.i.l.bf16 %v9315_v36 }
 0x270   : > { %v9498_v15 = vadd.f32 %v1557_v35, %v9486_v63  ;;  %v1559_v50 = vpop.f32.mrb[49].mxu1 }
 0x271   : > { %v9501_v48 = vadd.f32 %v1559_v50, %v9491_v34  ;;  %1626 = vmax.xlane.f32.xlu0 %v1625_v57  ;;  %v6974_v50 = vunpack.i.h.bf16 %v9237_v32 }
 0x272   : > { %12112 = vst [vmem:[#allocation102_spill] sm:$0xff] %v9498_v15 }
 0x273   : > { %12113 = vst [vmem:[#allocation103_spill] sm:$0xff] %v9501_v48  ;;  %v1628_v18 = vmax.f32 %v9498_v15, %v9501_v48  ;;  %v1563_v10 = vpop.f32.mrb[50].mxu1  ;;  %v9540_v48 = vld [vmem:[%s9333_s28 + $0xb0] sm:$0xff] }
 0x274   : > { %v9512_v41 = vadd.f32 %v1563_v10, %v9504_v46  ;;  %v1565_v35 = vpop.f32.mrb[51].mxu1  ;;  %v6954_v10 = vunpack.i.h.bf16 %v9315_v36  ;;  %v9543_v36 = vld [vmem:[%s9333_s28 + $0xb8] sm:$0xff] }
 0x275   : > { %v9515_v63 = vadd.f32 %v1565_v35, %v9507_v5  ;;  %6538 = vmatpush3.bf16.xpose.msk.msra.mxu1 %vm8572_vm1, %v6536_v11  ;;  %1629 = vmax.xlane.f32.xlu1 %v1628_v18  ;;  %v6973_v11 = vunpack.i.l.bf16 %v9237_v32  ;;  %12119 = vst [vmem:[#allocation109_spill] sm:$0xff] %v9543_v36 }
 0x276   : > { %12115 = vst [vmem:[#allocation105_spill] sm:$0xff] %v9512_v41  ;;  %6541 = vmatprep.subr.msk.bf16.mxu1 %vm8572_vm1, %v6539_v39 }
 0x277   : > { %12116 = vst [vmem:[#allocation106_spill] sm:$0xff] %v9515_v63  ;;  %v1631_v56 = vmax.f32 %v9512_v41, %v9515_v63  ;;  %v1569_v57 = vpop.f32.mrb[52].mxu1  ;;  %v6542_v63 = vpack.c.bf16 %v6954_v10, %v6953_v12  ;;  %v6577_v32 = vpack.c.bf16 %v6974_v50, %v6973_v11  ;;  %v9561_v10 = vld [vmem:[%s9333_s28 + $0xc8] sm:$0xff]  ;;  %v6853_v12 = vunpack.i.l.bf16 %v8911_v9 }
 0x278   : > { %v9534_v18 = vadd.f32 %v1569_v57, %v9520_v24  ;;  %v1571_v35 = vpop.f32.mrb[53].mxu1 }
 0x279   : > { %v9537_v39 = vadd.f32 %v1571_v35, %v9523_v40  ;;  %1632 = vmax.xlane.f32.xlu0 %v1631_v56  ;;  %v9556_v56 = vld [vmem:[%s9333_s28 + $0xc0] sm:$0xff]  ;;  %v6994_v35 = vunpack.i.h.bf16 %v9259_v6 }
 0x27a   : > { %12122 = vst [vmem:[#allocation112_spill] sm:$0xff] %v9556_v56 }
 0x27b   : > { %12118 = vst [vmem:[#allocation108_spill] sm:$0xff] %v9537_v39  ;;  %v1634_v41 = vmax.f32 %v9534_v18, %v9537_v39  ;;  %v1575_v5 = vpop.f32.mrb[54].mxu1  ;;  %v9576_v39 = vld [vmem:[%s9333_s28 + $0xd0] sm:$0xff] }
 0x27c   : > { %v9548_v15 = vadd.f32 %v1575_v5, %v9540_v48  ;;  %v1577_v57 = vpop.f32.mrb[55].mxu1  ;;  %v6854_v5 = vunpack.i.h.bf16 %v8911_v9  ;;  %v9579_v9 = vld [vmem:[%s9333_s28 + $0xd8] sm:$0xff] }
 0x27d   : > { %v9551_v24 = vadd.f32 %v1577_v57, %v9543_v36  ;;  %6544 = vmatpush3.bf16.xpose.msk.msra.mxu1 %vm8572_vm1, %v6542_v63  ;;  %1635 = vmax.xlane.f32.xlu1 %v1634_v41  ;;  %v6993_v63 = vunpack.i.l.bf16 %v9259_v6 }
 0x27e   : > { %12120 = vst [vmem:[#allocation110_spill] sm:$0xff] %v9548_v15  ;;  %6579 = vmatprep.subr.msk.bf16.mxu1 %vm8572_vm1, %v6577_v32 }
 0x27f   : > { %12121 = vst [vmem:[#allocation111_spill] sm:$0xff] %v9551_v24  ;;  %v1637_v50 = vmax.f32 %v9548_v15, %v9551_v24  ;;  %v1581_v11 = vpop.f32.mrb[56].mxu1  ;;  %v6580_v24 = vpack.c.bf16 %v6854_v5, %v6853_v12  ;;  %v6583_v6 = vpack.c.bf16 %v6994_v35, %v6993_v63  ;;  %v9596_v5 = vld [vmem:[%s9333_s28 + $0xe0] sm:$0xff]  ;;  %v7013_v63 = vunpack.i.l.bf16 %v9273_v2 }
 0x280   : > { %v9570_v41 = vadd.f32 %v1581_v11, %v9556_v56  ;;  %v1583_v57 = vpop.f32.mrb[57].mxu1  ;;  %12126 = vst [vmem:[#allocation116_spill] sm:$0xff] %v9596_v5 }
 0x281   : > { %v9573_v32 = vadd.f32 %v1583_v57, %v9561_v10  ;;  %1638 = vmax.xlane.f32.xlu0 %v1637_v50 }
 0x283   : > { %12123 = vst [vmem:[#allocation113_spill] sm:$0xff] %v9573_v32  ;;  %v1640_v15 = vmax.f32 %v9570_v41, %v9573_v32  ;;  %v1587_v36 = vpop.f32.mrb[58].mxu1 }
 0x284   : > { %v9584_v11 = vadd.f32 %v1587_v36, %v9576_v39  ;;  %v1589_v56 = vpop.f32.mrb[59].mxu1  ;;  %5618 = vmatmul.mubr.msk.f32.vlgmr.msra.gmra.mrb[64].mxu1 %vm1298_vm0, %v8925_v29  ;;  %v9601_v36 = vld [vmem:[%s9333_s28 + $0xe8] sm:$0xff]  ;;  %v6869_v29 = vunpack.i.h.bf16 %v8947_v54 }
 0x285   : > { %v9589_v50 = vadd.f32 %v1589_v56, %v9579_v9  ;;  %5619 = vmatprep.mubr.msk.f32.mxu1 %vm1298_vm0, %v8889_v27  ;;  %6582 = vmatpush3.bf16.xpose.msk.msra.mxu1 %vm8572_vm1, %v6580_v24  ;;  %v6868_v56 = vunpack.i.l.bf16 %v8947_v54  ;;  %v7014_v24 = vunpack.i.h.bf16 %v9273_v2  ;;  %v9620_v54 = vld [vmem:[%s9333_s28 + $0xf0] sm:$0xff] }
 0x286   : > { %12124 = vst [vmem:[#allocation114_spill] sm:$0xff] %v9584_v11  ;;  %1641 = vmax.xlane.f32.xlu1 %v1640_v15  ;;  %6585 = vmatprep.subr.msk.bf16.mxu1 %vm8572_vm1, %v6583_v6 }
 0x287   : > { %12125 = vst [vmem:[#allocation115_spill] sm:$0xff] %v9589_v50  ;;  %v1643_v12 = vmax.f32 %v9584_v11, %v9589_v50  ;;  %v1593_v35 = vpop.f32.mrb[60].mxu1  ;;  %v9623_v50 = vld [vmem:[%s9333_s28 + $0xf8] sm:$0xff]  ;;  %v6586_v11 = vpack.c.bf16 %v6869_v29, %v6868_v56  ;;  %v6884_v29 = vunpack.i.h.bf16 %v8987_v14  ;;  %v6883_v56 = vunpack.i.l.bf16 %v8987_v14 }
 0x288   : > { %v9610_v15 = vadd.f32 %v1593_v35, %v9596_v5  ;;  %v1595_v57 = vpop.f32.mrb[61].mxu1  ;;  %5620 = vmatmul.mubr.msk.f32.gmra.mrb[66].mxu1 %vm1298_vm0, %v8889_v27  ;;  %v6589_v5 = vpack.c.bf16 %v7014_v24, %v7013_v63  ;;  %v7033_v24 = vunpack.i.l.bf16 %v9293_v45  ;;  %v6898_v14 = vunpack.i.l.bf16 %v9031_v37 }
 0x289   : > { %v9615_v6 = vadd.f32 %v1595_v57, %v9601_v36  ;;  %5621 = vmatprep.mubr.msk.f32.mxu1 %vm1298_vm0, %v9005_v1  ;;  %1644 = vmax.xlane.f32.xlu0 %v1643_v12  ;;  %v7034_v12 = vunpack.i.h.bf16 %v9293_v45  ;;  %v7054_v45 = vunpack.i.h.bf16 %v9311_v7  ;;  %v7053_v63 = vunpack.i.l.bf16 %v9311_v7 }
 0x28b   : > { %v1646_v2 = vmax.f32 %v9610_v15, %v9615_v6  ;;  %v1599_v35 = vpop.f32.mrb[62].mxu1 }
 0x28c   : > { %v9628_v32 = vadd.f32 %v1599_v35, %v9620_v54  ;;  %v1601_v27 = vpop.f32.mrb[63].mxu1  ;;  %5622 = vmatmul.mubr.msk.f32.gmra.mrb[68].mxu1 %vm1298_vm0, %v9005_v1  ;;  %v6914_v35 = vunpack.i.h.bf16 %v9059_v26 }
 0x28d   : > { %v9633_v57 = vadd.f32 %v1601_v27, %v9623_v50  ;;  %5623 = vmatprep.mubr.msk.f32.mxu1 %vm1298_vm0, %v8949_v19  ;;  %6588 = vmatpush3.bf16.xpose.msk.msra.mxu1 %vm8572_vm1, %v6586_v11  ;;  %v6592_v11 = vpack.c.bf16 %v6884_v29, %v6883_v56  ;;  %v6913_v27 = vunpack.i.l.bf16 %v9059_v26  ;;  %v7074_v29 = vunpack.i.h.bf16 %v9349_v61 }
 0x28e   : > { %1647 = vmax.xlane.f32.xlu1 %v1646_v2  ;;  %6591 = vmatprep.subr.msk.bf16.mxu1 %vm8572_vm1, %v6589_v5  ;;  %v6595_v5 = vpack.c.bf16 %v7034_v12, %v7033_v24  ;;  %v6601_v2 = vpack.c.bf16 %v7054_v45, %v7053_v63  ;;  %v6929_v26 = vunpack.i.h.bf16 %v9083_v43  ;;  %v7088_v24 = vunpack.i.l.bf16 %v9428_v13 }
 0x28f   : > { %v1649_v1 = vmax.f32 %v9628_v32, %v9633_v57  ;;  %v6979_v45 = vunpack.i.h.bf16 %v9249_v22  ;;  %v6978_v63 = vunpack.i.l.bf16 %v9249_v22  ;;  %v6999_v22 = vunpack.i.h.bf16 %v9263_v49 }
 0x290   : > { %5624 = vmatmul.mubr.msk.f32.gmra.mrb[70].mxu1 %vm1298_vm0, %v8949_v19  ;;  %v6899_v19 = vunpack.i.h.bf16 %v9031_v37  ;;  %v7132_v37 = vpop.permute.xlu1 %7131 }
 0x291   : > { %5625 = vmatprep.mubr.msk.f32.mxu1 %vm1298_vm0, %v9069_v44  ;;  %1650 = vmax.xlane.f32.xlu0 %v1649_v1  ;;  %v7134_v7 = vunpack.i.h.bf16 %v7132_v37  ;;  %v6604_v1 = vpack.c.bf16 %v6914_v35, %v6913_v27  ;;  %v12127_v35 = vld [vmem:[#allocation29_spill] sm:$0xff]  ;;  %v12129_v27 = vld [vmem:[#allocation64_spill] sm:$0xff] }
 0x294   : > { %5626 = vmatmul.mubr.msk.f32.gmra.mrb[72].mxu1 %vm1298_vm0, %v9069_v44  ;;  %v6598_v44 = vpack.c.bf16 %v6899_v19, %v6898_v14 }
 0x295   : > { %5627 = vmatprep.mubr.msk.f32.mxu1 %vm1298_vm0, %v9033_v16  ;;  %6594 = vmatpush3.bf16.xpose.msk.msra.mxu1 %vm8572_vm1, %v6592_v11 }
 0x296   : > { %6597 = vmatprep.subr.msk.bf16.mxu1 %vm8572_vm1, %v6595_v5 }
 0x298   : > { %5628 = vmatmul.mubr.msk.f32.gmra.mrb[74].mxu1 %vm1298_vm0, %v9033_v16  ;;  %v7133_v16 = vunpack.i.l.bf16 %v7132_v37 }
 0x299   : > { %5629 = vmatprep.mubr.msk.f32.mxu1 %vm1298_vm0, %v9125_v58 }
 0x29a   : > { %v6545_v56 = vpack.c.bf16 %v7134_v7, %v7133_v16  ;;  %v7018_v7 = vunpack.i.l.bf16 %v9277_v0 }
 0x29c   : > { %5630 = vmatmul.mubr.msk.f32.gmra.mrb[76].mxu1 %vm1298_vm0, %v9125_v58  ;;  %v7073_v58 = vunpack.i.l.bf16 %v9349_v61  ;;  %6546 = vmatprep.subr.bf16.mxu0 %v6545_v56  ;;  %v7089_v61 = vunpack.i.h.bf16 %v9428_v13  ;;  %v7102_v13 = vpop.permute.xlu0 %7101 }
 0x29d   : > { %5631 = vmatprep.mubr.msk.f32.mxu1 %vm1298_vm0, %v9085_v8  ;;  %6600 = vmatpush3.bf16.xpose.msk.msra.mxu1 %vm8572_vm1, %v6598_v44  ;;  %v7104_v5 = vunpack.i.h.bf16 %v7102_v13  ;;  %v7103_v19 = vunpack.i.l.bf16 %v7102_v13  ;;  %v6657_v44 = vpack.c.bf16 %v6979_v45, %v6978_v63  ;;  %v12137_v45 = vld [vmem:[#allocation55_spill] sm:$0xff] }
 0x29e   : > { %6603 = vmatprep.subr.msk.bf16.mxu1 %vm8572_vm1, %v6601_v2  ;;  %v6607_v12 = vpack.c.bf16 %v7074_v29, %v7073_v58  ;;  %v6613_v11 = vpack.c.bf16 %v7089_v61, %v7088_v24  ;;  %v6998_v2 = vunpack.i.l.bf16 %v9263_v49  ;;  %v6873_v49 = vunpack.i.l.bf16 %v8959_v3  ;;  %v12133_v24 = vld [vmem:[#allocation69_spill] sm:$0xff] }
 0x29f   : > { %v6619_v14 = vpack.c.bf16 %v7104_v5, %v7103_v19  ;;  %v7039_v29 = vunpack.i.h.bf16 %v12129_v27  ;;  %v7038_v58 = vunpack.i.l.bf16 %v12129_v27  ;;  %v12135_v5 = vld [vmem:[#allocation39_spill] sm:$0xff]  ;;  %v12144_v27 = vld [vmem:[#allocation62_spill] sm:$0xff] }
 0x2a0   : > { %5632 = vmatmul.mubr.msk.f32.gmra.mrb[78].mxu1 %vm1298_vm0, %v9085_v8  ;;  %v6928_v8 = vunpack.i.l.bf16 %v9083_v43  ;;  %v6944_v43 = vunpack.i.h.bf16 %v9111_v38  ;;  %v6663_v37 = vpack.c.bf16 %v6999_v22, %v6998_v2  ;;  %v12136_v19 = vld [vmem:[#allocation35_spill] sm:$0xff]  ;;  %v7094_v22 = vunpack.i.h.bf16 %v9459_v23 }
 0x2a1   : > { %5633 = vmatprep.mubr.msk.f32.mxu1 %vm1298_vm0, %v9241_v31  ;;  %v7093_v2 = vunpack.i.l.bf16 %v9459_v23  ;;  %v12142_v23 = vld [vmem:[#allocation44_spill] sm:$0xff] }
 0x2a4   : > { %5634 = vmatmul.mubr.msk.f32.gmra.mrb[80].mxu1 %vm1298_vm0, %v9241_v31  ;;  %v6610_v31 = vpack.c.bf16 %v6929_v26, %v6928_v8  ;;  %v12132_v26 = vld [vmem:[#allocation15_spill] sm:$0xff] }
 0x2a5   : > { %5635 = vmatprep.mubr.msk.f32.mxu1 %vm1298_vm0, %v9149_v60  ;;  %6606 = vmatpush3.bf16.xpose.msk.msra.mxu1 %vm8572_vm1, %v6604_v1  ;;  %v6675_v1 = vpack.c.bf16 %v7039_v29, %v7038_v58  ;;  %v6904_v8 = vunpack.i.h.bf16 %v12132_v26  ;;  %v6903_v61 = vunpack.i.l.bf16 %v12132_v26  ;;  %v12145_v29 = vld [vmem:[#allocation22_spill] sm:$0xff]  ;;  %v12148_v26 = vld [vmem:[#allocation28_spill] sm:$0xff] }
 0x2a6   : > { %6609 = vmatprep.subr.msk.bf16.mxu1 %vm8572_vm1, %v6607_v12  ;;  %v12131_v12 = vld [vmem:[#allocation32_spill] sm:$0xff]  ;;  %v6964_v58 = vunpack.i.h.bf16 %v12145_v29 }
 0x2a8   : > { %5636 = vmatmul.mubr.msk.f32.gmra.mrb[82].mxu1 %vm1298_vm0, %v9149_v60  ;;  %v6943_v60 = vunpack.i.l.bf16 %v9111_v38  ;;  %v6959_v38 = vunpack.i.h.bf16 %v9147_v51 }
 0x2a9   : > { %5637 = vmatprep.mubr.msk.f32.mxu1 %vm1298_vm0, %v9271_v25 }
 0x2ac   : > { %5638 = vmatmul.mubr.msk.f32.gmra.mrb[84].mxu1 %vm1298_vm0, %v9271_v25  ;;  %v6616_v25 = vpack.c.bf16 %v6944_v43, %v6943_v60  ;;  %v12134_v43 = vld [vmem:[#allocation47_spill] sm:$0xff]  ;;  %v6678_v60 = vpack.c.bf16 %v6904_v8, %v6903_v61  ;;  %v12150_v61 = vld [vmem:[#allocation14_spill] sm:$0xff] }
 0x2ad   : > { %5639 = vmatprep.mubr.msk.f32.mxu1 %vm1298_vm0, %v9257_v55  ;;  %6612 = vmatpush3.bf16.xpose.msk.msra.mxu1 %vm8572_vm1, %v6610_v31  ;;  %v7059_v31 = vunpack.i.h.bf16 %v12133_v24  ;;  %v12149_v8 = vld [vmem:[#allocation27_spill] sm:$0xff] }
 0x2ae   : > { %6615 = vmatprep.subr.msk.bf16.mxu1 %vm8572_vm1, %v6613_v11  ;;  %v7058_v11 = vunpack.i.l.bf16 %v12133_v24  ;;  %v12152_v24 = vld [vmem:[#allocation31_spill] sm:$0xff] }
 0x2b0   : > { %5640 = vmatmul.mubr.msk.f32.gmra.mrb[86].mxu1 %vm1298_vm0, %v9257_v55  ;;  %v6958_v55 = vunpack.i.l.bf16 %v9147_v51  ;;  %v6859_v51 = vunpack.i.h.bf16 %v8923_v28  ;;  %v6681_v13 = vpack.c.bf16 %v7059_v31, %v7058_v11  ;;  %v12153_v31 = vld [vmem:[#allocation34_spill] sm:$0xff]  ;;  %v12154_v11 = vld [vmem:[#allocation33_spill] sm:$0xff] }
 0x2b1   : > { %5641 = vmatprep.mubr.msk.f32.mxu1 %vm1298_vm0, %v9299_v53 }
 0x2b4   : > { %5642 = vmatmul.mubr.msk.f32.gmra.mrb[88].mxu1 %vm1298_vm0, %v9299_v53  ;;  %v6622_v53 = vpack.c.bf16 %v6959_v38, %v6958_v55  ;;  %v7079_v38 = vunpack.i.h.bf16 %v9368_v42  ;;  %v7078_v55 = vunpack.i.l.bf16 %v9368_v42  ;;  %v12139_v42 = vld [vmem:[#allocation38_spill] sm:$0xff] }
 0x2b5   : > { %5643 = vmatprep.mubr.msk.f32.mxu1 %vm1298_vm0, %v9279_v59  ;;  %6618 = vmatpush3.bf16.xpose.msk.msra.mxu1 %vm8572_vm1, %v6616_v25  ;;  %v6919_v25 = vunpack.i.h.bf16 %v12136_v19 }
 0x2b6   : > { %6621 = vmatprep.subr.msk.bf16.mxu1 %vm8572_vm1, %v6619_v14  ;;  %v6918_v14 = vunpack.i.l.bf16 %v12136_v19  ;;  %v12159_v19 = vld [vmem:[#allocation58_spill] sm:$0xff] }
 0x2b8   : > { %5644 = vmatmul.mubr.msk.f32.gmra.mrb[90].mxu1 %vm1298_vm0, %v9279_v59  ;;  %v6858_v59 = vunpack.i.l.bf16 %v8923_v28  ;;  %v6874_v28 = vunpack.i.h.bf16 %v8959_v3  ;;  %v12128_v3 = vld [vmem:[#allocation19_spill] sm:$0xff]  ;;  %v6684_v63 = vpack.c.bf16 %v6919_v25, %v6918_v14  ;;  %v9907_v25 = vpop.permute.xlu1 %7136  ;;  %v12161_v14 = vld [vmem:[#allocation46_spill] sm:$0xff] }
 0x2b9   : > { %5645 = vmatprep.mubr.msk.f32.mxu1 %vm1298_vm0, %v9319_v33  ;;  %12160 = vst [vmem:[#allocation29_spill] sm:$0xff] %v9907_v25 }
 0x2bc   : > { %5646 = vmatmul.mubr.msk.f32.gmra.mrb[92].mxu1 %vm1298_vm0, %v9319_v33  ;;  %v6660_v33 = vpack.c.bf16 %v6859_v51, %v6858_v59  ;;  %v6934_v51 = vunpack.i.h.bf16 %v12139_v42  ;;  %v6933_v59 = vunpack.i.l.bf16 %v12139_v42 }
 0x2bd   : > { %5647 = vmatprep.mubr.msk.f32.mxu1 %vm1298_vm0, %v9305_v17  ;;  %6624 = vmatpush3.bf16.xpose.msk.msra.mxu1 %vm8572_vm1, %v6622_v53  ;;  %v6687_v53 = vpack.c.bf16 %v7079_v38, %v7078_v55  ;;  %v9913_v38 = vpop.permute.xlu1 %7141  ;;  %v12162_v55 = vld [vmem:[#allocation63_spill] sm:$0xff] }
 0x2be   : > { %6659 = vmatprep.subr.msk.bf16.mxu1 %vm8572_vm1, %v6657_v44  ;;  %v12138_v44 = vld [vmem:[#allocation49_spill] sm:$0xff] }
 0x2c0   : > { %5648 = vmatmul.mubr.msk.f32.gmra.mrb[94].mxu1 %vm1298_vm0, %v9305_v17  ;;  %v7019_v17 = vunpack.i.h.bf16 %v9277_v0  ;;  %v6889_v0 = vunpack.i.h.bf16 %v12128_v3 }
 0x2c1   : > { %5761 = vmatprep.mubr.msk.f32.mxu1 %vm1298_vm0, %v8937_v52 }
 0x2c2   : > { %v6669_v16 = vpack.c.bf16 %v7019_v17, %v7018_v7  ;;  %v6949_v17 = vunpack.i.h.bf16 %v12142_v23  ;;  %v6948_v7 = vunpack.i.l.bf16 %v12142_v23  ;;  %v12173_v23 = vld [vmem:[#allocation72_spill] sm:$0xff] }
 0x2c4   : > { %5762 = vmatmul.mubr.msk.f32.vlgmr.msra.gmra.mrb[96].mxu1 %vm1298_vm0, %v8937_v52  ;;  %v6666_v52 = vpack.c.bf16 %v6874_v28, %v6873_v49  ;;  %v6693_v28 = vpack.c.bf16 %v7094_v22, %v7093_v2  ;;  %v12141_v49 = vld [vmem:[#allocation57_spill] sm:$0xff] }
 0x2c5   : > { %5763 = vmatprep.mubr.msk.f32.mxu1 %vm1298_vm0, %v8901_v4  ;;  %6662 = vmatpush3.bf16.xpose.msk.msra.mxu1 %vm8572_vm1, %v6660_v33  ;;  %v12140_v33 = vld [vmem:[#allocation60_spill] sm:$0xff] }
 0x2c6   : > { %6665 = vmatprep.subr.msk.bf16.mxu1 %vm8572_vm1, %v6663_v37  ;;  %v6690_v37 = vpack.c.bf16 %v6934_v51, %v6933_v59 }
 0x2c8   : > { %5764 = vmatmul.mubr.msk.f32.gmra.mrb[98].mxu1 %vm1298_vm0, %v8901_v4  ;;  %v6888_v4 = vunpack.i.l.bf16 %v12128_v3  ;;  %v12143_v3 = vld [vmem:[#allocation66_spill] sm:$0xff] }
 0x2c9   : > { %5765 = vmatprep.mubr.msk.f32.mxu1 %vm1298_vm0, %v9021_v47 }
 0x2ca   : > { %v6672_v56 = vpack.c.bf16 %v6889_v0, %v6888_v4  ;;  %v6696_v0 = vpack.c.bf16 %v6949_v17, %v6948_v7 }
 0x2cc   : > { %5766 = vmatmul.mubr.msk.f32.gmra.mrb[100].mxu1 %vm1298_vm0, %v9021_v47  ;;  %v12130_v47 = vld [vmem:[#allocation37_spill] sm:$0xff] }
 0x2cd   : > { %5767 = vmatprep.mubr.msk.f32.mxu1 %vm1298_vm0, %v12127_v35  ;;  %6668 = vmatpush3.bf16.xpose.msk.msra.mxu1 %vm8572_vm1, %v6666_v52  ;;  %v7107_v52 = vpop.permute.xlu0 %7106 }
 0x2ce   : > { %6671 = vmatprep.subr.msk.bf16.mxu1 %vm8572_vm1, %v6669_v16  ;;  %v7109_v16 = vunpack.i.h.bf16 %v7107_v52 }
 0x2d0   : > { %5768 = vmatmul.mubr.msk.f32.gmra.mrb[102].mxu1 %vm1298_vm0, %v12127_v35  ;;  %v7108_v35 = vunpack.i.l.bf16 %v7107_v52 }
 0x2d1   : > { %5769 = vmatprep.mubr.msk.f32.mxu1 %vm1298_vm0, %v12130_v47  ;;  %v9933_v42 = vpop.permute.xlu0 %7111 }
 0x2d2   : > { %v6699_v4 = vpack.c.bf16 %v7109_v16, %v7108_v35  ;;  %12165 = vst [vmem:[#allocation19_spill] sm:$0xff] %v9933_v42 }
 0x2d4   : > { %5770 = vmatmul.mubr.msk.f32.gmra.mrb[104].mxu1 %vm1298_vm0, %v12130_v47  ;;  %v6963_v47 = vunpack.i.l.bf16 %v12145_v29  ;;  %v12175_v29 = vld [vmem:[#allocation73_spill] sm:$0xff] }
 0x2d5   : > { %5771 = vmatprep.mubr.msk.f32.mxu1 %vm1298_vm0, %v12131_v12  ;;  %6674 = vmatpush3.bf16.xpose.msk.msra.mxu1 %vm8572_vm1, %v6672_v56  ;;  %v12146_v56 = vld [vmem:[#allocation71_spill] sm:$0xff]  ;;  %v9937_v59 = vpop.permute.xlu0 %7116 }
 0x2d6   : > { %6677 = vmatprep.subr.msk.bf16.mxu1 %vm8572_vm1, %v6675_v1  ;;  %v6702_v1 = vpack.c.bf16 %v6964_v58, %v6963_v47  ;;  %12167 = vst [vmem:[#allocation37_spill] sm:$0xff] %v9937_v59  ;;  %v12176_v47 = vld [vmem:[#allocation76_spill] sm:$0xff] }
 0x2d8   : > { %5772 = vmatmul.mubr.msk.f32.gmra.mrb[106].mxu1 %vm1298_vm0, %v12131_v12  ;;  %v12147_v12 = vld [vmem:[#allocation67_spill] sm:$0xff] }
 0x2d9   : > { %5773 = vmatprep.mubr.msk.f32.mxu1 %vm1298_vm0, %v12134_v43  ;;  %v9941_v2 = vpop.permute.xlu0 %7121 }
 0x2da   : > { %12169 = vst [vmem:[#allocation15_spill] sm:$0xff] %v9941_v2 }
 0x2dc   : > { %5774 = vmatmul.mubr.msk.f32.gmra.mrb[108].mxu1 %vm1298_vm0, %v12134_v43  ;;  %v12155_v43 = vld [vmem:[#allocation42_spill] sm:$0xff] }
 0x2dd   : > { %5775 = vmatprep.mubr.msk.f32.mxu1 %vm1298_vm0, %v12135_v5  ;;  %6680 = vmatpush3.bf16.xpose.msk.msra.mxu1 %vm8572_vm1, %v6678_v60  ;;  %v12156_v60 = vld [vmem:[#allocation36_spill] sm:$0xff] }
 0x2de   : > { %6683 = vmatprep.subr.msk.bf16.mxu1 %vm8572_vm1, %v6681_v13  ;;  %v12157_v13 = vld [vmem:[#allocation52_spill] sm:$0xff] }
 0x2e0   : > { %5776 = vmatmul.mubr.msk.f32.gmra.mrb[110].mxu1 %vm1298_vm0, %v12135_v5  ;;  %v12158_v5 = vld [vmem:[#allocation41_spill] sm:$0xff] }
 0x2e1   : > { %5777 = vmatprep.mubr.msk.f32.mxu1 %vm1298_vm0, %v12137_v45 }
 0x2e4   : > { %5778 = vmatmul.mubr.msk.f32.gmra.mrb[112].mxu1 %vm1298_vm0, %v12137_v45  ;;  %v12163_v45 = vld [vmem:[#allocation51_spill] sm:$0xff] }
 0x2e5   : > { %5779 = vmatprep.mubr.msk.f32.mxu1 %vm1298_vm0, %v12138_v44  ;;  %6686 = vmatpush3.bf16.xpose.msk.msra.mxu1 %vm8572_vm1, %v6684_v63  ;;  %v9923_v63 = vpop.permute.xlu1 %7146 }
 0x2e6   : > { %6689 = vmatprep.subr.msk.bf16.mxu1 %vm8572_vm1, %v6687_v53  ;;  %v12164_v53 = vld [vmem:[#allocation68_spill] sm:$0xff] }
 0x2e8   : > { %5780 = vmatmul.mubr.msk.f32.gmra.mrb[114].mxu1 %vm1298_vm0, %v12138_v44 }
 0x2e9   : > { %5781 = vmatprep.mubr.msk.f32.mxu1 %vm1298_vm0, %v12140_v33  ;;  %v9929_v44 = vpop.permute.xlu1 %7151 }
 0x2ec   : > { %5782 = vmatmul.mubr.msk.f32.gmra.mrb[116].mxu1 %vm1298_vm0, %v12140_v33 }
 0x2ed   : > { %5783 = vmatprep.mubr.msk.f32.mxu1 %vm1298_vm0, %v12141_v49  ;;  %6692 = vmatpush3.bf16.xpose.msk.msra.mxu1 %vm8572_vm1, %v6690_v37  ;;  %v9935_v51 = vpop.permute.xlu1 %7156  ;;  %v9945_v37 = vpop.permute.xlu0 %7126 }
 0x2ee   : > { %6695 = vmatprep.subr.msk.bf16.mxu1 %vm8572_vm1, %v6693_v28  ;;  %12166 = vst [vmem:[#allocation64_spill] sm:$0xff] %v9935_v51  ;;  %12171 = vst [vmem:[#allocation47_spill] sm:$0xff] %v9945_v37 }
 0x2f0   : > { %5784 = vmatmul.mubr.msk.f32.gmra.mrb[118].mxu1 %vm1298_vm0, %v12141_v49 }
 0x2f1   : > { %5785 = vmatprep.mubr.msk.f32.mxu1 %vm1298_vm0, %v12143_v3  ;;  %v9939_v22 = vpop.permute.xlu1 %7161  ;;  %v1606_v16 = vpop.xlane.xlu0 %1605 }
 0x2f2   : > { %12168 = vst [vmem:[#allocation32_spill] sm:$0xff] %v9939_v22  ;;  %v1652_v58 = vsub.f32 %v12175_v29, %v1606_v16 }
 0x2f4   : > { %5786 = vmatmul.mubr.msk.f32.gmra.mrb[120].mxu1 %vm1298_vm0, %v12143_v3 }
 0x2f5   : > { %5787 = vmatprep.mubr.msk.f32.mxu1 %vm1298_vm0, %v12144_v27  ;;  %6698 = vmatpush3.bf16.xpose.msk.msra.mxu1 %vm8572_vm1, %v6696_v0  ;;  %v9943_v33 = vpop.permute.xlu1 %7166  ;;  %v12174_v0 = vld [vmem:[#allocation75_spill] sm:$0xff] }
 0x2f6   : > { %6701 = vmatprep.subr.msk.bf16.mxu1 %vm8572_vm1, %v6699_v4  ;;  %12170 = vst [vmem:[#allocation69_spill] sm:$0xff] %v9943_v33 }
 0x2f8   : > { %5788 = vmatmul.mubr.msk.f32.gmra.mrb[122].mxu1 %vm1298_vm0, %v12144_v27 }
 0x2f9   : > { %5789 = vmatprep.mubr.msk.f32.mxu1 %vm1298_vm0, %v12146_v56  ;;  %v9947_v49 = vpop.permute.xlu1 %7171 }
 0x2fa   : > { %12172 = vst [vmem:[#allocation39_spill] sm:$0xff] %v9947_v49 }
 0x2fc   : > { %5790 = vmatmul.mubr.msk.f32.gmra.mrb[124].mxu1 %vm1298_vm0, %v12146_v56 }
 0x2fd   : > { %5791 = vmatprep.mubr.msk.f32.mxu1 %vm1298_vm0, %v12147_v12  ;;  %6704 = vmatpush3.bf16.xpose.msk.msra.mxu1 %vm8572_vm1, %v6702_v1  ;;  %v12177_v1 = vld [vmem:[#allocation74_spill] sm:$0xff] }
 0x300   : > { %5792 = vmatmul.mubr.msk.f32.gmra.mrb[126].mxu1 %vm1298_vm0, %v12147_v12  ;;  %v1653_v12 = vsub.f32 %v12177_v1, %v1606_v16 }
 0x301   : > { %5905 = vmatprep.mubr.msk.f32.mxu1 %vm1298_vm0, %v12148_v26 }
 0x304   : > { %5906 = vmatmul.mubr.msk.f32.vlgmr.msra.gmra.mrb[128].mxu1 %vm1298_vm0, %v12148_v26  ;;  %v1609_v26 = vpop.xlane.xlu1 %1608 }
 0x305   : > { %5907 = vmatprep.mubr.msk.f32.mxu1 %vm1298_vm0, %v12149_v8 }
 0x308   : > { %5908 = vmatmul.mubr.msk.f32.gmra.mrb[130].mxu1 %vm1298_vm0, %v12149_v8 }
 0x309   : > { %5909 = vmatprep.mubr.msk.f32.mxu1 %vm1298_vm0, %v12150_v61 }
 0x30c   : > { %5910 = vmatmul.mubr.msk.f32.gmra.mrb[132].mxu1 %vm1298_vm0, %v12150_v61  ;;  %v1612_v61 = vpop.xlane.xlu0 %1611 }
 0x30d   : > { %5911 = vmatprep.mubr.msk.f32.mxu1 %vm1298_vm0, %v12151_v21 }
 0x310   : > { %5912 = vmatmul.mubr.msk.f32.gmra.mrb[134].mxu1 %vm1298_vm0, %v12151_v21  ;;  %v12178_v21 = vld [vmem:[#allocation79_spill] sm:$0xff]  ;;  %v1615_v1 = vpop.xlane.xlu0 %1614 }
 0x311   : > { %5913 = vmatprep.mubr.msk.f32.mxu1 %vm1298_vm0, %v12152_v24 }
 0x314   : > { %5914 = vmatmul.mubr.msk.f32.gmra.mrb[136].mxu1 %vm1298_vm0, %v12152_v24 }
 0x315   : > { %5915 = vmatprep.mubr.msk.f32.mxu1 %vm1298_vm0, %v12153_v31 }
 0x318   : > { %5916 = vmatmul.mubr.msk.f32.gmra.mrb[138].mxu1 %vm1298_vm0, %v12153_v31 }
 0x319   : > { %5917 = vmatprep.mubr.msk.f32.mxu1 %vm1298_vm0, %v12154_v11 }
 0x31c   : > { %5918 = vmatmul.mubr.msk.f32.gmra.mrb[140].mxu1 %vm1298_vm0, %v12154_v11  ;;  %v1684_v11 = vmul.f32 1.442695, %v1652_v58  ;;  %v12185_v58 = vld [vmem:[#allocation82_spill] sm:$0xff] }
 0x31d   : > { %5919 = vmatprep.mubr.msk.f32.mxu1 %vm1298_vm0, %v12155_v43 }
 0x31e   : > { %7445 = vpow2.f32 %v1684_v11  ;;  %v12187_v11 = vld [vmem:[#allocation85_spill] sm:$0xff] }
 0x320   : > { %5920 = vmatmul.mubr.msk.f32.gmra.mrb[142].mxu1 %vm1298_vm0, %v12155_v43  ;;  %v12179_v43 = vld [vmem:[#allocation77_spill] sm:$0xff] }
 0x321   : > { %5921 = vmatprep.mubr.msk.f32.mxu1 %vm1298_vm0, %v12156_v60 }
 0x324   : > { %5922 = vmatmul.mubr.msk.f32.gmra.mrb[144].mxu1 %vm1298_vm0, %v12156_v60  ;;  %v1654_v60 = vsub.f32 %v12179_v43, %v1609_v26  ;;  %v1658_v43 = vsub.f32 %v12187_v11, %v1615_v1 }
 0x325   : > { %5923 = vmatprep.mubr.msk.f32.mxu1 %vm1298_vm0, %v12157_v13 }
 0x326   : > { %v1688_v16 = vmul.f32 1.442695, %v1654_v60 }
 0x328   : > { %5924 = vmatmul.mubr.msk.f32.gmra.mrb[146].mxu1 %vm1298_vm0, %v12157_v13  ;;  %v12180_v13 = vld [vmem:[#allocation80_spill] sm:$0xff] }
 0x329   : > { %5925 = vmatprep.mubr.msk.f32.mxu1 %vm1298_vm0, %v12158_v5 }
 0x32c   : > { %5926 = vmatmul.mubr.msk.f32.gmra.mrb[148].mxu1 %vm1298_vm0, %v12158_v5 }
 0x32d   : > { %5927 = vmatprep.mubr.msk.f32.mxu1 %vm1298_vm0, %v12159_v19 }
 0x330   : > { %5928 = vmatmul.mubr.msk.f32.gmra.mrb[150].mxu1 %vm1298_vm0, %v12159_v19  ;;  %v1686_v19 = vmul.f32 1.442695, %v1653_v12 }
 0x331   : > { %5929 = vmatprep.mubr.msk.f32.mxu1 %vm1298_vm0, %v12161_v14 }
 0x332   : > { %7447 = vpow2.f32 %v1686_v19 }
 0x333   : > { %7449 = vpow2.f32 %v1688_v16  ;;  %v1696_v16 = vmul.f32 1.442695, %v1658_v43 }
 0x334   : > { %5930 = vmatmul.mubr.msk.f32.gmra.mrb[152].mxu1 %vm1298_vm0, %v12161_v14  ;;  %v12181_v14 = vld [vmem:[#allocation78_spill] sm:$0xff] }
 0x335   : > { %5931 = vmatprep.mubr.msk.f32.mxu1 %vm1298_vm0, %v12162_v55 }
 0x338   : > { %5932 = vmatmul.mubr.msk.f32.gmra.mrb[154].mxu1 %vm1298_vm0, %v12162_v55  ;;  %v1655_v55 = vsub.f32 %v12181_v14, %v1609_v26  ;;  %v1618_v14 = vpop.xlane.xlu1 %1617 }
 0x339   : > { %5933 = vmatprep.mubr.msk.f32.mxu1 %vm1298_vm0, %v12163_v45 }
 0x33a   : > { %v1690_v29 = vmul.f32 1.442695, %v1655_v55 }
 0x33c   : > { %5934 = vmatmul.mubr.msk.f32.gmra.mrb[156].mxu1 %vm1298_vm0, %v12163_v45  ;;  %7451 = vpow2.f32 %v1690_v29 }
 0x33d   : > { %5935 = vmatprep.mubr.msk.f32.mxu1 %vm1298_vm0, %v12164_v53 }
 0x340   : > { %5936 = vmatmul.mubr.msk.f32.gmra.mrb[158].mxu1 %vm1298_vm0, %v12164_v53 }
 0x357   : > { %v2247_v28 = vpop.f32.mrb[64].mxu1 }
 0x358   : > { %v9950_v17 = vadd.f32 %v2247_v28, %v12173_v23  ;;  %v2249_v7 = vpop.f32.mrb[65].mxu1  ;;  %v12182_v28 = vld [vmem:[#allocation83_spill] sm:$0xff] }
 0x359   : > { %v9953_v52 = vadd.f32 %v2249_v7, %v9345_v30 }
 0x35b   : > { %v2342_v35 = vmax.f32 %v9950_v17, %v9953_v52  ;;  %v2253_v3 = vpop.f32.mrb[66].mxu1 }
 0x35c   : > { %v9958_v4 = vadd.f32 %v2253_v3, %v12174_v0  ;;  %v2255_v27 = vpop.f32.mrb[67].mxu1  ;;  %v12184_v0 = vld [vmem:[#allocation84_spill] sm:$0xff] }
 0x35d   : > { %v9962_v56 = vadd.f32 %v2255_v27, %v12176_v47  ;;  %2343 = vmax.xlane.f32.xlu1 %v2342_v35  ;;  %v12183_v35 = vld [vmem:[#allocation81_spill] sm:$0xff]  ;;  %v1657_v47 = vsub.f32 %v12185_v58, %v1612_v61 }
 0x35e   : > { %v1656_v3 = vsub.f32 %v12183_v35, %v1612_v61  ;;  %v12188_v61 = vld [vmem:[#allocation86_spill] sm:$0xff]  ;;  %v12190_v35 = vld [vmem:[#allocation88_spill] sm:$0xff]  ;;  %v12192_v58 = vld [vmem:[#allocation89_spill] sm:$0xff] }
 0x35f   : > { %v2345_v30 = vmax.f32 %v9958_v4, %v9962_v56  ;;  %v2259_v8 = vpop.f32.mrb[68].mxu1  ;;  %v1659_v19 = vsub.f32 %v12188_v61, %v1615_v1  ;;  %v1621_v1 = vpop.xlane.xlu0 %1620 }
 0x360   : > { %v9968_v24 = vadd.f32 %v2259_v8, %v12178_v21  ;;  %v2261_v31 = vpop.f32.mrb[69].mxu1 }
 0x361   : > { %v9972_v5 = vadd.f32 %v2261_v31, %v12180_v13  ;;  %2346 = vmax.xlane.f32.xlu0 %v2345_v30  ;;  %v12186_v30 = vld [vmem:[#allocation87_spill] sm:$0xff]  ;;  %v1692_v31 = vmul.f32 1.442695, %v1656_v3  ;;  %v1694_v13 = vmul.f32 1.442695, %v1657_v47  ;;  %v1660_v3 = vsub.f32 %v12190_v35, %v1618_v14 }
 0x362   : > { %v1698_v29 = vmul.f32 1.442695, %v1659_v19  ;;  %v1661_v47 = vsub.f32 %v12192_v58, %v1618_v14 }
 0x363   : > { %v2348_v45 = vmax.f32 %v9968_v24, %v9972_v5  ;;  %v2265_v53 = vpop.f32.mrb[70].mxu1  ;;  %7453 = vpow2.f32 %v1692_v31  ;;  %v12193_v31 = vld [vmem:[#allocation94_spill] sm:$0xff]  ;;  %v1700_v61 = vmul.f32 1.442695, %v1660_v3  ;;  %v1627_v2 = vpop.xlane.xlu0 %1626 }
 0x364   : > { %v9978_v23 = vadd.f32 %v2265_v53, %v12182_v28  ;;  %v2267_v7 = vpop.f32.mrb[71].mxu1  ;;  %v12189_v53 = vld [vmem:[#allocation90_spill] sm:$0xff]  ;;  %7455 = vpow2.f32 %v1694_v13  ;;  %v1702_v14 = vmul.f32 1.442695, %v1661_v47  ;;  %v12197_v47 = vld [vmem:[#allocation95_spill] sm:$0xff] }
 0x365   : > { %v9982_v27 = vadd.f32 %v2267_v7, %v12184_v0  ;;  %2349 = vmax.xlane.f32.xlu1 %v2348_v45  ;;  %7457 = vpow2.f32 %v1696_v16 }
 0x366   : > { %7459 = vpow2.f32 %v1698_v29 }
 0x367   : > { %v2351_v12 = vmax.f32 %v9978_v23, %v9982_v27  ;;  %v2271_v26 = vpop.f32.mrb[72].mxu1  ;;  %7461 = vpow2.f32 %v1700_v61  ;;  %v1633_v42 = vpop.xlane.xlu0 %1632 }
 0x368   : > { %v9988_v8 = vadd.f32 %v2271_v26, %v12186_v30  ;;  %v2273_v21 = vpop.f32.mrb[73].mxu1  ;;  %7463 = vpow2.f32 %v1702_v14 }
 0x369   : > { %v9992_v60 = vadd.f32 %v2273_v21, %v9417_v62  ;;  %2352 = vmax.xlane.f32.xlu0 %v2351_v12  ;;  %v12191_v62 = vld [vmem:[#allocation91_spill] sm:$0xff]  ;;  %v10005_v12 = vpop.eup %7445 }
 0x36a   : > { %v10009_v21 = vpop.eup %7447 }
 0x36b   : > { %v2354_v55 = vmax.f32 %v9988_v8, %v9992_v60  ;;  %v2277_v45 = vpop.f32.mrb[74].mxu1  ;;  %v10019_v35 = vpop.eup %7449  ;;  %v1748_v16 = vadd.f32 %v10009_v21, %v10005_v12 }
 0x36c   : > { %v9998_v28 = vadd.f32 %v2277_v45, %v12189_v53  ;;  %v2279_v7 = vpop.f32.mrb[75].mxu1  ;;  %v12195_v45 = vld [vmem:[#allocation93_spill] sm:$0xff]  ;;  %v10025_v3 = vpop.eup %7451 }
 0x36d   : > { %v10002_v0 = vadd.f32 %v2279_v7, %v12191_v62  ;;  %2355 = vmax.xlane.f32.xlu1 %v2354_v55  ;;  %v12194_v55 = vld [vmem:[#allocation92_spill] sm:$0xff]  ;;  %v1663_v53 = vsub.f32 %v12195_v45, %v1621_v1  ;;  %v1624_v7 = vpop.xlane.xlu1 %1623  ;;  %v10035_v25 = vpop.eup %7453  ;;  %v1751_v61 = vadd.f32 %v10025_v3, %v10019_v35 }
 0x36e   : > { %v1662_v13 = vsub.f32 %v12194_v55, %v1621_v1  ;;  %v1664_v1 = vsub.f32 %v12197_v47, %v1624_v7  ;;  %v12199_v45 = vld [vmem:[#allocation96_spill] sm:$0xff]  ;;  %12200 = vst [vmem:[#allocation35_spill] sm:$0xff] %v10035_v25 }
 0x36f   : > { %v2357_v26 = vmax.f32 %v9998_v28, %v10002_v0  ;;  %v2283_v30 = vpop.f32.mrb[76].mxu1  ;;  %v1706_v55 = vmul.f32 1.442695, %v1663_v53  ;;  %v1665_v37 = vsub.f32 %v12199_v45, %v1624_v7  ;;  %v12203_v53 = vld [vmem:[#allocation99_spill] sm:$0xff]  ;;  %v12204_v45 = vld [vmem:[#allocation100_spill] sm:$0xff] }
 0x370   : > { %v10012_v11 = vadd.f32 %v2283_v30, %v12193_v31  ;;  %v2285_v43 = vpop.f32.mrb[77].mxu1  ;;  %v12196_v30 = vld [vmem:[#allocation97_spill] sm:$0xff]  ;;  %v1704_v29 = vmul.f32 1.442695, %v1662_v13  ;;  %v12198_v31 = vld [vmem:[#allocation98_spill] sm:$0xff]  ;;  %v10041_v13 = vpop.eup %7455  ;;  %v1666_v7 = vsub.f32 %v12203_v53, %v1627_v2  ;;  %v1667_v49 = vsub.f32 %v12204_v45, %v1627_v2  ;;  %v12209_v45 = vld [vmem:[#allocation103_spill] sm:$0xff] }
 0x371   : > { %v10016_v19 = vadd.f32 %v2285_v43, %v9455_v20  ;;  %2358 = vmax.xlane.f32.xlu0 %v2357_v26  ;;  %12201 = vst [vmem:[#allocation55_spill] sm:$0xff] %v10041_v13  ;;  %v1708_v14 = vmul.f32 1.442695, %v1664_v1  ;;  %v1630_v59 = vpop.xlane.xlu1 %1629  ;;  %v10051_v33 = vpop.eup %7457 }
 0x372   : > { %7465 = vpow2.f32 %v1704_v29  ;;  %12205 = vst [vmem:[#allocation49_spill] sm:$0xff] %v10051_v33  ;;  %v1754_v29 = vadd.f32 %v10041_v13, %v10035_v25  ;;  %v10057_v1 = vpop.eup %7459  ;;  %v1714_v53 = vmul.f32 1.442695, %v1667_v49  ;;  %v1669_v22 = vsub.f32 %v12209_v45, %v1630_v59  ;;  %v12214_v45 = vld [vmem:[#allocation106_spill] sm:$0xff] }
 0x373   : > { %v2360_v62 = vmax.f32 %v10012_v11, %v10016_v19  ;;  %v2289_v58 = vpop.f32.mrb[78].mxu1  ;;  %7467 = vpow2.f32 %v1706_v55  ;;  %12206 = vst [vmem:[#allocation38_spill] sm:$0xff] %v10057_v1  ;;  %v12207_v55 = vld [vmem:[#allocation102_spill] sm:$0xff]  ;;  %v10067_v51 = vpop.eup %7461  ;;  %v1671_v25 = vsub.f32 %v12214_v45, %v1633_v42 }
 0x374   : > { %v10028_v20 = vadd.f32 %v2289_v58, %v12196_v30  ;;  %v2291_v26 = vpop.f32.mrb[79].mxu1  ;;  %7469 = vpow2.f32 %v1708_v14  ;;  %v1668_v2 = vsub.f32 %v12207_v55, %v1630_v59  ;;  %12210 = vst [vmem:[#allocation60_spill] sm:$0xff] %v10067_v51  ;;  %v1757_v14 = vadd.f32 %v10057_v1, %v10051_v33 }
 0x375   : > { %v10032_v43 = vadd.f32 %v2291_v26, %v12198_v31  ;;  %2361 = vmax.xlane.f32.xlu1 %v2360_v62  ;;  %1749 = vadd.xlane.f32.xlu0 %v1748_v16  ;;  %v12202_v26 = vld [vmem:[#allocation101_spill] sm:$0xff]  ;;  %v1710_v31 = vmul.f32 1.442695, %v1665_v37  ;;  %v1712_v37 = vmul.f32 1.442695, %v1666_v7  ;;  %v10073_v7 = vpop.eup %7463  ;;  %v1636_v33 = vpop.xlane.xlu1 %1635 }
 0x376   : > { %12211 = vst [vmem:[#allocation57_spill] sm:$0xff] %v10073_v7  ;;  %v1716_v49 = vmul.f32 1.442695, %v1668_v2 }
 0x377   : > { %v2363_v58 = vmax.f32 %v10028_v20, %v10032_v43  ;;  %v2295_v30 = vpop.f32.mrb[80].mxu1  ;;  %7471 = vpow2.f32 %v1710_v31  ;;  %v12213_v31 = vld [vmem:[#allocation105_spill] sm:$0xff] }
 0x378   : > { %v10044_v47 = vadd.f32 %v2295_v30, %v12202_v26  ;;  %v2297_v62 = vpop.f32.mrb[81].mxu1  ;;  %7473 = vpow2.f32 %v1712_v37  ;;  %v1670_v59 = vsub.f32 %v12213_v31, %v1633_v42  ;;  %v1760_v37 = vadd.f32 %v10073_v7, %v10067_v51  ;;  %v12218_v31 = vld [vmem:[#allocation108_spill] sm:$0xff]  ;;  %v1639_v51 = vpop.xlane.xlu0 %1638 }
 0x379   : > { %v10048_v16 = vadd.f32 %v2297_v62, %v9491_v34  ;;  %2364 = vmax.xlane.f32.xlu1 %v2363_v58  ;;  %1752 = vadd.xlane.f32.xlu0 %v1751_v61  ;;  %v12208_v61 = vld [vmem:[#allocation104_spill] sm:$0xff]  ;;  %7475 = vpow2.f32 %v1714_v53  ;;  %v1672_v42 = vsub.f32 %v9534_v18, %v1636_v33  ;;  %v12217_v53 = vld [vmem:[#allocation109_spill] sm:$0xff]  ;;  %v1673_v45 = vsub.f32 %v12218_v31, %v1636_v33  ;;  %v12223_v31 = vld [vmem:[#allocation111_spill] sm:$0xff] }
 0x37a   : > { %7477 = vpow2.f32 %v1716_v49  ;;  %v1675_v13 = vsub.f32 %v12223_v31, %v1639_v51 }
 0x37b   : > { %v2366_v30 = vmax.f32 %v10044_v47, %v10048_v16  ;;  %v2301_v26 = vpop.f32.mrb[82].mxu1 }
 0x37c   : > { %v10060_v34 = vadd.f32 %v2301_v26, %v9504_v46  ;;  %v2303_v58 = vpop.f32.mrb[83].mxu1  ;;  %v10083_v1 = vpop.eup %7465 }
 0x37d   : > { %v10064_v62 = vadd.f32 %v2303_v58, %v12208_v61  ;;  %2367 = vmax.xlane.f32.xlu1 %v2366_v30  ;;  %1755 = vadd.xlane.f32.xlu0 %v1754_v29  ;;  %v12212_v58 = vld [vmem:[#allocation107_spill] sm:$0xff]  ;;  %v1718_v61 = vmul.f32 1.442695, %v1669_v22  ;;  %12215 = vst [vmem:[#allocation44_spill] sm:$0xff] %v10083_v1  ;;  %v10089_v2 = vpop.eup %7467  ;;  %v1720_v22 = vmul.f32 1.442695, %v1670_v59  ;;  %v1645_v31 = vpop.xlane.xlu0 %1644 }
 0x37e   : > { %12216 = vst [vmem:[#allocation66_spill] sm:$0xff] %v10089_v2  ;;  %v10099_v7 = vpop.eup %7469  ;;  %v1763_v49 = vadd.f32 %v10089_v2, %v10083_v1  ;;  %v12221_v59 = vld [vmem:[#allocation112_spill] sm:$0xff]  ;;  %v1642_v1 = vpop.xlane.xlu1 %1641 }
 0x37f   : > { %v2369_v46 = vmax.f32 %v10060_v34, %v10064_v62  ;;  %v2307_v26 = vpop.f32.mrb[84].mxu1  ;;  %7479 = vpow2.f32 %v1718_v61  ;;  %12219 = vst [vmem:[#allocation62_spill] sm:$0xff] %v10099_v7  ;;  %v12222_v61 = vld [vmem:[#allocation110_spill] sm:$0xff] }
 0x380   : > { %v10076_v55 = vadd.f32 %v2307_v26, %v12212_v58  ;;  %v2309_v30 = vpop.f32.mrb[85].mxu1  ;;  %7481 = vpow2.f32 %v1720_v22  ;;  %v1674_v33 = vsub.f32 %v12222_v61, %v1639_v51  ;;  %v1676_v51 = vsub.f32 %v9570_v41, %v1642_v1 }
 0x381   : > { %v10080_v29 = vadd.f32 %v2309_v30, %v9523_v40  ;;  %2370 = vmax.xlane.f32.xlu1 %v2369_v46  ;;  %1758 = vadd.xlane.f32.xlu0 %v1757_v14  ;;  %v1722_v30 = vmul.f32 1.442695, %v1671_v25  ;;  %v10105_v18 = vpop.eup %7471  ;;  %v1724_v25 = vmul.f32 1.442695, %v1672_v42 }
 0x382   : > { %12220 = vst [vmem:[#allocation22_spill] sm:$0xff] %v10105_v18  ;;  %v10115_v2 = vpop.eup %7473  ;;  %v1766_v22 = vadd.f32 %v10105_v18, %v10099_v7 }
 0x383   : > { %v2372_v26 = vmax.f32 %v10076_v55, %v10080_v29  ;;  %v2313_v58 = vpop.f32.mrb[86].mxu1  ;;  %7483 = vpow2.f32 %v1722_v30  ;;  %12224 = vst [vmem:[#allocation71_spill] sm:$0xff] %v10115_v2  ;;  %v10121_v42 = vpop.eup %7475  ;;  %v1728_v30 = vmul.f32 1.442695, %v1674_v33 }
 0x384   : > { %v10092_v40 = vadd.f32 %v2313_v58, %v9540_v48  ;;  %v2315_v46 = vpop.f32.mrb[87].mxu1  ;;  %12225 = vst [vmem:[#allocation67_spill] sm:$0xff] %v10121_v42  ;;  %7485 = vpow2.f32 %v1724_v25  ;;  %v10131_v7 = vpop.eup %7477  ;;  %v1769_v25 = vadd.f32 %v10121_v42, %v10115_v2 }
 0x385   : > { %v10096_v14 = vadd.f32 %v2315_v46, %v12217_v53  ;;  %2373 = vmax.xlane.f32.xlu1 %v2372_v26  ;;  %1761 = vadd.xlane.f32.xlu0 %v1760_v37  ;;  %v1726_v53 = vmul.f32 1.442695, %v1673_v45  ;;  %12227 = vst [vmem:[#allocation28_spill] sm:$0xff] %v10131_v7  ;;  %v1648_v2 = vpop.xlane.xlu1 %1647 }
 0x387   : > { %v2375_v48 = vmax.f32 %v10092_v40, %v10096_v14  ;;  %v2319_v58 = vpop.f32.mrb[88].mxu1  ;;  %7487 = vpow2.f32 %v1726_v53  ;;  %v12231_v53 = vld [vmem:[#allocation114_spill] sm:$0xff] }
 0x388   : > { %v10108_v46 = vadd.f32 %v2319_v58, %v12221_v59  ;;  %v2321_v26 = vpop.f32.mrb[89].mxu1  ;;  %7489 = vpow2.f32 %v1728_v30 }
 0x389   : > { %v10112_v37 = vadd.f32 %v2321_v26, %v9561_v10  ;;  %2376 = vmax.xlane.f32.xlu1 %v2375_v48  ;;  %1764 = vadd.xlane.f32.xlu0 %v1763_v49  ;;  %v1730_v49 = vmul.f32 1.442695, %v1675_v13  ;;  %v12226_v26 = vld [vmem:[#allocation113_spill] sm:$0xff]  ;;  %v10137_v41 = vpop.eup %7479  ;;  %v1732_v13 = vmul.f32 1.442695, %v1676_v51 }
 0x38a   : > { %v1677_v61 = vsub.f32 %v12226_v26, %v1642_v1  ;;  %12228 = vst [vmem:[#allocation27_spill] sm:$0xff] %v10137_v41  ;;  %v1678_v1 = vsub.f32 %v12231_v53, %v1645_v31  ;;  %v12233_v26 = vld [vmem:[#allocation115_spill] sm:$0xff]  ;;  %v10147_v42 = vpop.eup %7481  ;;  %v1772_v30 = vadd.f32 %v10137_v41, %v10131_v7  ;;  %v1651_v53 = vpop.xlane.xlu0 %1650  ;;  %v10274_v41 = vld [vmem:[%s9333_s28 + $0x50] sm:$0xff] }
 0x38b   : > { %v2378_v58 = vmax.f32 %v10108_v46, %v10112_v37  ;;  %v2325_v59 = vpop.f32.mrb[90].mxu1  ;;  %7491 = vpow2.f32 %v1730_v49  ;;  %v1679_v18 = vsub.f32 %v12233_v26, %v1645_v31  ;;  %12234 = vst [vmem:[#allocation31_spill] sm:$0xff] %v10147_v42 }
 0x38c   : > { %v10124_v10 = vadd.f32 %v2325_v59, %v9576_v39  ;;  %v2327_v48 = vpop.f32.mrb[91].mxu1  ;;  %7493 = vpow2.f32 %v1732_v13  ;;  %v1736_v49 = vmul.f32 1.442695, %v1678_v1 }
 0x38d   : > { %v10128_v45 = vadd.f32 %v2327_v48, %v9579_v9  ;;  %2379 = vmax.xlane.f32.xlu1 %v2378_v58  ;;  %1767 = vadd.xlane.f32.xlu0 %v1766_v22  ;;  %v12229_v9 = vld [vmem:[#allocation116_spill] sm:$0xff]  ;;  %v1734_v48 = vmul.f32 1.442695, %v1677_v61  ;;  %v10153_v51 = vpop.eup %7483  ;;  %v1680_v61 = vsub.f32 %v9610_v15, %v1648_v2 }
 0x38e   : > { %12235 = vst [vmem:[#allocation34_spill] sm:$0xff] %v10153_v51  ;;  %v10163_v26 = vpop.eup %7485  ;;  %v1775_v15 = vadd.f32 %v10153_v51, %v10147_v42  ;;  %v10214_v51 = vld [vmem:[%s9333_s28 + $0x20] sm:$0xff] }
 0x38f   : > { %v2381_v39 = vmax.f32 %v10124_v10, %v10128_v45  ;;  %v2331_v59 = vpop.f32.mrb[92].mxu1  ;;  %7495 = vpow2.f32 %v1734_v48  ;;  %12238 = vst [vmem:[#allocation36_spill] sm:$0xff] %v10163_v26  ;;  %v10179_v48 = vld [vmem:[%s9333_s28 + $0x8] sm:$0xff] }
 0x390   : > { %v10140_v33 = vadd.f32 %v2331_v59, %v12229_v9  ;;  %v2333_v58 = vpop.f32.mrb[93].mxu1  ;;  %7497 = vpow2.f32 %v1736_v49 }
 0x391   : > { %v10144_v22 = vadd.f32 %v2333_v58, %v9601_v36  ;;  %2382 = vmax.xlane.f32.xlu1 %v2381_v39  ;;  %1770 = vadd.xlane.f32.xlu0 %v1769_v25  ;;  %v1738_v25 = vmul.f32 1.442695, %v1679_v18  ;;  %v1681_v58 = vsub.f32 %v9615_v6, %v1648_v2  ;;  %v10169_v1 = vpop.eup %7487  ;;  %v1740_v6 = vmul.f32 1.442695, %v1680_v61 }
 0x392   : > { %12230 = vst [vmem:[#allocation14_spill] sm:$0xff] %v10140_v33  ;;  %12239 = vst [vmem:[#allocation52_spill] sm:$0xff] %v10169_v1  ;;  %v1682_v2 = vsub.f32 %v9628_v32, %v1651_v53  ;;  %v1778_v32 = vadd.f32 %v10169_v1, %v10163_v26 }
 0x393   : > { %12232 = vst [vmem:[#allocation30_spill] sm:$0xff] %v10144_v22  ;;  %v2384_v59 = vmax.f32 %v10140_v33, %v10144_v22  ;;  %v2337_v9 = vpop.f32.mrb[94].mxu1  ;;  %7499 = vpow2.f32 %v1738_v25  ;;  %v7859_v33 = vld [vmem:[%s9333_s28 + $0xf0] sm:$0xff] }
 0x394   : > { %v10156_v36 = vadd.f32 %v2337_v9, %v9620_v54  ;;  %v2339_v39 = vpop.f32.mrb[95].mxu1  ;;  %7501 = vpow2.f32 %v1740_v6 }
 0x395   : > { %v10160_v31 = vadd.f32 %v2339_v39, %v9623_v50  ;;  %2385 = vmax.xlane.f32.xlu1 %v2384_v59  ;;  %1773 = vadd.xlane.f32.xlu0 %v1772_v30  ;;  %v10172_v50 = vld [vmem:[%s9333_s28] sm:$0xff]  ;;  %v1742_v30 = vmul.f32 1.442695, %v1681_v58  ;;  %v1683_v39 = vsub.f32 %v9633_v57, %v1651_v53  ;;  %v1744_v57 = vmul.f32 1.442695, %v1682_v2  ;;  %v10200_v58 = vld [vmem:[%s9333_s28 + $0x18] sm:$0xff] }
 0x396   : > { %12236 = vst [vmem:[#allocation33_spill] sm:$0xff] %v10156_v36 }
 0x397   : > { %12237 = vst [vmem:[#allocation42_spill] sm:$0xff] %v10160_v31  ;;  %v2387_v54 = vmax.f32 %v10156_v36, %v10160_v31  ;;  %v3113_v13 = vpop.f32.mrb[96].mxu1  ;;  %7503 = vpow2.f32 %v1742_v30  ;;  %v10296_v31 = vld [vmem:[%s9333_s28 + $0x68] sm:$0xff] }
 0x398   : > { %v10175_v59 = vadd.f32 %v10172_v50, %v3113_v13  ;;  %v3115_v18 = vpop.f32.mrb[97].mxu1  ;;  %v10185_v13 = vpop.eup %7489  ;;  %7505 = vpow2.f32 %v1744_v57  ;;  %v10234_v57 = vld [vmem:[%s9333_s28 + $0x30] sm:$0xff]  ;;  %12263 = vst [vmem:[#allocation88_spill] sm:$0xff] %v10296_v31  ;;  %v7846_v36 = vld [vmem:[%s9333_s28 + $0x88] sm:$0xff] }
 0x399   : > { %v10182_v9 = vadd.f32 %v10179_v48, %v3115_v18  ;;  %2388 = vmax.xlane.f32.xlu1 %v2387_v54  ;;  %1776 = vadd.xlane.f32.xlu0 %v1775_v15  ;;  %12242 = vst [vmem:[#allocation46_spill] sm:$0xff] %v10185_v13  ;;  %v10191_v42 = vpop.eup %7491  ;;  %v10194_v18 = vld [vmem:[%s9333_s28 + $0x10] sm:$0xff]  ;;  %v1746_v15 = vmul.f32 1.442695, %v1683_v39  ;;  %v10220_v39 = vld [vmem:[%s9333_s28 + $0x28] sm:$0xff] }
 0x39a   : > { %12240 = vst [vmem:[#allocation41_spill] sm:$0xff] %v10175_v59  ;;  %12243 = vst [vmem:[#allocation63_spill] sm:$0xff] %v10191_v42  ;;  %v10205_v26 = vpop.eup %7493  ;;  %v1781_v6 = vadd.f32 %v10191_v42, %v10185_v13  ;;  %v10254_v42 = vld [vmem:[%s9333_s28 + $0x40] sm:$0xff] }
 0x39b   : > { %12241 = vst [vmem:[#allocation58_spill] sm:$0xff] %v10182_v9  ;;  %v3208_v49 = vmax.f32 %v10175_v59, %v10182_v9  ;;  %v3119_v61 = vpop.f32.mrb[98].mxu1  ;;  %12246 = vst [vmem:[#allocation72_spill] sm:$0xff] %v10205_v26  ;;  %v10211_v2 = vpop.eup %7495  ;;  %7507 = vpow2.f32 %v1746_v15  ;;  %v10240_v15 = vld [vmem:[%s9333_s28 + $0x38] sm:$0xff] }
 0x39c   : > { %v10197_v54 = vadd.f32 %v10194_v18, %v3119_v61  ;;  %v3121_v25 = vpop.f32.mrb[99].mxu1  ;;  %12247 = vst [vmem:[#allocation75_spill] sm:$0xff] %v10211_v2 }
 0x39d   : > { %v10203_v53 = vadd.f32 %v10200_v58, %v3121_v25  ;;  %3209 = vmax.xlane.f32.xlu1 %v3208_v49  ;;  %1779 = vadd.xlane.f32.xlu0 %v1778_v32  ;;  %v10225_v32 = vpop.eup %7497 }
 0x39e   : > { %12244 = vst [vmem:[#allocation51_spill] sm:$0xff] %v10197_v54  ;;  %12250 = vst [vmem:[#allocation74_spill] sm:$0xff] %v10225_v32  ;;  %v10231_v13 = vpop.eup %7499 }
 0x39f   : > { %12245 = vst [vmem:[#allocation68_spill] sm:$0xff] %v10203_v53  ;;  %v3211_v1 = vmax.f32 %v10197_v54, %v10203_v53  ;;  %v3125_v61 = vpop.f32.mrb[100].mxu1  ;;  %12251 = vst [vmem:[#allocation79_spill] sm:$0xff] %v10231_v13 }
 0x3a0   : > { %v10217_v25 = vadd.f32 %v10214_v51, %v3125_v61  ;;  %v3127_v30 = vpop.f32.mrb[101].mxu1  ;;  %v1784_v61 = vadd.f32 %v10211_v2, %v10205_v26  ;;  %v1787_v2 = vadd.f32 %v10231_v13, %v10225_v32 }
 0x3a1   : > { %v10223_v49 = vadd.f32 %v10220_v39, %v3127_v30  ;;  %3212 = vmax.xlane.f32.xlu1 %v3211_v1  ;;  %1782 = vadd.xlane.f32.xlu0 %v1781_v6 }
 0x3a2   : > { %12248 = vst [vmem:[#allocation73_spill] sm:$0xff] %v10217_v25 }
 0x3a3   : > { %12249 = vst [vmem:[#allocation76_spill] sm:$0xff] %v10223_v49  ;;  %v3214_v53 = vmax.f32 %v10217_v25, %v10223_v49  ;;  %v3131_v54 = vpop.f32.mrb[102].mxu1  ;;  %v10245_v49 = vpop.eup %7501 }
 0x3a4   : > { %v10237_v30 = vadd.f32 %v10234_v57, %v3131_v54  ;;  %v3133_v1 = vpop.f32.mrb[103].mxu1  ;;  %12254 = vst [vmem:[#allocation78_spill] sm:$0xff] %v10245_v49  ;;  %v10251_v54 = vpop.eup %7503 }
 0x3a5   : > { %v10243_v6 = vadd.f32 %v10240_v15, %v3133_v1  ;;  %3215 = vmax.xlane.f32.xlu1 %v3214_v53  ;;  %1785 = vadd.xlane.f32.xlu0 %v1784_v61  ;;  %12255 = vst [vmem:[#allocation83_spill] sm:$0xff] %v10251_v54  ;;  %v10260_v61 = vld [vmem:[%s9333_s28 + $0x48] sm:$0xff] }
 0x3a6   : > { %12252 = vst [vmem:[#allocation77_spill] sm:$0xff] %v10237_v30 }
 0x3a7   : > { %12253 = vst [vmem:[#allocation80_spill] sm:$0xff] %v10243_v6  ;;  %v3217_v25 = vmax.f32 %v10237_v30, %v10243_v6  ;;  %v3137_v26 = vpop.f32.mrb[104].mxu1  ;;  %v10265_v6 = vpop.eup %7505 }
 0x3a8   : > { %v10257_v1 = vadd.f32 %v10254_v42, %v3137_v26  ;;  %v3139_v53 = vpop.f32.mrb[105].mxu1  ;;  %12258 = vst [vmem:[#allocation82_spill] sm:$0xff] %v10265_v6  ;;  %v1790_v26 = vadd.f32 %v10251_v54, %v10245_v49  ;;  %v10271_v13 = vpop.eup %7507  ;;  %v10290_v54 = vld [vmem:[%s9333_s28 + $0x60] sm:$0xff] }
 0x3a9   : > { %v10263_v7 = vadd.f32 %v10260_v61, %v3139_v53  ;;  %3218 = vmax.xlane.f32.xlu1 %v3217_v25  ;;  %1788 = vadd.xlane.f32.xlu0 %v1787_v2  ;;  %12259 = vst [vmem:[#allocation87_spill] sm:$0xff] %v10271_v13  ;;  %v10280_v2 = vld [vmem:[%s9333_s28 + $0x58] sm:$0xff]  ;;  %v1793_v49 = vadd.f32 %v10271_v13, %v10265_v6 }
 0x3aa   : > { %12256 = vst [vmem:[#allocation81_spill] sm:$0xff] %v10257_v1  ;;  %v10310_v6 = vld [vmem:[%s9333_s28 + $0x78] sm:$0xff] }
 0x3ab   : > { %12257 = vst [vmem:[#allocation84_spill] sm:$0xff] %v10263_v7  ;;  %v3220_v30 = vmax.f32 %v10257_v1, %v10263_v7  ;;  %v3143_v32 = vpop.f32.mrb[106].mxu1  ;;  %12267 = vst [vmem:[#allocation92_spill] sm:$0xff] %v10310_v6 }
 0x3ac   : > { %v10277_v53 = vadd.f32 %v10274_v41, %v3143_v32  ;;  %v3145_v25 = vpop.f32.mrb[107].mxu1 }
 0x3ad   : > { %v10283_v9 = vadd.f32 %v10280_v2, %v3145_v25  ;;  %3221 = vmax.xlane.f32.xlu1 %v3220_v30  ;;  %1791 = vadd.xlane.f32.xlu0 %v1790_v26 }
 0x3ae   : > { %12260 = vst [vmem:[#allocation85_spill] sm:$0xff] %v10277_v53 }
 0x3af   : > { %12261 = vst [vmem:[#allocation86_spill] sm:$0xff] %v10283_v9  ;;  %v3223_v7 = vmax.f32 %v10277_v53, %v10283_v9  ;;  %v3149_v1 = vpop.f32.mrb[108].mxu1  ;;  %v10304_v9 = vld [vmem:[%s9333_s28 + $0x70] sm:$0xff] }
 0x3b0   : > { %v10293_v32 = vadd.f32 %v10290_v54, %v3149_v1  ;;  %v3151_v59 = vpop.f32.mrb[109].mxu1  ;;  %12265 = vst [vmem:[#allocation89_spill] sm:$0xff] %v10304_v9 }
 0x3b1   : > { %v10299_v30 = vadd.f32 %v10296_v31, %v3151_v59  ;;  %3224 = vmax.xlane.f32.xlu1 %v3223_v7  ;;  %1794 = vadd.xlane.f32.xlu0 %v1793_v49 }
 0x3b2   : > { %12262 = vst [vmem:[#allocation90_spill] sm:$0xff] %v10293_v32 }
 0x3b3   : > { %12264 = vst [vmem:[#allocation91_spill] sm:$0xff] %v10299_v30  ;;  %v3226_v26 = vmax.f32 %v10293_v32, %v10299_v30  ;;  %v3155_v25 = vpop.f32.mrb[110].mxu1  ;;  %v7845_v30 = vld [vmem:[%s9333_s28 + $0x80] sm:$0xff] }
 0x3b4   : > { %v10307_v1 = vadd.f32 %v10304_v9, %v3155_v25  ;;  %v3157_v53 = vpop.f32.mrb[111].mxu1 }
 0x3b5   : > { %v10313_v59 = vadd.f32 %v10310_v6, %v3157_v53  ;;  %3227 = vmax.xlane.f32.xlu1 %v3226_v26  ;;  %v7847_v6 = vld [vmem:[%s9333_s28 + $0x90] sm:$0xff] }
 0x3b6   : > { %12266 = vst [vmem:[#allocation94_spill] sm:$0xff] %v10307_v1 }
 0x3b7   : > { %12268 = vst [vmem:[#allocation93_spill] sm:$0xff] %v10313_v59  ;;  %v3229_v7 = vmax.f32 %v10307_v1, %v10313_v59  ;;  %v3161_v49 = vpop.f32.mrb[112].mxu1  ;;  %v7848_v1 = vld [vmem:[%s9333_s28 + $0x98] sm:$0xff] }
 0x3b8   : > { %v10318_v32 = vadd.f32 %v7845_v30, %v3161_v49  ;;  %v3163_v13 = vpop.f32.mrb[113].mxu1 }
 0x3b9   : > { %v10321_v25 = vadd.f32 %v7846_v36, %v3163_v13  ;;  %3230 = vmax.xlane.f32.xlu1 %v3229_v7  ;;  %v7849_v13 = vld [vmem:[%s9333_s28 + $0xa0] sm:$0xff] }
 0x3ba   : > { %12269 = vst [vmem:[#allocation97_spill] sm:$0xff] %v10318_v32 }
 0x3bb   : > { %12270 = vst [vmem:[#allocation95_spill] sm:$0xff] %v10321_v25  ;;  %v3232_v9 = vmax.f32 %v10318_v32, %v10321_v25  ;;  %v3167_v53 = vpop.f32.mrb[114].mxu1  ;;  %v7850_v25 = vld [vmem:[%s9333_s28 + $0xa8] sm:$0xff] }
 0x3bc   : > { %v10326_v26 = vadd.f32 %v7847_v6, %v3167_v53  ;;  %v3169_v59 = vpop.f32.mrb[115].mxu1 }
 0x3bd   : > { %v10329_v22 = vadd.f32 %v7848_v1, %v3169_v59  ;;  %3233 = vmax.xlane.f32.xlu1 %v3232_v9  ;;  %v7851_v59 = vld [vmem:[%s9333_s28 + $0xb0] sm:$0xff] }
 0x3be   : > { %12271 = vst [vmem:[#allocation98_spill] sm:$0xff] %v10326_v26 }
 0x3bf   : > { %12272 = vst [vmem:[#allocation96_spill] sm:$0xff] %v10329_v22  ;;  %v3235_v30 = vmax.f32 %v10326_v26, %v10329_v22  ;;  %v3173_v36 = vpop.f32.mrb[116].mxu1  ;;  %v7852_v22 = vld [vmem:[%s9333_s28 + $0xb8] sm:$0xff] }
 0x3c0   : > { %v10334_v7 = vadd.f32 %v7849_v13, %v3173_v36  ;;  %v3175_v49 = vpop.f32.mrb[117].mxu1  ;;  %v7853_v13 = vld [vmem:[%s9333_s28 + $0xc0] sm:$0xff] }
 0x3c1   : > { %v10337_v32 = vadd.f32 %v7850_v25, %v3175_v49  ;;  %3236 = vmax.xlane.f32.xlu1 %v3235_v30  ;;  %v12277_v30 = vld [vmem:[#allocation17_spill] sm:$0xff] }
 0x3c2   : > { %12273 = vst [vmem:[#allocation101_spill] sm:$0xff] %v10334_v7 }
 0x3c3   : > { %12274 = vst [vmem:[#allocation99_spill] sm:$0xff] %v10337_v32  ;;  %v3238_v6 = vmax.f32 %v10334_v7, %v10337_v32  ;;  %v3179_v1 = vpop.f32.mrb[118].mxu1 }
 0x3c4   : > { %v10342_v9 = vadd.f32 %v7851_v59, %v3179_v1  ;;  %v3181_v53 = vpop.f32.mrb[119].mxu1  ;;  %v7854_v59 = vld [vmem:[%s9333_s28 + $0xc8] sm:$0xff] }
 0x3c5   : > { %v10345_v26 = vadd.f32 %v7852_v22, %v3181_v53  ;;  %3239 = vmax.xlane.f32.xlu1 %v3238_v6  ;;  %v7855_v53 = vld [vmem:[%s9333_s28 + $0xd0] sm:$0xff] }
 0x3c6   : > { %12275 = vst [vmem:[#allocation100_spill] sm:$0xff] %v10342_v9 }
 0x3c7   : > { %12276 = vst [vmem:[#allocation102_spill] sm:$0xff] %v10345_v26  ;;  %v3241_v25 = vmax.f32 %v10342_v9, %v10345_v26  ;;  %v3185_v36 = vpop.f32.mrb[120].mxu1  ;;  %7181 = vrot.lane.b32.xlu0 %v12277_v30, %s7974_s17  ;;  %v7856_v30 = vld [vmem:[%s9333_s28 + $0xd8] sm:$0xff] }
 0x3c8   : > { %v10352_v49 = vadd.f32 %v7853_v13, %v3185_v36  ;;  %v3187_v1 = vpop.f32.mrb[121].mxu1 }
 0x3c9   : > { %v10355_v32 = vadd.f32 %v7854_v59, %v3187_v1  ;;  %3242 = vmax.xlane.f32.xlu1 %v3241_v25  ;;  %v7857_v1 = vld [vmem:[%s9333_s28 + $0xe0] sm:$0xff] }
 0x3ca   : > { %12278 = vst [vmem:[#allocation104_spill] sm:$0xff] %v10352_v49 }
 0x3cb   : > { %12279 = vst [vmem:[#allocation103_spill] sm:$0xff] %v10355_v32  ;;  %v3244_v22 = vmax.f32 %v10352_v49, %v10355_v32  ;;  %v3191_v6 = vpop.f32.mrb[122].mxu1  ;;  %v7858_v32 = vld [vmem:[%s9333_s28 + $0xe8] sm:$0xff] }
 0x3cc   : > { %v10360_v26 = vadd.f32 %v7855_v53, %v3191_v6  ;;  %v3193_v9 = vpop.f32.mrb[123].mxu1 }
 0x3cd   : > { %v10363_v7 = vadd.f32 %v7856_v30, %v3193_v9  ;;  %3245 = vmax.xlane.f32.xlu1 %v3244_v22  ;;  %v7860_v22 = vld [vmem:[%s9333_s28 + $0xf8] sm:$0xff] }
 0x3ce   : > { %12280 = vst [vmem:[#allocation107_spill] sm:$0xff] %v10360_v26 }
 0x3cf   : > { %12281 = vst [vmem:[#allocation105_spill] sm:$0xff] %v10363_v7  ;;  %v3247_v36 = vmax.f32 %v10360_v26, %v10363_v7  ;;  %v3197_v13 = vpop.f32.mrb[124].mxu1 }
 0x3d0   : > { %v10368_v25 = vadd.f32 %v7857_v1, %v3197_v13  ;;  %v3199_v59 = vpop.f32.mrb[125].mxu1 }
 0x3d1   : > { %v10371_v49 = vadd.f32 %v7858_v32, %v3199_v59  ;;  %3248 = vmax.xlane.f32.xlu1 %v3247_v36 }
 0x3d2   : > { %12282 = vst [vmem:[#allocation106_spill] sm:$0xff] %v10368_v25 }
 0x3d3   : > { %12283 = vst [vmem:[#allocation109_spill] sm:$0xff] %v10371_v49  ;;  %v3250_v6 = vmax.f32 %v10368_v25, %v10371_v49  ;;  %v3203_v53 = vpop.f32.mrb[126].mxu1 }
 0x3d4   : > { %v10376_v9 = vadd.f32 %v7859_v33, %v3203_v53  ;;  %v3205_v30 = vpop.f32.mrb[127].mxu1 }
 0x3d5   : > { %v10379_v31 = vadd.f32 %v7860_v22, %v3205_v30  ;;  %3251 = vmax.xlane.f32.xlu1 %v3250_v6 }
 0x3d6   : > { %12284 = vst [vmem:[#allocation108_spill] sm:$0xff] %v10376_v9 }
 0x3d7   : > { %12285 = vst [vmem:[#allocation112_spill] sm:$0xff] %v10379_v31  ;;  %v3253_v13 = vmax.f32 %v10376_v9, %v10379_v31  ;;  %v3947_v1 = vpop.f32.mrb[128].mxu1 }
 0x3d8   : > { %v10384_v32 = vadd.f32 %v10172_v50, %v3947_v1  ;;  %v3949_v36 = vpop.f32.mrb[129].mxu1 }
 0x3d9   : > { %v10387_v59 = vadd.f32 %v10179_v48, %v3949_v36  ;;  %3254 = vmax.xlane.f32.xlu1 %v3253_v13 }
 0x3da   : > { %12286 = vst [vmem:[#allocation110_spill] sm:$0xff] %v10384_v32 }
 0x3db   : > { %12287 = vst [vmem:[#allocation111_spill] sm:$0xff] %v10387_v59  ;;  %v4042_v33 = vmax.f32 %v10384_v32, %v10387_v59  ;;  %v3953_v53 = vpop.f32.mrb[130].mxu1 }
 0x3dc   : > { %v10392_v30 = vadd.f32 %v10194_v18, %v3953_v53  ;;  %v3955_v6 = vpop.f32.mrb[131].mxu1 }
 0x3dd   : > { %v10395_v22 = vadd.f32 %v10200_v58, %v3955_v6  ;;  %4043 = vmax.xlane.f32.xlu1 %v4042_v33 }
 0x3de   : > { %12288 = vst [vmem:[#allocation113_spill] sm:$0xff] %v10392_v30 }
 0x3df   : > { %12289 = vst [vmem:[#allocation116_spill] sm:$0xff] %v10395_v22  ;;  %v4045_v50 = vmax.f32 %v10392_v30, %v10395_v22  ;;  %v3959_v1 = vpop.f32.mrb[132].mxu1 }
 0x3e0   : > { %v10400_v48 = vadd.f32 %v10214_v51, %v3959_v1  ;;  %v3961_v13 = vpop.f32.mrb[133].mxu1 }
 0x3e1   : > { %v10403_v36 = vadd.f32 %v10220_v39, %v3961_v13  ;;  %4046 = vmax.xlane.f32.xlu1 %v4045_v50 }
 0x3e2   : > { %12290 = vst [vmem:[#allocation114_spill] sm:$0xff] %v10400_v48 }
 0x3e3   : > { %12291 = vst [vmem:[#allocation115_spill] sm:$0xff] %v10403_v36  ;;  %v4048_v18 = vmax.f32 %v10400_v48, %v10403_v36  ;;  %v3965_v53 = vpop.f32.mrb[134].mxu1 }
 0x3e4   : > { %v10408_v58 = vadd.f32 %v10234_v57, %v3965_v53  ;;  %v3967_v33 = vpop.f32.mrb[135].mxu1 }
 0x3e5   : > { %v10411_v6 = vadd.f32 %v10240_v15, %v3967_v33  ;;  %4049 = vmax.xlane.f32.xlu1 %v4048_v18 }
 0x3e6   : > { %12292 = vst [vmem:[#allocation117_spill] sm:$0xff] %v10408_v58 }
 0x3e7   : > { %12293 = vst [vmem:[#allocation118_spill] sm:$0xff] %v10411_v6  ;;  %v4051_v51 = vmax.f32 %v10408_v58, %v10411_v6  ;;  %v3971_v1 = vpop.f32.mrb[136].mxu1 }
 0x3e8   : > { %v10416_v39 = vadd.f32 %v10254_v42, %v3971_v1  ;;  %v3973_v50 = vpop.f32.mrb[137].mxu1 }
 0x3e9   : > { %v10419_v13 = vadd.f32 %v10260_v61, %v3973_v50  ;;  %4052 = vmax.xlane.f32.xlu1 %v4051_v51 }
 0x3ea   : > { %12294 = vst [vmem:[#allocation119_spill] sm:$0xff] %v10416_v39  ;;  %v2344_v36 = vpop.xlane.xlu1 %2343 }
 0x3eb   : > { %12295 = vst [vmem:[#allocation120_spill] sm:$0xff] %v10419_v13  ;;  %v4054_v57 = vmax.f32 %v10416_v39, %v10419_v13  ;;  %v2390_v15 = vsub.f32 %v9950_v17, %v2344_v36  ;;  %v2391_v18 = vsub.f32 %v9953_v52, %v2344_v36  ;;  %v3977_v53 = vpop.f32.mrb[138].mxu1 }
 0x3ec   : > { %v10426_v33 = vadd.f32 %v10274_v41, %v3977_v53  ;;  %v3979_v6 = vpop.f32.mrb[139].mxu1 }
 0x3ed   : > { %v2422_v42 = vmul.f32 1.442695, %v2390_v15  ;;  %v2424_v1 = vmul.f32 1.442695, %v2391_v18  ;;  %v10429_v58 = vadd.f32 %v10280_v2, %v3979_v6  ;;  %4055 = vmax.xlane.f32.xlu1 %v4054_v57 }
 0x3ee   : > { %12296 = vst [vmem:[#allocation121_spill] sm:$0xff] %v10426_v33  ;;  %v2347_v61 = vpop.xlane.xlu0 %2346 }
 0x3ef   : > { %12297 = vst [vmem:[#allocation122_spill] sm:$0xff] %v10429_v58  ;;  %7509 = vpow2.f32 %v2422_v42  ;;  %v4057_v51 = vmax.f32 %v10426_v33, %v10429_v58  ;;  %v2392_v17 = vsub.f32 %v9958_v4, %v2347_v61  ;;  %v2393_v52 = vsub.f32 %v9962_v56, %v2347_v61  ;;  %v10435_v36 = vpop.f32.mrb[140].mxu1 }
 0x3f0   : > { %7511 = vpow2.f32 %v2424_v1  ;;  %v10437_v41 = vpop.f32.mrb[141].mxu1 }
 0x3f1   : > { %v2426_v50 = vmul.f32 1.442695, %v2392_v17  ;;  %v2428_v15 = vmul.f32 1.442695, %v2393_v52  ;;  %4058 = vmax.xlane.f32.xlu1 %v4057_v51 }
 0x3f2   : > { %v2350_v2 = vpop.xlane.xlu1 %2349 }
 0x3f3   : > { %7513 = vpow2.f32 %v2426_v50  ;;  %v2394_v6 = vsub.f32 %v9968_v24, %v2350_v2  ;;  %v2395_v57 = vsub.f32 %v9972_v5, %v2350_v2  ;;  %v10441_v18 = vpop.f32.mrb[142].mxu1 }
 0x3f4   : > { %7515 = vpow2.f32 %v2428_v15  ;;  %v10443_v4 = vpop.f32.mrb[143].mxu1 }
 0x3f5   : > { %v2430_v56 = vmul.f32 1.442695, %v2394_v6  ;;  %v2432_v53 = vmul.f32 1.442695, %v2395_v57 }
 0x3f6   : > { %v2353_v42 = vpop.xlane.xlu0 %2352 }
 0x3f7   : > { %7517 = vpow2.f32 %v2430_v56  ;;  %v2396_v1 = vsub.f32 %v9978_v23, %v2353_v42  ;;  %v2397_v61 = vsub.f32 %v9982_v27, %v2353_v42  ;;  %v10447_v51 = vpop.f32.mrb[144].mxu1 }
 0x3f8   : > { %7519 = vpow2.f32 %v2432_v53  ;;  %v10449_v17 = vpop.f32.mrb[145].mxu1 }
 0x3f9   : > { %v10451_v24 = vpop.eup %7509  ;;  %v2434_v5 = vmul.f32 1.442695, %v2396_v1  ;;  %v2436_v52 = vmul.f32 1.442695, %v2397_v61 }
 0x3fa   : > { %v10453_v50 = vpop.eup %7511  ;;  %v2356_v15 = vpop.xlane.xlu1 %2355 }
 0x3fb   : > { %7521 = vpow2.f32 %v2434_v5  ;;  %v2398_v2 = vsub.f32 %v9988_v8, %v2356_v15  ;;  %v2399_v6 = vsub.f32 %v9992_v60, %v2356_v15  ;;  %v10457_v23 = vpop.f32.mrb[146].mxu1  ;;  %v2486_v57 = vadd.f32 %v10453_v50, %v10451_v24 }
 0x3fc   : > { %7523 = vpow2.f32 %v2436_v52  ;;  %v10459_v27 = vpop.f32.mrb[147].mxu1 }
 0x3fd   : > { %v10463_v56 = vpop.eup %7513  ;;  %v2438_v53 = vmul.f32 1.442695, %v2398_v2  ;;  %v2440_v42 = vmul.f32 1.442695, %v2399_v6  ;;  %2487 = vadd.xlane.f32.xlu0 %v2486_v57  ;;  %v12298_v57 = vld [vmem:[#allocation43_spill] sm:$0xff] }
 0x3fe   : > { %v10465_v1 = vpop.eup %7515  ;;  %v2359_v61 = vpop.xlane.xlu0 %2358 }
 0x3ff   : > { %7525 = vpow2.f32 %v2438_v53  ;;  %v2400_v8 = vsub.f32 %v9998_v28, %v2359_v61  ;;  %v2401_v60 = vsub.f32 %v10002_v0, %v2359_v61  ;;  %v10469_v5 = vpop.f32.mrb[148].mxu1  ;;  %v2489_v15 = vadd.f32 %v10465_v1, %v10463_v56 }
 0x400   : > { %7527 = vpow2.f32 %v2440_v42  ;;  %v10471_v52 = vpop.f32.mrb[149].mxu1 }
 0x401   : > { %v10475_v58 = vpop.eup %7517  ;;  %v2442_v2 = vmul.f32 1.442695, %v2400_v8  ;;  %v2444_v6 = vmul.f32 1.442695, %v2401_v60  ;;  %2490 = vadd.xlane.f32.xlu0 %v2489_v15 }
 0x402   : > { %v10477_v33 = vpop.eup %7519  ;;  %7176 = vrot.lane.b32.xlu1 %v12298_v57, %s7974_s17  ;;  %v2362_v28 = vpop.xlane.xlu1 %2361 }
 0x403   : > { %v1750_v0 = vpop.xlane.xlu0 %1749  ;;  %7529 = vpow2.f32 %v2442_v2  ;;  %v2402_v53 = vsub.f32 %v10012_v11, %v2362_v28  ;;  %v2403_v42 = vsub.f32 %v10016_v19, %v2362_v28  ;;  %v10483_v61 = vpop.f32.mrb[150].mxu1  ;;  %v2492_v8 = vadd.f32 %v10477_v33, %v10475_v58 }
 0x404   : > { %7531 = vpow2.f32 %v2444_v6  ;;  %v10485_v13 = vpop.f32.mrb[151].mxu1 }
 0x405   : > { %v10489_v60 = vpop.eup %7521  ;;  %v2446_v15 = vmul.f32 1.442695, %v2402_v53  ;;  %v2448_v39 = vmul.f32 1.442695, %v2403_v42  ;;  %7533 = vrcp.f32 %v1750_v0  ;;  %2493 = vadd.xlane.f32.xlu0 %v2492_v8 }
 0x406   : > { %v10491_v48 = vpop.eup %7523  ;;  %v2365_v2 = vpop.xlane.xlu1 %2364 }
 0x407   : > { %v1753_v11 = vpop.xlane.xlu0 %1752  ;;  %7535 = vpow2.f32 %v2446_v15  ;;  %v2404_v19 = vsub.f32 %v10028_v20, %v2365_v2  ;;  %v2405_v6 = vsub.f32 %v10032_v43, %v2365_v2  ;;  %v10495_v28 = vpop.f32.mrb[152].mxu1  ;;  %v2495_v53 = vadd.f32 %v10491_v48, %v10489_v60  ;;  %v12301_v15 = vld [vmem:[#allocation56_spill] sm:$0xff]  ;;  %v12302_v43 = vld [vmem:[#allocation59_spill] sm:$0xff] }
 0x408   : > { %12299 = vst [vmem:[#allocation123_spill] sm:$0xff] %v10495_v28  ;;  %7537 = vpow2.f32 %v2448_v39  ;;  %v10497_v22 = vpop.f32.mrb[153].mxu1  ;;  %v6984_v59 = vunpack.i.h.bf16 %v12301_v15  ;;  %v6983_v20 = vunpack.i.l.bf16 %v12301_v15  ;;  %v7004_v2 = vunpack.i.h.bf16 %v12302_v43 }
 0x409   : > { %12300 = vst [vmem:[#allocation124_spill] sm:$0xff] %v10497_v22  ;;  %v10501_v42 = vpop.eup %7525  ;;  %v2450_v0 = vmul.f32 1.442695, %v2404_v19  ;;  %v2452_v30 = vmul.f32 1.442695, %v2405_v6  ;;  %7539 = vrcp.f32 %v1753_v11  ;;  %v7003_v39 = vunpack.i.l.bf16 %v12302_v43  ;;  %2496 = vadd.xlane.f32.xlu0 %v2495_v53 }
 0x40a   : > { %v10503_v8 = vpop.eup %7527  ;;  %v2368_v32 = vpop.xlane.xlu1 %2367  ;;  %v7148_v22 = vunpack.i.l.bf16 %v9923_v63 }
 0x40b   : > { %v1756_v57 = vpop.xlane.xlu0 %1755  ;;  %7541 = vpow2.f32 %v2450_v0  ;;  %v2406_v31 = vsub.f32 %v10044_v47, %v2368_v32  ;;  %v2407_v19 = vsub.f32 %v10048_v16, %v2368_v32  ;;  %v10511_v6 = vpop.f32.mrb[154].mxu1  ;;  %v2498_v15 = vadd.f32 %v10503_v8, %v10501_v42 }
 0x40c   : > { %12303 = vst [vmem:[#allocation56_spill] sm:$0xff] %v10511_v6  ;;  %7543 = vpow2.f32 %v2452_v30  ;;  %v10513_v11 = vpop.f32.mrb[155].mxu1  ;;  %v6547_v0 = vpack.c.bf16 %v6984_v59, %v6983_v20  ;;  %v10521_v26 = vpack.c.bf16 %v7004_v2, %v7003_v39  ;;  %v7144_v30 = vunpack.i.h.bf16 %v9913_v38  ;;  %v12307_v39 = vld [vmem:[#allocation61_spill] sm:$0xff] }
 0x40d   : > { %12304 = vst [vmem:[#allocation59_spill] sm:$0xff] %v10513_v11  ;;  %v10517_v9 = vpop.eup %7529  ;;  %v2454_v7 = vmul.f32 1.442695, %v2406_v31  ;;  %v2456_v43 = vmul.f32 1.442695, %v2407_v19  ;;  %7545 = vrcp.f32 %v1756_v57  ;;  %2499 = vadd.xlane.f32.xlu0 %v2498_v15  ;;  %v7143_v31 = vunpack.i.l.bf16 %v9913_v38  ;;  %v12308_v38 = vld [vmem:[#allocation65_spill] sm:$0xff] }
 0x40e   : > { %v10519_v53 = vpop.eup %7531  ;;  %v2371_v47 = vpop.xlane.xlu1 %2370  ;;  %v7023_v15 = vunpack.i.l.bf16 %v12307_v39 }
 0x40f   : > { %v1759_v16 = vpop.xlane.xlu0 %1758  ;;  %v7534_v32 = vpop.eup %7533  ;;  %7547 = vpow2.f32 %v2454_v7  ;;  %v2408_v49 = vsub.f32 %v10060_v34, %v2371_v47  ;;  %v2409_v25 = vsub.f32 %v10064_v62, %v2371_v47  ;;  %v2501_v59 = vadd.f32 %v10519_v53, %v10517_v9 }
 0x410   : > { %v10526_v11 = vpop.f32.mrb[156].mxu1  ;;  %7549 = vpow2.f32 %v2456_v43  ;;  %v1813_v20 = vmul.f32 %v7534_v32, %v10009_v21  ;;  %v7024_v7 = vunpack.i.h.bf16 %v12307_v39  ;;  %v7044_v43 = vunpack.i.h.bf16 %v12308_v38 }
 0x411   : > { %12305 = vst [vmem:[#allocation125_spill] sm:$0xff] %v10526_v11  ;;  %v10529_v57 = vpop.f32.mrb[157].mxu1  ;;  %v10534_v2 = vpop.eup %7535  ;;  %v2458_v19 = vmul.f32 1.442695, %v2408_v49  ;;  %v2460_v34 = vmul.f32 1.442695, %v2409_v25  ;;  %7551 = vrcp.f32 %v1759_v16  ;;  %v7149_v47 = vunpack.i.h.bf16 %v9923_v63  ;;  %2502 = vadd.xlane.f32.xlu0 %v2501_v59 }
 0x412   : > { %12306 = vst [vmem:[#allocation126_spill] sm:$0xff] %v10529_v57  ;;  %v10537_v62 = vpop.eup %7537  ;;  %1908 = vmatprep.mubr.f32.mxu0 %v1813_v20  ;;  %v1812_v57 = vmul.f32 %v7534_v32, %v10005_v12  ;;  %v2374_v21 = vpop.xlane.xlu1 %2373  ;;  %v6549_v39 = vpack.c.bf16 %v7144_v30, %v7143_v31  ;;  %v7043_v63 = vunpack.i.l.bf16 %v12308_v38  ;;  %v7154_v30 = vunpack.i.h.bf16 %v9929_v44 }
 0x413   : > { %v1762_v11 = vpop.xlane.xlu0 %1761  ;;  %v7540_v6 = vpop.eup %7539  ;;  %7553 = vpow2.f32 %v2458_v19  ;;  %v2410_v49 = vsub.f32 %v10076_v55, %v2374_v21  ;;  %v2411_v25 = vsub.f32 %v10080_v29, %v2374_v21  ;;  %v2504_v12 = vadd.f32 %v10537_v62, %v10534_v2 }
 0x414   : > { %v10546_v16 = vpop.f32.mrb[158].mxu1  ;;  %7555 = vpow2.f32 %v2460_v34  ;;  %1909 = vmatmul.mubr.f32.vlgmr.msra.gmra.mrb[48].mxu0 %v1812_v57  ;;  %v1815_v32 = vmul.f32 %v7540_v6, %v10025_v3  ;;  %v6555_v19 = vpack.c.bf16 %v7024_v7, %v7023_v15  ;;  %v7153_v31 = vunpack.i.l.bf16 %v9929_v44  ;;  %v12311_v44 = vld [vmem:[#allocation55_spill] sm:$0xff] }
 0x415   : > { %12309 = vst [vmem:[#allocation61_spill] sm:$0xff] %v10546_v16  ;;  %v10548_v28 = vpop.f32.mrb[159].mxu1  ;;  %v10553_v59 = vpop.eup %7541  ;;  %6548 = vmatpush3.bf16.msra.mxu0 %v6547_v0  ;;  %v2462_v55 = vmul.f32 1.442695, %v2410_v49  ;;  %v2464_v20 = vmul.f32 1.442695, %v2411_v25  ;;  %7557 = vrcp.f32 %v1762_v11  ;;  %2505 = vadd.xlane.f32.xlu0 %v2504_v12  ;;  %v1814_v57 = vmul.f32 %v7540_v6, %v10019_v35 }
 0x416   : > { %12310 = vst [vmem:[#allocation65_spill] sm:$0xff] %v10548_v28  ;;  %v10556_v29 = vpop.eup %7543  ;;  %6550 = vmatprep.subr.bf16.mxu0 %v6549_v39  ;;  %v2377_v3 = vpop.xlane.xlu1 %2376  ;;  %1913 = vmatprep.mubr.f32.mxu0 %v1815_v32  ;;  %v6553_v38 = vpack.c.bf16 %v7149_v47, %v7148_v22  ;;  %v12312_v49 = vld [vmem:[#allocation35_spill] sm:$0xff]  ;;  %v6559_v6 = vpack.c.bf16 %v7044_v43, %v7043_v63  ;;  %v12314_v32 = vld [vmem:[#allocation64_spill] sm:$0xff] }
 0x417   : > { %v1765_v34 = vpop.xlane.xlu0 %1764  ;;  %v7546_v21 = vpop.eup %7545  ;;  %7559 = vpow2.f32 %v2462_v55  ;;  %v2412_v0 = vsub.f32 %v10092_v40, %v2377_v3  ;;  %v2413_v11 = vsub.f32 %v10096_v14, %v2377_v3  ;;  %v2507_v7 = vadd.f32 %v10556_v29, %v10553_v59  ;;  %v12313_v14 = vld [vmem:[#allocation70_spill] sm:$0xff] }
 0x418   : > { %7561 = vpow2.f32 %v2464_v20  ;;  %1914 = vmatmul.mubr.f32.gmra.mrb[50].mxu0 %v1814_v57  ;;  %v1817_v15 = vmul.f32 %v7546_v21, %v12311_v44  ;;  %v1816_v25 = vmul.f32 %v7546_v21, %v12312_v49  ;;  %v7064_v22 = vunpack.i.h.bf16 %v12313_v14  ;;  %v12316_v44 = vld [vmem:[#allocation49_spill] sm:$0xff]  ;;  %v12317_v49 = vld [vmem:[#allocation19_spill] sm:$0xff] }
 0x419   : > { %v10567_v35 = vpop.eup %7547  ;;  %6552 = vmatpush3.bf16.msra.mxu0 %v10521_v26  ;;  %v2466_v39 = vmul.f32 1.442695, %v2412_v0  ;;  %v2468_v12 = vmul.f32 1.442695, %v2413_v11  ;;  %7563 = vrcp.f32 %v1765_v34  ;;  %v7063_v47 = vunpack.i.l.bf16 %v12313_v14  ;;  %2508 = vadd.xlane.f32.xlu0 %v2507_v7  ;;  %v12315_v0 = vld [vmem:[#allocation38_spill] sm:$0xff] }
 0x41a   : > { %v10570_v40 = vpop.eup %7549  ;;  %v7159_v55 = vunpack.i.h.bf16 %v12314_v32  ;;  %v7158_v20 = vunpack.i.l.bf16 %v12314_v32  ;;  %6554 = vmatprep.subr.bf16.mxu0 %v6553_v38  ;;  %v2380_v57 = vpop.xlane.xlu1 %2379  ;;  %1918 = vmatprep.mubr.f32.mxu0 %v1817_v15  ;;  %v6557_v21 = vpack.c.bf16 %v7154_v30, %v7153_v31  ;;  %v7114_v14 = vunpack.i.h.bf16 %v12317_v49  ;;  %v12318_v32 = vld [vmem:[#allocation32_spill] sm:$0xff] }
 0x41b   : > { %v1768_v3 = vpop.xlane.xlu0 %1767  ;;  %v7552_v43 = vpop.eup %7551  ;;  %7565 = vpow2.f32 %v2466_v39  ;;  %v2414_v26 = vsub.f32 %v10108_v46, %v2380_v57  ;;  %v2415_v63 = vsub.f32 %v10112_v37, %v2380_v57  ;;  %v2510_v34 = vadd.f32 %v10570_v40, %v10567_v35 }
 0x41c   : > { %7567 = vpow2.f32 %v2468_v12  ;;  %1919 = vmatmul.mubr.f32.gmra.mrb[52].mxu0 %v1816_v25  ;;  %v1819_v11 = vmul.f32 %v7552_v43, %v12315_v0  ;;  %v1818_v38 = vmul.f32 %v7552_v43, %v12316_v44  ;;  %v7113_v37 = vunpack.i.l.bf16 %v12317_v49 }
 0x41d   : > { %v10582_v7 = vpop.eup %7553  ;;  %6556 = vmatpush3.bf16.msra.mxu0 %v6555_v19  ;;  %v2470_v15 = vmul.f32 1.442695, %v2414_v26  ;;  %v2472_v39 = vmul.f32 1.442695, %v2415_v63  ;;  %7569 = vrcp.f32 %v1768_v3  ;;  %v7164_v12 = vunpack.i.h.bf16 %v12318_v32  ;;  %2511 = vadd.xlane.f32.xlu0 %v2510_v34  ;;  %v12320_v34 = vld [vmem:[#allocation57_spill] sm:$0xff] }
 0x41e   : > { %v10585_v46 = vpop.eup %7555  ;;  %v7163_v30 = vunpack.i.l.bf16 %v12318_v32  ;;  %6558 = vmatprep.subr.bf16.mxu0 %v6557_v21  ;;  %v2383_v31 = vpop.xlane.xlu1 %2382  ;;  %v6561_v25 = vpack.c.bf16 %v7159_v55, %v7158_v20  ;;  %1923 = vmatprep.mubr.f32.mxu0 %v1819_v11  ;;  %v10596_v63 = vadd.f32 %v10290_v54, %v10435_v36  ;;  %v12321_v55 = vld [vmem:[#allocation60_spill] sm:$0xff]  ;;  %v6563_v54 = vpack.c.bf16 %v7064_v22, %v7063_v47  ;;  %v12327_v47 = vld [vmem:[#allocation66_spill] sm:$0xff] }
 0x41f   : > { %v1771_v57 = vpop.xlane.xlu0 %1770  ;;  %v7558_v43 = vpop.eup %7557  ;;  %7571 = vpow2.f32 %v2470_v15  ;;  %v2416_v19 = vsub.f32 %v10124_v10, %v2383_v31  ;;  %v2417_v3 = vsub.f32 %v10128_v45, %v2383_v31  ;;  %v2513_v26 = vadd.f32 %v10585_v46, %v10582_v7  ;;  %v12322_v11 = vld [vmem:[#allocation88_spill] sm:$0xff]  ;;  %v12324_v15 = vld [vmem:[#allocation69_spill] sm:$0xff] }
 0x420   : > { %12319 = vst [vmem:[#allocation55_spill] sm:$0xff] %v10596_v63  ;;  %7573 = vpow2.f32 %v2472_v39  ;;  %1924 = vmatmul.mubr.f32.gmra.mrb[54].mxu0 %v1818_v38  ;;  %v1821_v21 = vmul.f32 %v7558_v43, %v12320_v34  ;;  %v1820_v20 = vmul.f32 %v7558_v43, %v12321_v55  ;;  %v10604_v10 = vadd.f32 %v12322_v11, %v10437_v41  ;;  %v12325_v41 = vld [vmem:[#allocation14_spill] sm:$0xff] }
 0x421   : > { %v10600_v0 = vpop.eup %7559  ;;  %6560 = vmatpush3.bf16.msra.mxu0 %v6559_v6  ;;  %v2474_v45 = vmul.f32 1.442695, %v2416_v19  ;;  %v2476_v44 = vmul.f32 1.442695, %v2417_v3  ;;  %7575 = vrcp.f32 %v1771_v57  ;;  %v6567_v36 = vpack.c.bf16 %v7114_v14, %v7113_v37  ;;  %2514 = vadd.xlane.f32.xlu0 %v2513_v26  ;;  %v12326_v19 = vld [vmem:[#allocation30_spill] sm:$0xff]  ;;  %v12328_v37 = vld [vmem:[#allocation44_spill] sm:$0xff] }
 0x422   : > { %12323 = vst [vmem:[#allocation35_spill] sm:$0xff] %v10604_v10  ;;  %v10606_v49 = vpop.eup %7561  ;;  %v7169_v38 = vunpack.i.h.bf16 %v12324_v15  ;;  %v7168_v39 = vunpack.i.l.bf16 %v12324_v15  ;;  %6562 = vmatprep.subr.bf16.mxu0 %v6561_v25  ;;  %v2386_v32 = vpop.xlane.xlu1 %2385  ;;  %1928 = vmatprep.mubr.f32.mxu0 %v1821_v21  ;;  %v6565_v22 = vpack.c.bf16 %v7164_v12, %v7163_v30  ;;  %v4060_v34 = vmax.f32 %v10596_v63, %v10604_v10  ;;  %v12330_v12 = vld [vmem:[#allocation39_spill] sm:$0xff]  ;;  %v12335_v10 = vld [vmem:[#allocation29_spill] sm:$0xff] }
 0x423   : > { %v1774_v31 = vpop.xlane.xlu0 %1773  ;;  %v7564_v43 = vpop.eup %7563  ;;  %7577 = vpow2.f32 %v2474_v45  ;;  %v2418_v6 = vsub.f32 %v12325_v41, %v2386_v32  ;;  %v2419_v3 = vsub.f32 %v12326_v19, %v2386_v32  ;;  %v2516_v57 = vadd.f32 %v10606_v49, %v10600_v0  ;;  %v12329_v45 = vld [vmem:[#allocation37_spill] sm:$0xff] }
 0x424   : > { %7579 = vpow2.f32 %v2476_v44  ;;  %1929 = vmatmul.mubr.f32.gmra.mrb[56].mxu0 %v1820_v20  ;;  %v1823_v14 = vmul.f32 %v7564_v43, %v12327_v47  ;;  %v1822_v25 = vmul.f32 %v7564_v43, %v12328_v37  ;;  %v7119_v15 = vunpack.i.h.bf16 %v12329_v45  ;;  %v12333_v37 = vld [vmem:[#allocation22_spill] sm:$0xff] }
 0x425   : > { %v10616_v26 = vpop.eup %7565  ;;  %6564 = vmatpush3.bf16.msra.mxu0 %v6563_v54  ;;  %v2478_v21 = vmul.f32 1.442695, %v2418_v6  ;;  %v2480_v55 = vmul.f32 1.442695, %v2419_v3  ;;  %7581 = vrcp.f32 %v1774_v31  ;;  %v7118_v20 = vunpack.i.l.bf16 %v12329_v45  ;;  %2517 = vadd.xlane.f32.xlu0 %v2516_v57  ;;  %v12331_v54 = vld [vmem:[#allocation33_spill] sm:$0xff]  ;;  %v12332_v6 = vld [vmem:[#allocation42_spill] sm:$0xff] }
 0x426   : > { %v10620_v11 = vpop.eup %7567  ;;  %v7174_v30 = vunpack.i.h.bf16 %v12330_v12  ;;  %v7173_v44 = vunpack.i.l.bf16 %v12330_v12  ;;  %6566 = vmatprep.subr.bf16.mxu0 %v6565_v22  ;;  %v2389_v32 = vpop.xlane.xlu1 %2388  ;;  %1933 = vmatprep.mubr.f32.mxu0 %v1823_v14  ;;  %v6569_v47 = vpack.c.bf16 %v7169_v38, %v7168_v39  ;;  %v12334_v22 = vld [vmem:[#allocation62_spill] sm:$0xff]  ;;  %v7138_v38 = vunpack.i.l.bf16 %v12335_v10 }
 0x427   : > { %v1777_v43 = vpop.xlane.xlu0 %1776  ;;  %v7570_v41 = vpop.eup %7569  ;;  %7583 = vpow2.f32 %v2478_v21  ;;  %4061 = vmax.xlane.f32.xlu1 %v4060_v34  ;;  %v2420_v31 = vsub.f32 %v12331_v54, %v2389_v32  ;;  %v2421_v19 = vsub.f32 %v12332_v6, %v2389_v32  ;;  %v2519_v3 = vadd.f32 %v10620_v11, %v10616_v26  ;;  %v12336_v6 = vld [vmem:[#allocation15_spill] sm:$0xff] }
 0x428   : > { %7585 = vpow2.f32 %v2480_v55  ;;  %1934 = vmatmul.mubr.f32.gmra.mrb[58].mxu0 %v1822_v25  ;;  %v1825_v45 = vmul.f32 %v7570_v41, %v12333_v37  ;;  %v1824_v57 = vmul.f32 %v7570_v41, %v12334_v22  ;;  %v7139_v21 = vunpack.i.h.bf16 %v12335_v10  ;;  %v12339_v37 = vld [vmem:[#allocation67_spill] sm:$0xff] }
 0x429   : > { %v10632_v12 = vpop.eup %7571  ;;  %6568 = vmatpush3.bf16.msra.mxu0 %v6567_v36  ;;  %v2482_v14 = vmul.f32 1.442695, %v2420_v31  ;;  %v2484_v34 = vmul.f32 1.442695, %v2421_v19  ;;  %7587 = vrcp.f32 %v1777_v43  ;;  %v6571_v32 = vpack.c.bf16 %v7119_v15, %v7118_v20  ;;  %2520 = vadd.xlane.f32.xlu0 %v2519_v3  ;;  %v12337_v36 = vld [vmem:[#allocation41_spill] sm:$0xff]  ;;  %v12338_v19 = vld [vmem:[#allocation58_spill] sm:$0xff] }
 0x42a   : > { %v10635_v54 = vpop.eup %7573  ;;  %v7124_v63 = vunpack.i.h.bf16 %v12336_v6  ;;  %v7123_v25 = vunpack.i.l.bf16 %v12336_v6  ;;  %6570 = vmatprep.subr.bf16.mxu0 %v6569_v47  ;;  %v3210_v39 = vpop.xlane.xlu1 %3209  ;;  %1938 = vmatprep.mubr.f32.mxu0 %v1825_v45  ;;  %v6573_v20 = vpack.c.bf16 %v7174_v30, %v7173_v44  ;;  %v12340_v10 = vld [vmem:[#allocation71_spill] sm:$0xff]  ;;  %v6625_v44 = vpack.c.bf16 %v7139_v21, %v7138_v38  ;;  %v12343_v38 = vld [vmem:[#allocation34_spill] sm:$0xff] }
 0x42b   : > { %v1780_v55 = vpop.xlane.xlu0 %1779  ;;  %v7576_v41 = vpop.eup %7575  ;;  %7589 = vpow2.f32 %v2482_v14  ;;  %v3256_v31 = vsub.f32 %v12337_v36, %v3210_v39  ;;  %v3257_v43 = vsub.f32 %v12338_v19, %v3210_v39  ;;  %v2522_v15 = vadd.f32 %v10635_v54, %v10632_v12 }
 0x42c   : > { %7591 = vpow2.f32 %v2484_v34  ;;  %1939 = vmatmul.mubr.f32.gmra.mrb[60].mxu0 %v1824_v57  ;;  %v1827_v22 = vmul.f32 %v7576_v41, %v12339_v37  ;;  %v1826_v47 = vmul.f32 %v7576_v41, %v12340_v10  ;;  %v6575_v57 = vpack.c.bf16 %v7124_v63, %v7123_v25  ;;  %v12344_v37 = vld [vmem:[#allocation31_spill] sm:$0xff] }
 0x42d   : > { %v10646_v3 = vpop.eup %7577  ;;  %6572 = vmatpush3.bf16.msra.mxu0 %v6571_v32  ;;  %v3288_v6 = vmul.f32 1.442695, %v3256_v31  ;;  %v3290_v14 = vmul.f32 1.442695, %v3257_v43  ;;  %7593 = vrcp.f32 %v1780_v55  ;;  %2523 = vadd.xlane.f32.xlu0 %v2522_v15  ;;  %v12341_v32 = vld [vmem:[#allocation27_spill] sm:$0xff]  ;;  %v12342_v55 = vld [vmem:[#allocation28_spill] sm:$0xff] }
 0x42e   : > { %v10648_v45 = vpop.eup %7579  ;;  %6574 = vmatprep.subr.bf16.mxu0 %v6573_v20  ;;  %v10650_v39 = vpop.xlane.xlu1 %3212  ;;  %1943 = vmatprep.mubr.f32.mxu0 %v1827_v22 }
 0x42f   : > { %v1783_v36 = vpop.xlane.xlu0 %1782  ;;  %v7582_v34 = vpop.eup %7581  ;;  %7595 = vpow2.f32 %v3288_v6  ;;  %v2525_v30 = vadd.f32 %v10648_v45, %v10646_v3 }
 0x430   : > { %7597 = vpow2.f32 %v3290_v14  ;;  %1944 = vmatmul.mubr.f32.gmra.mrb[62].mxu0 %v1826_v47  ;;  %v1829_v41 = vmul.f32 %v7582_v34, %v12341_v32  ;;  %v1828_v31 = vmul.f32 %v7582_v34, %v12342_v55  ;;  %v12347_v32 = vld [vmem:[#allocation36_spill] sm:$0xff] }
 0x431   : > { %v10656_v19 = vpop.eup %7583  ;;  %6576 = vmatpush3.bf16.msra.mxu0 %v6575_v57  ;;  %7599 = vrcp.f32 %v1783_v36  ;;  %2526 = vadd.xlane.f32.xlu0 %v2525_v30  ;;  %v12345_v57 = vld [vmem:[#allocation45_spill] sm:$0xff]  ;;  %v12346_v30 = vld [vmem:[#allocation52_spill] sm:$0xff] }
 0x432   : > { %v10658_v43 = vpop.eup %7585  ;;  %6626 = vmatprep.subr.bf16.mxu0 %v6625_v44  ;;  %v10660_v63 = vpop.xlane.xlu1 %3215  ;;  %1948 = vmatprep.mubr.f32.mxu0 %v1829_v41 }
 0x433   : > { %v1786_v25 = vpop.xlane.xlu0 %1785  ;;  %v7588_v15 = vpop.eup %7587  ;;  %v2528_v21 = vadd.f32 %v10658_v43, %v10656_v19 }
 0x434   : > { %1949 = vmatmul.mubr.f32.gmra.mrb[64].mxu0 %v1828_v31  ;;  %v1831_v20 = vmul.f32 %v7588_v15, %v12343_v38  ;;  %v1830_v22 = vmul.f32 %v7588_v15, %v12344_v37  ;;  %7601 = vrcp.f32 %v1786_v25 }
 0x435   : > { %v10666_v10 = vpop.eup %7589  ;;  %2529 = vadd.xlane.f32.xlu0 %v2528_v21 }
 0x436   : > { %v10668_v47 = vpop.eup %7591  ;;  %1953 = vmatprep.mubr.f32.mxu0 %v1831_v20  ;;  %v10670_v6 = vpop.xlane.xlu1 %3218  ;;  %v12349_v20 = vld [vmem:[#allocation63_spill] sm:$0xff] }
 0x437   : > { %v1789_v14 = vpop.xlane.xlu0 %1788  ;;  %v7594_v36 = vpop.eup %7593  ;;  %v2531_v34 = vadd.f32 %v10668_v47, %v10666_v10 }
 0x438   : > { %1954 = vmatmul.mubr.f32.gmra.mrb[66].mxu0 %v1830_v22  ;;  %7186 = vrot.lane.b32.xlu1 %v12345_v57, %s7974_s17  ;;  %v1833_v44 = vmul.f32 %v7594_v36, %v12346_v30  ;;  %v1832_v41 = vmul.f32 %v7594_v36, %v12347_v32  ;;  %7603 = vrcp.f32 %v1789_v14  ;;  %v12350_v22 = vld [vmem:[#allocation46_spill] sm:$0xff]  ;;  %v12353_v57 = vld [vmem:[#allocation72_spill] sm:$0xff] }
 0x439   : > { %v10678_v55 = vpop.eup %7595  ;;  %2532 = vadd.xlane.f32.xlu0 %v2531_v34 }
 0x43a   : > { %12348 = vst [vmem:[#allocation70_spill] sm:$0xff] %v10678_v55  ;;  %v10680_v31 = vpop.eup %7597  ;;  %1958 = vmatprep.mubr.f32.mxu0 %v1833_v44  ;;  %v10682_v25 = vpop.xlane.xlu1 %3221  ;;  %v12352_v44 = vld [vmem:[#allocation75_spill] sm:$0xff] }
 0x43b   : > { %v1792_v15 = vpop.xlane.xlu0 %1791  ;;  %v7600_v21 = vpop.eup %7599  ;;  %v3352_v38 = vadd.f32 %v10680_v31, %v10678_v55 }
 0x43c   : > { %1959 = vmatmul.mubr.f32.gmra.mrb[68].mxu0 %v1832_v41  ;;  %v1835_v37 = vmul.f32 %v7600_v21, %v12349_v20  ;;  %v1834_v30 = vmul.f32 %v7600_v21, %v12350_v22  ;;  %7605 = vrcp.f32 %v1792_v15  ;;  %v12354_v20 = vld [vmem:[#allocation79_spill] sm:$0xff]  ;;  %v12355_v15 = vld [vmem:[#allocation74_spill] sm:$0xff] }
 0x43d   : > { %3353 = vadd.xlane.f32.xlu0 %v3352_v38 }
 0x43e   : > { %1963 = vmatprep.mubr.f32.mxu0 %v1835_v37  ;;  %v10688_v14 = vpop.xlane.xlu1 %3224  ;;  %v7602_v34 = vpop.eup %7601 }
 0x43f   : > { %12351 = vst [vmem:[#allocation64_spill] sm:$0xff] %v10688_v14  ;;  %v1795_v36 = vpop.xlane.xlu0 %1794  ;;  %v1837_v32 = vmul.f32 %v7602_v34, %v12352_v44  ;;  %v1836_v28 = vmul.f32 %v7602_v34, %v12353_v57  ;;  %v12358_v44 = vld [vmem:[#allocation78_spill] sm:$0xff]  ;;  %v12360_v34 = vld [vmem:[#allocation87_spill] sm:$0xff] }
 0x440   : > { %1964 = vmatmul.mubr.f32.gmra.mrb[70].mxu0 %v1834_v30  ;;  %7607 = vrcp.f32 %v1795_v36  ;;  %v12357_v30 = vld [vmem:[#allocation83_spill] sm:$0xff] }
 0x441   : > { %1968 = vmatprep.mubr.f32.mxu0 %v1837_v32  ;;  %v12361_v32 = vld [vmem:[#allocation82_spill] sm:$0xff] }
 0x442   : > { %v10692_v55 = vpop.xlane.xlu1 %3227  ;;  %v7604_v41 = vpop.eup %7603 }
 0x443   : > { %v1839_v21 = vmul.f32 %v7604_v41, %v12354_v20  ;;  %v1838_v38 = vmul.f32 %v7604_v41, %v12355_v15  ;;  %v12363_v15 = vld [vmem:[#allocation18_spill] sm:$0xff] }
 0x444   : > { %1969 = vmatmul.mubr.f32.gmra.mrb[72].mxu0 %v1836_v28 }
 0x445   : > { %1973 = vmatprep.mubr.f32.mxu0 %v1839_v21 }
 0x446   : > { %v10696_v37 = vpop.xlane.xlu1 %3230  ;;  %v7606_v22 = vpop.eup %7605 }
 0x447   : > { %12356 = vst [vmem:[#allocation38_spill] sm:$0xff] %v10696_v37  ;;  %v1841_v16 = vmul.f32 %v7606_v22, %v12357_v30  ;;  %v1840_v14 = vmul.f32 %v7606_v22, %v12358_v44  ;;  %v12366_v22 = vld [vmem:[#allocation92_spill] sm:$0xff] }
 0x448   : > { %1974 = vmatmul.mubr.f32.gmra.mrb[74].mxu0 %v1838_v38  ;;  %v12364_v38 = vld [vmem:[#allocation89_spill] sm:$0xff] }
 0x449   : > { %1978 = vmatprep.mubr.f32.mxu0 %v1841_v16  ;;  %v10712_v16 = vadd.f32 %v12364_v38, %v10441_v18 }
 0x44a   : > { %v10700_v57 = vpop.xlane.xlu1 %3233  ;;  %v7608_v36 = vpop.eup %7607 }
 0x44b   : > { %12359 = vst [vmem:[#allocation49_spill] sm:$0xff] %v10700_v57  ;;  %v1843_v28 = vmul.f32 %v7608_v36, %v12360_v34  ;;  %v1842_v20 = vmul.f32 %v7608_v36, %v12361_v32  ;;  %12365 = vst [vmem:[#allocation32_spill] sm:$0xff] %v10712_v16  ;;  %v12369_v34 = vld [vmem:[#allocation51_spill] sm:$0xff]  ;;  %v12370_v32 = vld [vmem:[#allocation68_spill] sm:$0xff] }
 0x44c   : > { %1979 = vmatmul.mubr.f32.gmra.mrb[76].mxu0 %v1840_v14  ;;  %v10716_v14 = vadd.f32 %v12366_v22, %v10443_v4 }
 0x44d   : > { %1983 = vmatprep.mubr.f32.mxu0 %v1843_v28  ;;  %v3258_v28 = vsub.f32 %v12369_v34, %v10650_v39  ;;  %v12374_v34 = vld [vmem:[#allocation48_spill] sm:$0xff] }
 0x44e   : > { %v10704_v41 = vpop.xlane.xlu1 %3236  ;;  %12367 = vst [vmem:[#allocation57_spill] sm:$0xff] %v10716_v14  ;;  %v4063_v44 = vmax.f32 %v10712_v16, %v10716_v14 }
 0x44f   : > { %12362 = vst [vmem:[#allocation19_spill] sm:$0xff] %v10704_v41  ;;  %v3292_v38 = vmul.f32 1.442695, %v3258_v28 }
 0x450   : > { %1984 = vmatmul.mubr.f32.gmra.mrb[78].mxu0 %v1842_v20  ;;  %v3259_v20 = vsub.f32 %v12370_v32, %v10650_v39 }
 0x451   : > { %7609 = vpow2.f32 %v3292_v38 }
 0x452   : > { %v10706_v21 = vpop.xlane.xlu1 %3239 }
 0x453   : > { %7191 = vrot.lane.b32.xlu0 %v12363_v15, %s7974_s17  ;;  %v3294_v15 = vmul.f32 1.442695, %v3259_v20  ;;  %v7182_v20 = vpop.permute.xlu0 %7181 }
 0x455   : > { %7611 = vpow2.f32 %v3294_v15 }
 0x456   : > { %v10718_v30 = vpop.xlane.xlu1 %3242 }
 0x457   : > { %12368 = vst [vmem:[#allocation60_spill] sm:$0xff] %v10718_v30 }
 0x45a   : > { %v10722_v36 = vpop.xlane.xlu1 %3245 }
 0x45b   : > { %v10734_v14 = vpop.eup %7609 }
 0x45c   : > { %4064 = vmax.xlane.f32.xlu1 %v4063_v44  ;;  %12373 = vst [vmem:[#allocation14_spill] sm:$0xff] %v10734_v14 }
 0x45e   : > { %v10728_v18 = vpop.xlane.xlu1 %3248 }
 0x45f   : > { %12371 = vst [vmem:[#allocation88_spill] sm:$0xff] %v10728_v18  ;;  %v10738_v16 = vpop.eup %7611 }
 0x460   : > { %12375 = vst [vmem:[#allocation30_spill] sm:$0xff] %v10738_v16  ;;  %v3355_v44 = vadd.f32 %v10738_v16, %v10734_v14 }
 0x462   : > { %v10730_v4 = vpop.xlane.xlu1 %3251 }
 0x466   : > { %v10732_v22 = vpop.xlane.xlu1 %3254 }
 0x467   : > { %12372 = vst [vmem:[#allocation69_spill] sm:$0xff] %v10732_v22  ;;  %v12381_v22 = vld [vmem:[#allocation20_spill] sm:$0xff] }
 0x46a   : > { %v10740_v39 = vpop.xlane.xlu1 %4043 }
 0x46b   : > { %12376 = vst [vmem:[#allocation66_spill] sm:$0xff] %v10740_v39  ;;  %v7862_v39 = vld [vmem:[%s9333_s28 + $0x88] sm:$0xff] }
 0x46c   : > { %v10760_v14 = vadd.f32 %v7862_v39, %v10449_v17  ;;  %v12387_v39 = vld [vmem:[#allocation47_spill] sm:$0xff] }
 0x46d   : > { %7196 = vrot.lane.b32.xlu1 %v12374_v34, %s7974_s17  ;;  %v7861_v34 = vld [vmem:[%s9333_s28 + $0x80] sm:$0xff] }
 0x46e   : > { %v10744_v28 = vpop.xlane.xlu1 %4046  ;;  %v10756_v18 = vadd.f32 %v7861_v34, %v10447_v51  ;;  %12383 = vst [vmem:[#allocation22_spill] sm:$0xff] %v10760_v14 }
 0x46f   : > { %12377 = vst [vmem:[#allocation44_spill] sm:$0xff] %v10744_v28 }
 0x470   : > { %12382 = vst [vmem:[#allocation42_spill] sm:$0xff] %v10756_v18 }
 0x472   : > { %3356 = vadd.xlane.f32.xlu0 %v3355_v44  ;;  %v10746_v32 = vpop.xlane.xlu1 %4049 }
 0x473   : > { %12378 = vst [vmem:[#allocation37_spill] sm:$0xff] %v10746_v32 }
 0x476   : > { %v10748_v15 = vpop.xlane.xlu1 %4052 }
 0x477   : > { %12379 = vst [vmem:[#allocation39_spill] sm:$0xff] %v10748_v15  ;;  %v4066_v15 = vmax.f32 %v10756_v18, %v10760_v14 }
 0x47a   : > { %v10750_v38 = vpop.xlane.xlu1 %4055 }
 0x47b   : > { %12380 = vst [vmem:[#allocation33_spill] sm:$0xff] %v10750_v38  ;;  %v12385_v38 = vld [vmem:[#allocation73_spill] sm:$0xff] }
 0x47c   : > { %v3260_v32 = vsub.f32 %v12385_v38, %v10660_v63 }
 0x47e   : > { %v10762_v16 = vpop.xlane.xlu1 %4058  ;;  %v3296_v34 = vmul.f32 1.442695, %v3260_v32  ;;  %v7183_v32 = vunpack.i.l.bf16 %v7182_v20 }
 0x47f   : > { %12384 = vst [vmem:[#allocation62_spill] sm:$0xff] %v10762_v16  ;;  %v7128_v16 = vunpack.i.l.bf16 %v12387_v39 }
 0x482   : > { %v7177_v30 = vpop.permute.xlu1 %7176 }
 0x483   : > { %v7179_v14 = vunpack.i.h.bf16 %v7177_v30  ;;  %v7178_v18 = vunpack.i.l.bf16 %v7177_v30 }
 0x488   : > { %7201 = vrot.lane.b32.xlu0 %v12381_v22, %s7974_s17  ;;  %v12386_v22 = vld [vmem:[#allocation76_spill] sm:$0xff] }
 0x489   : > { %v3261_v51 = vsub.f32 %v12386_v22, %v10660_v63  ;;  %v7184_v22 = vunpack.i.h.bf16 %v7182_v20 }
 0x48a   : > { %v2488_v44 = vpop.xlane.xlu0 %2487 }
 0x48b   : > { %7613 = vrcp.f32 %v2488_v44  ;;  %v7129_v44 = vunpack.i.h.bf16 %v12387_v39  ;;  %v3298_v41 = vmul.f32 1.442695, %v3261_v51 }
 0x48d   : > { %v6627_v63 = vpack.c.bf16 %v7129_v44, %v7128_v16 }
 0x48e   : > { %v2491_v28 = vpop.xlane.xlu0 %2490 }
 0x48f   : > { %7615 = vrcp.f32 %v2491_v28 }
 0x491   : > { %4067 = vmax.xlane.f32.xlu1 %v4066_v15 }
 0x492   : > { %v2494_v17 = vpop.xlane.xlu0 %2493 }
 0x493   : > { %7617 = vrcp.f32 %v2494_v17  ;;  %v6629_v17 = vpack.c.bf16 %v7179_v14, %v7178_v18 }
 0x494   : > { %7619 = vpow2.f32 %v3296_v34 }
 0x495   : > { %v7614_v57 = vpop.eup %7613 }
 0x496   : > { %v2497_v38 = vpop.xlane.xlu0 %2496  ;;  %v2551_v28 = vmul.f32 %v7614_v57, %v10453_v50  ;;  %v2550_v37 = vmul.f32 %v7614_v57, %v10451_v24  ;;  %v6631_v50 = vpack.c.bf16 %v7184_v22, %v7183_v32 }
 0x497   : > { %7621 = vrcp.f32 %v2497_v38 }
 0x498   : > { %7623 = vpow2.f32 %v3298_v41  ;;  %2774 = vmatprep.mubr.f32.mxu0 %v2551_v28 }
 0x499   : > { %v7616_v15 = vpop.eup %7615  ;;  %2775 = vmatmul.mubr.f32.vlgmr.msra.gmra.mrb[80].mxu0 %v2550_v37 }
 0x49a   : > { %6628 = vmatpush3.bf16.msra.mxu0 %v6627_v63  ;;  %v2500_v51 = vpop.xlane.xlu0 %2499  ;;  %v2553_v39 = vmul.f32 %v7616_v15, %v10465_v1  ;;  %v2552_v30 = vmul.f32 %v7616_v15, %v10463_v56  ;;  %v12388_v56 = vld [vmem:[#allocation21_spill] sm:$0xff] }
 0x49b   : > { %6630 = vmatprep.subr.bf16.mxu0 %v6629_v17  ;;  %7625 = vrcp.f32 %v2500_v51 }
 0x49c   : > { %2779 = vmatprep.mubr.f32.mxu0 %v2553_v39 }
 0x49d   : > { %v7618_v24 = vpop.eup %7617  ;;  %2780 = vmatmul.mubr.f32.gmra.mrb[82].mxu0 %v2552_v30 }
 0x49e   : > { %6632 = vmatpush3.bf16.msra.mxu0 %v6631_v50  ;;  %v2503_v57 = vpop.xlane.xlu0 %2502  ;;  %v2555_v41 = vmul.f32 %v7618_v24, %v10477_v33  ;;  %v2554_v16 = vmul.f32 %v7618_v24, %v10475_v58  ;;  %v10778_v37 = vpop.eup %7619 }
 0x49f   : > { %7627 = vrcp.f32 %v2503_v57 }
 0x4a0   : > { %2784 = vmatprep.mubr.f32.mxu0 %v2555_v41 }
 0x4a1   : > { %v7622_v14 = vpop.eup %7621  ;;  %2785 = vmatmul.mubr.f32.gmra.mrb[84].mxu0 %v2554_v16 }
 0x4a2   : > { %7206 = vrot.lane.b32.xlu1 %v12388_v56, %s7974_s17  ;;  %v10782_v1 = vpop.eup %7623  ;;  %v2506_v18 = vpop.xlane.xlu0 %2505  ;;  %v2557_v20 = vmul.f32 %v7622_v14, %v10491_v48  ;;  %v2556_v34 = vmul.f32 %v7622_v14, %v10489_v60 }
 0x4a3   : > { %7629 = vrcp.f32 %v2506_v18  ;;  %v3358_v58 = vadd.f32 %v10782_v1, %v10778_v37 }
 0x4a4   : > { %2789 = vmatprep.mubr.f32.mxu0 %v2557_v20 }
 0x4a5   : > { %v7626_v33 = vpop.eup %7625  ;;  %2790 = vmatmul.mubr.f32.gmra.mrb[86].mxu0 %v2556_v34 }
 0x4a6   : > { %v2509_v44 = vpop.xlane.xlu0 %2508  ;;  %v2559_v38 = vmul.f32 %v7626_v33, %v10503_v8  ;;  %v2558_v28 = vmul.f32 %v7626_v33, %v10501_v42 }
 0x4a7   : > { %7631 = vrcp.f32 %v2509_v44  ;;  %3359 = vadd.xlane.f32.xlu0 %v3358_v58  ;;  %v7863_v58 = vld [vmem:[%s9333_s28 + $0x90] sm:$0xff] }
 0x4a8   : > { %2794 = vmatprep.mubr.f32.mxu0 %v2559_v38  ;;  %v10808_v44 = vadd.f32 %v7863_v58, %v10457_v23  ;;  %v12391_v23 = vld [vmem:[#allocation77_spill] sm:$0xff] }
 0x4a9   : > { %v7628_v63 = vpop.eup %7627  ;;  %2795 = vmatmul.mubr.f32.gmra.mrb[88].mxu0 %v2558_v28 }
 0x4aa   : > { %v2512_v48 = vpop.xlane.xlu0 %2511  ;;  %v2561_v60 = vmul.f32 %v7628_v63, %v10519_v53  ;;  %v2560_v22 = vmul.f32 %v7628_v63, %v10517_v9 }
 0x4ab   : > { %7633 = vrcp.f32 %v2512_v48 }
 0x4ac   : > { %2799 = vmatprep.mubr.f32.mxu0 %v2561_v60 }
 0x4ad   : > { %v7630_v32 = vpop.eup %7629  ;;  %2800 = vmatmul.mubr.f32.gmra.mrb[90].mxu0 %v2560_v22 }
 0x4ae   : > { %v2515_v15 = vpop.xlane.xlu0 %2514  ;;  %v2563_v17 = vmul.f32 %v7630_v32, %v10537_v62  ;;  %v2562_v8 = vmul.f32 %v7630_v32, %v10534_v2 }
 0x4af   : > { %7635 = vrcp.f32 %v2515_v15 }
 0x4b0   : > { %2804 = vmatprep.mubr.f32.mxu0 %v2563_v17 }
 0x4b1   : > { %v7632_v42 = vpop.eup %7631  ;;  %2805 = vmatmul.mubr.f32.gmra.mrb[92].mxu0 %v2562_v8 }
 0x4b2   : > { %v2518_v51 = vpop.xlane.xlu0 %2517  ;;  %v2565_v39 = vmul.f32 %v7632_v42, %v10556_v29  ;;  %v2564_v53 = vmul.f32 %v7632_v42, %v10553_v59 }
 0x4b3   : > { %7637 = vrcp.f32 %v2518_v51 }
 0x4b4   : > { %v10796_v9 = vpop.xlane.xlu1 %4061  ;;  %2809 = vmatprep.mubr.f32.mxu0 %v2565_v39 }
 0x4b5   : > { %12389 = vst [vmem:[#allocation29_spill] sm:$0xff] %v10796_v9  ;;  %v7634_v30 = vpop.eup %7633  ;;  %2810 = vmatmul.mubr.f32.gmra.mrb[94].mxu0 %v2564_v53  ;;  %v12468_v9 = vld [vmem:[#allocation16_spill] sm:$0xff] }
 0x4b6   : > { %v2521_v50 = vpop.xlane.xlu0 %2520  ;;  %v2567_v62 = vmul.f32 %v7634_v30, %v10570_v40  ;;  %v2566_v2 = vmul.f32 %v7634_v30, %v10567_v35  ;;  %v12390_v35 = vld [vmem:[#allocation23_spill] sm:$0xff] }
 0x4b7   : > { %7639 = vrcp.f32 %v2521_v50 }
 0x4b8   : > { %v7187_v24 = vpop.permute.xlu1 %7186  ;;  %2814 = vmatprep.mubr.f32.mxu0 %v2567_v62 }
 0x4b9   : > { %v7189_v57 = vunpack.i.h.bf16 %v7187_v24  ;;  %v7188_v41 = vunpack.i.l.bf16 %v7187_v24  ;;  %v7636_v29 = vpop.eup %7635  ;;  %2815 = vmatmul.mubr.f32.gmra.mrb[96].mxu0 %v2566_v2 }
 0x4ba   : > { %v2524_v16 = vpop.xlane.xlu0 %2523  ;;  %v2569_v14 = vmul.f32 %v7636_v29, %v10585_v46  ;;  %v2568_v18 = vmul.f32 %v7636_v29, %v10582_v7  ;;  %v7864_v46 = vld [vmem:[%s9333_s28 + $0x98] sm:$0xff] }
 0x4bb   : > { %v6633_v59 = vpack.c.bf16 %v7189_v57, %v7188_v41  ;;  %7641 = vrcp.f32 %v2524_v16  ;;  %v10812_v7 = vadd.f32 %v7864_v46, %v10459_v27  ;;  %v12392_v27 = vld [vmem:[#allocation80_spill] sm:$0xff] }
 0x4bc   : > { %2819 = vmatprep.mubr.f32.mxu0 %v2569_v14  ;;  %v3263_v22 = vsub.f32 %v12392_v27, %v10670_v6 }
 0x4bd   : > { %6634 = vmatprep.subr.bf16.mxu0 %v6633_v59  ;;  %v7638_v40 = vpop.eup %7637  ;;  %7211 = vrot.lane.b32.xlu0 %v12390_v35, %s7974_s17 }
 0x4be   : > { %2820 = vmatmul.mubr.f32.gmra.mrb[98].mxu0 %v2568_v18  ;;  %v2527_v20 = vpop.xlane.xlu0 %2526  ;;  %v2571_v34 = vmul.f32 %v7638_v40, %v10606_v49  ;;  %v2570_v33 = vmul.f32 %v7638_v40, %v10600_v0  ;;  %v4069_v0 = vmax.f32 %v10808_v44, %v10812_v7  ;;  %v3262_v49 = vsub.f32 %v12391_v23, %v10670_v6 }
 0x4bf   : > { %7643 = vrcp.f32 %v2527_v20  ;;  %v3302_v8 = vmul.f32 1.442695, %v3263_v22 }
 0x4c0   : > { %2824 = vmatprep.mubr.f32.mxu0 %v2571_v34 }
 0x4c1   : > { %v7640_v38 = vpop.eup %7639 }
 0x4c2   : > { %2825 = vmatmul.mubr.f32.gmra.mrb[100].mxu0 %v2570_v33  ;;  %v2530_v28 = vpop.xlane.xlu0 %2529  ;;  %v2573_v63 = vmul.f32 %v7640_v38, %v10620_v11  ;;  %v2572_v48 = vmul.f32 %v7640_v38, %v10616_v26  ;;  %v3300_v26 = vmul.f32 1.442695, %v3262_v49  ;;  %v7866_v49 = vld [vmem:[%s9333_s28 + $0xa8] sm:$0xff] }
 0x4c3   : > { %7645 = vrcp.f32 %v2530_v28 }
 0x4c4   : > { %2829 = vmatprep.mubr.f32.mxu0 %v2573_v63  ;;  %v12397_v63 = vld [vmem:[#allocation24_spill] sm:$0xff] }
 0x4c5   : > { %v7642_v60 = vpop.eup %7641 }
 0x4c6   : > { %2830 = vmatmul.mubr.f32.gmra.mrb[102].mxu0 %v2572_v48  ;;  %4070 = vmax.xlane.f32.xlu1 %v4069_v0  ;;  %v2533_v32 = vpop.xlane.xlu0 %2532  ;;  %v2575_v15 = vmul.f32 %v7642_v60, %v10635_v54  ;;  %v2574_v11 = vmul.f32 %v7642_v60, %v10632_v12  ;;  %v7865_v0 = vld [vmem:[%s9333_s28 + $0xa0] sm:$0xff]  ;;  %v10858_v60 = vadd.f32 %v7866_v49, %v10471_v52 }
 0x4c7   : > { %7647 = vrcp.f32 %v2533_v32  ;;  %v10854_v23 = vadd.f32 %v7865_v0, %v10469_v5 }
 0x4c8   : > { %2834 = vmatprep.mubr.f32.mxu0 %v2575_v15 }
 0x4c9   : > { %v7644_v17 = vpop.eup %7643  ;;  %v4072_v15 = vmax.f32 %v10854_v23, %v10858_v60 }
 0x4ca   : > { %2835 = vmatmul.mubr.f32.gmra.mrb[104].mxu0 %v2574_v11  ;;  %v3354_v42 = vpop.xlane.xlu0 %3353  ;;  %v2577_v51 = vmul.f32 %v7644_v17, %v10648_v45  ;;  %v2576_v39 = vmul.f32 %v7644_v17, %v10646_v3 }
 0x4cb   : > { %7649 = vrcp.f32 %v3354_v42 }
 0x4cc   : > { %7651 = vpow2.f32 %v3300_v26  ;;  %2839 = vmatprep.mubr.f32.mxu0 %v2577_v51  ;;  %v12400_v26 = vld [vmem:[#allocation81_spill] sm:$0xff] }
 0x4cd   : > { %v7646_v6 = vpop.eup %7645  ;;  %7653 = vpow2.f32 %v3302_v8  ;;  %v3264_v17 = vsub.f32 %v12400_v26, %v10682_v25  ;;  %v12401_v8 = vld [vmem:[#allocation84_spill] sm:$0xff] }
 0x4ce   : > { %2840 = vmatmul.mubr.f32.gmra.mrb[106].mxu0 %v2576_v39  ;;  %v7192_v54 = vpop.permute.xlu0 %7191  ;;  %v2579_v12 = vmul.f32 %v7646_v6, %v10658_v43  ;;  %v2578_v53 = vmul.f32 %v7646_v6, %v10656_v19  ;;  %v12393_v43 = vld [vmem:[#allocation50_spill] sm:$0xff]  ;;  %v3265_v5 = vsub.f32 %v12401_v8, %v10682_v25 }
 0x4cf   : > { %v7194_v30 = vunpack.i.h.bf16 %v7192_v54  ;;  %v7193_v50 = vunpack.i.l.bf16 %v7192_v54  ;;  %v3304_v39 = vmul.f32 1.442695, %v3264_v17 }
 0x4d0   : > { %2844 = vmatprep.mubr.f32.mxu0 %v2579_v12  ;;  %v3306_v6 = vmul.f32 1.442695, %v3265_v5 }
 0x4d1   : > { %v7648_v62 = vpop.eup %7647  ;;  %v6635_v2 = vpack.c.bf16 %v7194_v30, %v7193_v50  ;;  %7655 = vpow2.f32 %v3304_v39 }
 0x4d2   : > { %2845 = vmatmul.mubr.f32.gmra.mrb[108].mxu0 %v2578_v53  ;;  %v2581_v45 = vmul.f32 %v7648_v62, %v10668_v47  ;;  %v2580_v3 = vmul.f32 %v7648_v62, %v10666_v10  ;;  %7657 = vpow2.f32 %v3306_v6 }
 0x4d3   : > { %6636 = vmatpush3.bf16.msra.mxu0 %v6635_v2 }
 0x4d4   : > { %2849 = vmatprep.mubr.f32.mxu0 %v2581_v45 }
 0x4d5   : > { %v10830_v24 = vpop.eup %7649 }
 0x4d6   : > { %2850 = vmatmul.mubr.f32.gmra.mrb[110].mxu0 %v2580_v3  ;;  %v10832_v57 = vpop.eup %7651  ;;  %v3417_v19 = vmul.f32 %v10830_v24, %v10680_v31 }
 0x4d7   : > { %7216 = vrot.lane.b32.xlu1 %v12393_v43, %s7974_s17  ;;  %v10838_v41 = vpop.eup %7653 }
 0x4d8   : > { %3608 = vmatprep.mubr.f32.mxu0 %v3417_v19  ;;  %v3361_v47 = vadd.f32 %v10838_v41, %v10832_v57 }
 0x4dc   : > { %3362 = vadd.xlane.f32.xlu0 %v3361_v47 }
 0x4e7   : > { %v5537_v10 = vpop.f32.mrb[48].mxu0 }
 0x4e8   : > { %v5538_v29 = vpop.f32.mrb[49].mxu0 }
 0x4e9   : > { %v10842_v59 = vadd.f32 %v5538_v29, %v5537_v10  ;;  %v10844_v16 = vpop.xlane.xlu1 %4064 }
 0x4eb   : > { %12394 = vst [vmem:[#allocation15_spill] sm:$0xff] %v10842_v59  ;;  %v5540_v14 = vpop.f32.mrb[50].mxu0 }
 0x4ec   : > { %v5541_v18 = vpop.f32.mrb[51].mxu0 }
 0x4ed   : > { %v10846_v40 = vadd.f32 %v5541_v18, %v5540_v14  ;;  %v7197_v31 = vpop.permute.xlu1 %7196  ;;  %v10880_v18 = vpop.eup %7655 }
 0x4ee   : > { %v7199_v20 = vunpack.i.h.bf16 %v7197_v31  ;;  %v7198_v34 = vunpack.i.l.bf16 %v7197_v31 }
 0x4ef   : > { %12395 = vst [vmem:[#allocation41_spill] sm:$0xff] %v10846_v40  ;;  %v5543_v33 = vpop.f32.mrb[52].mxu0 }
 0x4f0   : > { %v6637_v58 = vpack.c.bf16 %v7199_v20, %v7198_v34  ;;  %v5544_v46 = vpop.f32.mrb[53].mxu0  ;;  %v12406_v20 = vld [vmem:[#allocation26_spill] sm:$0xff]  ;;  %v10884_v34 = vpop.eup %7657 }
 0x4f1   : > { %v10848_v38 = vadd.f32 %v5544_v46, %v5543_v33 }
 0x4f2   : > { %6638 = vmatprep.subr.bf16.mxu0 %v6637_v58  ;;  %7221 = vrot.lane.b32.xlu0 %v12397_v63, %s7974_s17 }
 0x4f3   : > { %12396 = vst [vmem:[#allocation58_spill] sm:$0xff] %v10848_v38  ;;  %v5546_v28 = vpop.f32.mrb[54].mxu0 }
 0x4f4   : > { %v5547_v48 = vpop.f32.mrb[55].mxu0 }
 0x4f5   : > { %v10860_v27 = vadd.f32 %v5547_v48, %v5546_v28  ;;  %v3364_v28 = vadd.f32 %v10884_v34, %v10880_v18 }
 0x4f7   : > { %12398 = vst [vmem:[#allocation67_spill] sm:$0xff] %v10860_v27  ;;  %v5549_v22 = vpop.f32.mrb[56].mxu0 }
 0x4f8   : > { %v5550_v32 = vpop.f32.mrb[57].mxu0 }
 0x4f9   : > { %v10864_v11 = vadd.f32 %v5550_v32, %v5549_v22 }
 0x4fb   : > { %12399 = vst [vmem:[#allocation71_spill] sm:$0xff] %v10864_v11  ;;  %v5552_v42 = vpop.f32.mrb[58].mxu0  ;;  %4073 = vmax.xlane.f32.xlu1 %v4072_v15 }
 0x4fc   : > { %v5553_v51 = vpop.f32.mrb[59].mxu0 }
 0x4fd   : > { %v10870_v52 = vadd.f32 %v5553_v51, %v5552_v42 }
 0x4ff   : > { %12402 = vst [vmem:[#allocation27_spill] sm:$0xff] %v10870_v52  ;;  %v5555_v54 = vpop.f32.mrb[60].mxu0  ;;  %v10872_v53 = vpop.xlane.xlu0 %3356 }
 0x500   : > { %v5556_v12 = vpop.f32.mrb[61].mxu0 }
 0x501   : > { %v10874_v30 = vadd.f32 %v5556_v12, %v5555_v54 }
 0x503   : > { %12403 = vst [vmem:[#allocation28_spill] sm:$0xff] %v10874_v30  ;;  %v5558_v50 = vpop.f32.mrb[62].mxu0  ;;  %v7202_v2 = vpop.permute.xlu0 %7201 }
 0x504   : > { %v5559_v62 = vpop.f32.mrb[63].mxu0  ;;  %v7204_v25 = vunpack.i.h.bf16 %v7202_v2  ;;  %v7203_v3 = vunpack.i.l.bf16 %v7202_v2 }
 0x505   : > { %v10876_v45 = vadd.f32 %v5559_v62, %v5558_v50 }
 0x506   : > { %v6639_v19 = vpack.c.bf16 %v7204_v25, %v7203_v3 }
 0x507   : > { %12404 = vst [vmem:[#allocation34_spill] sm:$0xff] %v10876_v45  ;;  %v5561_v47 = vpop.f32.mrb[64].mxu0 }
 0x508   : > { %v5562_v10 = vpop.f32.mrb[65].mxu0  ;;  %6640 = vmatpush3.bf16.msra.mxu0 %v6639_v19  ;;  %v12414_v19 = vld [vmem:[#allocation25_spill] sm:$0xff] }
 0x509   : > { %v10878_v29 = vadd.f32 %v5562_v10, %v5561_v47  ;;  %v7867_v47 = vld [vmem:[%s9333_s28 + $0xb0] sm:$0xff] }
 0x50a   : > { %v10908_v10 = vadd.f32 %v7867_v47, %v10483_v61 }
 0x50b   : > { %12405 = vst [vmem:[#allocation31_spill] sm:$0xff] %v10878_v29  ;;  %v5564_v14 = vpop.f32.mrb[66].mxu0  ;;  %v12446_v29 = vld [vmem:[#allocation65_spill] sm:$0xff] }
 0x50c   : > { %v5565_v31 = vpop.f32.mrb[67].mxu0  ;;  %7226 = vrot.lane.b32.xlu1 %v12406_v20, %s7974_s17 }
 0x50d   : > { %v10886_v33 = vadd.f32 %v5565_v31, %v5564_v14  ;;  %v7868_v14 = vld [vmem:[%s9333_s28 + $0xb8] sm:$0xff] }
 0x50e   : > { %v10912_v31 = vadd.f32 %v7868_v14, %v10485_v13 }
 0x50f   : > { %12407 = vst [vmem:[#allocation52_spill] sm:$0xff] %v10886_v33  ;;  %v5567_v58 = vpop.f32.mrb[68].mxu0 }
 0x510   : > { %v5568_v46 = vpop.f32.mrb[69].mxu0  ;;  %12415 = vst [vmem:[#allocation74_spill] sm:$0xff] %v10912_v31 }
 0x511   : > { %v10890_v48 = vadd.f32 %v5568_v46, %v5567_v58  ;;  %3365 = vadd.xlane.f32.xlu0 %v3364_v28  ;;  %v4075_v58 = vmax.f32 %v10908_v10, %v10912_v31  ;;  %v12416_v46 = vld [vmem:[#allocation64_spill] sm:$0xff]  ;;  %v12417_v28 = vld [vmem:[#allocation85_spill] sm:$0xff] }
 0x513   : > { %12408 = vst [vmem:[#allocation36_spill] sm:$0xff] %v10890_v48  ;;  %v5570_v0 = vpop.f32.mrb[70].mxu0 }
 0x514   : > { %v5571_v49 = vpop.f32.mrb[71].mxu0 }
 0x515   : > { %v10892_v22 = vadd.f32 %v5571_v49, %v5570_v0  ;;  %v3266_v0 = vsub.f32 %v12417_v28, %v12416_v46  ;;  %v12418_v49 = vld [vmem:[#allocation86_spill] sm:$0xff] }
 0x517   : > { %12409 = vst [vmem:[#allocation63_spill] sm:$0xff] %v10892_v22  ;;  %v5573_v32 = vpop.f32.mrb[72].mxu0 }
 0x518   : > { %v5574_v15 = vpop.f32.mrb[73].mxu0 }
 0x519   : > { %v10894_v26 = vadd.f32 %v5574_v15, %v5573_v32  ;;  %v3267_v32 = vsub.f32 %v12418_v49, %v12416_v46  ;;  %v3308_v15 = vmul.f32 1.442695, %v3266_v0  ;;  %v12420_v46 = vld [vmem:[#allocation101_spill] sm:$0xff]  ;;  %v12422_v49 = vld [vmem:[#allocation99_spill] sm:$0xff] }
 0x51a   : > { %v3276_v28 = vsub.f32 %v12420_v46, %v10706_v21  ;;  %v12421_v0 = vld [vmem:[#allocation53_spill] sm:$0xff] }
 0x51b   : > { %12410 = vst [vmem:[#allocation46_spill] sm:$0xff] %v10894_v26  ;;  %v5576_v17 = vpop.f32.mrb[74].mxu0  ;;  %7659 = vpow2.f32 %v3308_v15  ;;  %v7869_v15 = vld [vmem:[%s9333_s28 + $0xc0] sm:$0xff] }
 0x51c   : > { %v5577_v8 = vpop.f32.mrb[75].mxu0 }
 0x51d   : > { %v10896_v5 = vadd.f32 %v5577_v8, %v5576_v17  ;;  %v3310_v17 = vmul.f32 1.442695, %v3267_v32  ;;  %v3277_v32 = vsub.f32 %v12422_v49, %v10706_v21  ;;  %v7871_v49 = vld [vmem:[%s9333_s28 + $0xd0] sm:$0xff] }
 0x51e   : > { %v10898_v42 = vpop.xlane.xlu1 %4067 }
 0x51f   : > { %12411 = vst [vmem:[#allocation75_spill] sm:$0xff] %v10896_v5  ;;  %v5579_v51 = vpop.f32.mrb[76].mxu0  ;;  %7661 = vpow2.f32 %v3310_v17  ;;  %v12423_v17 = vld [vmem:[#allocation123_spill] sm:$0xff] }
 0x520   : > { %v5580_v39 = vpop.f32.mrb[77].mxu0 }
 0x521   : > { %v10900_v6 = vadd.f32 %v5580_v39, %v5579_v51 }
 0x522   : > { %v7207_v54 = vpop.permute.xlu1 %7206 }
 0x523   : > { %12412 = vst [vmem:[#allocation72_spill] sm:$0xff] %v10900_v6  ;;  %v5582_v12 = vpop.f32.mrb[78].mxu0  ;;  %v7209_v50 = vunpack.i.h.bf16 %v7207_v54  ;;  %v7208_v62 = vunpack.i.l.bf16 %v7207_v54 }
 0x524   : > { %v5583_v2 = vpop.f32.mrb[79].mxu0 }
 0x525   : > { %v6641_v25 = vpack.c.bf16 %v7209_v50, %v7208_v62  ;;  %v10902_v3 = vadd.f32 %v5583_v2, %v5582_v12  ;;  %v10922_v54 = vpop.eup %7659  ;;  %v12419_v12 = vld [vmem:[#allocation54_spill] sm:$0xff] }
 0x527   : > { %12413 = vst [vmem:[#allocation79_spill] sm:$0xff] %v10902_v3  ;;  %6642 = vmatprep.subr.bf16.mxu0 %v6641_v25  ;;  %7231 = vrot.lane.b32.xlu0 %v12414_v19, %s7974_s17  ;;  %v12429_v3 = vld [vmem:[#allocation56_spill] sm:$0xff] }
 0x529   : > { %v10926_v50 = vpop.eup %7661 }
 0x52a   : > { %v3367_v62 = vadd.f32 %v10926_v50, %v10922_v54 }
 0x530   : > { %4076 = vmax.xlane.f32.xlu1 %v4075_v58 }
 0x534   : > { %v10920_v8 = vpop.xlane.xlu0 %3359 }
 0x538   : > { %v7212_v61 = vpop.permute.xlu0 %7211 }
 0x539   : > { %v7214_v51 = vunpack.i.h.bf16 %v7212_v61  ;;  %v7213_v13 = vunpack.i.l.bf16 %v7212_v61  ;;  %v10940_v61 = vadd.f32 %v7869_v15, %v12423_v17  ;;  %v10954_v15 = vadd.f32 %v7871_v49, %v12429_v3  ;;  %v7872_v17 = vld [vmem:[%s9333_s28 + $0xd8] sm:$0xff] }
 0x53a   : > { %v12436_v3 = vld [vmem:[#allocation109_spill] sm:$0xff] }
 0x53b   : > { %v6643_v39 = vpack.c.bf16 %v7214_v51, %v7213_v13  ;;  %12424 = vst [vmem:[#allocation83_spill] sm:$0xff] %v10940_v61  ;;  %v7870_v51 = vld [vmem:[%s9333_s28 + $0xc8] sm:$0xff]  ;;  %v12425_v13 = vld [vmem:[#allocation124_spill] sm:$0xff]  ;;  %12430 = vst [vmem:[#allocation87_spill] sm:$0xff] %v10954_v15  ;;  %v3285_v49 = vsub.f32 %v12436_v3, %v10730_v4 }
 0x53d   : > { %6644 = vmatpush3.bf16.msra.mxu0 %v6643_v39  ;;  %v10944_v39 = vadd.f32 %v7870_v51, %v12425_v13  ;;  %v12431_v51 = vld [vmem:[#allocation59_spill] sm:$0xff]  ;;  %v3346_v33 = vmul.f32 1.442695, %v3285_v49 }
 0x53e   : > { %v10958_v13 = vadd.f32 %v7872_v17, %v12431_v51  ;;  %v7873_v51 = vld [vmem:[%s9333_s28 + $0xe0] sm:$0xff] }
 0x53f   : > { %12426 = vst [vmem:[#allocation78_spill] sm:$0xff] %v10944_v39  ;;  %v4078_v21 = vmax.f32 %v10940_v61, %v10944_v39  ;;  %v12473_v39 = vld [vmem:[#allocation108_spill] sm:$0xff] }
 0x540   : > { %12432 = vst [vmem:[#allocation82_spill] sm:$0xff] %v10958_v13  ;;  %v4081_v17 = vmax.f32 %v10954_v15, %v10958_v13 }
 0x541   : > { %7236 = vrot.lane.b32.xlu1 %v12419_v12, %s7974_s17 }
 0x546   : > { %3368 = vadd.xlane.f32.xlu0 %v3367_v62  ;;  %v3328_v62 = vmul.f32 1.442695, %v3276_v28  ;;  %v12433_v28 = vld [vmem:[#allocation90_spill] sm:$0xff] }
 0x548   : > { %7663 = vpow2.f32 %v3328_v62  ;;  %v12439_v62 = vld [vmem:[#allocation126_spill] sm:$0xff] }
 0x552   : > { %v10998_v30 = vpop.eup %7663 }
 0x553   : > { %v10930_v2 = vpop.xlane.xlu1 %4070 }
 0x557   : > { %v7217_v25 = vpop.permute.xlu1 %7216 }
 0x558   : > { %v7219_v47 = vunpack.i.h.bf16 %v7217_v25  ;;  %v7218_v14 = vunpack.i.l.bf16 %v7217_v25  ;;  %v12427_v25 = vld [vmem:[#allocation104_spill] sm:$0xff] }
 0x55a   : > { %v6645_v58 = vpack.c.bf16 %v7219_v47, %v7218_v14  ;;  %v3280_v47 = vsub.f32 %v12427_v25, %v10722_v36  ;;  %v3330_v14 = vmul.f32 1.442695, %v3277_v32  ;;  %v3268_v25 = vsub.f32 %v12433_v28, %v10692_v55  ;;  %v12434_v32 = vld [vmem:[#allocation91_spill] sm:$0xff]  ;;  %v12437_v28 = vld [vmem:[#allocation125_spill] sm:$0xff] }
 0x55b   : > { %v3269_v6 = vsub.f32 %v12434_v32, %v10692_v55  ;;  %v10972_v22 = vadd.f32 %v7873_v51, %v12437_v28  ;;  %v7874_v55 = vld [vmem:[%s9333_s28 + $0xe8] sm:$0xff] }
 0x55c   : > { %6646 = vmatprep.subr.bf16.mxu0 %v6645_v58  ;;  %7241 = vrot.lane.b32.xlu0 %v12421_v0, %s7974_s17  ;;  %v12428_v58 = vld [vmem:[#allocation103_spill] sm:$0xff]  ;;  %7665 = vpow2.f32 %v3330_v14  ;;  %v3312_v32 = vmul.f32 1.442695, %v3268_v25  ;;  %v12441_v14 = vld [vmem:[#allocation38_spill] sm:$0xff] }
 0x55d   : > { %v3281_v46 = vsub.f32 %v12428_v58, %v10722_v36  ;;  %v3336_v36 = vmul.f32 1.442695, %v3280_v47  ;;  %v12435_v58 = vld [vmem:[#allocation106_spill] sm:$0xff]  ;;  %12438 = vst [vmem:[#allocation89_spill] sm:$0xff] %v10972_v22  ;;  %v10976_v47 = vadd.f32 %v7874_v55, %v12439_v62  ;;  %v7875_v55 = vld [vmem:[%s9333_s28 + $0xf0] sm:$0xff]  ;;  %v12444_v62 = vld [vmem:[#allocation61_spill] sm:$0xff] }
 0x55e   : > { %v3284_v5 = vsub.f32 %v12435_v58, %v10730_v4  ;;  %v12443_v4 = vld [vmem:[#allocation93_spill] sm:$0xff]  ;;  %v10988_v25 = vadd.f32 %v7875_v55, %v12444_v62 }
 0x55f   : > { %v3338_v26 = vmul.f32 1.442695, %v3281_v46  ;;  %12440 = vst [vmem:[#allocation92_spill] sm:$0xff] %v10976_v47  ;;  %v12442_v46 = vld [vmem:[#allocation94_spill] sm:$0xff]  ;;  %v3271_v3 = vsub.f32 %v12443_v4, %v12441_v14  ;;  %7667 = vpow2.f32 %v3336_v36  ;;  %v4084_v28 = vmax.f32 %v10972_v22, %v10976_v47  ;;  %v12472_v22 = vld [vmem:[#allocation69_spill] sm:$0xff] }
 0x560   : > { %v3270_v58 = vsub.f32 %v12442_v46, %v12441_v14  ;;  %v3344_v48 = vmul.f32 1.442695, %v3284_v5  ;;  %12445 = vst [vmem:[#allocation51_spill] sm:$0xff] %v10988_v25  ;;  %v12448_v5 = vld [vmem:[#allocation49_spill] sm:$0xff]  ;;  %v12450_v14 = vld [vmem:[#allocation95_spill] sm:$0xff]  ;;  %v3286_v61 = vsub.f32 %v12473_v39, %v12472_v22 }
 0x561   : > { %7669 = vpow2.f32 %v3338_v26  ;;  %v3318_v49 = vmul.f32 1.442695, %v3271_v3  ;;  %v3273_v4 = vsub.f32 %v12450_v14, %v12448_v5 }
 0x562   : > { %7671 = vpow2.f32 %v3312_v32  ;;  %v3316_v36 = vmul.f32 1.442695, %v3270_v58 }
 0x565   : > { %4079 = vmax.xlane.f32.xlu1 %v4078_v21  ;;  %v3314_v21 = vmul.f32 1.442695, %v3269_v6  ;;  %v7876_v6 = vld [vmem:[%s9333_s28 + $0xf8] sm:$0xff]  ;;  %s4962_s28 = sadd.s32 %s5307_s27, %s8125_s15 }
 0x566   : > { %v10992_v46 = vadd.f32 %v7876_v6, %v12446_v29  ;;  %v11004_v6 = vpop.eup %7665  ;;  %s5308_s23 = sshll.u32 %s4962_s28, 7 }
 0x567   : > { %7673 = vpow2.f32 %v3314_v21  ;;  %s11644_s30 = scalar_lea.hbm %s12566_s19, %s5308_s23 }
 0x568   : > { %12447 = vst [vmem:[#allocation68_spill] sm:$0xff] %v10992_v46  ;;  %7675 = vpow2.f32 %v3344_v48  ;;  %v4087_v29 = vmax.f32 %v10988_v25, %v10992_v46  ;;  %v12453_v48 = vld [vmem:[#allocation98_spill] sm:$0xff] }
 0x569   : > { %4082 = vmax.xlane.f32.xlu1 %v4081_v17  ;;  %v10982_v51 = vpop.xlane.xlu0 %3362  ;;  %v12449_v17 = vld [vmem:[#allocation97_spill] sm:$0xff]  ;;  %7677 = vpow2.f32 %v3346_v33  ;;  %v3322_v33 = vmul.f32 1.442695, %v3273_v4  ;;  %v12456_v4 = vld [vmem:[#allocation60_spill] sm:$0xff] }
 0x56a   : > { %v3272_v26 = vsub.f32 %v12449_v17, %v12448_v5  ;;  %7679 = vpow2.f32 %v3316_v36  ;;  %v12452_v5 = vld [vmem:[#allocation19_spill] sm:$0xff]  ;;  %v3382_v36 = vadd.f32 %v11004_v6, %v10998_v30 }
 0x56b   : > { %v3274_v17 = vsub.f32 %v12453_v48, %v12452_v5  ;;  %7681 = vpow2.f32 %v3318_v49 }
 0x56c   : > { %v5681_v45 = vpop.f32.mrb[80].mxu0  ;;  %v3320_v3 = vmul.f32 1.442695, %v3272_v26 }
 0x56d   : > { %4085 = vmax.xlane.f32.xlu1 %v4084_v28  ;;  %v5682_v55 = vpop.f32.mrb[81].mxu0  ;;  %v7222_v62 = vpop.permute.xlu0 %7221  ;;  %v12454_v28 = vld [vmem:[#allocation96_spill] sm:$0xff]  ;;  %v3324_v49 = vmul.f32 1.442695, %v3274_v17 }
 0x56e   : > { %v11002_v32 = vadd.f32 %v5682_v55, %v5681_v45  ;;  %v7224_v21 = vunpack.i.h.bf16 %v7222_v62  ;;  %v7223_v58 = vunpack.i.l.bf16 %v7222_v62  ;;  %v3275_v14 = vsub.f32 %v12454_v28, %v12452_v5  ;;  %v11010_v45 = vpop.eup %7667  ;;  %v12457_v62 = vld [vmem:[#allocation100_spill] sm:$0xff] }
 0x56f   : > { %v11016_v26 = vpop.eup %7669  ;;  %7683 = vpow2.f32 %v3320_v3  ;;  %v3278_v48 = vsub.f32 %v12457_v62, %v12456_v4 }
 0x570   : > { %12451 = vst [vmem:[#allocation73_spill] sm:$0xff] %v11002_v32  ;;  %v6647_v52 = vpack.c.bf16 %v7224_v21, %v7223_v58  ;;  %v5684_v11 = vpop.f32.mrb[82].mxu0  ;;  %v11020_v5 = vpop.eup %7671  ;;  %7685 = vpow2.f32 %v3322_v33  ;;  %v12458_v21 = vld [vmem:[#allocation102_spill] sm:$0xff]  ;;  %v3388_v62 = vadd.f32 %v11016_v26, %v11010_v45 }
 0x571   : > { %4088 = vmax.xlane.f32.xlu1 %v4087_v29  ;;  %v5685_v27 = vpop.f32.mrb[83].mxu0  ;;  %v3326_v29 = vmul.f32 1.442695, %v3275_v14  ;;  %v3279_v58 = vsub.f32 %v12458_v21, %v12456_v4  ;;  %7687 = vpow2.f32 %v3324_v49  ;;  %v3332_v14 = vmul.f32 1.442695, %v3278_v48  ;;  %v12460_v4 = vld [vmem:[#allocation88_spill] sm:$0xff] }
 0x572   : > { %v11012_v55 = vadd.f32 %v5685_v27, %v5684_v11  ;;  %6648 = vmatpush3.bf16.msra.mxu0 %v6647_v52  ;;  %v11026_v52 = vpop.eup %7673  ;;  %v12461_v21 = vld [vmem:[#allocation107_spill] sm:$0xff] }
 0x573   : > { %v11028_v3 = vpop.eup %7675  ;;  %v3282_v38 = vsub.f32 %v12461_v21, %v12460_v4  ;;  %7689 = vpow2.f32 %v3326_v29  ;;  %v3334_v27 = vmul.f32 1.442695, %v3279_v58 }
 0x574   : > { %12455 = vst [vmem:[#allocation76_spill] sm:$0xff] %v11012_v55  ;;  %v5687_v11 = vpop.f32.mrb[84].mxu0  ;;  %v11034_v33 = vpop.eup %7677  ;;  %7691 = vpow2.f32 %v3332_v14 }
 0x575   : > { %3383 = vadd.xlane.f32.xlu1 %v3382_v36  ;;  %v5688_v28 = vpop.f32.mrb[85].mxu0  ;;  %v12462_v36 = vld [vmem:[#allocation105_spill] sm:$0xff]  ;;  %v11040_v32 = vpop.eup %7679  ;;  %v3394_v48 = vadd.f32 %v11034_v33, %v11028_v3  ;;  %v3340_v29 = vmul.f32 1.442695, %v3282_v38  ;;  %7693 = vpow2.f32 %v3334_v27 }
 0x576   : > { %v11030_v17 = vadd.f32 %v5688_v28, %v5687_v11  ;;  %v3283_v59 = vsub.f32 %v12462_v36, %v12460_v4  ;;  %v3370_v28 = vadd.f32 %v11026_v52, %v11020_v5  ;;  %v11044_v55 = vpop.eup %7681 }
 0x577   : > { %7695 = vpow2.f32 %v3340_v29 }
 0x578   : > { %12459 = vst [vmem:[#allocation47_spill] sm:$0xff] %v11030_v17  ;;  %v5690_v40 = vpop.f32.mrb[86].mxu0  ;;  %v3342_v58 = vmul.f32 1.442695, %v3283_v59 }
 0x579   : > { %3389 = vadd.xlane.f32.xlu1 %v3388_v62  ;;  %v5691_v11 = vpop.f32.mrb[87].mxu0  ;;  %v11052_v21 = vpop.eup %7683 }
 0x57a   : > { %v11046_v49 = vadd.f32 %v5691_v11, %v5690_v40  ;;  %v3373_v40 = vadd.f32 %v11044_v55, %v11040_v32  ;;  %v11056_v11 = vpop.eup %7685  ;;  %7697 = vpow2.f32 %v3342_v58 }
 0x57b   : > { %3371 = vadd.xlane.f32.xlu0 %v3370_v28  ;;  %v11060_v59 = vpop.eup %7687  ;;  %v3376_v14 = vadd.f32 %v11056_v11, %v11052_v21 }
 0x57c   : > { %12463 = vst [vmem:[#allocation21_spill] sm:$0xff] %v11046_v49  ;;  %v5693_v4 = vpop.f32.mrb[88].mxu0 }
 0x57d   : > { %3395 = vadd.xlane.f32.xlu1 %v3394_v48  ;;  %v5694_v36 = vpop.f32.mrb[89].mxu0  ;;  %v11064_v28 = vpop.eup %7689 }
 0x57e   : > { %v11058_v46 = vadd.f32 %v5694_v36, %v5693_v4  ;;  %v11070_v36 = vpop.eup %7691  ;;  %v3379_v58 = vadd.f32 %v11064_v28, %v11060_v59 }
 0x57f   : > { %3374 = vadd.xlane.f32.xlu0 %v3373_v40  ;;  %v11074_v40 = vpop.eup %7693 }
 0x580   : > { %12464 = vst [vmem:[#allocation23_spill] sm:$0xff] %v11058_v46  ;;  %v5696_v38 = vpop.f32.mrb[90].mxu0  ;;  %v3385_v62 = vadd.f32 %v11074_v40, %v11070_v36 }
 0x581   : > { %v5697_v27 = vpop.f32.mrb[91].mxu0 }
 0x582   : > { %v11066_v48 = vadd.f32 %v5697_v27, %v5696_v38  ;;  %v11080_v27 = vpop.eup %7695 }
 0x583   : > { %3377 = vadd.xlane.f32.xlu0 %v3376_v14 }
 0x584   : > { %12465 = vst [vmem:[#allocation77_spill] sm:$0xff] %v11066_v48  ;;  %v5699_v4 = vpop.f32.mrb[92].mxu0  ;;  %v11084_v46 = vpop.eup %7697 }
 0x585   : > { %v5700_v29 = vpop.f32.mrb[93].mxu0  ;;  %v3391_v0 = vadd.f32 %v11084_v46, %v11080_v27 }
 0x586   : > { %v11076_v17 = vadd.f32 %v5700_v29, %v5699_v4 }
 0x587   : > { %3380 = vadd.xlane.f32.xlu0 %v3379_v58 }
 0x588   : > { %12466 = vst [vmem:[#allocation80_spill] sm:$0xff] %v11076_v17  ;;  %v11078_v49 = vpop.xlane.xlu1 %4073  ;;  %v5702_v38 = vpop.f32.mrb[94].mxu0 }
 0x589   : > { %v5703_v14 = vpop.f32.mrb[95].mxu0 }
 0x58a   : > { %v11086_v48 = vadd.f32 %v5703_v14, %v5702_v38 }
 0x58b   : > { %3386 = vadd.xlane.f32.xlu0 %v3385_v62 }
 0x58c   : > { %12467 = vst [vmem:[#allocation50_spill] sm:$0xff] %v11086_v48  ;;  %v7227_v25 = vpop.permute.xlu1 %7226  ;;  %v5705_v13 = vpop.f32.mrb[96].mxu0 }
 0x58d   : > { %v7229_v29 = vunpack.i.h.bf16 %v7227_v25  ;;  %v7228_v58 = vunpack.i.l.bf16 %v7227_v25  ;;  %v5706_v15 = vpop.f32.mrb[97].mxu0 }
 0x58e   : > { %7251 = vrot.lane.b32.xlu1 %v12468_v9, %s7975_s18  ;;  %v11094_v47 = vadd.f32 %v5706_v15, %v5705_v13  ;;  %v12474_v15 = vld [vmem:[#allocation112_spill] sm:$0xff] }
 0x58f   : > { %v6649_v12 = vpack.c.bf16 %v7229_v29, %v7228_v58  ;;  %3392 = vadd.xlane.f32.xlu0 %v3391_v0  ;;  %v3287_v0 = vsub.f32 %v12474_v15, %v12472_v22 }
 0x590   : > { %12469 = vst [vmem:[#allocation24_spill] sm:$0xff] %v11094_v47 }
 0x591   : > { %v5708_v38 = vpop.f32.mrb[98].mxu0  ;;  %6650 = vmatprep.subr.bf16.mxu0 %v6649_v12  ;;  %v3350_v25 = vmul.f32 1.442695, %v3287_v0 }
 0x592   : > { %v5709_v62 = vpop.f32.mrb[99].mxu0 }
 0x593   : > { %v11096_v14 = vadd.f32 %v5709_v62, %v5708_v38  ;;  %v3348_v38 = vmul.f32 1.442695, %v3286_v61  ;;  %v12478_v61 = vld [vmem:[#allocation40_spill] sm:$0xff] }
 0x595   : > { %12470 = vst [vmem:[#allocation81_spill] sm:$0xff] %v11096_v14  ;;  %v5711_v4 = vpop.f32.mrb[100].mxu0  ;;  %7699 = vpow2.f32 %v3348_v38 }
 0x596   : > { %v5712_v17 = vpop.f32.mrb[101].mxu0  ;;  %7701 = vpow2.f32 %v3350_v25  ;;  %v12480_v25 = vld [vmem:[#allocation43_spill] sm:$0xff] }
 0x597   : > { %v11100_v48 = vadd.f32 %v5712_v17, %v5711_v4 }
 0x599   : > { %12471 = vst [vmem:[#allocation84_spill] sm:$0xff] %v11100_v48  ;;  %v5714_v9 = vpop.f32.mrb[102].mxu0 }
 0x59a   : > { %v5715_v29 = vpop.f32.mrb[103].mxu0 }
 0x59b   : > { %v11106_v13 = vadd.f32 %v5715_v29, %v5714_v9 }
 0x59d   : > { %12475 = vst [vmem:[#allocation26_spill] sm:$0xff] %v11106_v13  ;;  %v5717_v58 = vpop.f32.mrb[104].mxu0 }
 0x59e   : > { %v5718_v62 = vpop.f32.mrb[105].mxu0  ;;  %v3366_v17 = vpop.xlane.xlu0 %3365 }
 0x59f   : > { %v11110_v47 = vadd.f32 %v5718_v62, %v5717_v58 }
 0x5a1   : > { %12476 = vst [vmem:[#allocation25_spill] sm:$0xff] %v11110_v47  ;;  %v5720_v4 = vpop.f32.mrb[106].mxu0 }
 0x5a2   : > { %v5721_v14 = vpop.f32.mrb[107].mxu0  ;;  %v7232_v31 = vpop.permute.xlu0 %7231 }
 0x5a3   : > { %v11112_v39 = vadd.f32 %v5721_v14, %v5720_v4  ;;  %v7234_v22 = vunpack.i.h.bf16 %v7232_v31  ;;  %v7233_v9 = vunpack.i.l.bf16 %v7232_v31  ;;  %v11124_v31 = vpop.eup %7699 }
 0x5a4   : > { %v11126_v4 = vpop.eup %7701 }
 0x5a5   : > { %12477 = vst [vmem:[#allocation64_spill] sm:$0xff] %v11112_v39  ;;  %v5723_v15 = vpop.f32.mrb[108].mxu0  ;;  %v6651_v12 = vpack.c.bf16 %v7234_v22, %v7233_v9  ;;  %7246 = vrot.lane.b32.xlu0 %v12478_v61, %s7975_s18  ;;  %v12482_v9 = vld [vmem:[#allocation17_spill] sm:$0xff]  ;;  %v12484_v61 = vld [vmem:[#allocation110_spill] sm:$0xff] }
 0x5a6   : > { %v5724_v0 = vpop.f32.mrb[109].mxu0 }
 0x5a7   : > { %v11118_v58 = vadd.f32 %v5724_v0, %v5723_v15  ;;  %6652 = vmatpush3.bf16.msra.mxu0 %v6651_v12  ;;  %v3397_v12 = vadd.f32 %v11126_v4, %v11124_v31  ;;  %v12483_v15 = vld [vmem:[#allocation66_spill] sm:$0xff] }
 0x5a8   : > { %v4090_v0 = vsub.f32 %v12484_v61, %v12483_v15 }
 0x5a9   : > { %12479 = vst [vmem:[#allocation85_spill] sm:$0xff] %v11118_v58  ;;  %v5726_v38 = vpop.f32.mrb[110].mxu0  ;;  %7256 = vrot.lane.b32.xlu0 %v12480_v25, %s7975_s18 }
 0x5aa   : > { %v5727_v14 = vpop.f32.mrb[111].mxu0 }
 0x5ab   : > { %v11122_v62 = vadd.f32 %v5727_v14, %v5726_v38  ;;  %v12485_v38 = vld [vmem:[#allocation111_spill] sm:$0xff]  ;;  %v4122_v14 = vmul.f32 1.442695, %v4090_v0  ;;  %v12487_v0 = vld [vmem:[#allocation44_spill] sm:$0xff] }
 0x5ac   : > { %v4091_v25 = vsub.f32 %v12485_v38, %v12483_v15  ;;  %v12488_v38 = vld [vmem:[#allocation113_spill] sm:$0xff] }
 0x5ad   : > { %12481 = vst [vmem:[#allocation86_spill] sm:$0xff] %v11122_v62  ;;  %7261 = vrot.lane.b32.xlu0 %v12482_v9, %s7975_s18  ;;  %7703 = vpow2.f32 %v4122_v14  ;;  %v12486_v9 = vld [vmem:[#allocation45_spill] sm:$0xff] }
 0x5ae   : > { %v4124_v29 = vmul.f32 1.442695, %v4091_v25  ;;  %v4092_v25 = vsub.f32 %v12488_v38, %v12487_v0  ;;  %v12490_v38 = vld [vmem:[#allocation70_spill] sm:$0xff] }
 0x5b0   : > { %7705 = vpow2.f32 %v4124_v29  ;;  %v12489_v29 = vld [vmem:[#allocation116_spill] sm:$0xff] }
 0x5b1   : > { %v4093_v14 = vsub.f32 %v12489_v29, %v12487_v0  ;;  %7707 = vrcp.f32 %v10872_v53  ;;  %v3416_v0 = vmul.f32 %v10830_v24, %v12490_v38  ;;  %v12491_v53 = vld [vmem:[#allocation30_spill] sm:$0xff] }
 0x5b2   : > { %3398 = vadd.xlane.f32.xlu1 %v3397_v12  ;;  %7709 = vrcp.f32 %v10920_v8 }
 0x5b7   : > { %v11142_v12 = vpop.eup %7703 }
 0x5ba   : > { %v11144_v61 = vpop.eup %7705 }
 0x5bb   : > { %v4186_v15 = vadd.f32 %v11144_v61, %v11142_v12  ;;  %v7708_v13 = vpop.eup %7707 }
 0x5bc   : > { %v7710_v29 = vpop.eup %7709 }
 0x5bd   : > { %v11138_v47 = vpop.xlane.xlu1 %4076 }
 0x5c1   : > { %v7237_v22 = vpop.permute.xlu1 %7236 }
 0x5c2   : > { %v7239_v58 = vunpack.i.h.bf16 %v7237_v22  ;;  %v7238_v62 = vunpack.i.l.bf16 %v7237_v22  ;;  %v4126_v22 = vmul.f32 1.442695, %v4092_v25  ;;  %v3419_v25 = vmul.f32 %v7708_v13, %v12491_v53 }
 0x5c3   : > { %7266 = vrot.lane.b32.xlu1 %v12486_v9, %s7975_s18  ;;  %v4128_v9 = vmul.f32 1.442695, %v4093_v14 }
 0x5c4   : > { %v6653_v39 = vpack.c.bf16 %v7239_v58, %v7238_v62  ;;  %7711 = vpow2.f32 %v4126_v22  ;;  %v12492_v22 = vld [vmem:[#allocation14_spill] sm:$0xff] }
 0x5c5   : > { %7713 = vpow2.f32 %v4128_v9  ;;  %v3418_v9 = vmul.f32 %v7708_v13, %v12492_v22 }
 0x5c6   : > { %6654 = vmatprep.subr.bf16.mxu0 %v6653_v39  ;;  %7715 = vrcp.f32 %v10982_v51  ;;  %v12493_v51 = vld [vmem:[#allocation18_spill] sm:$0xff] }
 0x5c7   : > { %7717 = vrcp.f32 %v3366_v17  ;;  %v3420_v17 = vmul.f32 %v7710_v29, %v10778_v37 }
 0x5cc   : > { %4187 = vadd.xlane.f32.xlu0 %v4186_v15 }
 0x5ce   : > { %v11158_v14 = vpop.eup %7711 }
 0x5cf   : > { %v11160_v8 = vpop.eup %7713 }
 0x5d0   : > { %v4189_v24 = vadd.f32 %v11160_v8, %v11158_v14 }
 0x5d3   : > { %v3369_v58 = vpop.xlane.xlu0 %3368 }
 0x5d4   : > { %7719 = vrcp.f32 %v3369_v58 }
 0x5d7   : > { %v7242_v39 = vpop.permute.xlu0 %7241 }
 0x5d8   : > { %v7244_v62 = vunpack.i.h.bf16 %v7242_v39  ;;  %v7243_v48 = vunpack.i.l.bf16 %v7242_v39  ;;  %v7716_v39 = vpop.eup %7715 }
 0x5d9   : > { %v3423_v58 = vmul.f32 %v7716_v39, %v10838_v41  ;;  %v7718_v13 = vpop.eup %7717  ;;  %v12496_v41 = vld [vmem:[#allocation37_spill] sm:$0xff] }
 0x5da   : > { %v6655_v15 = vpack.c.bf16 %v7244_v62, %v7243_v48  ;;  %v3421_v48 = vmul.f32 %v7710_v29, %v10782_v1  ;;  %v12494_v62 = vld [vmem:[#allocation48_spill] sm:$0xff]  ;;  %v3425_v38 = vmul.f32 %v7718_v13, %v10884_v34  ;;  %v3424_v37 = vmul.f32 %v7718_v13, %v10880_v18 }
 0x5db   : > { %v12495_v1 = vld [vmem:[#allocation20_spill] sm:$0xff] }
 0x5dc   : > { %6656 = vmatpush3.bf16.msra.mxu0 %v6655_v15  ;;  %v3422_v15 = vmul.f32 %v7716_v39, %v10832_v57  ;;  %v12498_v57 = vld [vmem:[#allocation115_spill] sm:$0xff] }
 0x5df   : > { %3609 = vmatmul.mubr.f32.vlgmr.msra.gmra.mrb[112].mxu0 %v3416_v0  ;;  %v7720_v0 = vpop.eup %7719 }
 0x5e0   : > { %3613 = vmatprep.mubr.f32.mxu0 %v3419_v25  ;;  %v3427_v53 = vmul.f32 %v7720_v0, %v10926_v50  ;;  %v12497_v25 = vld [vmem:[#allocation114_spill] sm:$0xff]  ;;  %v3426_v22 = vmul.f32 %v7720_v0, %v10922_v54  ;;  %v12499_v54 = vld [vmem:[#allocation39_spill] sm:$0xff] }
 0x5e1   : > { %v4094_v29 = vsub.f32 %v12497_v25, %v12496_v41 }
 0x5e2   : > { %7271 = vrot.lane.b32.xlu0 %v12493_v51, %s7975_s18 }
 0x5e3   : > { %3614 = vmatmul.mubr.f32.gmra.mrb[114].mxu0 %v3418_v9  ;;  %v4095_v9 = vsub.f32 %v12498_v57, %v12496_v41  ;;  %v4130_v34 = vmul.f32 1.442695, %v4094_v29 }
 0x5e4   : > { %3618 = vmatprep.mubr.f32.mxu0 %v3421_v48 }
 0x5e5   : > { %v4132_v48 = vmul.f32 1.442695, %v4095_v9  ;;  %7721 = vpow2.f32 %v4130_v34 }
 0x5e6   : > { %7276 = vrot.lane.b32.xlu0 %v12494_v62, %s7975_s18 }
 0x5e7   : > { %4190 = vadd.xlane.f32.xlu1 %v4189_v24  ;;  %3619 = vmatmul.mubr.f32.gmra.mrb[116].mxu0 %v3420_v17  ;;  %7723 = vpow2.f32 %v4132_v48  ;;  %v12500_v24 = vld [vmem:[#allocation117_spill] sm:$0xff] }
 0x5e8   : > { %3623 = vmatprep.mubr.f32.mxu0 %v3423_v58  ;;  %v4096_v17 = vsub.f32 %v12500_v24, %v12499_v54  ;;  %v12501_v58 = vld [vmem:[#allocation118_spill] sm:$0xff] }
 0x5e9   : > { %v4097_v13 = vsub.f32 %v12501_v58, %v12499_v54 }
 0x5ea   : > { %7281 = vrot.lane.b32.xlu0 %v12495_v1, %s7975_s18  ;;  %v4134_v1 = vmul.f32 1.442695, %v4096_v17 }
 0x5eb   : > { %3624 = vmatmul.mubr.f32.gmra.mrb[118].mxu0 %v3422_v15 }
 0x5ec   : > { %3628 = vmatprep.mubr.f32.mxu0 %v3425_v38  ;;  %v4136_v38 = vmul.f32 1.442695, %v4097_v13 }
 0x5ef   : > { %3629 = vmatmul.mubr.f32.gmra.mrb[120].mxu0 %v3424_v37  ;;  %v11191_v39 = vpop.eup %7721 }
 0x5f0   : > { %3633 = vmatprep.mubr.f32.mxu0 %v3427_v53 }
 0x5f1   : > { %v11195_v62 = vpop.eup %7723 }
 0x5f2   : > { %v11183_v51 = vpop.xlane.xlu1 %4079 }
 0x5f3   : > { %3634 = vmatmul.mubr.f32.gmra.mrb[122].mxu0 %v3426_v22 }
 0x5f6   : > { %v11187_v18 = vpop.xlane.xlu1 %4082 }
 0x5f8   : > { %7286 = vrot.lane.b32.xlu1 %v12388_v56, %s7975_s18  ;;  %v4192_v56 = vadd.f32 %v11195_v62, %v11191_v39 }
 0x5fa   : > { %v11189_v50 = vpop.xlane.xlu1 %4085 }
 0x5fe   : > { %v11199_v15 = vpop.xlane.xlu1 %4088 }
 0x602   : > { %v3384_v37 = vpop.xlane.xlu1 %3383 }
 0x606   : > { %v3390_v25 = vpop.xlane.xlu1 %3389 }
 0x608   : > { %v3372_v0 = vpop.xlane.xlu0 %3371 }
 0x609   : > { %7725 = vrcp.f32 %v3372_v0  ;;  %4193 = vadd.xlane.f32.xlu0 %v4192_v56 }
 0x60a   : > { %7727 = vpow2.f32 %v4134_v1  ;;  %v3396_v24 = vpop.xlane.xlu1 %3395 }
 0x60b   : > { %7729 = vpow2.f32 %v4136_v38 }
 0x60c   : > { %v3375_v53 = vpop.xlane.xlu0 %3374 }
 0x60d   : > { %7731 = vrcp.f32 %v3375_v53 }
 0x60e   : > { %v7252_v0 = vpop.permute.xlu1 %7251 }
 0x60f   : > { %v7253_v53 = vunpack.i.l.bf16 %v7252_v0 }
 0x610   : > { %v3378_v41 = vpop.xlane.xlu0 %3377 }
 0x611   : > { %7733 = vrcp.f32 %v3378_v41 }
 0x612   : > { %7735 = vrcp.f32 %v3384_v37 }
 0x613   : > { %v7726_v29 = vpop.eup %7725 }
 0x614   : > { %v3381_v22 = vpop.xlane.xlu0 %3380  ;;  %v3429_v57 = vmul.f32 %v7726_v29, %v11026_v52  ;;  %v3428_v9 = vmul.f32 %v7726_v29, %v11020_v5  ;;  %v11205_v34 = vpop.eup %7727 }
 0x615   : > { %7737 = vrcp.f32 %v3381_v22  ;;  %v11207_v48 = vpop.eup %7729 }
 0x616   : > { %3638 = vmatprep.mubr.f32.mxu0 %v3429_v57  ;;  %v4195_v52 = vadd.f32 %v11207_v48, %v11205_v34 }
 0x617   : > { %v7732_v54 = vpop.eup %7731  ;;  %3639 = vmatmul.mubr.f32.gmra.mrb[124].mxu0 %v3428_v9 }
 0x618   : > { %v3387_v17 = vpop.xlane.xlu0 %3386  ;;  %v3431_v58 = vmul.f32 %v7732_v54, %v11044_v55  ;;  %v3430_v13 = vmul.f32 %v7732_v54, %v11040_v32  ;;  %v7254_v32 = vunpack.i.h.bf16 %v7252_v0 }
 0x619   : > { %7739 = vrcp.f32 %v3387_v17 }
 0x61a   : > { %3643 = vmatprep.mubr.f32.mxu0 %v3431_v58  ;;  %7741 = vrcp.f32 %v3390_v25 }
 0x61b   : > { %v7734_v5 = vpop.eup %7733  ;;  %3644 = vmatmul.mubr.f32.gmra.mrb[126].mxu0 %v3430_v13 }
 0x61c   : > { %4196 = vadd.xlane.f32.xlu1 %v4195_v52  ;;  %v3393_v1 = vpop.xlane.xlu0 %3392  ;;  %v3433_v56 = vmul.f32 %v7734_v5, %v11056_v11  ;;  %v3432_v38 = vmul.f32 %v7734_v5, %v11052_v21  ;;  %v7736_v37 = vpop.eup %7735 }
 0x61d   : > { %7743 = vrcp.f32 %v3393_v1  ;;  %v3437_v21 = vmul.f32 %v7736_v37, %v11004_v6 }
 0x61e   : > { %3648 = vmatprep.mubr.f32.mxu0 %v3433_v56  ;;  %7745 = vrcp.f32 %v3396_v24 }
 0x61f   : > { %v7738_v55 = vpop.eup %7737  ;;  %7291 = vrot.lane.b32.xlu0 %v12390_v35, %s7975_s18  ;;  %3649 = vmatmul.mubr.f32.gmra.mrb[128].mxu0 %v3432_v38  ;;  %v6707_v35 = vpack.c.bf16 %v7254_v32, %v7253_v53  ;;  %v12503_v38 = vld [vmem:[#allocation119_spill] sm:$0xff] }
 0x620   : > { %v7247_v41 = vpop.permute.xlu0 %7246  ;;  %v3435_v29 = vmul.f32 %v7738_v55, %v11064_v28  ;;  %v3434_v22 = vmul.f32 %v7738_v55, %v11060_v59  ;;  %v3436_v59 = vmul.f32 %v7736_v37, %v10998_v30 }
 0x621   : > { %v7249_v11 = vunpack.i.h.bf16 %v7247_v41  ;;  %v7248_v57 = vunpack.i.l.bf16 %v7247_v41 }
 0x622   : > { %3653 = vmatprep.mubr.f32.mxu0 %v3435_v29  ;;  %v12506_v29 = vld [vmem:[#allocation121_spill] sm:$0xff] }
 0x623   : > { %v7740_v25 = vpop.eup %7739  ;;  %v6705_v9 = vpack.c.bf16 %v7249_v11, %v7248_v57  ;;  %7296 = vrot.lane.b32.xlu0 %v12393_v43, %s7975_s18  ;;  %3654 = vmatmul.mubr.f32.gmra.mrb[130].mxu0 %v3434_v22  ;;  %v12507_v11 = vld [vmem:[#allocation122_spill] sm:$0xff] }
 0x624   : > { %v7257_v54 = vpop.permute.xlu0 %7256  ;;  %3658 = vmatprep.mubr.f32.mxu0 %v3437_v21  ;;  %v3439_v58 = vmul.f32 %v7740_v25, %v11074_v40  ;;  %v7742_v13 = vpop.eup %7741  ;;  %v3438_v24 = vmul.f32 %v7740_v25, %v11070_v36  ;;  %v12502_v40 = vld [vmem:[#allocation33_spill] sm:$0xff]  ;;  %v12504_v36 = vld [vmem:[#allocation120_spill] sm:$0xff] }
 0x625   : > { %v7259_v17 = vunpack.i.h.bf16 %v7257_v54  ;;  %v7258_v28 = vunpack.i.l.bf16 %v7257_v54  ;;  %6706 = vmatprep.subr.bf16.mxu0 %v6705_v9  ;;  %v3441_v1 = vmul.f32 %v7742_v13, %v11016_v26  ;;  %v4098_v0 = vsub.f32 %v12503_v38, %v12502_v40 }
 0x626   : > { %6708 = vmatpush3.bf16.msra.mxu0 %v6707_v35  ;;  %v4099_v32 = vsub.f32 %v12504_v36, %v12502_v40  ;;  %v12509_v35 = vld [vmem:[#allocation57_spill] sm:$0xff]  ;;  %v4109_v40 = vsub.f32 %v10812_v7, %v10930_v2 }
 0x627   : > { %v6709_v6 = vpack.c.bf16 %v7259_v17, %v7258_v28  ;;  %7301 = vrot.lane.b32.xlu0 %v12397_v63, %s7975_s18  ;;  %3659 = vmatmul.mubr.f32.gmra.mrb[132].mxu0 %v3436_v59  ;;  %v7744_v56 = vpop.eup %7743  ;;  %v3440_v63 = vmul.f32 %v7742_v13, %v11010_v45  ;;  %v4105_v54 = vsub.f32 %v12509_v35, %v10844_v16  ;;  %v12510_v13 = vld [vmem:[#allocation42_spill] sm:$0xff] }
 0x628   : > { %v7262_v43 = vpop.permute.xlu0 %7261  ;;  %3663 = vmatprep.mubr.f32.mxu0 %v3439_v58  ;;  %v3443_v37 = vmul.f32 %v7744_v56, %v11084_v46  ;;  %v7746_v55 = vpop.eup %7745  ;;  %v3442_v26 = vmul.f32 %v7744_v56, %v11080_v27  ;;  %v4140_v45 = vmul.f32 1.442695, %v4099_v32  ;;  %v12505_v46 = vld [vmem:[#allocation62_spill] sm:$0xff]  ;;  %v4108_v56 = vsub.f32 %v10808_v44, %v10930_v2 }
 0x629   : > { %v7264_v52 = vunpack.i.h.bf16 %v7262_v43  ;;  %v7263_v5 = vunpack.i.l.bf16 %v7262_v43  ;;  %6710 = vmatprep.subr.bf16.mxu0 %v6709_v6  ;;  %v3445_v53 = vmul.f32 %v7746_v55, %v11034_v33  ;;  %v3444_v41 = vmul.f32 %v7746_v55, %v11028_v3  ;;  %v12508_v33 = vld [vmem:[#allocation32_spill] sm:$0xff] }
 0x62a   : > { %v4100_v22 = vsub.f32 %v12506_v29, %v12505_v46  ;;  %v4101_v57 = vsub.f32 %v12507_v11, %v12505_v46  ;;  %v4104_v25 = vsub.f32 %v12508_v33, %v10844_v16  ;;  %v4106_v6 = vsub.f32 %v12510_v13, %v10898_v42  ;;  %v12516_v33 = vld [vmem:[#allocation92_spill] sm:$0xff] }
 0x62b   : > { %v6711_v30 = vpack.c.bf16 %v7264_v52, %v7263_v5  ;;  %3664 = vmatmul.mubr.f32.gmra.mrb[134].mxu0 %v3438_v24  ;;  %v4152_v52 = vmul.f32 1.442695, %v4105_v54  ;;  %v12511_v5 = vld [vmem:[#allocation22_spill] sm:$0xff]  ;;  %v4160_v55 = vmul.f32 1.442695, %v4109_v40  ;;  %v4111_v44 = vsub.f32 %v10858_v60, %v11078_v49 }
 0x62c   : > { %3668 = vmatprep.mubr.f32.mxu0 %v3441_v1  ;;  %v4142_v21 = vmul.f32 1.442695, %v4100_v22  ;;  %v4144_v3 = vmul.f32 1.442695, %v4101_v57  ;;  %v4150_v58 = vmul.f32 1.442695, %v4104_v25  ;;  %v4107_v24 = vsub.f32 %v12511_v5, %v10898_v42 }
 0x62d   : > { %7306 = vrot.lane.b32.xlu1 %v12406_v20, %s7975_s18  ;;  %6712 = vmatpush3.bf16.msra.mxu0 %v6711_v30  ;;  %v4138_v20 = vmul.f32 1.442695, %v4098_v0  ;;  %v4154_v16 = vmul.f32 1.442695, %v4106_v6  ;;  %v4158_v42 = vmul.f32 1.442695, %v4108_v56  ;;  %v4112_v2 = vsub.f32 %v10908_v10, %v11138_v47 }
 0x62e   : > { %v12515_v57 = vld [vmem:[#allocation89_spill] sm:$0xff]  ;;  %v4119_v25 = vsub.f32 %v12516_v33, %v11189_v50 }
 0x62f   : > { %3669 = vmatmul.mubr.f32.gmra.mrb[136].mxu0 %v3440_v63  ;;  %7747 = vpow2.f32 %v4138_v20  ;;  %v4156_v63 = vmul.f32 1.442695, %v4107_v24  ;;  %v4166_v20 = vmul.f32 1.442695, %v4112_v2  ;;  %v12518_v24 = vld [vmem:[#allocation53_spill] sm:$0xff] }
 0x630   : > { %3673 = vmatprep.mubr.f32.mxu0 %v3443_v37  ;;  %7749 = vpow2.f32 %v4140_v45  ;;  %v4110_v37 = vsub.f32 %v10854_v23, %v11078_v49  ;;  %v12512_v23 = vld [vmem:[#allocation74_spill] sm:$0xff] }
 0x631   : > { %7311 = vrot.lane.b32.xlu1 %v12414_v19, %s7975_s18 }
 0x632   : > { %v4162_v7 = vmul.f32 1.442695, %v4110_v37 }
 0x633   : > { %3674 = vmatmul.mubr.f32.gmra.mrb[138].mxu0 %v3442_v26 }
 0x634   : > { %3678 = vmatprep.mubr.f32.mxu0 %v3445_v53  ;;  %v12513_v53 = vld [vmem:[#allocation83_spill] sm:$0xff] }
 0x635   : > { %v4114_v45 = vsub.f32 %v12513_v53, %v11183_v51 }
 0x637   : > { %3679 = vmatmul.mubr.f32.gmra.mrb[140].mxu0 %v3444_v41  ;;  %v12514_v41 = vld [vmem:[#allocation78_spill] sm:$0xff]  ;;  %v4170_v11 = vmul.f32 1.442695, %v4114_v45 }
 0x638   : > { %v4115_v46 = vsub.f32 %v12514_v41, %v11183_v51 }
 0x639   : > { %v11245_v27 = vpop.eup %7747 }
 0x63a   : > { %v11249_v9 = vpop.eup %7749 }
 0x63b   : > { %v4198_v43 = vadd.f32 %v11249_v9, %v11245_v27 }
 0x63f   : > { %v3399_v19 = vpop.xlane.xlu1 %3398 }
 0x640   : > { %7751 = vrcp.f32 %v3399_v19  ;;  %v4118_v19 = vsub.f32 %v12515_v57, %v11189_v50 }
 0x641   : > { %7753 = vpow2.f32 %v4142_v21  ;;  %v4172_v21 = vmul.f32 1.442695, %v4115_v46 }
 0x642   : > { %7755 = vpow2.f32 %v4144_v3 }
 0x643   : > { %v7267_v17 = vpop.permute.xlu1 %7266  ;;  %7757 = vpow2.f32 %v4150_v58 }
 0x644   : > { %v7269_v28 = vunpack.i.h.bf16 %v7267_v17  ;;  %v7268_v59 = vunpack.i.l.bf16 %v7267_v17  ;;  %7759 = vpow2.f32 %v4152_v52  ;;  %v4178_v17 = vmul.f32 1.442695, %v4118_v19  ;;  %v12523_v19 = vld [vmem:[#allocation82_spill] sm:$0xff] }
 0x645   : > { %7761 = vpow2.f32 %v4154_v16 }
 0x646   : > { %v6713_v1 = vpack.c.bf16 %v7269_v28, %v7268_v59  ;;  %4199 = vadd.xlane.f32.xlu0 %v4198_v43  ;;  %7763 = vpow2.f32 %v4156_v63  ;;  %v12517_v28 = vld [vmem:[#allocation54_spill] sm:$0xff]  ;;  %v4180_v59 = vmul.f32 1.442695, %v4119_v25 }
 0x647   : > { %7765 = vpow2.f32 %v4158_v42 }
 0x648   : > { %6714 = vmatprep.subr.bf16.mxu0 %v6713_v1  ;;  %7767 = vpow2.f32 %v4160_v55 }
 0x649   : > { %7769 = vpow2.f32 %v4162_v7 }
 0x64a   : > { %v7752_v30 = vpop.eup %7751 }
 0x64b   : > { %v3447_v38 = vmul.f32 %v7752_v30, %v11126_v4  ;;  %v3446_v0 = vmul.f32 %v7752_v30, %v11124_v31  ;;  %v11269_v36 = vpop.eup %7753  ;;  %v4164_v31 = vmul.f32 1.442695, %v4111_v44  ;;  %v4113_v4 = vsub.f32 %v12512_v23, %v11138_v47  ;;  %v12519_v23 = vld [vmem:[#allocation29_spill] sm:$0xff] }
 0x64c   : > { %v11271_v32 = vpop.eup %7755 }
 0x64d   : > { %3683 = vmatprep.mubr.f32.mxu0 %v3447_v38  ;;  %v11277_v26 = vpop.eup %7757  ;;  %v4201_v60 = vadd.f32 %v11271_v32, %v11269_v36  ;;  %7771 = vpow2.f32 %v4164_v31  ;;  %v4168_v10 = vmul.f32 1.442695, %v4113_v4  ;;  %v12520_v4 = vld [vmem:[#allocation55_spill] sm:$0xff] }
 0x64e   : > { %3684 = vmatmul.mubr.f32.gmra.mrb[142].mxu0 %v3446_v0  ;;  %v11281_v49 = vpop.eup %7759  ;;  %7773 = vpow2.f32 %v4166_v20  ;;  %v12521_v20 = vld [vmem:[#allocation35_spill] sm:$0xff] }
 0x64f   : > { %v11287_v29 = vpop.eup %7761  ;;  %v4207_v47 = vadd.f32 %v11281_v49, %v11277_v26  ;;  %7775 = vpow2.f32 %v4168_v10  ;;  %v4103_v53 = vsub.f32 %v12521_v20, %v12519_v23 }
 0x650   : > { %v11291_v22 = vpop.eup %7763 }
 0x651   : > { %v11297_v51 = vpop.eup %7765  ;;  %v4210_v35 = vadd.f32 %v11291_v22, %v11287_v29  ;;  %v4148_v57 = vmul.f32 1.442695, %v4103_v53 }
 0x652   : > { %v11301_v54 = vpop.eup %7767 }
 0x653   : > { %v11305_v13 = vpop.eup %7769  ;;  %v4213_v43 = vadd.f32 %v11301_v54, %v11297_v51 }
 0x655   : > { %4202 = vadd.xlane.f32.xlu1 %v4201_v60  ;;  %v4102_v60 = vsub.f32 %v12520_v4, %v12519_v23 }
 0x657   : > { %v11309_v52 = vpop.eup %7771  ;;  %v4146_v46 = vmul.f32 1.442695, %v4102_v60 }
 0x658   : > { %v11313_v16 = vpop.eup %7773  ;;  %v4216_v63 = vadd.f32 %v11309_v52, %v11305_v13 }
 0x659   : > { %4208 = vadd.xlane.f32.xlu1 %v4207_v47  ;;  %v4188_v3 = vpop.xlane.xlu0 %4187  ;;  %v11317_v40 = vpop.eup %7775  ;;  %v12522_v47 = vld [vmem:[#allocation87_spill] sm:$0xff] }
 0x65a   : > { %7777 = vrcp.f32 %v4188_v3  ;;  %v4219_v2 = vadd.f32 %v11317_v40, %v11313_v16  ;;  %v12524_v3 = vld [vmem:[#allocation51_spill] sm:$0xff] }
 0x65b   : > { %7779 = vpow2.f32 %v4170_v11  ;;  %v4116_v11 = vsub.f32 %v12522_v47, %v11187_v18 }
 0x65c   : > { %7316 = vrot.lane.b32.xlu0 %v12517_v28, %s7975_s18  ;;  %7781 = vpow2.f32 %v4172_v21  ;;  %v4117_v21 = vsub.f32 %v12523_v19, %v11187_v18  ;;  %v12525_v28 = vld [vmem:[#allocation68_spill] sm:$0xff] }
 0x65d   : > { %4211 = vadd.xlane.f32.xlu1 %v4210_v35  ;;  %v7272_v58 = vpop.permute.xlu0 %7271  ;;  %7783 = vpow2.f32 %v4178_v17  ;;  %v4174_v25 = vmul.f32 1.442695, %v4116_v11  ;;  %v4120_v35 = vsub.f32 %v12524_v3, %v11199_v15 }
 0x65e   : > { %v7274_v50 = vunpack.i.h.bf16 %v7272_v58  ;;  %v7273_v6 = vunpack.i.l.bf16 %v7272_v58  ;;  %7785 = vpow2.f32 %v4180_v59  ;;  %v4176_v17 = vmul.f32 1.442695, %v4117_v21 }
 0x65f   : > { %7787 = vpow2.f32 %v4146_v46  ;;  %v4121_v59 = vsub.f32 %v12525_v28, %v11199_v15  ;;  %v4182_v58 = vmul.f32 1.442695, %v4120_v35 }
 0x660   : > { %v6715_v5 = vpack.c.bf16 %v7274_v50, %v7273_v6  ;;  %7321 = vrot.lane.b32.xlu0 %v12518_v24, %s7975_s18  ;;  %7789 = vpow2.f32 %v4148_v57 }
 0x661   : > { %4214 = vadd.xlane.f32.xlu1 %v4213_v43  ;;  %v7277_v1 = vpop.permute.xlu0 %7276  ;;  %7791 = vpow2.f32 %v4174_v25  ;;  %v4184_v18 = vmul.f32 1.442695, %v4121_v59 }
 0x662   : > { %v7279_v56 = vunpack.i.h.bf16 %v7277_v1  ;;  %v7278_v30 = vunpack.i.l.bf16 %v7277_v1  ;;  %6716 = vmatpush3.bf16.msra.mxu0 %v6715_v5  ;;  %7793 = vpow2.f32 %v4176_v17 }
 0x663   : > { %7795 = vpow2.f32 %v4182_v58 }
 0x664   : > { %v11319_v38 = vpop.eup %7777  ;;  %v6717_v0 = vpack.c.bf16 %v7279_v56, %v7278_v30  ;;  %7797 = vpow2.f32 %v4184_v18 }
 0x665   : > { %4217 = vadd.xlane.f32.xlu1 %v4216_v63  ;;  %v7282_v42 = vpop.permute.xlu0 %7281  ;;  %v4251_v37 = vmul.f32 %v11319_v38, %v11144_v61  ;;  %v11323_v55 = vpop.eup %7779 }
 0x666   : > { %v7284_v44 = vunpack.i.h.bf16 %v7282_v42  ;;  %v7283_v7 = vunpack.i.l.bf16 %v7282_v42  ;;  %6718 = vmatprep.subr.bf16.mxu0 %v6717_v0  ;;  %v11327_v31 = vpop.eup %7781  ;;  %v12526_v42 = vld [vmem:[#allocation76_spill] sm:$0xff] }
 0x667   : > { %4442 = vmatprep.mubr.f32.mxu0 %v4251_v37  ;;  %v11333_v61 = vpop.eup %7783  ;;  %v4222_v10 = vadd.f32 %v11327_v31, %v11323_v55  ;;  %v12527_v37 = vld [vmem:[#allocation73_spill] sm:$0xff] }
 0x668   : > { %v6719_v45 = vpack.c.bf16 %v7284_v44, %v7283_v7  ;;  %v11337_v41 = vpop.eup %7785  ;;  %v12528_v44 = vpack.i.bf16 %v12526_v42, %v12527_v37 }
 0x669   : > { %4220 = vadd.xlane.f32.xlu1 %v4219_v2  ;;  %v4228_v33 = vadd.f32 %v11337_v41, %v11333_v61  ;;  %v11351_v24 = vpop.eup %7787 }
 0x66a   : > { %6720 = vmatpush3.bf16.msra.mxu0 %v6719_v45  ;;  %v11353_v1 = vpop.eup %7789 }
 0x66b   : > { %v11355_v30 = vpop.eup %7791  ;;  %v4204_v15 = vadd.f32 %v11353_v1, %v11351_v24 }
 0x66c   : > { %v11359_v63 = vpop.eup %7793 }
 0x66d   : > { %4223 = vadd.xlane.f32.xlu1 %v4222_v10  ;;  %v11361_v0 = vpop.eup %7795  ;;  %v4225_v7 = vadd.f32 %v11359_v63, %v11355_v30 }
 0x66e   : > { %v11369_v2 = vpop.eup %7797 }
 0x66f   : > { %v4231_v23 = vadd.f32 %v11369_v2, %v11361_v0 }
 0x671   : > { %4229 = vadd.xlane.f32.xlu1 %v4228_v33 }
 0x674   : > { %v11349_v50 = vpop.xlane.xlu1 %4190 }
 0x675   : > { %7799 = vrcp.f32 %v11349_v50 }
 0x678   : > { %v7287_v6 = vpop.permute.xlu1 %7286 }
 0x679   : > { %v7289_v43 = vunpack.i.h.bf16 %v7287_v6  ;;  %v7288_v5 = vunpack.i.l.bf16 %v7287_v6 }
 0x67b   : > { %v6721_v56 = vpack.c.bf16 %v7289_v43, %v7288_v5 }
 0x67d   : > { %6722 = vmatprep.subr.bf16.mxu0 %v6721_v56 }
 0x67f   : > { %4205 = vadd.xlane.f32.xlu0 %v4204_v15 }
 0x682   : > { %7326 = vrot.lane.b32.xlu1 %v12528_v44, %s7975_s18 }
 0x683   : > { %4226 = vadd.xlane.f32.xlu0 %v4225_v7 }
 0x687   : > { %4232 = vadd.xlane.f32.xlu0 %v4231_v23 }
 0x696   : > { %v4194_v4 = vpop.xlane.xlu0 %4193 }
 0x697   : > { %7801 = vrcp.f32 %v4194_v4 }
 0x69a   : > { %v7292_v60 = vpop.permute.xlu0 %7291 }
 0x69b   : > { %v7294_v20 = vunpack.i.h.bf16 %v7292_v60  ;;  %v7293_v53 = vunpack.i.l.bf16 %v7292_v60 }
 0x69d   : > { %v6723_v45 = vpack.c.bf16 %v7294_v20, %v7293_v53 }
 0x69e   : > { %v7297_v10 = vpop.permute.xlu0 %7296 }
 0x69f   : > { %v7299_v46 = vunpack.i.h.bf16 %v7297_v10  ;;  %v7298_v47 = vunpack.i.l.bf16 %v7297_v10  ;;  %6724 = vmatpush3.bf16.msra.mxu0 %v6723_v45 }
 0x6a1   : > { %v6725_v11 = vpack.c.bf16 %v7299_v46, %v7298_v47 }
 0x6a2   : > { %v7302_v57 = vpop.permute.xlu0 %7301 }
 0x6a3   : > { %v7304_v19 = vunpack.i.h.bf16 %v7302_v57  ;;  %v7303_v21 = vunpack.i.l.bf16 %v7302_v57  ;;  %6726 = vmatprep.subr.bf16.mxu0 %v6725_v11 }
 0x6a5   : > { %v6727_v33 = vpack.c.bf16 %v7304_v19, %v7303_v21 }
 0x6a7   : > { %6728 = vmatpush3.bf16.msra.mxu0 %v6727_v33  ;;  %v12529_v33 = vld [vmem:[#allocation77_spill] sm:$0xff] }
 0x6a9   : > { %v4197_v25 = vpop.xlane.xlu1 %4196 }
 0x6aa   : > { %7803 = vrcp.f32 %v4197_v25 }
 0x6ad   : > { %v7307_v3 = vpop.permute.xlu1 %7306 }
 0x6ae   : > { %v7309_v35 = vunpack.i.h.bf16 %v7307_v3  ;;  %v7308_v17 = vunpack.i.l.bf16 %v7307_v3  ;;  %v12530_v3 = vld [vmem:[#allocation23_spill] sm:$0xff] }
 0x6b0   : > { %v6729_v28 = vpack.c.bf16 %v7309_v35, %v7308_v17  ;;  %v12531_v35 = vpack.i.bf16 %v12529_v33, %v12530_v3 }
 0x6b1   : > { %v7312_v59 = vpop.permute.xlu1 %7311 }
 0x6b2   : > { %v7314_v58 = vunpack.i.h.bf16 %v7312_v59  ;;  %v7313_v18 = vunpack.i.l.bf16 %v7312_v59  ;;  %6730 = vmatprep.subr.bf16.mxu0 %v6729_v28  ;;  %v5825_v6 = vpop.f32.mrb[112].mxu0 }
 0x6b3   : > { %v5826_v5 = vpop.f32.mrb[113].mxu0 }
 0x6b4   : > { %v6731_v43 = vpack.c.bf16 %v7314_v58, %v7313_v18  ;;  %v5827_v56 = vadd.f32 %v5826_v5, %v5825_v6 }
 0x6b6   : > { %6732 = vmatpush3.bf16.msra.mxu0 %v6731_v43  ;;  %v5828_v15 = vpop.f32.mrb[114].mxu0 }
 0x6b7   : > { %v5829_v42 = vpop.f32.mrb[115].mxu0 }
 0x6b8   : > { %v5830_v37 = vadd.f32 %v5829_v42, %v5828_v15  ;;  %v7800_v42 = vpop.eup %7799 }
 0x6b9   : > { %v4253_v50 = vmul.f32 %v7800_v42, %v11160_v8  ;;  %v4252_v4 = vmul.f32 %v7800_v42, %v11158_v14 }
 0x6ba   : > { %v7330_v44 = vpack.i.bf16 %v5830_v37, %v5827_v56  ;;  %v5831_v7 = vpop.f32.mrb[116].mxu0  ;;  %v4250_v37 = vmul.f32 %v11319_v38, %v11142_v12 }
 0x6bb   : > { %v5832_v23 = vpop.f32.mrb[117].mxu0 }
 0x6bc   : > { %v5833_v60 = vadd.f32 %v5832_v23, %v5831_v7  ;;  %7331 = vrot.lane.b32.xlu0 %v7330_v44, %s7974_s17  ;;  %v7802_v7 = vpop.eup %7801 }
 0x6bd   : > { %v4255_v23 = vmul.f32 %v7802_v7, %v11195_v62  ;;  %v4254_v25 = vmul.f32 %v7802_v7, %v11191_v39 }
 0x6be   : > { %v5834_v20 = vpop.f32.mrb[118].mxu0 }
 0x6bf   : > { %v5835_v53 = vpop.f32.mrb[119].mxu0 }
 0x6c0   : > { %v5836_v45 = vadd.f32 %v5835_v53, %v5834_v20 }
 0x6c2   : > { %v7345_v10 = vpack.i.bf16 %v5836_v45, %v5833_v60  ;;  %v5837_v46 = vpop.f32.mrb[120].mxu0  ;;  %v7804_v60 = vpop.eup %7803 }
 0x6c3   : > { %v5838_v47 = vpop.f32.mrb[121].mxu0  ;;  %v4257_v12 = vmul.f32 %v7804_v60, %v11207_v48  ;;  %v4256_v45 = vmul.f32 %v7804_v60, %v11205_v34 }
 0x6c4   : > { %v11374_v11 = vadd.f32 %v5838_v47, %v5837_v46  ;;  %7346 = vrot.lane.b32.xlu0 %v7345_v10, %s7974_s17 }
 0x6c6   : > { %v5840_v57 = vpop.f32.mrb[122].mxu0 }
 0x6c7   : > { %v5841_v19 = vpop.f32.mrb[123].mxu0 }
 0x6c8   : > { %v11377_v21 = vadd.f32 %v5841_v19, %v5840_v57  ;;  %7356 = vrot.lane.b32.xlu0 %v12531_v35, %s7975_s18 }
 0x6ca   : > { %v7360_v17 = vpack.i.bf16 %v11377_v21, %v11374_v11 }
 0x6d3   : > { %v4200_v28 = vpop.xlane.xlu0 %4199 }
 0x6d4   : > { %7805 = vrcp.f32 %v4200_v28 }
 0x6d7   : > { %v7317_v59 = vpop.permute.xlu0 %7316 }
 0x6d8   : > { %v7319_v58 = vunpack.i.h.bf16 %v7317_v59  ;;  %v7318_v18 = vunpack.i.l.bf16 %v7317_v59 }
 0x6da   : > { %v6733_v6 = vpack.c.bf16 %v7319_v58, %v7318_v18 }
 0x6db   : > { %v7322_v43 = vpop.permute.xlu0 %7321 }
 0x6dc   : > { %v7324_v5 = vunpack.i.h.bf16 %v7322_v43  ;;  %v7323_v56 = vunpack.i.l.bf16 %v7322_v43  ;;  %6734 = vmatprep.subr.bf16.mxu0 %v6733_v6 }
 0x6de   : > { %v6735_v15 = vpack.c.bf16 %v7324_v5, %v7323_v56  ;;  %v7806_v38 = vpop.eup %7805 }
 0x6df   : > { %v4259_v14 = vmul.f32 %v7806_v38, %v11249_v9  ;;  %v4258_v39 = vmul.f32 %v7806_v38, %v11245_v27 }
 0x6e0   : > { %6736 = vmatpush3.bf16.msra.mxu0 %v6735_v15 }
 0x6e2   : > { %v4203_v44 = vpop.xlane.xlu1 %4202 }
 0x6e3   : > { %4443 = vmatmul.mubr.f32.vlgmr.msra.gmra.mrb[144].mxu0 %v4250_v37  ;;  %7807 = vrcp.f32 %v4203_v44 }
 0x6e4   : > { %4447 = vmatprep.mubr.f32.mxu0 %v4253_v50 }
 0x6e6   : > { %v4209_v43 = vpop.xlane.xlu1 %4208 }
 0x6e7   : > { %4448 = vmatmul.mubr.f32.gmra.mrb[146].mxu0 %v4252_v4  ;;  %7809 = vrcp.f32 %v4209_v43 }
 0x6e8   : > { %4452 = vmatprep.mubr.f32.mxu0 %v4255_v23 }
 0x6ea   : > { %v5843_v20 = vpop.f32.mrb[124].mxu0  ;;  %v4212_v37 = vpop.xlane.xlu1 %4211 }
 0x6eb   : > { %v5844_v53 = vpop.f32.mrb[125].mxu0  ;;  %4453 = vmatmul.mubr.f32.gmra.mrb[148].mxu0 %v4254_v25 }
 0x6ec   : > { %v11393_v8 = vadd.f32 %v5844_v53, %v5843_v20  ;;  %4457 = vmatprep.mubr.f32.mxu0 %v4257_v12 }
 0x6ed   : > { %v7808_v62 = vpop.eup %7807 }
 0x6ee   : > { %v5846_v10 = vpop.f32.mrb[126].mxu0  ;;  %v4261_v19 = vmul.f32 %v7808_v62, %v11271_v32  ;;  %v4260_v9 = vmul.f32 %v7808_v62, %v11269_v36  ;;  %v4215_v25 = vpop.xlane.xlu1 %4214 }
 0x6ef   : > { %v5847_v46 = vpop.f32.mrb[127].mxu0  ;;  %4458 = vmatmul.mubr.f32.gmra.mrb[150].mxu0 %v4256_v45 }
 0x6f0   : > { %v11397_v47 = vadd.f32 %v5847_v46, %v5846_v10  ;;  %4462 = vmatprep.mubr.f32.mxu0 %v4259_v14 }
 0x6f1   : > { %v7810_v53 = vpop.eup %7809 }
 0x6f2   : > { %v7375_v48 = vpack.i.bf16 %v11397_v47, %v11393_v8  ;;  %v5849_v57 = vpop.f32.mrb[128].mxu0  ;;  %v4218_v38 = vpop.xlane.xlu1 %4217  ;;  %v4265_v46 = vmul.f32 %v7810_v53, %v11281_v49 }
 0x6f3   : > { %v5850_v33 = vpop.f32.mrb[129].mxu0  ;;  %4463 = vmatmul.mubr.f32.gmra.mrb[152].mxu0 %v4258_v39 }
 0x6f4   : > { %v11403_v34 = vadd.f32 %v5850_v33, %v5849_v57  ;;  %4467 = vmatprep.mubr.f32.mxu0 %v4261_v19  ;;  %v4264_v57 = vmul.f32 %v7810_v53, %v11277_v26  ;;  %v4771_v53 = vld [vmem:[%s11714_s10 + $0x30] sm:$0xff] }
 0x6f6   : > { %v5852_v3 = vpop.f32.mrb[130].mxu0  ;;  %v4221_v10 = vpop.xlane.xlu1 %4220 }
 0x6f7   : > { %v5853_v35 = vpop.f32.mrb[131].mxu0  ;;  %4468 = vmatmul.mubr.f32.gmra.mrb[154].mxu0 %v4260_v9 }
 0x6f8   : > { %v11406_v28 = vadd.f32 %v5853_v35, %v5852_v3 }
 0x6fa   : > { %v7390_v27 = vpack.i.bf16 %v11406_v28, %v11403_v34  ;;  %v5855_v59 = vpop.f32.mrb[132].mxu0  ;;  %v4224_v19 = vpop.xlane.xlu1 %4223 }
 0x6fb   : > { %v5856_v58 = vpop.f32.mrb[133].mxu0 }
 0x6fc   : > { %v11410_v18 = vadd.f32 %v5856_v58, %v5855_v59 }
 0x6fe   : > { %v5858_v32 = vpop.f32.mrb[134].mxu0 }
 0x6ff   : > { %v5859_v6 = vpop.f32.mrb[135].mxu0 }
 0x700   : > { %v11412_v5 = vadd.f32 %v5859_v6, %v5858_v32  ;;  %v4230_v32 = vpop.xlane.xlu1 %4229 }
 0x702   : > { %v7405_v36 = vpack.i.bf16 %v11412_v5, %v11410_v18  ;;  %v5861_v56 = vpop.f32.mrb[136].mxu0 }
 0x703   : > { %v5862_v15 = vpop.f32.mrb[137].mxu0 }
 0x704   : > { %v11416_v42 = vadd.f32 %v5862_v15, %v5861_v56 }
 0x706   : > { %v5864_v44 = vpop.f32.mrb[138].mxu0 }
 0x707   : > { %v5865_v50 = vpop.f32.mrb[139].mxu0 }
 0x708   : > { %v11418_v7 = vadd.f32 %v5865_v50, %v5864_v44 }
 0x70a   : > { %v7420_v4 = vpack.i.bf16 %v11418_v7, %v11416_v42  ;;  %v5867_v23 = vpop.f32.mrb[140].mxu0  ;;  %v7327_v7 = vpop.permute.xlu1 %7326 }
 0x70b   : > { %v5868_v60 = vpop.f32.mrb[141].mxu0 }
 0x70c   : > { %v11422_v20 = vadd.f32 %v5868_v60, %v5867_v23  ;;  %v4206_v12 = vpop.xlane.xlu0 %4205 }
 0x70d   : > { %7811 = vrcp.f32 %v4206_v12  ;;  %v4770_v12 = vld [vmem:[%s11714_s10 + $0x28] sm:$0xff] }
 0x70e   : > { %7813 = vrcp.f32 %v4212_v37 }
 0x70f   : > { %7815 = vrcp.f32 %v4215_v25 }
 0x710   : > { %7817 = vrcp.f32 %v4218_v38  ;;  %v4227_v35 = vpop.xlane.xlu0 %4226 }
 0x711   : > { %7819 = vrcp.f32 %v4221_v10 }
 0x712   : > { %7821 = vrcp.f32 %v4224_v19 }
 0x713   : > { %7823 = vrcp.f32 %v4227_v35 }
 0x714   : > { %7825 = vrcp.f32 %v4230_v32  ;;  %v4233_v56 = vpop.xlane.xlu0 %4232 }
 0x715   : > { %7827 = vrcp.f32 %v4233_v56 }
 0x717   : > { %v7812_v45 = vpop.eup %7811 }
 0x718   : > { %v4263_v14 = vmul.f32 %v7812_v45, %v11353_v1  ;;  %v4262_v62 = vmul.f32 %v7812_v45, %v11351_v24  ;;  %v7814_v39 = vpop.eup %7813  ;;  %v4772_v45 = vld [vmem:[%s11714_s10 + $0x38] sm:$0xff] }
 0x719   : > { %v4267_v33 = vmul.f32 %v7814_v39, %v11291_v22  ;;  %v7816_v9 = vpop.eup %7815  ;;  %v4266_v24 = vmul.f32 %v7814_v39, %v11287_v29  ;;  %v6749_v10 = vpack.c.bf16 %v4772_v45, %v4771_v53  ;;  %v4775_v39 = vld [vmem:[%s11714_s10 + $0x50] sm:$0xff] }
 0x71a   : > { %4472 = vmatprep.mubr.f32.mxu0 %v4263_v14  ;;  %v4269_v49 = vmul.f32 %v7816_v9, %v11301_v54  ;;  %v7818_v58 = vpop.eup %7817  ;;  %v4268_v22 = vmul.f32 %v7816_v9, %v11297_v51  ;;  %v4773_v14 = vld [vmem:[%s11714_s10 + $0x40] sm:$0xff]  ;;  %v4778_v9 = vld [vmem:[%s11714_s10 + $0x68] sm:$0xff] }
 0x71b   : > { %4473 = vmatmul.mubr.f32.gmra.mrb[156].mxu0 %v4262_v62  ;;  %v4271_v6 = vmul.f32 %v7818_v58, %v11309_v52  ;;  %v7820_v43 = vpop.eup %7819  ;;  %v4270_v29 = vmul.f32 %v7818_v58, %v11305_v13  ;;  %v4774_v62 = vld [vmem:[%s11714_s10 + $0x48] sm:$0xff] }
 0x71c   : > { %4477 = vmatprep.mubr.f32.mxu0 %v4265_v46  ;;  %v4273_v54 = vmul.f32 %v7820_v43, %v11317_v40  ;;  %v7822_v15 = vpop.eup %7821  ;;  %v4272_v37 = vmul.f32 %v7820_v43, %v11313_v16  ;;  %v6753_v46 = vpack.c.bf16 %v4774_v62, %v4773_v14 }
 0x71d   : > { %v4275_v51 = vmul.f32 %v7822_v15, %v11327_v31  ;;  %v7824_v44 = vpop.eup %7823  ;;  %v4274_v52 = vmul.f32 %v7822_v15, %v11323_v55 }
 0x71e   : > { %v4277_v50 = vmul.f32 %v7824_v44, %v11359_v63  ;;  %v7826_v23 = vpop.eup %7825  ;;  %v4276_v13 = vmul.f32 %v7824_v44, %v11355_v30  ;;  %v4765_v63 = vld [vmem:[%s11714_s10] sm:$0xff] }
 0x71f   : > { %4478 = vmatmul.mubr.f32.gmra.mrb[158].mxu0 %v4264_v57  ;;  %v4279_v40 = vmul.f32 %v7826_v23, %v11337_v41  ;;  %v7828_v60 = vpop.eup %7827  ;;  %v4278_v16 = vmul.f32 %v7826_v23, %v11333_v61  ;;  %v4766_v41 = vld [vmem:[%s11714_s10 + $0x8] sm:$0xff]  ;;  %v4767_v61 = vld [vmem:[%s11714_s10 + $0x10] sm:$0xff]  ;;  %v4776_v57 = vld [vmem:[%s11714_s10 + $0x58] sm:$0xff] }
 0x720   : > { %4482 = vmatprep.mubr.f32.mxu0 %v4267_v33  ;;  %v4281_v31 = vmul.f32 %v7828_v60, %v11369_v2  ;;  %v4280_v55 = vmul.f32 %v7828_v60, %v11361_v0  ;;  %v6737_v30 = vpack.c.bf16 %v4766_v41, %v4765_v63  ;;  %v4768_v2 = vld [vmem:[%s11714_s10 + $0x18] sm:$0xff]  ;;  %v4769_v0 = vld [vmem:[%s11714_s10 + $0x20] sm:$0xff]  ;;  %v6757_v19 = vpack.c.bf16 %v4776_v57, %v4775_v39 }
 0x721   : > { %v5870_v3 = vpop.f32.mrb[142].mxu0  ;;  %v6741_v25 = vpack.c.bf16 %v4768_v2, %v4767_v61  ;;  %v6745_v38 = vpack.c.bf16 %v4770_v12, %v4769_v0  ;;  %v4777_v33 = vld [vmem:[%s11714_s10 + $0x60] sm:$0xff]  ;;  %v12536_v61 = vld [vmem:[#allocation80_spill] sm:$0xff]  ;;  %v12538_v0 = vld [vmem:[#allocation81_spill] sm:$0xff] }
 0x722   : > { %v5871_v1 = vpop.f32.mrb[143].mxu0  ;;  %6738 = vmatprep.subr.bf16.mxu1 %v6737_v30 }
 0x723   : > { %v11430_v59 = vadd.f32 %v5871_v1, %v5870_v3  ;;  %4483 = vmatmul.mubr.f32.gmra.mrb[160].mxu0 %v4266_v24  ;;  %6740 = vmatpush3.bf16.msra.mxu1 %v6737_v30  ;;  %v6761_v3 = vpack.c.bf16 %v4778_v9, %v4777_v33  ;;  %v4779_v1 = vld [vmem:[%s11714_s10 + $0x70] sm:$0xff]  ;;  %v4780_v24 = vld [vmem:[%s11714_s10 + $0x78] sm:$0xff]  ;;  %v12535_v30 = vld [vmem:[#allocation50_spill] sm:$0xff] }
 0x724   : > { %4487 = vmatprep.mubr.f32.mxu0 %v4269_v49  ;;  %6742 = vmatprep.subr.bf16.mxu1 %v6741_v25  ;;  %v6765_v35 = vpack.c.bf16 %v4780_v24, %v4779_v1  ;;  %v12537_v2 = vpack.i.bf16 %v12535_v30, %v12536_v61  ;;  %v12541_v9 = vld [vmem:[#allocation26_spill] sm:$0xff]  ;;  %v12551_v30 = vld [vmem:[#allocation15_spill] sm:$0xff] }
 0x725   : > { %v7435_v26 = vpack.i.bf16 %v11430_v59, %v11422_v20 }
 0x727   : > { %4488 = vmatmul.mubr.f32.gmra.mrb[162].mxu0 %v4268_v22  ;;  %6744 = vmatpush3.bf16.msra.mxu1 %v6741_v25  ;;  %v12539_v25 = vld [vmem:[#allocation24_spill] sm:$0xff] }
 0x728   : > { %4492 = vmatprep.mubr.f32.mxu0 %v4271_v6  ;;  %6746 = vmatprep.subr.bf16.mxu1 %v6745_v38  ;;  %v12540_v12 = vpack.i.bf16 %v12538_v0, %v12539_v25 }
 0x72b   : > { %4493 = vmatmul.mubr.f32.gmra.mrb[164].mxu0 %v4270_v29  ;;  %6748 = vmatpush3.bf16.msra.mxu1 %v6745_v38 }
 0x72c   : > { %4497 = vmatprep.mubr.f32.mxu0 %v4273_v54  ;;  %6750 = vmatprep.subr.bf16.mxu1 %v6749_v10 }
 0x72f   : > { %4498 = vmatmul.mubr.f32.gmra.mrb[166].mxu0 %v4272_v37  ;;  %6752 = vmatpush3.bf16.msra.mxu1 %v6749_v10 }
 0x730   : > { %4502 = vmatprep.mubr.f32.mxu0 %v4275_v51  ;;  %6754 = vmatprep.subr.bf16.mxu1 %v6753_v46 }
 0x733   : > { %4503 = vmatmul.mubr.f32.gmra.mrb[168].mxu0 %v4274_v52  ;;  %6756 = vmatpush3.bf16.msra.mxu1 %v6753_v46  ;;  %v12532_v52 = vld [vmem:[#allocation21_spill] sm:$0xff] }
 0x734   : > { %4507 = vmatprep.mubr.f32.mxu0 %v4277_v50  ;;  %6758 = vmatprep.subr.bf16.mxu1 %v6757_v19  ;;  %v12533_v50 = vld [vmem:[#allocation47_spill] sm:$0xff] }
 0x735   : > { %v12534_v23 = vpack.i.bf16 %v12532_v52, %v12533_v50 }
 0x737   : > { %4508 = vmatmul.mubr.f32.gmra.mrb[170].mxu0 %v4276_v13  ;;  %6760 = vmatpush3.bf16.msra.mxu1 %v6757_v19 }
 0x738   : > { %4512 = vmatprep.mubr.f32.mxu0 %v4279_v40  ;;  %6762 = vmatprep.subr.bf16.mxu1 %v6761_v3 }
 0x73b   : > { %4513 = vmatmul.mubr.f32.gmra.mrb[172].mxu0 %v4278_v16  ;;  %6764 = vmatpush3.bf16.msra.mxu1 %v6761_v3  ;;  %v12542_v3 = vld [vmem:[#allocation84_spill] sm:$0xff] }
 0x73c   : > { %4517 = vmatprep.mubr.f32.mxu0 %v4281_v31  ;;  %6766 = vmatprep.subr.bf16.mxu1 %v6765_v35  ;;  %v12543_v1 = vpack.i.bf16 %v12541_v9, %v12542_v3 }
 0x73f   : > { %4518 = vmatmul.mubr.f32.gmra.mrb[174].mxu0 %v4280_v55  ;;  %6768 = vmatpush3.bf16.msra.mxu1 %v6765_v35 }
 0x7b6   : > { %v5969_v49 = vpop.f32.mrb[144].mxu0 }
 0x7b7   : > { %v5970_v58 = vpop.f32.mrb[145].mxu0 }
 0x7b8   : > { %v5971_v22 = vadd.f32 %v5970_v58, %v5969_v49 }
 0x7ba   : > { %v5972_v32 = vpop.f32.mrb[146].mxu0 }
 0x7bb   : > { %v5973_v6 = vpop.f32.mrb[147].mxu0 }
 0x7bc   : > { %v5974_v43 = vadd.f32 %v5973_v6, %v5972_v32  ;;  %v12545_v32 = vld [vmem:[#allocation25_spill] sm:$0xff] }
 0x7be   : > { %v7335_v29 = vpack.i.bf16 %v5974_v43, %v5971_v22  ;;  %v5975_v56 = vpop.f32.mrb[148].mxu0  ;;  %v12544_v22 = vld [vmem:[#allocation64_spill] sm:$0xff] }
 0x7bf   : > { %v5976_v54 = vpop.f32.mrb[149].mxu0  ;;  %v12546_v6 = vpack.i.bf16 %v12544_v22, %v12545_v32 }
 0x7c0   : > { %v5977_v15 = vadd.f32 %v5976_v54, %v5975_v56  ;;  %7336 = vrot.lane.b32.xlu1 %v7335_v29, %s7973_s13 }
 0x7c2   : > { %v5978_v37 = vpop.f32.mrb[150].mxu0 }
 0x7c3   : > { %v5979_v51 = vpop.f32.mrb[151].mxu0 }
 0x7c4   : > { %v5980_v44 = vadd.f32 %v5979_v51, %v5978_v37  ;;  %7341 = vrot.lane.b32.xlu1 %v12534_v23, %s7975_s18  ;;  %v12548_v37 = vld [vmem:[#allocation85_spill] sm:$0xff]  ;;  %v7329_v23 = vunpack.i.h.bf16 %v7327_v7 }
 0x7c6   : > { %v7350_v13 = vpack.i.bf16 %v5980_v44, %v5977_v15  ;;  %v5981_v40 = vpop.f32.mrb[152].mxu0  ;;  %v12547_v15 = vld [vmem:[#allocation86_spill] sm:$0xff] }
 0x7c7   : > { %v5982_v60 = vpop.f32.mrb[153].mxu0  ;;  %v12549_v51 = vpack.i.bf16 %v12547_v15, %v12548_v37 }
 0x7c8   : > { %v5983_v16 = vadd.f32 %v5982_v60, %v5981_v40  ;;  %7351 = vrot.lane.b32.xlu1 %v7350_v13, %s7973_s13  ;;  %v7328_v13 = vunpack.i.l.bf16 %v7327_v7 }
 0x7ca   : > { %v5984_v31 = vpop.f32.mrb[154].mxu0  ;;  %v4715_v20 = vsel %vm1298_vm0, %v12551_v30, %v7328_v13 }
 0x7cb   : > { %v5985_v55 = vpop.f32.mrb[155].mxu0 }
 0x7cc   : > { %v5986_v63 = vadd.f32 %v5985_v55, %v5984_v31  ;;  %7361 = vrot.lane.b32.xlu1 %v7360_v17, %s7974_s17  ;;  %v12550_v31 = vld [vmem:[#allocation41_spill] sm:$0xff] }
 0x7cd   : > { %v4716_v55 = vsel %vm1298_vm0, %v12550_v31, %v7329_v23 }
 0x7ce   : > { %v7365_v41 = vpack.i.bf16 %v5986_v63, %v5983_v16 }
 0x7d0   : > { %7371 = vrot.lane.b32.xlu1 %v12537_v2, %s7975_s18  ;;  %7366 = vrot.lane.b32.xlu0 %v7365_v41, %s7973_s13 }
 0x7d4   : > { %7376 = vrot.lane.b32.xlu0 %v7375_v48, %s7974_s17 }
 0x7d8   : > { %7386 = vrot.lane.b32.xlu0 %v12540_v12, %s7975_s18 }
 0x7ee   : > { %v5987_v11 = vpop.f32.mrb[156].mxu0 }
 0x7ef   : > { %v5988_v21 = vpop.f32.mrb[157].mxu0 }
 0x7f0   : > { %v5989_v17 = vadd.f32 %v5988_v21, %v5987_v11  ;;  %v12552_v21 = vld [vmem:[#allocation58_spill] sm:$0xff] }
 0x7f2   : > { %v5990_v38 = vpop.f32.mrb[158].mxu0 }
 0x7f3   : > { %v5991_v53 = vpop.f32.mrb[159].mxu0 }
 0x7f4   : > { %v5992_v45 = vadd.f32 %v5991_v53, %v5990_v38  ;;  %v12553_v38 = vld [vmem:[#allocation67_spill] sm:$0xff] }
 0x7f6   : > { %v7380_v10 = vpack.i.bf16 %v5992_v45, %v5989_v17  ;;  %v5993_v14 = vpop.f32.mrb[160].mxu0 }
 0x7f7   : > { %v5994_v62 = vpop.f32.mrb[161].mxu0 }
 0x7f8   : > { %v5995_v46 = vadd.f32 %v5994_v62, %v5993_v14  ;;  %7381 = vrot.lane.b32.xlu1 %v7380_v10, %s7973_s13 }
 0x7fa   : > { %v5996_v39 = vpop.f32.mrb[162].mxu0 }
 0x7fb   : > { %v5997_v8 = vpop.f32.mrb[163].mxu0 }
 0x7fc   : > { %v5998_v47 = vadd.f32 %v5997_v8, %v5996_v39  ;;  %7391 = vrot.lane.b32.xlu1 %v7390_v27, %s7974_s17 }
 0x7fe   : > { %v7395_v48 = vpack.i.bf16 %v5998_v47, %v5995_v46  ;;  %v5999_v57 = vpop.f32.mrb[164].mxu0 }
 0x7ff   : > { %v6000_v19 = vpop.f32.mrb[165].mxu0 }
 0x800   : > { %v6001_v33 = vadd.f32 %v6000_v19, %v5999_v57  ;;  %7401 = vrot.lane.b32.xlu1 %v12543_v1, %s7975_s18  ;;  %7396 = vrot.lane.b32.xlu0 %v7395_v48, %s7973_s13 }
 0x802   : > { %v6002_v24 = vpop.f32.mrb[166].mxu0 }
 0x803   : > { %v6003_v35 = vpop.f32.mrb[167].mxu0 }
 0x804   : > { %v6004_v49 = vadd.f32 %v6003_v35, %v6002_v24  ;;  %7406 = vrot.lane.b32.xlu0 %v7405_v36, %s7974_s17 }
 0x806   : > { %v7410_v34 = vpack.i.bf16 %v6004_v49, %v6001_v33  ;;  %v6005_v28 = vpop.f32.mrb[168].mxu0 }
 0x807   : > { %v6006_v27 = vpop.f32.mrb[169].mxu0 }
 0x808   : > { %v6007_v58 = vadd.f32 %v6006_v27, %v6005_v28  ;;  %7411 = vrot.lane.b32.xlu1 %v7410_v34, %s7973_s13  ;;  %7416 = vrot.lane.b32.xlu0 %v12546_v6, %s7975_s18  ;;  %v12554_v34 = vld [vmem:[#allocation71_spill] sm:$0xff] }
 0x809   : > { %v12555_v27 = vld [vmem:[#allocation27_spill] sm:$0xff] }
 0x80a   : > { %v6008_v43 = vpop.f32.mrb[170].mxu0 }
 0x80b   : > { %v6009_v29 = vpop.f32.mrb[171].mxu0 }
 0x80c   : > { %v6010_v56 = vadd.f32 %v6009_v29, %v6008_v43  ;;  %7421 = vrot.lane.b32.xlu1 %v7420_v4, %s7974_s17  ;;  %v7332_v4 = vpop.permute.xlu0 %7331 }
 0x80d   : > { %v7334_v40 = vunpack.i.h.bf16 %v7332_v4  ;;  %v7333_v60 = vunpack.i.l.bf16 %v7332_v4 }
 0x80e   : > { %v7425_v18 = vpack.i.bf16 %v6010_v56, %v6007_v58  ;;  %v6011_v5 = vpop.f32.mrb[172].mxu0 }
 0x80f   : > { %v6012_v36 = vpop.f32.mrb[173].mxu0  ;;  %v4733_v59 = vsel %vm4731_vm2, %v4716_v55, %v7334_v40 }
 0x810   : > { %v6013_v54 = vadd.f32 %v6012_v36, %v6011_v5  ;;  %7431 = vrot.lane.b32.xlu1 %v12549_v51, %s7975_s18  ;;  %7426 = vrot.lane.b32.xlu0 %v7425_v18, %s7973_s13  ;;  %v7347_v0 = vpop.permute.xlu0 %7346 }
 0x811   : > { %v7349_v45 = vunpack.i.h.bf16 %v7347_v0  ;;  %v7348_v10 = vunpack.i.l.bf16 %v7347_v0 }
 0x812   : > { %v6014_v44 = vpop.f32.mrb[174].mxu0 }
 0x813   : > { %v6015_v52 = vpop.f32.mrb[175].mxu0 }
 0x814   : > { %v6016_v50 = vadd.f32 %v6015_v52, %v6014_v44  ;;  %7436 = vrot.lane.b32.xlu0 %v7435_v26, %s7974_s17  ;;  %v4732_v26 = vsel %vm4731_vm2, %v4715_v20, %v7333_v60  ;;  %v7357_v39 = vpop.permute.xlu0 %7356  ;;  %v12556_v44 = vld [vmem:[#allocation28_spill] sm:$0xff] }
 0x815   : > { %v7359_v33 = vunpack.i.h.bf16 %v7357_v39  ;;  %v7358_v9 = vunpack.i.l.bf16 %v7357_v39  ;;  %v12560_v39 = vld [vmem:[#allocation36_spill] sm:$0xff] }
 0x816   : > { %v7440_v42 = vpack.i.bf16 %v6016_v50, %v6013_v54  ;;  %v12557_v50 = vld [vmem:[#allocation34_spill] sm:$0xff] }
 0x817   : > { %v4719_v28 = vsel %vm1298_vm0, %v12554_v34, %v7358_v9  ;;  %v4720_v58 = vsel %vm1298_vm0, %v12555_v27, %v7359_v33 }
 0x818   : > { %7441 = vrot.lane.b32.xlu1 %v7440_v42, %s7973_s13  ;;  %s487_s13 = sand.u32 1, %s7947_s22  }
 0x819   : > { %s5097_s17 = sshll.u32 %s487_s13, 7  ;;  %s11652_s25 = scalar_lea.sflag [#allocation3], %s487_s13 }
 0x81a   : > { %s11622_s14 = scalar_lea.vmem [#allocation2], %s5097_s17  ;;  %s7883_s17 = scalar_lea.vmem %s7882_s24, 4096 }
 0x81b   : > { %s4965_s29 = sshll.u32 %s11622_s14, 4  ;;  %s11646_s29 = int_to_ptr.vmem [resolvable:$true] %s4965_s29 }
 0x81c   : > { %s7877_s15 = scalar_lea.vmem %s11646_s29, 2048  ;;  %p7884_p4 = scmp.lt.s32.totalorder %s11646_s29, %s7882_s24 }
 0x81d   : > { %p7878_p0 = scmp.ne.s32.totalorder %s11646_s29, %s7877_s15  ;;  %p7885_p5 = scmp.lt.s32.totalorder %s7883_s17, %s7877_s15 }
 0x81f   : > { %p7879_p1 = pnand %p7878_p0, %p8095_p3  ;;  %p7886_p6 = por %p7885_p5, %p7884_p4 }
 0x821   : > { %p7880_p2 = pneg %p7879_p1 }
 0x823   : > { %p7887_p7 = pnand %p7886_p6, %p7880_p2 }
 0x832   : > { %v7337_v16 = vpop.permute.xlu1 %7336 }
 0x833   : > { %v7339_v63 = vunpack.i.h.bf16 %v7337_v16  ;;  %v7338_v41 = vunpack.i.l.bf16 %v7337_v16 }
 0x835   : > { %v4749_v61 = vsel %vm4748_vm3, %v4732_v26, %v7338_v41  ;;  %v4750_v2 = vsel %vm4748_vm3, %v4733_v59, %v7339_v63  ;;  %v12558_v59 = vld [vmem:[#allocation31_spill] sm:$0xff] }
 0x836   : > { %v7342_v25 = vpop.permute.xlu1 %7341  ;;  %6297 = vmatprep.mubr.f32.mxu1 %v4749_v61  ;;  %v12559_v61 = vld [vmem:[#allocation52_spill] sm:$0xff] }
 0x837   : > { %v7344_v12 = vunpack.i.h.bf16 %v7342_v25  ;;  %v7343_v11 = vunpack.i.l.bf16 %v7342_v25  ;;  %6298 = vmatmul.mubr.f32.vlgmr.msra.gmra.mrb[160].mxu1 %v4750_v2 }
 0x839   : > { %v4717_v17 = vsel %vm1298_vm0, %v12552_v21, %v7343_v11  ;;  %v4718_v53 = vsel %vm1298_vm0, %v12553_v38, %v7344_v12 }
 0x83a   : > { %v7352_v14 = vpop.permute.xlu1 %7351  ;;  %v4734_v8 = vsel %vm4731_vm2, %v4717_v17, %v7348_v10  ;;  %v4735_v47 = vsel %vm4731_vm2, %v4718_v53, %v7349_v45 }
 0x83b   : > { %v7354_v62 = vunpack.i.h.bf16 %v7352_v14  ;;  %v7353_v46 = vunpack.i.l.bf16 %v7352_v14 }
 0x83d   : > { %v4751_v48 = vsel %vm4748_vm3, %v4734_v8, %v7353_v46  ;;  %v4752_v57 = vsel %vm4748_vm3, %v4735_v47, %v7354_v62  ;;  %v12561_v47 = vld [vmem:[#allocation63_spill] sm:$0xff] }
 0x83e   : > { %v7362_v19 = vpop.permute.xlu1 %7361  ;;  %6300 = vmatprep.mubr.f32.mxu1 %v4751_v48 }
 0x83f   : > { %6301 = vmatmul.mubr.f32.gmra.mrb[162].mxu1 %v4752_v57  ;;  %v7364_v3 = vunpack.i.h.bf16 %v7362_v19  ;;  %v7363_v1 = vunpack.i.l.bf16 %v7362_v19 }
 0x841   : > { %v4736_v22 = vsel %vm4731_vm2, %v4719_v28, %v7363_v1  ;;  %v4737_v32 = vsel %vm4731_vm2, %v4720_v58, %v7364_v3 }
 0x842   : > { %v7367_v24 = vpop.permute.xlu0 %7366  ;;  %v7372_v29 = vpop.permute.xlu1 %7371 }
 0x843   : > { %v7369_v35 = vunpack.i.h.bf16 %v7367_v24  ;;  %v7368_v49 = vunpack.i.l.bf16 %v7367_v24  ;;  %v7374_v18 = vunpack.i.h.bf16 %v7372_v29  ;;  %v7373_v5 = vunpack.i.l.bf16 %v7372_v29 }
 0x845   : > { %v4753_v6 = vsel %vm4748_vm3, %v4736_v22, %v7368_v49  ;;  %v4754_v43 = vsel %vm4748_vm3, %v4737_v32, %v7369_v35  ;;  %v4721_v52 = vsel %vm1298_vm0, %v12556_v44, %v7373_v5  ;;  %v4722_v42 = vsel %vm1298_vm0, %v12557_v50, %v7374_v18  ;;  %v12562_v22 = vld [vmem:[#allocation46_spill] sm:$0xff] }
 0x846   : > { %6303 = vmatprep.mubr.f32.mxu1 %v4753_v6  ;;  %v7377_v56 = vpop.permute.xlu0 %7376  ;;  %v12563_v6 = vld [vmem:[#allocation75_spill] sm:$0xff] }
 0x847   : > { %6304 = vmatmul.mubr.f32.gmra.mrb[164].mxu1 %v4754_v43  ;;  %v7379_v36 = vunpack.i.h.bf16 %v7377_v56  ;;  %v7378_v54 = vunpack.i.l.bf16 %v7377_v56 }
 0x849   : > { %v4738_v4 = vsel %vm4731_vm2, %v4721_v52, %v7378_v54  ;;  %v4739_v23 = vsel %vm4731_vm2, %v4722_v42, %v7379_v36 }
 0x84a   : > { %v7387_v7 = vpop.permute.xlu0 %7386 }
 0x84b   : > { %v7389_v16 = vunpack.i.h.bf16 %v7387_v7  ;;  %v7388_v31 = vunpack.i.l.bf16 %v7387_v7  ;;  %v12564_v7 = vld [vmem:[#allocation72_spill] sm:$0xff] }
 0x84d   : > { %v4723_v26 = vsel %vm1298_vm0, %v12558_v59, %v7388_v31  ;;  %v4724_v2 = vsel %vm1298_vm0, %v12559_v61, %v7389_v16 }
 0x86a   : > { %v7382_v15 = vpop.permute.xlu1 %7381 }
 0x86b   : > { %v7384_v37 = vunpack.i.h.bf16 %v7382_v15  ;;  %v7383_v51 = vunpack.i.l.bf16 %v7382_v15 }
 0x86d   : > { %v4755_v13 = vsel %vm4748_vm3, %v4738_v4, %v7383_v51  ;;  %v4756_v40 = vsel %vm4748_vm3, %v4739_v23, %v7384_v37  ;;  %v12565_v23 = vld [vmem:[#allocation79_spill] sm:$0xff] }
 0x86e   : > { %v7392_v60 = vpop.permute.xlu1 %7391  ;;  %6306 = vmatprep.mubr.f32.mxu1 %v4755_v13 }
 0x86f   : > { %6307 = vmatmul.mubr.f32.gmra.mrb[166].mxu1 %v4756_v40  ;;  %v7394_v55 = vunpack.i.h.bf16 %v7392_v60  ;;  %v7393_v63 = vunpack.i.l.bf16 %v7392_v60 }
 0x871   : > { %v4740_v25 = vsel %vm4731_vm2, %v4723_v26, %v7393_v63  ;;  %v4741_v12 = vsel %vm4731_vm2, %v4724_v2, %v7394_v55  ;;  %v5304_v55 = vld [vmem:[%s11715_s11] ss:$0 sm:$0xff] }
 0x872   : > { %v7397_v41 = vpop.permute.xlu0 %7396  ;;  %v7402_v0 = vpop.permute.xlu1 %7401 }
 0x873   : > { %v7399_v30 = vunpack.i.h.bf16 %v7397_v41  ;;  %v7398_v20 = vunpack.i.l.bf16 %v7397_v41  ;;  %v7404_v38 = vunpack.i.h.bf16 %v7402_v0  ;;  %v7403_v53 = vunpack.i.l.bf16 %v7402_v0 }
 0x875   : > { %v4757_v11 = vsel %vm4748_vm3, %v4740_v25, %v7398_v20  ;;  %v4758_v21 = vsel %vm4748_vm3, %v4741_v12, %v7399_v30  ;;  %v4725_v8 = vsel %vm1298_vm0, %v12560_v39, %v7403_v53  ;;  %v4726_v48 = vsel %vm1298_vm0, %v12561_v47, %v7404_v38 }
 0x876   : > { %v7407_v17 = vpop.permute.xlu0 %7406  ;;  %6309 = vmatprep.mubr.f32.mxu1 %v4757_v11 }
 0x877   : > { %6310 = vmatmul.mubr.f32.gmra.mrb[168].mxu1 %v4758_v21  ;;  %v7409_v45 = vunpack.i.h.bf16 %v7407_v17  ;;  %v7408_v10 = vunpack.i.l.bf16 %v7407_v17 }
 0x879   : > { %v4742_v19 = vsel %vm4731_vm2, %v4725_v8, %v7408_v10  ;;  %v4743_v33 = vsel %vm4731_vm2, %v4726_v48, %v7409_v45 }
 0x87a   : > { %v7412_v14 = vpop.permute.xlu1 %7411  ;;  %v7417_v57 = vpop.permute.xlu0 %7416 }
 0x87b   : > { %v7414_v62 = vunpack.i.h.bf16 %v7412_v14  ;;  %v7413_v46 = vunpack.i.l.bf16 %v7412_v14  ;;  %v7419_v24 = vunpack.i.h.bf16 %v7417_v57  ;;  %v7418_v35 = vunpack.i.l.bf16 %v7417_v57 }
 0x87d   : > { %v4759_v9 = vsel %vm4748_vm3, %v4742_v19, %v7413_v46  ;;  %v4760_v3 = vsel %vm4748_vm3, %v4743_v33, %v7414_v62  ;;  %v4727_v32 = vsel %vm1298_vm0, %v12562_v22, %v7418_v35  ;;  %v4728_v43 = vsel %vm1298_vm0, %v12563_v6, %v7419_v24 }
 0x87e   : > { %v7422_v1 = vpop.permute.xlu1 %7421  ;;  %6312 = vmatprep.mubr.f32.mxu1 %v4759_v9 }
 0x87f   : > { %6313 = vmatmul.mubr.f32.gmra.mrb[170].mxu1 %v4760_v3  ;;  %v7424_v49 = vunpack.i.h.bf16 %v7422_v1  ;;  %v7423_v34 = vunpack.i.l.bf16 %v7422_v1 }
 0x881   : > { %v4744_v56 = vsel %vm4731_vm2, %v4727_v32, %v7423_v34  ;;  %v4745_v18 = vsel %vm4731_vm2, %v4728_v43, %v7424_v49 }
 0x882   : > { %v7427_v28 = vpop.permute.xlu0 %7426  ;;  %v7432_v29 = vpop.permute.xlu1 %7431 }
 0x883   : > { %v7429_v27 = vunpack.i.h.bf16 %v7427_v28  ;;  %v7428_v58 = vunpack.i.l.bf16 %v7427_v28  ;;  %v7434_v15 = vunpack.i.h.bf16 %v7432_v29  ;;  %v7433_v37 = vunpack.i.l.bf16 %v7432_v29 }
 0x885   : > { %v4761_v5 = vsel %vm4748_vm3, %v4744_v56, %v7428_v58  ;;  %v4762_v36 = vsel %vm4748_vm3, %v4745_v18, %v7429_v27  ;;  %v4729_v4 = vsel %vm1298_vm0, %v12564_v7, %v7433_v37  ;;  %v4730_v13 = vsel %vm1298_vm0, %v12565_v23, %v7434_v15 }
 0x886   : > { %v7437_v54 = vpop.permute.xlu0 %7436  ;;  %6315 = vmatprep.mubr.f32.mxu1 %v4761_v5 }
 0x887   : > { %6316 = vmatmul.mubr.f32.gmra.mrb[172].mxu1 %v4762_v36  ;;  %v7439_v51 = vunpack.i.h.bf16 %v7437_v54  ;;  %v7438_v44 = vunpack.i.l.bf16 %v7437_v54 }
 0x889   : > { %v4746_v40 = vsel %vm4731_vm2, %v4729_v4, %v7438_v44  ;;  %v4747_v60 = vsel %vm4731_vm2, %v4730_v13, %v7439_v51 }
 0x88a   : > { %v7442_v52 = vpop.permute.xlu1 %7441 }
 0x88b   : > { %v7444_v50 = vunpack.i.h.bf16 %v7442_v52  ;;  %v7443_v42 = vunpack.i.l.bf16 %v7442_v52 }
 0x88d   : > { %v4763_v16 = vsel %vm4748_vm3, %v4746_v40, %v7443_v42  ;;  %v4764_v31 = vsel %vm4748_vm3, %v4747_v60, %v7444_v50 }
 0x88e   : > { %6318 = vmatprep.mubr.f32.mxu1 %v4763_v16 }
 0x88f   : > { %6319 = vmatmul.mubr.f32.gmra.mrb[174].mxu1 %v4764_v31 }
 0x90a   : > { %v6299_v63 = vpop.f32.mrb[160].mxu1 }
 0x90b   : > { %v4860_v41 = vadd.f32 %v6299_v63, %v5304_v55  ;;  %v4854_v30 = vpop.f32.mrb[161].mxu1 }
 0x90c   : > { %v4855_v20 = vadd.f32 %v5304_v55, %v4854_v30 }
 0x90d   : > { %4934 = vst [vmem:[%s11622_s14 + $0x8] sm:$0xff] %v4860_v41 }
 0x90e   : > { %4933 = vst [vmem:[%s11622_s14] sm:$0xff] %v4855_v20 }
 0x912   : > { %v6302_v59 = vpop.f32.mrb[162].mxu1 }
 0x913   : > { %v4870_v26 = vadd.f32 %v6302_v59, %v5304_v55  ;;  %v4864_v61 = vpop.f32.mrb[163].mxu1 }
 0x914   : > { %v4865_v2 = vadd.f32 %v5304_v55, %v4864_v61 }
 0x915   : > { %4936 = vst [vmem:[%s11622_s14 + $0x18] sm:$0xff] %v4870_v26 }
 0x916   : > { %4935 = vst [vmem:[%s11622_s14 + $0x10] sm:$0xff] %v4865_v2 }
 0x91a   : > { %v6305_v0 = vpop.f32.mrb[164].mxu1 }
 0x91b   : > { %v4880_v25 = vadd.f32 %v6305_v0, %v5304_v55  ;;  %v4874_v12 = vpop.f32.mrb[165].mxu1 }
 0x91c   : > { %v4875_v11 = vadd.f32 %v5304_v55, %v4874_v12 }
 0x91d   : > { %4938 = vst [vmem:[%s11622_s14 + $0x28] sm:$0xff] %v4880_v25 }
 0x91e   : > { %4937 = vst [vmem:[%s11622_s14 + $0x20] sm:$0xff] %v4875_v11 }
 0x942   : > { %v6308_v21 = vpop.f32.mrb[166].mxu1 }
 0x943   : > { %v4890_v17 = vadd.f32 %v6308_v21, %v5304_v55  ;;  %v4884_v38 = vpop.f32.mrb[167].mxu1 }
 0x944   : > { %v4885_v53 = vadd.f32 %v5304_v55, %v4884_v38 }
 0x945   : > { %4940 = vst [vmem:[%s11622_s14 + $0x38] sm:$0xff] %v4890_v17 }
 0x946   : > { %4939 = vst [vmem:[%s11622_s14 + $0x30] sm:$0xff] %v4885_v53 }
 0x94a   : > { %v6311_v45 = vpop.f32.mrb[168].mxu1 }
 0x94b   : > { %v4900_v10 = vadd.f32 %v6311_v45, %v5304_v55  ;;  %v4894_v14 = vpop.f32.mrb[169].mxu1 }
 0x94c   : > { %v4895_v62 = vadd.f32 %v5304_v55, %v4894_v14 }
 0x94d   : > { %4942 = vst [vmem:[%s11622_s14 + $0x48] sm:$0xff] %v4900_v10 }
 0x94e   : > { %4941 = vst [vmem:[%s11622_s14 + $0x40] sm:$0xff] %v4895_v62 }
 0x952   : > { %v6314_v46 = vpop.f32.mrb[170].mxu1 }
 0x953   : > { %v4910_v39 = vadd.f32 %v6314_v46, %v5304_v55  ;;  %v4904_v8 = vpop.f32.mrb[171].mxu1 }
 0x954   : > { %v4905_v47 = vadd.f32 %v5304_v55, %v4904_v8 }
 0x955   : > { %4944 = vst [vmem:[%s11622_s14 + $0x58] sm:$0xff] %v4910_v39 }
 0x956   : > { %4943 = vst [vmem:[%s11622_s14 + $0x50] sm:$0xff] %v4905_v47 }
 0x95a   : > { %v6317_v48 = vpop.f32.mrb[172].mxu1 }
 0x95b   : > { %v4920_v57 = vadd.f32 %v6317_v48, %v5304_v55  ;;  %v4914_v19 = vpop.f32.mrb[173].mxu1 }
 0x95c   : > { %v4915_v33 = vadd.f32 %v5304_v55, %v4914_v19 }
 0x95d   : > { %4946 = vst [vmem:[%s11622_s14 + $0x68] sm:$0xff] %v4920_v57 }
 0x95e   : > { %4945 = vst [vmem:[%s11622_s14 + $0x60] sm:$0xff] %v4915_v33 }
 0x962   : > { %v6320_v9 = vpop.f32.mrb[174].mxu1 }
 0x963   : > { %v4930_v3 = vadd.f32 %v6320_v9, %v5304_v55  ;;  %v4924_v1 = vpop.f32.mrb[175].mxu1 }
 0x964   : > { %v4925_v24 = vadd.f32 %v5304_v55, %v4924_v1 }
 0x965   : > { %4948 = vst [vmem:[%s11622_s14 + $0x78] sm:$0xff] %v4930_v3 }
 0x966   : > { %4947 = vst [vmem:[%s11622_s14 + $0x70] sm:$0xff] %v4925_v24 }
 0x967   : > { %7890 = shalt.err (!%p7887_p7)
}
 0x968   : > { %s7891_s13 = scalar_lea.hbm %s11644_s30, 2048  ;;  %s7895_s14 = scalar_lea.hbm %s12566_s19, 8192 }
 0x969   : > { %p7892_p9 = scmp.ne.s32.totalorder %s11644_s30, %s7891_s13  ;;  %p7896_p12 = scmp.lt.u32.totalorder %s11644_s30, %s12566_s19 }
 0x96a   : > { %p7897_p13 = scmp.lt.u32.totalorder %s7895_s14, %s7891_s13  ;;  %p7899_p1 = scmp.lt.u32.totalorder %s7891_s13, %s11644_s30 }
 0x96b   : > { %p7893_p10 = pnand %p7892_p9, %p8095_p3 }
 0x96c   : > { %p7898_p0 = por %p7897_p13, %p7896_p12 }
 0x96d   : > { %p7894_p11 = pneg %p7893_p10 }
 0x96e   : > { %p7900_p2 = por %p7899_p1, %p7898_p0 }
 0x970   : > { %p7901_p4 = pnand %p7900_p2, %p7894_p11 }
 0x972   : > { %7904 = shalt.err (!%p7901_p4)
}
 0x973   : > { %s7977_s23 = smov 128   ;;  %s7978_s12 = smov 8  }
 0x974   : > { %6769 = dma.vmem_to_hbm [thread:$0]  (%p8095_p3), %s11646_s29, 2048, %s11644_s30, %s11652_s25, %s7977_s23, %s7977_s23, %s7978_s12  }
 0x975 PF: > { %s12567_s26 = sld [smem:[#allocation9_spill]]  ;;  %s12568_s15 = sld [smem:[#allocation5_spill]] }
 0x97b   : > { %p6775_p5 = scmp.ge.s32.totalorder %s12567_s26, 2  ;;  %s4980_s24 = sand.u32 1, %s12568_s15  }
 0x97c   : > { %s4981_s17 = scalar_lea.sflag [#allocation3], %s4980_s24 }
 0x97d   : > { %p6772_p6 = pnand %p6775_p5, %p8104_p8 }
 0x97f   : > { %7938 = dma.done.wait (!%p6772_p6), %s4981_s17, 2048  }
 0x980   : > { %7940 = vsyncadd (!%p6772_p6), %s4981_s17, 4294965248  ;;  %s25_s28 = sadd.s32 1, %s12567_s26   ;;  %s12570_s13 = sld [smem:[#allocation6_spill]] }
 0x981   : > { %p22_p7 = scmp.ge.s32.totalorder %s25_s28, 6   ;;  %s12571_s23 = sld [smem:[#allocation13_spill]] }
 0x982   : > { %s12572_s24 = sld [smem:[#allocation7_spill]]  ;;  %s12573_s25 = sld [smem:[#allocation8_spill]] }
 0x983   : > { %s12574_s26 = sld [smem:[#allocation10_spill]]  ;;  %s12575_s27 = sld [smem:[#allocation11_spill]] }
 0x984   : > { %s12576_s21 = smov %s7947_s22  ;;  %24 = sbr.rel (!%p22_p7) target bundleno = 7 (0x7), region = 112 }
 0x986   : > { %s12577_s22 = smov %s12570_s13 }
 0x98b   :  { %4986 = vsyncpa [#allocation3], 1 }
 0x98c   :  { %4988 = vsyncpa [#allocation3 + $0x1], 1 }

</bundles_post_ra>
